<compile_context>
chip_gen: v5e
topology: v5e:2x2
jax: 0.10.0
libtpu: 0.0.40
codegen_flags: <defaults>
</compile_context>

<pallas_src>
import jax
import jax.numpy as jnp
from jax.experimental import pallas as pl
from jax.experimental.pallas import tpu as pltpu

DIM = 1024


def _round_up(x, m):
    return ((x + m - 1) // m) * m


def _mlp_kernel(x_ref, w1_ref, b1_ref, w2_ref, b2_ref, w3_ref, b3_ref, o_ref):
    # x_ref: (in_dim, TB) bf16, batch on lanes.  Weights in PyTorch (out, in) layout.
    x = x_ref[...]

    # Layer 1: (DIM, in_dim) @ (in_dim, TB) on the MXU, f32 accumulation.
    h1 = jnp.dot(w1_ref[...], x, preferred_element_type=jnp.float32)      # (DIM, TB) f32
    h1 = jnp.maximum(h1 + b1_ref[...], 0.0)                               # bias + ReLU in f32
    h1 = h1.astype(jnp.bfloat16)                                          # (dropout = identity)

    # Layer 2: (DIM, DIM) @ (DIM, TB).
    h2 = jnp.dot(w2_ref[...], h1, preferred_element_type=jnp.float32)     # (DIM, TB) f32
    h2 = jnp.maximum(h2 + b2_ref[...], 0.0)
    h2 = h2.astype(jnp.bfloat16)                                          # (dropout = identity)

    # Layer 3: skinny (1, DIM) @ (DIM, TB) -> lane-dense (1, TB) logit row.
    logit = jnp.dot(w3_ref[...], h2, preferred_element_type=jnp.float32)  # (1, TB) f32
    logit = logit + b3_ref[0, 0]

    o_ref[...] = jax.nn.sigmoid(logit).astype(o_ref.dtype)


def discriminator_forward(feat, params, *, tile_b=512):
    """feat: (B, in_dim) float32 -> (B, 1) float32 sigmoid probabilities."""
    w1, b1, w2, b2, w3, b3 = params
    B, in_dim = feat.shape
    assert w1.shape == (DIM, in_dim) and w2.shape == (DIM, DIM) and w3.shape == (1, DIM)
    assert tile_b % 128 == 0

    # Batch tile on the lane axis: multiple of 128, no larger than needed.
    tb = min(tile_b, max(128, _round_up(B, 128)))
    Bp = _round_up(B, tb)
    num_tiles = Bp // tb

    # Lane-major (transposed) bf16 input, zero-padded to Bp columns.
    x_t = jnp.zeros((in_dim, Bp), jnp.bfloat16).at[:, :B].set(
        feat.astype(jnp.bfloat16).T)

    w1b = w1.astype(jnp.bfloat16)
    w2b = w2.astype(jnp.bfloat16)
    w3b = w3.astype(jnp.bfloat16)
    b1c = b1.reshape(DIM, 1).astype(jnp.float32)
    b2c = b2.reshape(DIM, 1).astype(jnp.float32)
    b3c = b3.reshape(1, 1).astype(jnp.float32)

    flops = int(2 * Bp * (in_dim * DIM + DIM * DIM + DIM))
    bytes_accessed = int(
        x_t.size * 2 + w1b.size * 2 + w2b.size * 2 + w3b.size * 2
        + (2 * DIM + 1) * 4 + Bp * 4)

    out = pl.pallas_call(
        _mlp_kernel,
        out_shape=jax.ShapeDtypeStruct((1, Bp), jnp.float32),
        grid=(num_tiles,),
        in_specs=[
            pl.BlockSpec((in_dim, tb), lambda i: (0, i)),        # feat tile (pipelined)
            pl.BlockSpec((DIM, in_dim), lambda i: (0, 0)),       # w1 (VMEM-resident)
            pl.BlockSpec((DIM, 1), lambda i: (0, 0)),            # b1
            pl.BlockSpec((DIM, DIM), lambda i: (0, 0)),          # w2 (VMEM-resident)
            pl.BlockSpec((DIM, 1), lambda i: (0, 0)),            # b2
            pl.BlockSpec((1, DIM), lambda i: (0, 0)),            # w3
            pl.BlockSpec(memory_space=pltpu.MemorySpace.SMEM),   # b3 scalar
        ],
        out_specs=pl.BlockSpec((1, tb), lambda i: (0, i)),       # lane-dense logits
        compiler_params=pltpu.CompilerParams(
            dimension_semantics=("parallel",),
            vmem_limit_bytes=24 << 20,
        ),
        cost_estimate=pl.CostEstimate(
            flops=flops, transcendentals=Bp, bytes_accessed=bytes_accessed),
    )(x_t, w1b, b1c, w2b, b2c, w3b, b3c)

    return out[0, :B].reshape(B, 1)


def init_params(in_dim, key):
    """xavier_normal_ weights (PyTorch (out, in) layout) + zero biases."""
    k1, k2, k3 = jax.random.split(key, 3)

    def xavier_normal(k, fan_out, fan_in):
        std = jnp.sqrt(2.0 / (fan_in + fan_out))
        return std * jax.random.normal(k, (fan_out, fan_in), dtype=jnp.float32)

    w1 = xavier_normal(k1, DIM, in_dim)
    b1 = jnp.zeros((DIM,), jnp.float32)
    w2 = xavier_normal(k2, DIM, DIM)
    b2 = jnp.zeros((DIM,), jnp.float32)
    w3 = xavier_normal(k3, 1, DIM)
    b3 = jnp.zeros((1,), jnp.float32)
    return (w1, b1, w2, b2, w3, b3)


def _reference_f32(feat, params):
    w1, b1, w2, b2, w3, b3 = params
    h1 = jnp.maximum(feat @ w1.T + b1, 0.0)
    h2 = jnp.maximum(h1 @ w2.T + b2, 0.0)
    return jax.nn.sigmoid(h2 @ w3.T + b3)


def _reference_bf16(feat, params):
    """Same math as the kernel: bf16 matmul inputs, f32 accumulation."""
    w1, b1, w2, b2, w3, b3 = params
    x = feat.astype(jnp.bfloat16)
    h1 = jnp.dot(x, w1.astype(jnp.bfloat16).T, preferred_element_type=jnp.float32) + b1
    h1 = jnp.maximum(h1, 0.0).astype(jnp.bfloat16)
    h2 = jnp.dot(h1, w2.astype(jnp.bfloat16).T, preferred_element_type=jnp.float32) + b2
    h2 = jnp.maximum(h2, 0.0).astype(jnp.bfloat16)
    logit = jnp.dot(h2, w3.astype(jnp.bfloat16).T, preferred_element_type=jnp.float32) + b3
    return jax.nn.sigmoid(logit)


if __name__ == "__main__":
    B, in_dim = 8, 256
    key = jax.random.PRNGKey(0)
    k_feat, k_params = jax.random.split(key)

    feat = jax.random.normal(k_feat, (B, in_dim), dtype=jnp.float32)
    params = init_params(in_dim, k_params)

    out = discriminator_forward(feat, params)
    out = jax.block_until_ready(out)

    assert out.shape == (B, 1), out.shape

    ref_bf16 = _reference_bf16(feat, params)
    ref_f32 = _reference_f32(feat, params)
    assert jnp.allclose(out, ref_bf16, atol=1e-3, rtol=1e-3), "mismatch vs bf16 reference"
    assert jnp.allclose(out, ref_f32, atol=3e-2, rtol=3e-2), "mismatch vs f32 reference"

    print("KERNEL_OK")
</pallas_src>

<mosaic_0001>
module attributes {stable_mosaic.version = 11 : i64} {
  func.func @_mlp_kernel(%arg0: i32, %arg1: memref<256x128xbf16, #tpu.memory_space<vmem>>, %arg2: memref<1024x256xbf16, #tpu.memory_space<vmem>>, %arg3: memref<1024x1xf32, #tpu.memory_space<vmem>>, %arg4: memref<1024x1024xbf16, #tpu.memory_space<vmem>>, %arg5: memref<1024x1xf32, #tpu.memory_space<vmem>>, %arg6: memref<1x1024xbf16, #tpu.memory_space<vmem>>, %arg7: memref<1x1xf32, #tpu.memory_space<smem>>, %arg8: memref<1x128xf32, #tpu.memory_space<vmem>>) attributes {dimension_semantics = [#tpu.dimension_semantics<parallel>], iteration_bounds = array<i64: 1>, scalar_prefetch = 0 : i64, scratch_operands = 0 : i64, tpu.core_type = #tpu.core_type<tc>, window_params = [{transform_indices = @transform_0, window_bounds = array<i64: 256, 128>}, {pipeline_mode = #tpu.pipeline_mode<synchronous>, transform_indices = @transform_1, window_bounds = array<i64: 1024, 256>}, {pipeline_mode = #tpu.pipeline_mode<synchronous>, transform_indices = @transform_2, window_bounds = array<i64: 1024, 1>}, {pipeline_mode = #tpu.pipeline_mode<synchronous>, transform_indices = @transform_3, window_bounds = array<i64: 1024, 1024>}, {pipeline_mode = #tpu.pipeline_mode<synchronous>, transform_indices = @transform_4, window_bounds = array<i64: 1024, 1>}, {pipeline_mode = #tpu.pipeline_mode<synchronous>, transform_indices = @transform_5, window_bounds = array<i64: 1, 1024>}, {transform_indices = @transform_6, window_bounds = array<i64: 1, 1>}, {transform_indices = @transform_7, window_bounds = array<i64: 1, 128>}]} {
    %c0 = arith.constant 0 : index
    %c0_0 = arith.constant 0 : index
    %0 = vector.load %arg1[%c0, %c0_0] : memref<256x128xbf16, #tpu.memory_space<vmem>>, vector<256x128xbf16>
    %c0_1 = arith.constant 0 : index
    %c0_2 = arith.constant 0 : index
    %1 = vector.load %arg2[%c0_1, %c0_2] : memref<1024x256xbf16, #tpu.memory_space<vmem>>, vector<1024x256xbf16>
    %cst = arith.constant dense<0.000000e+00> : vector<1024x128xf32>
    %2 = tpu.matmul %1, %0, %cst {dimension_numbers = #tpu.dot_dimension_numbers<[1], [0], [0], [1], [0, 0, 1, 1], [], []>} : vector<1024x256xbf16>, vector<256x128xbf16>, vector<1024x128xf32> -> vector<1024x128xf32>
    %c0_3 = arith.constant 0 : index
    %c0_4 = arith.constant 0 : index
    %3 = vector.load %arg3[%c0_3, %c0_4] : memref<1024x1xf32, #tpu.memory_space<vmem>>, vector<1024x1xf32>
    %4 = vector.broadcast %3 : vector<1024x1xf32> to vector<1024x128xf32>
    %5 = arith.addf %2, %4 : vector<1024x128xf32>
    %cst_5 = arith.constant 0.000000e+00 : f32
    %6 = vector.broadcast %cst_5 : f32 to vector<1024x128xf32>
    %7 = arith.maximumf %5, %6 : vector<1024x128xf32>
    %8 = arith.truncf %7 : vector<1024x128xf32> to vector<1024x128xbf16>
    %c0_6 = arith.constant 0 : index
    %c0_7 = arith.constant 0 : index
    %9 = vector.load %arg4[%c0_6, %c0_7] : memref<1024x1024xbf16, #tpu.memory_space<vmem>>, vector<1024x1024xbf16>
    %cst_8 = arith.constant dense<0.000000e+00> : vector<1024x128xf32>
    %10 = tpu.matmul %9, %8, %cst_8 {dimension_numbers = #tpu.dot_dimension_numbers<[1], [0], [0], [1], [0, 0, 1, 1], [], []>} : vector<1024x1024xbf16>, vector<1024x128xbf16>, vector<1024x128xf32> -> vector<1024x128xf32>
    %c0_9 = arith.constant 0 : index
    %c0_10 = arith.constant 0 : index
    %11 = vector.load %arg5[%c0_9, %c0_10] : memref<1024x1xf32, #tpu.memory_space<vmem>>, vector<1024x1xf32>
    %12 = vector.broadcast %11 : vector<1024x1xf32> to vector<1024x128xf32>
    %13 = arith.addf %10, %12 : vector<1024x128xf32>
    %cst_11 = arith.constant 0.000000e+00 : f32
    %14 = vector.broadcast %cst_11 : f32 to vector<1024x128xf32>
    %15 = arith.maximumf %13, %14 : vector<1024x128xf32>
    %16 = arith.truncf %15 : vector<1024x128xf32> to vector<1024x128xbf16>
    %c0_12 = arith.constant 0 : index
    %c0_13 = arith.constant 0 : index
    %17 = vector.load %arg6[%c0_12, %c0_13] : memref<1x1024xbf16, #tpu.memory_space<vmem>>, vector<1x1024xbf16>
    %cst_14 = arith.constant dense<0.000000e+00> : vector<1x128xf32>
    %18 = tpu.matmul %17, %16, %cst_14 {dimension_numbers = #tpu.dot_dimension_numbers<[1], [0], [0], [1], [0, 0, 1, 1], [], []>} : vector<1x1024xbf16>, vector<1024x128xbf16>, vector<1x128xf32> -> vector<1x128xf32>
    %c0_15 = arith.constant 0 : index
    %c0_16 = arith.constant 0 : index
    %19 = memref.load %arg7[%c0_15, %c0_16] : memref<1x1xf32, #tpu.memory_space<smem>>
    %20 = vector.broadcast %19 : f32 to vector<1x128xf32>
    %21 = arith.addf %18, %20 : vector<1x128xf32>
    %22 = arith.negf %21 : vector<1x128xf32>
    %23 = math.exp %22 : vector<1x128xf32>
    %cst_17 = arith.constant 1.000000e+00 : f32
    %24 = vector.broadcast %cst_17 : f32 to vector<1x128xf32>
    %25 = arith.addf %24, %23 : vector<1x128xf32>
    %26 = arith.divf %24, %25 : vector<1x128xf32>
    %c0_18 = arith.constant 0 : index
    %c0_19 = arith.constant 0 : index
    %27 = vector.load %arg8[%c0_18, %c0_19] : memref<1x128xf32, #tpu.memory_space<vmem>>, vector<1x128xf32>
    tpu.vector_store %arg8[%c0_18, %c0_19], %26 {strides = array<i32>} : memref<1x128xf32, #tpu.memory_space<vmem>>, vector<1x128xf32>,
    return
  }
  func.func @transform_0(%arg0: i32) -> (i32, i32) {
    %c0_i32 = arith.constant 0 : i32
    %c0_i32_0 = arith.constant 0 : i32
    return %c0_i32, %arg0 : i32, i32
  }
  func.func @transform_1(%arg0: i32) -> (i32, i32) {
    %c0_i32 = arith.constant 0 : i32
    %c0_i32_0 = arith.constant 0 : i32
    %c0_i32_1 = arith.constant 0 : i32
    return %c0_i32, %c0_i32_0 : i32, i32
  }
  func.func @transform_2(%arg0: i32) -> (i32, i32) {
    %c0_i32 = arith.constant 0 : i32
    %c0_i32_0 = arith.constant 0 : i32
    %c0_i32_1 = arith.constant 0 : i32
    return %c0_i32, %c0_i32_0 : i32, i32
  }
  func.func @transform_3(%arg0: i32) -> (i32, i32) {
    %c0_i32 = arith.constant 0 : i32
    %c0_i32_0 = arith.constant 0 : i32
    %c0_i32_1 = arith.constant 0 : i32
    return %c0_i32, %c0_i32_0 : i32, i32
  }
  func.func @transform_4(%arg0: i32) -> (i32, i32) {
    %c0_i32 = arith.constant 0 : i32
    %c0_i32_0 = arith.constant 0 : i32
    %c0_i32_1 = arith.constant 0 : i32
    return %c0_i32, %c0_i32_0 : i32, i32
  }
  func.func @transform_5(%arg0: i32) -> (i32, i32) {
    %c0_i32 = arith.constant 0 : i32
    %c0_i32_0 = arith.constant 0 : i32
    %c0_i32_1 = arith.constant 0 : i32
    return %c0_i32, %c0_i32_0 : i32, i32
  }
  func.func @transform_6(%arg0: i32) -> (i32, i32) {
    %c0_i32 = arith.constant 0 : i32
    %c0_i32_0 = arith.constant 0 : i32
    %c0_i32_1 = arith.constant 0 : i32
    return %c0_i32, %c0_i32_0 : i32, i32
  }
  func.func @transform_7(%arg0: i32) -> (i32, i32) {
    %c0_i32 = arith.constant 0 : i32
    %c0_i32_0 = arith.constant 0 : i32
    return %c0_i32, %arg0 : i32, i32
  }
}

</mosaic_0001>

<bundles_post_ra>
// kernel: tpu_custom_call.1
= control target key start
LH: loop header
LB: loop body
LE: loop exit
PB: predicated region body
PF: predicated region fallthrough
CT: control target
= control target key end

     0   :  { %13 = vsyncpa [#allocation4], 0  ;;  %s16686_s0 = inlined_call_operand.hbm [shape: bf16[256,128], index: 0, kind: input, shape index: {}]   ;;  %s16687_s1 = inlined_call_operand.hbm [shape: bf16[1024,256], index: 1, kind: input, shape index: {}]   ;;  %s16688_s2 = inlined_call_operand.vmem [shape: f32[1024,1], index: 2, kind: input, shape index: {}]   ;;  %s16689_s3 = inlined_call_operand.hbm [shape: bf16[1024,1024], index: 3, kind: input, shape index: {}]   ;;  %s16690_s4 = inlined_call_operand.vmem [shape: f32[1024,1], index: 4, kind: input, shape index: {}]   ;;  %s16691_s5 = inlined_call_operand.hbm [shape: bf16[1,1024], index: 5, kind: input, shape index: {}]   ;;  %s16692_s6 = inlined_call_operand.<no memory space> [shape: f32[1,1], index: 6, kind: input, shape index: {}]   ;;  %s16693_s7 = inlined_call_operand.hbm [shape: f32[1,128], index: 7, kind: output, shape index: {}]  }
   0x1   :  { %14 = vsyncpa [#allocation7], 0 }
   0x2   :  { %15 = vsyncpa [#allocation10], 0  ;;  %s34_s26 = sshll.u32 %s16687_s1, 4  ;;  %s35_s26 = int_to_ptr.hbm [resolvable:$true] %s34_s26 }
   0x3   :  { %16 = vsyncpa [#allocation5], 0  ;;  %s12875_s27 = smov [#allocation6]   ;;  %s21_s8 = sshll.u32 %s16686_s0, 4  ;;  %s22_s8 = int_to_ptr.hbm [resolvable:$true] %s21_s8 }
   0x4   :  { %s36_s28 = sshll.u32 %s12875_s27, 4  ;;  %s12876_s9 = smov 128   ;;  %s37_s28 = int_to_ptr.vmem [resolvable:$true] %s36_s28 }
   0x5   :  { %s12877_s10 = smov 8   ;;  %s12878_s11 = smov [#allocation3]  }
   0x6   :  { %42 = dma.hbm_to_vmem [thread:$0]  %s35_s26, 16384, %s37_s28, [#allocation7], %s12876_s9, %s12876_s9, %s12877_s10  }
   0x7   :  { %s23_s12 = sshll.u32 %s12878_s11, 4  ;;  %s12879_s13 = smov 64   ;;  %s24_s12 = int_to_ptr.vmem [resolvable:$true] %s23_s12 }
   0x8   :  { %s12880_s14 = smov 4   ;;  %s49_s16 = sshll.u32 %s16689_s3, 4  ;;  %s50_s16 = int_to_ptr.hbm [resolvable:$true] %s49_s16 }
   0x9   :  { %29 = dma.hbm_to_vmem [thread:$0]  %s22_s8, 2048, %s24_s12, [#allocation4], %s12879_s13, %s12879_s13, %s12880_s14  }
   0xa   :  { %s12881_s17 = smov [#allocation8]   ;;  %s65_s20 = sshll.u32 %s16691_s5, 4  ;;  %s66_s20 = int_to_ptr.hbm [resolvable:$true] %s65_s20 }
   0xb   :  { %s51_s18 = sshll.u32 %s12881_s17, 4  ;;  %s12882_s21 = smov 512   ;;  %s52_s18 = int_to_ptr.vmem [resolvable:$true] %s51_s18 }
   0xc   :  { %s12883_s22 = smov 32   ;;  %s12884_s23 = smov [#allocation9]  }
   0xd   :  { %57 = dma.hbm_to_vmem [thread:$0]  %s50_s16, 65536, %s52_s18, [#allocation7], %s12882_s21, %s12882_s21, %s12883_s22  }
   0xe   :  { %s67_s24 = sshll.u32 %s12884_s23, 4  ;;  %s68_s24 = int_to_ptr.vmem [resolvable:$true] %s67_s24 }
   0xf   :  { %70 = dma.hbm_to_vmem [thread:$0]  %s66_s20, 128, %s68_s24, [#allocation10]  }
  0x10   :  { %12867 = dma.done.wait [#allocation4], 2048  }
  0x11   :  { %12868 = vsyncadd [#allocation4], 4294965248 }
  0x12   :  { %12869 = dma.done.wait [#allocation7], 81920  }
  0x13   :  { %12870 = vsyncadd [#allocation7], 4294885376 }
  0x14   :  { %12871 = dma.done.wait [#allocation10], 128  }
  0x15   :  { %12872 = vsyncadd [#allocation10], 4294967168  ;;  %v12885_v0 = vmov 0   ;;  %v279_v1 = vld [vmem:[%s16688_s2 + $0xf0] sm:$0xff]  ;;  %v261_v3 = vld [vmem:[%s16688_s2 + $0x60] sm:$0xff]  ;;  %s9419_s19 = sshll.u32 %s16693_s7, 4  ;;  %s9420_s19 = int_to_ptr.hbm [resolvable:$true] %s9419_s19 }
  0x16   :  { %12742 = vset.pattern.permute.xlu2 %v12885_v0  ;;  %12741 = vset.pattern.permute.xlu1 %v12885_v0  ;;  %v263_v2 = vld [vmem:[%s16688_s2 + $0x70] sm:$0xff]  ;;  %v12063_v4 = vld [vmem:[#allocation3 + $0x38] sm:$0xff]  ;;  %v12062_v6 = vld [vmem:[#allocation3 + $0x30] sm:$0xff] }
  0x17   :  { %12740 = vset.pattern.permute.xlu0 %v12885_v0  ;;  %529 = vperm.xlu1 %12741, %v279_v1   ;;  %v12071_v5 = vld [vmem:[#allocation3 + $0x78] sm:$0xff]  ;;  %v12070_v7 = vld [vmem:[#allocation3 + $0x70] sm:$0xff]  ;;  %v262_v10 = vld [vmem:[%s16688_s2 + $0x68] sm:$0xff] }
  0x18   :  { %449 = vperm.xlu0 %12740, %v263_v2   ;;  %439 = vperm.xlu2 %12742, %v261_v3   ;;  %v280_v8 = vld [vmem:[%s16688_s2 + $0xf8] sm:$0xff]  ;;  %v12061_v11 = vld [vmem:[#allocation3 + $0x28] sm:$0xff]  ;;  %v12060_v13 = vld [vmem:[#allocation3 + $0x20] sm:$0xff] }
  0x19   :  { %1753 = vmatpush.bf16.msra.mxu0 %v12063_v4  ;;  %12712 = vmatpush.bf16.msra.mxu2 %v12063_v4  ;;  %v264_v9 = vld [vmem:[%s16688_s2 + $0x78] sm:$0xff]  ;;  %v12069_v12 = vld [vmem:[#allocation3 + $0x68] sm:$0xff]  ;;  %v12068_v14 = vld [vmem:[#allocation3 + $0x60] sm:$0xff] }
  0x1a   :  { %2082 = vmatpush.bf16.msra.mxu1 %v12071_v5  ;;  %12720 = vmatpush.bf16.msra.mxu3 %v12071_v5  ;;  %v278_v15 = vld [vmem:[%s16688_s2 + $0xe8] sm:$0xff]  ;;  %v277_v16 = vld [vmem:[%s16688_s2 + $0xe0] sm:$0xff]  ;;  %v259_v17 = vld [vmem:[%s16688_s2 + $0x50] sm:$0xff] }
  0x1b   :  { %v12059_v18 = vld [vmem:[#allocation3 + $0x18] sm:$0xff]  ;;  %v12058_v20 = vld [vmem:[#allocation3 + $0x10] sm:$0xff]  ;;  %v275_v22 = vld [vmem:[%s16688_s2 + $0xd0] sm:$0xff] }
  0x1c   :  { %v12067_v19 = vld [vmem:[#allocation3 + $0x58] sm:$0xff]  ;;  %v12066_v21 = vld [vmem:[#allocation3 + $0x50] sm:$0xff]  ;;  %v12057_v25 = vld [vmem:[#allocation3 + $0x8] sm:$0xff] }
  0x1d   :  { %1754 = vmatpush.bf16.msra.mxu0 %v12062_v6  ;;  %12713 = vmatpush.bf16.msra.mxu2 %v12062_v6  ;;  %v260_v23 = vld [vmem:[%s16688_s2 + $0x58] sm:$0xff]  ;;  %v12065_v26 = vld [vmem:[#allocation3 + $0x48] sm:$0xff]  ;;  %v12056_v27 = vld [vmem:[#allocation3] sm:$0xff] }
  0x1e   :  { %2083 = vmatpush.bf16.msra.mxu1 %v12070_v7  ;;  %12721 = vmatpush.bf16.msra.mxu3 %v12070_v7  ;;  %v276_v24 = vld [vmem:[%s16688_s2 + $0xd8] sm:$0xff]  ;;  %v12064_v28 = vld [vmem:[#allocation3 + $0x40] sm:$0xff]  ;;  %v12073_v30 = vld [vmem:[#allocation6 + $0x4] sm:$0xf0] }
  0x1f   :  { %534 = vperm.xlu1 %12741, %v280_v8   ;;  %v9433_v29 = vld [vmem:[#allocation6] sm:$0xf]  ;;  %v12145_v32 = vld [vmem:[#allocation6 + $0x244] sm:$0xf0]  ;;  %v12072_v33 = vld [vmem:[#allocation6 + $0x4] sm:$0xf] }
  0x20   :  { %454 = vperm.xlu0 %12740, %v264_v9   ;;  %444 = vperm.xlu2 %12742, %v262_v10   ;;  %v9721_v31 = vld [vmem:[#allocation6 + $0x240] sm:$0xf]  ;;  %v9435_v34 = vld [vmem:[#allocation6 + $0x8] sm:$0xf0]  ;;  %v12144_v35 = vld [vmem:[#allocation6 + $0x244] sm:$0xf]  ;;  %v9434_v39 = vor.u32 %v12073_v30, %v9433_v29 }
  0x21   :  { %1755 = vmatpush.bf16.msra.mxu0 %v12061_v11  ;;  %12714 = vmatpush.bf16.msra.mxu2 %v12061_v11  ;;  %v9723_v36 = vld [vmem:[#allocation6 + $0x248] sm:$0xf0]  ;;  %v296_v37 = vld [vmem:[%s16688_s2 + $0x178] sm:$0xff]  ;;  %v257_v40 = vld [vmem:[%s16688_s2 + $0x40] sm:$0xff]  ;;  %v9722_v41 = vor.u32 %v12145_v32, %v9721_v31  ;;  %v9438_v42 = vor.u32 %v12072_v33, %v9435_v34 }
  0x22   :  { %2084 = vmatpush.bf16.msra.mxu1 %v12069_v12  ;;  %12722 = vmatpush.bf16.msra.mxu3 %v12069_v12  ;;  %v295_v38 = vld [vmem:[%s16688_s2 + $0x170] sm:$0xff]  ;;  %v9726_v43 = vor.u32 %v12144_v35, %v9723_v36  ;;  %v258_v45 = vld [vmem:[%s16688_s2 + $0x48] sm:$0xff]  ;;  %v312_v46 = vld [vmem:[%s16688_s2 + $0x1f8] sm:$0xff] }
  0x23   :  { %v311_v44 = vld [vmem:[%s16688_s2 + $0x1f0] sm:$0xff]  ;;  %v9441_v47 = vld [vmem:[#allocation6 + $0x10] sm:$0xf]  ;;  %v12075_v48 = vld [vmem:[#allocation6 + $0x14] sm:$0xf0] }
  0x24   :  { %v9729_v49 = vld [vmem:[#allocation6 + $0x250] sm:$0xf]  ;;  %v12147_v50 = vld [vmem:[#allocation6 + $0x254] sm:$0xf0]  ;;  %v12074_v51 = vld [vmem:[#allocation6 + $0x14] sm:$0xf]  ;;  %v9442_v57 = vor.u32 %v12075_v48, %v9441_v47 }
  0x25   :  { %1756 = vmatpush.bf16.msra.mxu0 %v12060_v13  ;;  %12715 = vmatpush.bf16.msra.mxu2 %v12060_v13  ;;  %v9443_v52 = vld [vmem:[#allocation6 + $0x18] sm:$0xf0]  ;;  %v12146_v53 = vld [vmem:[#allocation6 + $0x254] sm:$0xf]  ;;  %v274_v55 = vld [vmem:[%s16688_s2 + $0xc8] sm:$0xff]  ;;  %v9730_v59 = vor.u32 %v12147_v50, %v9729_v49 }
  0x26   :  { %2085 = vmatpush.bf16.msra.mxu1 %v12068_v14  ;;  %12723 = vmatpush.bf16.msra.mxu3 %v12068_v14  ;;  %v9731_v54 = vld [vmem:[#allocation6 + $0x258] sm:$0xf0]  ;;  %v9446_v60 = vor.u32 %v12074_v51, %v9443_v52  ;;  %v294_v62 = vld [vmem:[%s16688_s2 + $0x168] sm:$0xff]  ;;  %v255_v63 = vld [vmem:[%s16688_s2 + $0x30] sm:$0xff] }
  0x27   :  { %524 = vperm.xlu1 %12741, %v278_v15   ;;  %v273_v56 = vld [vmem:[%s16688_s2 + $0xc0] sm:$0xff]  ;;  %v9734_v61 = vor.u32 %v12146_v53, %v9731_v54  ;;  %v256_v0 = vld [vmem:[%s16688_s2 + $0x38] sm:$0xff]  ;;  %v9449_v1 = vld [vmem:[#allocation6 + $0x20] sm:$0xf] }
  0x28   :  { %519 = vperm.xlu0 %12740, %v277_v16   ;;  %429 = vperm.xlu2 %12742, %v259_v17   ;;  %v293_v58 = vld [vmem:[%s16688_s2 + $0x160] sm:$0xff]  ;;  %v12077_v2 = vld [vmem:[#allocation6 + $0x24] sm:$0xf0]  ;;  %v9737_v3 = vld [vmem:[#allocation6 + $0x260] sm:$0xf] }
  0x29   :  { %1757 = vmatpush.bf16.msra.mxu0 %v12059_v18  ;;  %12716 = vmatpush.bf16.msra.mxu2 %v12059_v18  ;;  %v12149_v4 = vld [vmem:[#allocation6 + $0x264] sm:$0xf0]  ;;  %v12076_v5 = vld [vmem:[#allocation6 + $0x24] sm:$0xf]  ;;  %v9451_v6 = vld [vmem:[#allocation6 + $0x28] sm:$0xf0]  ;;  %v9450_v11 = vor.u32 %v12077_v2, %v9449_v1 }
  0x2a   :  { %2086 = vmatpush.bf16.msra.mxu1 %v12067_v19  ;;  %12724 = vmatpush.bf16.msra.mxu3 %v12067_v19  ;;  %v12148_v7 = vld [vmem:[#allocation6 + $0x264] sm:$0xf]  ;;  %v9739_v8 = vld [vmem:[#allocation6 + $0x268] sm:$0xf0]  ;;  %v309_v9 = vld [vmem:[%s16688_s2 + $0x1e0] sm:$0xff]  ;;  %v9738_v13 = vor.u32 %v12149_v4, %v9737_v3  ;;  %v9454_v14 = vor.u32 %v12076_v5, %v9451_v6 }
  0x2b   :  { %v310_v10 = vld [vmem:[%s16688_s2 + $0x1e8] sm:$0xff]  ;;  %v271_v12 = vld [vmem:[%s16688_s2 + $0xb0] sm:$0xff]  ;;  %v9742_v15 = vor.u32 %v12148_v7, %v9739_v8  ;;  %v272_v16 = vld [vmem:[%s16688_s2 + $0xb8] sm:$0xff] }
  0x2c   :  { %v291_v17 = vld [vmem:[%s16688_s2 + $0x150] sm:$0xff]  ;;  %v292_v18 = vld [vmem:[%s16688_s2 + $0x158] sm:$0xff]  ;;  %v269_v34 = vld [vmem:[%s16688_s2 + $0xa0] sm:$0xff] }
  0x2d   :  { %1758 = vmatpush.bf16.msra.mxu0 %v12058_v20  ;;  %12717 = vmatpush.bf16.msra.mxu2 %v12058_v20  ;;  %v9457_v19 = vld [vmem:[#allocation6 + $0x30] sm:$0xf]  ;;  %v12079_v20 = vld [vmem:[#allocation6 + $0x34] sm:$0xf0]  ;;  %v307_v30 = vld [vmem:[%s16688_s2 + $0x1d0] sm:$0xff] }
  0x2e   :  { %2087 = vmatpush.bf16.msra.mxu1 %v12066_v21  ;;  %12725 = vmatpush.bf16.msra.mxu3 %v12066_v21  ;;  %v9745_v21 = vld [vmem:[#allocation6 + $0x270] sm:$0xf]  ;;  %v9458_v29 = vor.u32 %v12079_v20, %v9457_v19  ;;  %v270_v36 = vld [vmem:[%s16688_s2 + $0xa8] sm:$0xff]  ;;  %v289_v47 = vld [vmem:[%s16688_s2 + $0x140] sm:$0xff] }
  0x2f   :  { %509 = vperm.xlu1 %12741, %v275_v22   ;;  %v12151_v22 = vld [vmem:[#allocation6 + $0x274] sm:$0xf0]  ;;  %v308_v35 = vld [vmem:[%s16688_s2 + $0x1d8] sm:$0xff]  ;;  %v251_v49 = vld [vmem:[%s16688_s2 + $0x10] sm:$0xff] }
  0x30   :  { %434 = vperm.xlu0 %12740, %v260_v23   ;;  %514 = vperm.xlu2 %12742, %v276_v24   ;;  %v12078_v23 = vld [vmem:[#allocation6 + $0x34] sm:$0xf]  ;;  %v9459_v24 = vld [vmem:[#allocation6 + $0x38] sm:$0xf0]  ;;  %v9746_v31 = vor.u32 %v12151_v22, %v9745_v21  ;;  %v267_v3 = vld [vmem:[%s16688_s2 + $0x90] sm:$0xff] }
  0x31   :  { %1759 = vmatpush.bf16.msra.mxu0 %v12057_v25  ;;  %12718 = vmatpush.bf16.msra.mxu2 %v12057_v25  ;;  %v12150_v25 = vld [vmem:[#allocation6 + $0x274] sm:$0xf]  ;;  %v9462_v32 = vor.u32 %v12078_v23, %v9459_v24  ;;  %v305_v54 = vld [vmem:[%s16688_s2 + $0x1c0] sm:$0xff]  ;;  %v287_v5 = vld [vmem:[%s16688_s2 + $0x130] sm:$0xff] }
  0x32   :  { %2088 = vmatpush.bf16.msra.mxu1 %v12065_v26  ;;  %12726 = vmatpush.bf16.msra.mxu3 %v12065_v26  ;;  %v9747_v26 = vld [vmem:[#allocation6 + $0x278] sm:$0xf0]  ;;  %v268_v2 = vld [vmem:[%s16688_s2 + $0x98] sm:$0xff]  ;;  %v9769_v19 = vld [vmem:[#allocation6 + $0x2a0] sm:$0xf] }
  0x33   :  { %v9750_v33 = vor.u32 %v12150_v25, %v9747_v26  ;;  %v9763_v1 = vld [vmem:[#allocation6 + $0x298] sm:$0xf0]  ;;  %v12157_v21 = vld [vmem:[#allocation6 + $0x2a4] sm:$0xf0]  ;;  %v12084_v22 = vld [vmem:[#allocation6 + $0x64] sm:$0xf] }
  0x34   :  { %v9483_v23 = vld [vmem:[#allocation6 + $0x68] sm:$0xf0]  ;;  %v12156_v24 = vld [vmem:[#allocation6 + $0x2a4] sm:$0xf] }
  0x35   :  { %1760 = vmatpush.bf16.msra.mxu0 %v12056_v27  ;;  %12719 = vmatpush.bf16.msra.mxu2 %v12056_v27  ;;  %v254_v27 = vld [vmem:[%s16688_s2 + $0x28] sm:$0xff]  ;;  %v9771_v25 = vld [vmem:[#allocation6 + $0x2a8] sm:$0xf0] }
  0x36   :  { %2089 = vmatpush.bf16.msra.mxu1 %v12064_v28  ;;  %12727 = vmatpush.bf16.msra.mxu3 %v12064_v28  ;;  %v253_v28 = vld [vmem:[%s16688_s2 + $0x20] sm:$0xff]  ;;  %v303_v26 = vld [vmem:[%s16688_s2 + $0x1b0] sm:$0xff] }
  0x37   :  { %614 = vperm.xlu1 %12741, %v296_v37   ;;  %v9465_v37 = vld [vmem:[#allocation6 + $0x40] sm:$0xf] }
  0x38   :  { %609 = vperm.xlu0 %12740, %v295_v38   ;;  %419 = vperm.xlu2 %12742, %v257_v40   ;;  %v12081_v38 = vld [vmem:[#allocation6 + $0x44] sm:$0xf0] }
  0x39   :  { %1761 = vmatmul.bf16.vlgmr.msra.gmra.mxu0 %v9434_v39  ;;  %1941 = vmatmul.bf16.vlgmr.msra.gmra.mxu2 %v9722_v41  ;;  %v9753_v39 = vld [vmem:[#allocation6 + $0x280] sm:$0xf]  ;;  %v12153_v41 = vld [vmem:[#allocation6 + $0x284] sm:$0xf0]  ;;  %v9466_v48 = vor.u32 %v12081_v38, %v9465_v37  ;;  %v285_v37 = vld [vmem:[%s16688_s2 + $0x120] sm:$0xff] }
  0x3a   :  { %2090 = vmatmul.bf16.vlgmr.msra.gmra.mxu1 %v9438_v42  ;;  %2270 = vmatmul.bf16.vlgmr.msra.gmra.mxu3 %v9726_v43  ;;  %v12080_v42 = vld [vmem:[#allocation6 + $0x44] sm:$0xf]  ;;  %v9467_v43 = vld [vmem:[#allocation6 + $0x48] sm:$0xf0]  ;;  %v9754_v50 = vor.u32 %v12153_v41, %v9753_v39 }
  0x3b   :  { %v9470_v51 = vor.u32 %v12080_v42, %v9467_v43  ;;  %v286_v38 = vld [vmem:[%s16688_s2 + $0x128] sm:$0xff]  ;;  %v9489_v42 = vld [vmem:[#allocation6 + $0x70] sm:$0xf]  ;;  %v12087_v43 = vld [vmem:[#allocation6 + $0x74] sm:$0xf0] }
  0x3f   :  { %689 = vperm.xlu1 %12741, %v311_v44   ;;  %v12152_v44 = vld [vmem:[#allocation6 + $0x284] sm:$0xf] }
  0x40   :  { %424 = vperm.xlu0 %12740, %v258_v45   ;;  %694 = vperm.xlu2 %12742, %v312_v46   ;;  %v9755_v45 = vld [vmem:[#allocation6 + $0x288] sm:$0xf0]  ;;  %v290_v46 = vld [vmem:[%s16688_s2 + $0x148] sm:$0xff] }
  0x41   :  { %v9758_v52 = vor.u32 %v12152_v44, %v9755_v45  ;;  %v9777_v44 = vld [vmem:[#allocation6 + $0x2b0] sm:$0xf] }
  0x47   :  { %504 = vperm.xlu1 %12741, %v274_v55   ;;  %v252_v55 = vld [vmem:[%s16688_s2 + $0x18] sm:$0xff] }
  0x48   :  { %499 = vperm.xlu0 %12740, %v273_v56   ;;  %599 = vperm.xlu2 %12742, %v293_v58   ;;  %v306_v56 = vld [vmem:[%s16688_s2 + $0x1c8] sm:$0xff]  ;;  %v12083_v58 = vld [vmem:[#allocation6 + $0x54] sm:$0xf0] }
  0x49   :  { %1766 = vmatmul.bf16.gmra.mxu0 %v9442_v57  ;;  %1946 = vmatmul.bf16.gmra.mxu2 %v9730_v59  ;;  %v9473_v57 = vld [vmem:[#allocation6 + $0x50] sm:$0xf] }
  0x4a   :  { %2095 = vmatmul.bf16.gmra.mxu1 %v9446_v60  ;;  %2275 = vmatmul.bf16.gmra.mxu3 %v9734_v61  ;;  %v9761_v59 = vld [vmem:[#allocation6 + $0x290] sm:$0xf]  ;;  %v12155_v61 = vld [vmem:[#allocation6 + $0x294] sm:$0xf0]  ;;  %v9474_v4 = vor.u32 %v12083_v58, %v9473_v57 }
  0x4b   :  { %v9762_v6 = vor.u32 %v12155_v61, %v9761_v59 }
  0x4f   :  { %409 = vperm.xlu1 %12741, %v255_v63   ;;  %v9475_v63 = vld [vmem:[#allocation6 + $0x58] sm:$0xf0] }
  0x50   :  { %604 = vperm.xlu0 %12740, %v294_v62   ;;  %414 = vperm.xlu2 %12742, %v256_v0   ;;  %v12082_v62 = vld [vmem:[#allocation6 + $0x54] sm:$0xf] }
  0x51   :  { %v12154_v0 = vld [vmem:[#allocation6 + $0x294] sm:$0xf]  ;;  %v9478_v7 = vor.u32 %v12082_v62, %v9475_v63 }
  0x52   :  { %v9766_v8 = vor.u32 %v12154_v0, %v9763_v1  ;;  %v284_v63 = vld [vmem:[%s16688_s2 + $0x118] sm:$0xff]  ;;  %v299_v0 = vld [vmem:[%s16688_s2 + $0x190] sm:$0xff] }
  0x53   :  { %v300_v1 = vld [vmem:[%s16688_s2 + $0x198] sm:$0xff] }
  0x57   :  { %684 = vperm.xlu1 %12741, %v310_v10  }
  0x58   :  { %679 = vperm.xlu0 %12740, %v309_v9   ;;  %489 = vperm.xlu2 %12742, %v271_v12   ;;  %v288_v12 = vld [vmem:[%s16688_s2 + $0x138] sm:$0xff] }
  0x59   :  { %1771 = vmatmul.bf16.gmra.mxu0 %v9450_v11  ;;  %1951 = vmatmul.bf16.gmra.mxu2 %v9738_v13  ;;  %v249_v13 = vld [vmem:[%s16688_s2] sm:$0xff] }
  0x5a   :  { %2100 = vmatmul.bf16.gmra.mxu1 %v9454_v14  ;;  %2280 = vmatmul.bf16.gmra.mxu3 %v9742_v15  ;;  %v250_v14 = vld [vmem:[%s16688_s2 + $0x8] sm:$0xff] }
  0x5f   :  { %589 = vperm.xlu1 %12741, %v291_v17   ;;  %v9481_v17 = vld [vmem:[#allocation6 + $0x60] sm:$0xf] }
  0x60   :  { %494 = vperm.xlu0 %12740, %v272_v16   ;;  %594 = vperm.xlu2 %12742, %v292_v18   ;;  %v12085_v18 = vld [vmem:[#allocation6 + $0x64] sm:$0xf0] }
  0x67   :  { %404 = vperm.xlu1 %12741, %v254_v27   ;;  %v304_v27 = vld [vmem:[%s16688_s2 + $0x1b8] sm:$0xff] }
  0x68   :  { %399 = vperm.xlu0 %12740, %v253_v28   ;;  %669 = vperm.xlu2 %12742, %v307_v30   ;;  %v9482_v28 = vor.u32 %v12085_v18, %v9481_v17  ;;  %v9770_v30 = vor.u32 %v12157_v21, %v9769_v19  ;;  %v9787_v17 = vld [vmem:[#allocation6 + $0x2c8] sm:$0xf0]  ;;  %v281_v18 = vld [vmem:[%s16688_s2 + $0x100] sm:$0xff]  ;;  %v282_v19 = vld [vmem:[%s16688_s2 + $0x108] sm:$0xff] }
  0x69   :  { %1776 = vmatmul.bf16.gmra.mxu0 %v9458_v29  ;;  %1956 = vmatmul.bf16.gmra.mxu2 %v9746_v31  ;;  %v265_v29 = vld [vmem:[%s16688_s2 + $0x80] sm:$0xff]  ;;  %v9486_v31 = vor.u32 %v12084_v22, %v9483_v23 }
  0x6a   :  { %2105 = vmatmul.bf16.gmra.mxu1 %v9462_v32  ;;  %2285 = vmatmul.bf16.gmra.mxu3 %v9750_v33  ;;  %v9774_v32 = vor.u32 %v12156_v24, %v9771_v25  ;;  %v297_v23 = vld [vmem:[%s16688_s2 + $0x180] sm:$0xff] }
  0x6f   :  { %479 = vperm.xlu1 %12741, %v269_v34  }
  0x70   :  { %674 = vperm.xlu0 %12740, %v308_v35   ;;  %484 = vperm.xlu2 %12742, %v270_v36   ;;  %v266_v36 = vld [vmem:[%s16688_s2 + $0x88] sm:$0xff] }
  0x72   :  { %v13047_v40 = vpop.permute.xlu2 %439 }
  0x77   :  { %584 = vperm.xlu1 %12741, %v290_v46   ;;  %v12159_v46 = vld [vmem:[#allocation6 + $0x2b4] sm:$0xf0] }
  0x78   :  { %579 = vperm.xlu0 %12740, %v289_v47   ;;  %389 = vperm.xlu2 %12742, %v251_v49   ;;  %v12086_v47 = vld [vmem:[#allocation6 + $0x74] sm:$0xf] }
  0x79   :  { %1781 = vmatmul.bf16.gmra.mxu0 %v9466_v48  ;;  %1961 = vmatmul.bf16.gmra.mxu2 %v9754_v50  ;;  %v9491_v48 = vld [vmem:[#allocation6 + $0x78] sm:$0xf0]  ;;  %v12158_v49 = vld [vmem:[#allocation6 + $0x2b4] sm:$0xf] }
  0x7a   :  { %2110 = vmatmul.bf16.gmra.mxu1 %v9470_v51  ;;  %v13058_v53 = vpop.permute.xlu2 %444  ;;  %2290 = vmatmul.bf16.gmra.mxu3 %v9758_v52  ;;  %v9779_v50 = vld [vmem:[#allocation6 + $0x2b8] sm:$0xf0]  ;;  %v302_v52 = vld [vmem:[%s16688_s2 + $0x1a8] sm:$0xff]  ;;  %v9494_v57 = vor.u32 %v12086_v47, %v9491_v48  ;;  %v9505_v47 = vld [vmem:[#allocation6 + $0x90] sm:$0xf] }
  0x7b   :  { %v301_v51 = vld [vmem:[%s16688_s2 + $0x1a0] sm:$0xff]  ;;  %v9782_v58 = vor.u32 %v12158_v49, %v9779_v50  ;;  %v9793_v49 = vld [vmem:[#allocation6 + $0x2d0] sm:$0xf] }
  0x7c   :  { %v12091_v48 = vld [vmem:[#allocation6 + $0x94] sm:$0xf0] }
  0x7f   :  { %659 = vperm.xlu1 %12741, %v305_v54   ;;  %v9490_v54 = vor.u32 %v12087_v43, %v9489_v42  ;;  %v328_v42 = vld [vmem:[%s16688_s2 + $0x278] sm:$0xff] }
  0x80   :  { %394 = vperm.xlu0 %12740, %v252_v55   ;;  %664 = vperm.xlu2 %12742, %v306_v56   ;;  %v283_v55 = vld [vmem:[%s16688_s2 + $0x110] sm:$0xff]  ;;  %v9778_v56 = vor.u32 %v12159_v46, %v9777_v44 }
  0x82   :  { %v13069_v60 = vpop.permute.xlu2 %429 }
  0x87   :  { %474 = vperm.xlu1 %12741, %v268_v2  }
  0x88   :  { %469 = vperm.xlu0 %12740, %v267_v3   ;;  %569 = vperm.xlu2 %12742, %v287_v5   ;;  %v12089_v5 = vld [vmem:[#allocation6 + $0x84] sm:$0xf0] }
  0x89   :  { %1786 = vmatmul.bf16.gmra.mxu0 %v9474_v4  ;;  %1966 = vmatmul.bf16.gmra.mxu2 %v9762_v6  ;;  %v13080_v9 = vpop.permute.xlu1 %529  ;;  %v9497_v4 = vld [vmem:[#allocation6 + $0x80] sm:$0xf] }
  0x8a   :  { %2115 = vmatmul.bf16.gmra.mxu1 %v9478_v7  ;;  %16694 = vst [vmem:[#allocation16_spill] sm:$0xff] %v13080_v9  ;;  %v13082_v10 = vpop.permute.xlu0 %449  ;;  %v13084_v11 = vpop.permute.xlu2 %514  ;;  %2295 = vmatmul.bf16.gmra.mxu3 %v9766_v8  ;;  %v9785_v6 = vld [vmem:[#allocation6 + $0x2c0] sm:$0xf]  ;;  %v12161_v8 = vld [vmem:[#allocation6 + $0x2c4] sm:$0xf0]  ;;  %v9498_v21 = vor.u32 %v12089_v5, %v9497_v4  ;;  %v325_v5 = vld [vmem:[%s16688_s2 + $0x260] sm:$0xff] }
  0x8b   :  { %16695 = vst [vmem:[#allocation17_spill] sm:$0xff] %v13084_v11  ;;  %v9786_v24 = vor.u32 %v12161_v8, %v9785_v6 }
  0x8f   :  { %379 = vperm.xlu1 %12741, %v249_v13   ;;  %v9499_v13 = vld [vmem:[#allocation6 + $0x88] sm:$0xf0] }
  0x90   :  { %574 = vperm.xlu0 %12740, %v288_v12   ;;  %384 = vperm.xlu2 %12742, %v250_v14   ;;  %v12088_v12 = vld [vmem:[#allocation6 + $0x84] sm:$0xf] }
  0x91   :  { %v13095_v15 = vpop.permute.xlu1 %534  ;;  %v12160_v14 = vld [vmem:[#allocation6 + $0x2c4] sm:$0xf]  ;;  %v9502_v25 = vor.u32 %v12088_v12, %v9499_v13 }
  0x92   :  { %16696 = vst [vmem:[#allocation18_spill] sm:$0xff] %v13095_v15  ;;  %v13097_v16 = vpop.permute.xlu0 %454  ;;  %v13099_v20 = vpop.permute.xlu2 %419 }
  0x97   :  { %654 = vperm.xlu1 %12741, %v304_v27   ;;  %v9790_v27 = vor.u32 %v12160_v14, %v9787_v17 }
  0x98   :  { %649 = vperm.xlu0 %12740, %v303_v26   ;;  %459 = vperm.xlu2 %12742, %v265_v29  }
  0x99   :  { %1791 = vmatmul.bf16.gmra.mxu0 %v9482_v28  ;;  %1971 = vmatmul.bf16.gmra.mxu2 %v9770_v30  ;;  %v13110_v33 = vpop.permute.xlu1 %524 }
  0x9a   :  { %2120 = vmatmul.bf16.gmra.mxu1 %v9486_v31  ;;  %16697 = vst [vmem:[#allocation19_spill] sm:$0xff] %v13110_v33  ;;  %v13112_v34 = vpop.permute.xlu0 %519  ;;  %v13114_v35 = vpop.permute.xlu2 %694  ;;  %2300 = vmatmul.bf16.gmra.mxu3 %v9774_v32  ;;  %v298_v32 = vld [vmem:[%s16688_s2 + $0x188] sm:$0xff] }
  0x9b   :  { %16698 = vst [vmem:[#allocation20_spill] sm:$0xff] %v13112_v34 }
  0x9c   :  { %16699 = vst [vmem:[#allocation21_spill] sm:$0xff] %v13114_v35 }
  0x9f   :  { %559 = vperm.xlu1 %12741, %v285_v37  }
  0xa0   :  { %464 = vperm.xlu0 %12740, %v266_v36   ;;  %564 = vperm.xlu2 %12742, %v286_v38   ;;  %v327_v36 = vld [vmem:[%s16688_s2 + $0x270] sm:$0xff] }
  0xa1   :  { %v13125_v39 = vpop.permute.xlu1 %509 }
  0xa2   :  { %16700 = vst [vmem:[#allocation22_spill] sm:$0xff] %v13125_v39  ;;  %v13127_v41 = vpop.permute.xlu0 %434  ;;  %v13129_v45 = vpop.permute.xlu2 %599 }
  0xa3   :  { %16701 = vst [vmem:[#allocation23_spill] sm:$0xff] %v13129_v45 }
  0xa7   :  { %644 = vperm.xlu1 %12741, %v302_v52   ;;  %v12090_v52 = vld [vmem:[#allocation6 + $0x94] sm:$0xf] }
  0xa8   :  { %639 = vperm.xlu0 %12740, %v301_v51   ;;  %549 = vperm.xlu2 %12742, %v283_v55   ;;  %v12163_v51 = vld [vmem:[#allocation6 + $0x2d4] sm:$0xf0]  ;;  %v12162_v55 = vld [vmem:[#allocation6 + $0x2d4] sm:$0xf] }
  0xa9   :  { %1796 = vmatmul.bf16.gmra.mxu0 %v9490_v54  ;;  %1976 = vmatmul.bf16.gmra.mxu2 %v9778_v56  ;;  %v13140_v59 = vpop.permute.xlu1 %614  ;;  %v9507_v54 = vld [vmem:[#allocation6 + $0x98] sm:$0xf0]  ;;  %v9794_v6 = vor.u32 %v12163_v51, %v9793_v49  ;;  %v9801_v49 = vld [vmem:[#allocation6 + $0x2e0] sm:$0xf] }
  0xaa   :  { %2125 = vmatmul.bf16.gmra.mxu1 %v9494_v57  ;;  %16702 = vst [vmem:[#allocation24_spill] sm:$0xff] %v13140_v59  ;;  %v13142_v61 = vpop.permute.xlu0 %609  ;;  %v13144_v62 = vpop.permute.xlu2 %414  ;;  %2305 = vmatmul.bf16.gmra.mxu3 %v9782_v58  ;;  %v9795_v56 = vld [vmem:[#allocation6 + $0x2d8] sm:$0xf0]  ;;  %v343_v58 = vld [vmem:[%s16688_s2 + $0x2f0] sm:$0xff]  ;;  %v9510_v8 = vor.u32 %v12090_v52, %v9507_v54  ;;  %v12092_v54 = vld [vmem:[#allocation6 + $0xa4] sm:$0xf] }
  0xab   :  { %16703 = vst [vmem:[#allocation25_spill] sm:$0xff] %v13142_v61  ;;  %v9798_v13 = vor.u32 %v12162_v55, %v9795_v56  ;;  %v12165_v52 = vld [vmem:[#allocation6 + $0x2e4] sm:$0xf0]  ;;  %v9515_v55 = vld [vmem:[#allocation6 + $0xa8] sm:$0xf0] }
  0xaf   :  { %629 = vperm.xlu1 %12741, %v299_v0   ;;  %v9506_v0 = vor.u32 %v12091_v48, %v9505_v47  ;;  %v9513_v47 = vld [vmem:[#allocation6 + $0xa0] sm:$0xf]  ;;  %v12093_v48 = vld [vmem:[#allocation6 + $0xa4] sm:$0xf0] }
  0xb0   :  { %554 = vperm.xlu0 %12740, %v284_v63   ;;  %634 = vperm.xlu2 %12742, %v300_v1   ;;  %v344_v63 = vld [vmem:[%s16688_s2 + $0x2f8] sm:$0xff] }
  0xb1   :  { %v13155_v2 = vpop.permute.xlu1 %689 }
  0xb2   :  { %16704 = vst [vmem:[#allocation26_spill] sm:$0xff] %v13155_v2  ;;  %v13157_v3 = vpop.permute.xlu0 %424  ;;  %v13159_v7 = vpop.permute.xlu2 %489 }
  0xb6   :  { %v13167_v22 = vpop.f32.mrf.mxu0 }
  0xb7   :  { %v13172_v26 = vpop.f32.mrf.mxu1  ;;  %544 = vperm.xlu1 %12741, %v282_v19  }
  0xb8   :  { %539 = vperm.xlu0 %12740, %v281_v18   ;;  %619 = vperm.xlu2 %12742, %v297_v23   ;;  %v341_v23 = vld [vmem:[%s16688_s2 + $0x2e0] sm:$0xff] }
  0xb9   :  { %1801 = vmatmul.bf16.gmra.mxu0 %v9498_v21  ;;  %1981 = vmatmul.bf16.gmra.mxu2 %v9786_v24  ;;  %v13174_v28 = vpop.permute.xlu1 %504  ;;  %v326_v21 = vld [vmem:[%s16688_s2 + $0x268] sm:$0xff] }
  0xba   :  { %2130 = vmatmul.bf16.gmra.mxu1 %v9502_v25  ;;  %16705 = vst [vmem:[#allocation27_spill] sm:$0xff] %v13174_v28  ;;  %v13176_v29 = vpop.permute.xlu0 %499  ;;  %v13178_v30 = vpop.permute.xlu2 %594  ;;  %2310 = vmatmul.bf16.gmra.mxu3 %v9790_v27  ;;  %v342_v27 = vld [vmem:[%s16688_s2 + $0x2e8] sm:$0xff] }
  0xbb   :  { %16706 = vst [vmem:[#allocation28_spill] sm:$0xff] %v13176_v29 }
  0xbc   :  { %16707 = vst [vmem:[#allocation29_spill] sm:$0xff] %v13178_v30  ;;  %v13180_v31 = vpop.f32.mrf.mxu2 }
  0xbd   :  { %16708 = vst [vmem:[#allocation30_spill] sm:$0xff] %v13180_v31  ;;  %v13190_v38 = vpop.f32.mrf.mxu3 }
  0xbe   :  { %v13188_v37 = vpop.f32.mrf.mxu0  ;;  %16709 = vst [vmem:[#allocation31_spill] sm:$0xff] %v13190_v38 }
  0xbf   :  { %v13195_v43 = vpop.f32.mrf.mxu1  ;;  %769 = vperm.xlu1 %12741, %v327_v36  }
  0xc0   :  { %624 = vperm.xlu0 %12740, %v298_v32   ;;  %774 = vperm.xlu2 %12742, %v328_v42  }
  0xc1   :  { %v13199_v46 = vpop.permute.xlu1 %409 }
  0xc2   :  { %v13197_v44 = vpop.permute.xlu0 %604  ;;  %v13201_v50 = vpop.permute.xlu2 %669 }
  0xc3   :  { %16710 = vst [vmem:[#allocation32_spill] sm:$0xff] %v13197_v44 }
  0xc4   :  { %16711 = vst [vmem:[#allocation33_spill] sm:$0xff] %v13201_v50  ;;  %v13203_v57 = vpop.f32.mrf.mxu2 }
  0xc5   :  { %16712 = vst [vmem:[#allocation34_spill] sm:$0xff] %v13203_v57  ;;  %v13211_v4 = vpop.f32.mrf.mxu3 }
  0xc6   :  { %v1767_v1 = vpop.f32.mrf.mxu0  ;;  %16713 = vst [vmem:[#allocation35_spill] sm:$0xff] %v13211_v4  ;;  %v9843_v4 = vld [vmem:[#allocation6 + $0x338] sm:$0xf0] }
  0xc7   :  { %v2096_v12 = vpop.f32.mrf.mxu1  ;;  %854 = vperm.xlu1 %12741, %v344_v63   ;;  %v9803_v63 = vld [vmem:[#allocation6 + $0x2e8] sm:$0xf0] }
  0xc8   :  { %849 = vperm.xlu0 %12740, %v343_v58   ;;  %759 = vperm.xlu2 %12742, %v325_v5   ;;  %v12164_v58 = vld [vmem:[#allocation6 + $0x2e4] sm:$0xf]  ;;  %v323_v5 = vld [vmem:[%s16688_s2 + $0x250] sm:$0xff] }
  0xc9   :  { %1806 = vmatmul.bf16.gmra.mxu0 %v9506_v0  ;;  %1986 = vmatmul.bf16.gmra.mxu2 %v9794_v6  ;;  %v13218_v17 = vpop.permute.xlu1 %684  ;;  %v324_v6 = vld [vmem:[%s16688_s2 + $0x258] sm:$0xff]  ;;  %v9806_v35 = vor.u32 %v12164_v58, %v9803_v63 }
  0xca   :  { %2135 = vmatmul.bf16.gmra.mxu1 %v9510_v8  ;;  %v13216_v14 = vpop.permute.xlu0 %679  ;;  %16715 = vst [vmem:[#allocation37_spill] sm:$0xff] %v13218_v17  ;;  %v13220_v18 = vpop.permute.xlu2 %484  ;;  %2315 = vmatmul.bf16.gmra.mxu3 %v9798_v13  ;;  %v9514_v8 = vor.u32 %v12093_v48, %v9513_v47  ;;  %v360_v58 = vld [vmem:[%s16688_s2 + $0x378] sm:$0xff] }
  0xcb   :  { %16714 = vst [vmem:[#allocation36_spill] sm:$0xff] %v13216_v14 }
  0xcc   :  { %v13222_v19 = vpop.f32.mrf.mxu2 }
  0xcd   :  { %v13232_v25 = vpop.f32.mrf.mxu3 }
  0xce   :  { %v13230_v24 = vpop.f32.mrf.mxu0 }
  0xcf   :  { %v13237_v32 = vpop.f32.mrf.mxu1  ;;  %839 = vperm.xlu1 %12741, %v341_v23  }
  0xd0   :  { %764 = vperm.xlu0 %12740, %v326_v21   ;;  %844 = vperm.xlu2 %12742, %v342_v27   ;;  %v9802_v27 = vor.u32 %v12165_v52, %v9801_v49  ;;  %v340_v49 = vld [vmem:[%s16688_s2 + $0x2d8] sm:$0xff]  ;;  %v359_v52 = vld [vmem:[%s16688_s2 + $0x370] sm:$0xff] }
  0xd1   :  { %v13241_v42 = vpop.permute.xlu1 %589 }
  0xd2   :  { %v13239_v36 = vpop.permute.xlu0 %494  ;;  %16717 = vst [vmem:[#allocation39_spill] sm:$0xff] %v13241_v42  ;;  %v390_v51 = vpop.permute.xlu2 %389 }
  0xd3   :  { %16716 = vst [vmem:[#allocation38_spill] sm:$0xff] %v13239_v36  ;;  %v1768_v56 = vadd.f32 %v1767_v1, %v390_v51  ;;  %v339_v1 = vld [vmem:[%s16688_s2 + $0x2d0] sm:$0xff]  ;;  %v9518_v51 = vor.u32 %v12092_v54, %v9515_v55 }
  0xd4   :  { %v13243_v0 = vpop.f32.mrf.mxu2 }
  0xd5   :  { %v13251_v13 = vadd.f32 %v2096_v12, %v1768_v56  ;;  %v13253_v23 = vpop.f32.mrf.mxu3 }
  0xd6   :  { %v1772_v21 = vpop.f32.mrf.mxu0 }
  0xd7   :  { %v2101_v50 = vpop.f32.mrf.mxu1  ;;  %754 = vperm.xlu1 %12741, %v324_v6  }
  0xd8   :  { %749 = vperm.xlu0 %12740, %v323_v5   ;;  %829 = vperm.xlu2 %12742, %v339_v1   ;;  %v9521_v5 = vld [vmem:[#allocation6 + $0xb0] sm:$0xf] }
  0xd9   :  { %1811 = vmatmul.bf16.gmra.mxu0 %v9514_v8  ;;  %1991 = vmatmul.bf16.gmra.mxu2 %v9802_v27  ;;  %v405_v47 = vpop.permute.xlu1 %404  ;;  %v9809_v1 = vld [vmem:[#allocation6 + $0x2f0] sm:$0xf]  ;;  %v12167_v27 = vld [vmem:[#allocation6 + $0x2f4] sm:$0xf0] }
  0xda   :  { %2140 = vmatmul.bf16.gmra.mxu1 %v9518_v51  ;;  %v400_v12 = vpop.permute.xlu0 %399  ;;  %v13258_v56 = vpop.permute.xlu2 %664  ;;  %2320 = vmatmul.bf16.gmra.mxu3 %v9806_v35  ;;  %v9810_v42 = vor.u32 %v12167_v27, %v9809_v1 }
  0xdb   :  { %v1773_v48 = vadd.f32 %v1772_v21, %v400_v12  ;;  %16718 = vst [vmem:[#allocation40_spill] sm:$0xff] %v13258_v56  ;;  %v12095_v21 = vld [vmem:[#allocation6 + $0xb4] sm:$0xf0]  ;;  %v9523_v56 = vld [vmem:[#allocation6 + $0xb8] sm:$0xf0] }
  0xdc   :  { %v13260_v17 = vpop.f32.mrf.mxu2 }
  0xdd   :  { %v2102_v14 = vadd.f32 %v2101_v50, %v1773_v48  ;;  %v13268_v55 = vpop.f32.mrf.mxu3  ;;  %v12094_v48 = vld [vmem:[#allocation6 + $0xb4] sm:$0xf] }
  0xde   :  { %v1774_v54 = vpop.f32.mrf.mxu0  ;;  %v9526_v30 = vor.u32 %v12094_v48, %v9523_v56  ;;  %v9529_v48 = vld [vmem:[#allocation6 + $0xc0] sm:$0xf] }
  0xdf   :  { %v1775_v63 = vadd.f32 %v1774_v54, %v405_v47  ;;  %v2103_v35 = vpop.f32.mrf.mxu1  ;;  %929 = vperm.xlu1 %12741, %v359_v52   ;;  %v2415_v2 = vmax.f32 %v2102_v14, 0.0  ;;  %v12166_v47 = vld [vmem:[#allocation6 + $0x2f4] sm:$0xf]  ;;  %v9811_v54 = vld [vmem:[#allocation6 + $0x2f8] sm:$0xf0]  ;;  %v375_v14 = vld [vmem:[%s16688_s2 + $0x3f0] sm:$0xff] }
  0xe0   :  { %834 = vperm.xlu0 %12740, %v340_v49   ;;  %934 = vperm.xlu2 %12742, %v360_v58   ;;  %v321_v52 = vld [vmem:[%s16688_s2 + $0x240] sm:$0xff]  ;;  %v322_v58 = vld [vmem:[%s16688_s2 + $0x248] sm:$0xff]  ;;  %v9814_v44 = vor.u32 %v12166_v47, %v9811_v54 }
  0xe1   :  { %v2104_v50 = vadd.f32 %v2103_v35, %v1775_v63  ;;  %v13273_v6 = vpop.permute.xlu1 %479  ;;  %v9522_v63 = vor.u32 %v12095_v21, %v9521_v5 }
  0xe2   :  { %v13275_v8 = vpop.permute.xlu0 %674  ;;  %v13277_v12 = vpop.permute.xlu2 %569 }
  0xe3   :  { %16719 = vst [vmem:[#allocation41_spill] sm:$0xff] %v13275_v8  ;;  %v2416_v51 = vmax.f32 %v2104_v50, 0.0 }
  0xe4   :  { %16720 = vst [vmem:[#allocation42_spill] sm:$0xff] %v13277_v12  ;;  %v13279_v49 = vpop.f32.mrf.mxu2 }
  0xe5   :  { %v13287_v35 = vpack.c.bf16 %v2416_v51, %v2415_v2  ;;  %v13289_v8 = vpop.f32.mrf.mxu3 }
  0xe6   :  { %v1777_v50 = vpop.f32.mrf.mxu0 }
  0xe7   :  { %v1778_v45 = vadd.f32 %v1777_v50, %v13199_v46  ;;  %v2106_v59 = vpop.f32.mrf.mxu1  ;;  %744 = vperm.xlu1 %12741, %v322_v58   ;;  %v376_v46 = vld [vmem:[%s16688_s2 + $0x3f8] sm:$0xff]  ;;  %v12169_v58 = vld [vmem:[#allocation6 + $0x304] sm:$0xf0] }
  0xe8   :  { %739 = vperm.xlu0 %12740, %v321_v52   ;;  %1009 = vperm.xlu2 %12742, %v375_v14   ;;  %v9817_v52 = vld [vmem:[#allocation6 + $0x300] sm:$0xf] }
  0xe9   :  { %v2107_v61 = vadd.f32 %v2106_v59, %v1778_v45  ;;  %1816 = vmatmul.bf16.gmra.mxu0 %v9522_v63  ;;  %1996 = vmatmul.bf16.gmra.mxu2 %v9810_v42  ;;  %v13295_v2 = vpop.permute.xlu1 %584  ;;  %v337_v45 = vld [vmem:[%s16688_s2 + $0x2c0] sm:$0xff] }
  0xea   :  { %2145 = vmatmul.bf16.gmra.mxu1 %v9526_v30  ;;  %16721 = vst [vmem:[#allocation43_spill] sm:$0xff] %v13295_v2  ;;  %v13297_v5 = vpop.permute.xlu0 %579  ;;  %v385_v21 = vpop.permute.xlu2 %384  ;;  %2325 = vmatmul.bf16.gmra.mxu3 %v9814_v44 }
  0xeb   :  { %16722 = vst [vmem:[#allocation44_spill] sm:$0xff] %v13297_v5  ;;  %v1765_v1 = vadd.f32 %v13188_v37, %v385_v21  ;;  %v338_v37 = vld [vmem:[%s16688_s2 + $0x2c8] sm:$0xff]  ;;  %v2417_v63 = vmax.f32 %v2107_v61, 0.0 }
  0xec   :  { %v13300_v56 = vpop.f32.mrf.mxu2  ;;  %v358_v61 = vld [vmem:[%s16688_s2 + $0x368] sm:$0xff] }
  0xed   :  { %v13309_v59 = vadd.f32 %v13195_v43, %v1765_v1  ;;  %v13311_v42 = vpop.f32.mrf.mxu3  ;;  %v12097_v43 = vld [vmem:[#allocation6 + $0xc4] sm:$0xf0]  ;;  %v12096_v1 = vld [vmem:[#allocation6 + $0xc4] sm:$0xf] }
  0xee   :  { %v1779_v30 = vpop.f32.mrf.mxu0 }
  0xef   :  { %v1780_v44 = vadd.f32 %v1779_v30, %v13144_v62  ;;  %v2108_v27 = vpop.f32.mrf.mxu1  ;;  %819 = vperm.xlu1 %12741, %v337_v45   ;;  %v9531_v62 = vld [vmem:[#allocation6 + $0xc8] sm:$0xf0]  ;;  %v12168_v30 = vld [vmem:[#allocation6 + $0x304] sm:$0xf] }
  0xf0   :  { %1014 = vperm.xlu0 %12740, %v376_v46   ;;  %824 = vperm.xlu2 %12742, %v338_v37   ;;  %v9819_v46 = vld [vmem:[#allocation6 + $0x308] sm:$0xf0] }
  0xf1   :  { %v2109_v51 = vadd.f32 %v2108_v27, %v1780_v44  ;;  %v13317_v47 = vpop.permute.xlu1 %659  ;;  %v357_v44 = vld [vmem:[%s16688_s2 + $0x360] sm:$0xff]  ;;  %v9530_v27 = vor.u32 %v12097_v43, %v9529_v48  ;;  %v9822_v12 = vor.u32 %v12168_v30, %v9819_v46  ;;  %v2413_v48 = vmax.f32 %v13251_v13, 0.0  ;;  %v9537_v46 = vld [vmem:[#allocation6 + $0xd0] sm:$0xf] }
  0xf2   :  { %16723 = vst [vmem:[#allocation45_spill] sm:$0xff] %v13317_v47  ;;  %v395_v54 = vpop.permute.xlu0 %394  ;;  %v13320_v21 = vpop.permute.xlu2 %459  ;;  %v9534_v47 = vor.u32 %v12096_v1, %v9531_v62  ;;  %v373_v13 = vld [vmem:[%s16688_s2 + $0x3e0] sm:$0xff] }
  0xf3   :  { %v2418_v50 = vmax.f32 %v2109_v51, 0.0  ;;  %v1770_v14 = vadd.f32 %v13230_v24, %v395_v54 }
  0xf4   :  { %v13323_v37 = vpop.f32.mrf.mxu2 }
  0xf5   :  { %v2099_v45 = vadd.f32 %v13237_v32, %v1770_v14  ;;  %v13331_v24 = vpack.c.bf16 %v2418_v50, %v2417_v63  ;;  %v13333_v54 = vpop.f32.mrf.mxu3  ;;  %v319_v32 = vld [vmem:[%s16688_s2 + $0x230] sm:$0xff]  ;;  %v9818_v14 = vor.u32 %v12169_v58, %v9817_v52 }
  0xf6   :  { %v1782_v51 = vpop.f32.mrf.mxu0 }
  0xf7   :  { %v1783_v2 = vadd.f32 %v1782_v51, %v13099_v20  ;;  %v2111_v5 = vpop.f32.mrf.mxu1  ;;  %924 = vperm.xlu1 %12741, %v358_v61   ;;  %v2414_v43 = vmax.f32 %v2099_v45, 0.0  ;;  %v12099_v45 = vld [vmem:[#allocation6 + $0xd4] sm:$0xf0]  ;;  %v12098_v51 = vld [vmem:[#allocation6 + $0xd4] sm:$0xf] }
  0xf8   :  { %919 = vperm.xlu0 %12740, %v357_v44   ;;  %729 = vperm.xlu2 %12742, %v319_v32   ;;  %v9825_v44 = vld [vmem:[#allocation6 + $0x310] sm:$0xf]  ;;  %v9539_v32 = vld [vmem:[#allocation6 + $0xd8] sm:$0xf0] }
  0xf9   :  { %v13339_v28 = vadd.f32 %v2111_v5, %v1783_v2  ;;  %1821 = vmatmul.bf16.gmra.mxu0 %v9530_v27  ;;  %2001 = vmatmul.bf16.gmra.mxu2 %v9818_v14  ;;  %v13342_v63 = vpop.permute.xlu1 %474  ;;  %v13348_v20 = vpack.c.bf16 %v2414_v43, %v2413_v48  ;;  %v320_v2 = vld [vmem:[%s16688_s2 + $0x238] sm:$0xff]  ;;  %v12171_v27 = vld [vmem:[#allocation6 + $0x314] sm:$0xf0]  ;;  %v9827_v48 = vld [vmem:[#allocation6 + $0x318] sm:$0xf0] }
  0xfa   :  { %2150 = vmatmul.bf16.gmra.mxu1 %v9534_v47  ;;  %v13344_v50 = vpop.permute.xlu0 %469  ;;  %v13346_v52 = vpop.permute.xlu2 %564  ;;  %2330 = vmatmul.bf16.gmra.mxu3 %v9822_v12  ;;  %v374_v12 = vld [vmem:[%s16688_s2 + $0x3e8] sm:$0xff]  ;;  %v12170_v14 = vld [vmem:[#allocation6 + $0x314] sm:$0xf] }
  0xfb   :  { %16724 = vst [vmem:[#allocation46_spill] sm:$0xff] %v13346_v52  ;;  %v9826_v52 = vor.u32 %v12171_v27, %v9825_v44  ;;  %v9830_v39 = vor.u32 %v12170_v14, %v9827_v48  ;;  %v356_v44 = vld [vmem:[%s16688_s2 + $0x358] sm:$0xff]  ;;  %v9545_v14 = vld [vmem:[#allocation6 + $0xe0] sm:$0xf]  ;;  %v12101_v48 = vld [vmem:[#allocation6 + $0xe4] sm:$0xf0] }
  0xfc   :  { %v13350_v58 = vpop.f32.mrf.mxu2 }
  0xfd   :  { %16725 = vst [vmem:[#allocation47_spill] sm:$0xff] %v13350_v58  ;;  %v13360_v47 = vpop.f32.mrf.mxu3  ;;  %v355_v58 = vld [vmem:[%s16688_s2 + $0x350] sm:$0xff] }
  0xfe   :  { %v13358_v5 = vpop.f32.mrf.mxu0  ;;  %16726 = vst [vmem:[#allocation48_spill] sm:$0xff] %v13360_v47 }
  0xff   :  { %v13365_v1 = vpop.f32.mrf.mxu1  ;;  %999 = vperm.xlu1 %12741, %v373_v13   ;;  %v336_v13 = vld [vmem:[%s16688_s2 + $0x2b8] sm:$0xff] }
 0x100   :  { %734 = vperm.xlu0 %12740, %v320_v2   ;;  %1004 = vperm.xlu2 %12742, %v374_v12   ;;  %v335_v2 = vld [vmem:[%s16688_s2 + $0x2b0] sm:$0xff]  ;;  %v9538_v12 = vor.u32 %v12099_v45, %v9537_v46 }
 0x101   :  { %v13369_v30 = vpop.permute.xlu1 %379 }
 0x102   :  { %v13367_v62 = vpop.permute.xlu0 %574  ;;  %v13371_v61 = vpop.permute.xlu2 %549 }
 0x103   :  { %16727 = vst [vmem:[#allocation49_spill] sm:$0xff] %v13367_v62 }
 0x104   :  { %16728 = vst [vmem:[#allocation50_spill] sm:$0xff] %v13371_v61  ;;  %v13373_v43 = vpop.f32.mrf.mxu2  ;;  %v9542_v61 = vor.u32 %v12098_v51, %v9539_v32 }
 0x105   :  { %16729 = vst [vmem:[#allocation51_spill] sm:$0xff] %v13373_v43  ;;  %v13383_v47 = vpop.f32.mrf.mxu3 }
 0x106   :  { %v13381_v62 = vpop.f32.mrf.mxu0  ;;  %16730 = vst [vmem:[#allocation52_spill] sm:$0xff] %v13383_v47 }
 0x107   :  { %v13388_v43 = vpop.f32.mrf.mxu1  ;;  %814 = vperm.xlu1 %12741, %v336_v13  }
 0x108   :  { %809 = vperm.xlu0 %12740, %v335_v2   ;;  %909 = vperm.xlu2 %12742, %v355_v58   ;;  %v317_v58 = vld [vmem:[%s16688_s2 + $0x220] sm:$0xff]  ;;  %v9833_v2 = vld [vmem:[#allocation6 + $0x320] sm:$0xf] }
 0x109   :  { %1826 = vmatmul.bf16.gmra.mxu0 %v9538_v12  ;;  %2006 = vmatmul.bf16.gmra.mxu2 %v9826_v52  ;;  %v13392_v45 = vpop.permute.xlu1 %654  ;;  %v12173_v12 = vld [vmem:[#allocation6 + $0x324] sm:$0xf0] }
 0x10a   :  { %2155 = vmatmul.bf16.gmra.mxu1 %v9542_v61  ;;  %v13390_v46 = vpop.permute.xlu0 %649  ;;  %16732 = vst [vmem:[#allocation54_spill] sm:$0xff] %v13392_v45  ;;  %v13394_v47 = vpop.permute.xlu2 %634  ;;  %2335 = vmatmul.bf16.gmra.mxu3 %v9830_v39  ;;  %v318_v61 = vld [vmem:[%s16688_s2 + $0x228] sm:$0xff]  ;;  %v9834_v15 = vor.u32 %v12173_v12, %v9833_v2  ;;  %v12103_v12 = vld [vmem:[#allocation6 + $0xf4] sm:$0xf0] }
 0x10b   :  { %16731 = vst [vmem:[#allocation53_spill] sm:$0xff] %v13390_v46  ;;  %v12100_v45 = vld [vmem:[#allocation6 + $0xe4] sm:$0xf]  ;;  %v9547_v46 = vld [vmem:[#allocation6 + $0xe8] sm:$0xf0] }
 0x10c   :  { %16733 = vst [vmem:[#allocation55_spill] sm:$0xff] %v13394_v47  ;;  %v13396_v11 = vpop.f32.mrf.mxu2  ;;  %v12172_v47 = vld [vmem:[#allocation6 + $0x324] sm:$0xf]  ;;  %v9550_v33 = vor.u32 %v12100_v45, %v9547_v46 }
 0x10d   :  { %16734 = vst [vmem:[#allocation56_spill] sm:$0xff] %v13396_v11  ;;  %v13406_v52 = vpop.f32.mrf.mxu3  ;;  %v334_v46 = vld [vmem:[%s16688_s2 + $0x2a8] sm:$0xff] }
 0x10e   :  { %v13404_v27 = vpop.f32.mrf.mxu0  ;;  %16735 = vst [vmem:[#allocation57_spill] sm:$0xff] %v13406_v52  ;;  %v9835_v52 = vld [vmem:[#allocation6 + $0x328] sm:$0xf0] }
 0x10f   :  { %v13411_v51 = vpop.f32.mrf.mxu1  ;;  %719 = vperm.xlu1 %12741, %v317_v58   ;;  %v372_v58 = vld [vmem:[%s16688_s2 + $0x3d8] sm:$0xff]  ;;  %v9838_v9 = vor.u32 %v12172_v47, %v9835_v52  ;;  %v353_v47 = vld [vmem:[%s16688_s2 + $0x340] sm:$0xff] }
 0x110   :  { %914 = vperm.xlu0 %12740, %v356_v44   ;;  %724 = vperm.xlu2 %12742, %v318_v61   ;;  %v371_v44 = vld [vmem:[%s16688_s2 + $0x3d0] sm:$0xff]  ;;  %v9546_v61 = vor.u32 %v12101_v48, %v9545_v14 }
 0x111   :  { %v13415_v32 = vpop.permute.xlu1 %559 }
 0x112   :  { %v13413_v39 = vpop.permute.xlu0 %464  ;;  %16736 = vst [vmem:[#allocation58_spill] sm:$0xff] %v13415_v32  ;;  %v13417_v13 = vpop.permute.xlu2 %619 }
 0x113   :  { %16737 = vst [vmem:[#allocation59_spill] sm:$0xff] %v13417_v13  ;;  %v333_v13 = vld [vmem:[%s16688_s2 + $0x2a0] sm:$0xff] }
 0x114   :  { %v13419_v11 = vpop.f32.mrf.mxu2 }
 0x115   :  { %16738 = vst [vmem:[#allocation60_spill] sm:$0xff] %v13419_v11  ;;  %v13429_v34 = vpop.f32.mrf.mxu3 }
 0x116   :  { %v13427_v32 = vpop.f32.mrf.mxu0  ;;  %16739 = vst [vmem:[#allocation61_spill] sm:$0xff] %v13429_v34 }
 0x117   :  { %v13434_v11 = vpop.f32.mrf.mxu1  ;;  %994 = vperm.xlu1 %12741, %v372_v58  }
 0x118   :  { %989 = vperm.xlu0 %12740, %v371_v44   ;;  %799 = vperm.xlu2 %12742, %v333_v13   ;;  %v9553_v13 = vld [vmem:[#allocation6 + $0xf0] sm:$0xf] }
 0x119   :  { %1831 = vmatmul.bf16.gmra.mxu0 %v9546_v61  ;;  %2011 = vmatmul.bf16.gmra.mxu2 %v9834_v15  ;;  %v13438_v48 = vpop.permute.xlu1 %644  ;;  %v9841_v44 = vld [vmem:[#allocation6 + $0x330] sm:$0xf]  ;;  %v12175_v61 = vld [vmem:[#allocation6 + $0x334] sm:$0xf0] }
 0x11a   :  { %2160 = vmatmul.bf16.gmra.mxu1 %v9550_v33  ;;  %v13436_v14 = vpop.permute.xlu0 %639  ;;  %16741 = vst [vmem:[#allocation63_spill] sm:$0xff] %v13438_v48  ;;  %v13440_v34 = vpop.permute.xlu2 %774  ;;  %2340 = vmatmul.bf16.gmra.mxu3 %v9838_v9  ;;  %v354_v33 = vld [vmem:[%s16688_s2 + $0x348] sm:$0xff]  ;;  %v12102_v48 = vld [vmem:[#allocation6 + $0xf4] sm:$0xf] }
 0x11b   :  { %16740 = vst [vmem:[#allocation62_spill] sm:$0xff] %v13436_v14  ;;  %v9555_v14 = vld [vmem:[#allocation6 + $0xf8] sm:$0xf0] }
 0x11c   :  { %v13442_v29 = vpop.f32.mrf.mxu2 }
 0x11d   :  { %16742 = vst [vmem:[#allocation64_spill] sm:$0xff] %v13442_v29  ;;  %v13450_v15 = vpop.f32.mrf.mxu3  ;;  %v12174_v29 = vld [vmem:[#allocation6 + $0x334] sm:$0xf] }
 0x11e   :  { %v1794_v45 = vpop.f32.mrf.mxu0  ;;  %16743 = vst [vmem:[#allocation65_spill] sm:$0xff] %v13450_v15  ;;  %v9846_v31 = vor.u32 %v12174_v29, %v9843_v4  ;;  %v370_v29 = vld [vmem:[%s16688_s2 + $0x3c8] sm:$0xff] }
 0x11f   :  { %v2123_v52 = vpop.f32.mrf.mxu1  ;;  %899 = vperm.xlu1 %12741, %v353_v47   ;;  %v316_v47 = vld [vmem:[%s16688_s2 + $0x218] sm:$0xff] }
 0x120   :  { %804 = vperm.xlu0 %12740, %v334_v46   ;;  %904 = vperm.xlu2 %12742, %v354_v33   ;;  %v315_v46 = vld [vmem:[%s16688_s2 + $0x210] sm:$0xff]  ;;  %v9554_v33 = vor.u32 %v12103_v12, %v9553_v13 }
 0x121   :  { %v13457_v2 = vpop.permute.xlu1 %629 }
 0x122   :  { %v13455_v9 = vpop.permute.xlu0 %554  ;;  %16745 = vst [vmem:[#allocation67_spill] sm:$0xff] %v13457_v2  ;;  %v760_v58 = vpop.permute.xlu2 %759 }
 0x123   :  { %16744 = vst [vmem:[#allocation66_spill] sm:$0xff] %v13455_v9  ;;  %v1953_v15 = vadd.f32 %v13260_v17, %v760_v58  ;;  %v369_v17 = vld [vmem:[%s16688_s2 + $0x3c0] sm:$0xff]  ;;  %v9842_v58 = vor.u32 %v12175_v61, %v9841_v44  ;;  %v1795_v44 = vadd.f32 %v1794_v45, %v13058_v53  ;;  %v1793_v53 = vadd.f32 %v13427_v32, %v13047_v40  ;;  %v12177_v40 = vld [vmem:[#allocation6 + $0x344] sm:$0xf0] }
 0x124   :  { %v13460_v38 = vpop.f32.mrf.mxu2  ;;  %v1790_v61 = vadd.f32 %v13404_v27, %v13127_v41  ;;  %v12104_v41 = vld [vmem:[#allocation6 + $0x104] sm:$0xf]  ;;  %v9563_v27 = vld [vmem:[#allocation6 + $0x108] sm:$0xf0] }
 0x125   :  { %16746 = vst [vmem:[#allocation68_spill] sm:$0xff] %v13460_v38  ;;  %v13469_v2 = vadd.f32 %v13268_v55, %v1953_v15  ;;  %v13471_v36 = vpop.f32.mrf.mxu3  ;;  %v9558_v38 = vor.u32 %v12102_v48, %v9555_v14 }
 0x126   :  { %v1797_v9 = vpop.f32.mrf.mxu0  ;;  %16747 = vst [vmem:[#allocation69_spill] sm:$0xff] %v13471_v36  ;;  %v12105_v36 = vld [vmem:[#allocation6 + $0x104] sm:$0xf0] }
 0x127   :  { %v2126_v57 = vpop.f32.mrf.mxu1  ;;  %714 = vperm.xlu1 %12741, %v316_v47   ;;  %v1798_v15 = vadd.f32 %v1797_v9, %v13082_v10  ;;  %v332_v10 = vld [vmem:[%s16688_s2 + $0x298] sm:$0xff] }
 0x128   :  { %709 = vperm.xlu0 %12740, %v315_v46   ;;  %979 = vperm.xlu2 %12742, %v369_v17   ;;  %v2124_v46 = vadd.f32 %v2123_v52, %v1795_v44  ;;  %v1785_v52 = vadd.f32 %v13358_v5, %v13157_v3  ;;  %v12176_v44 = vld [vmem:[#allocation6 + $0x344] sm:$0xf]  ;;  %v313_v3 = vld [vmem:[%s16688_s2 + $0x200] sm:$0xff] }
 0x129   :  { %1836 = vmatmul.bf16.gmra.mxu0 %v9554_v33  ;;  %2016 = vmatmul.bf16.gmra.mxu2 %v9842_v58  ;;  %v13478_v55 = vpop.permute.xlu1 %544  ;;  %v9561_v33 = vld [vmem:[#allocation6 + $0x100] sm:$0xf] }
 0x12a   :  { %2165 = vmatmul.bf16.gmra.mxu1 %v9558_v38  ;;  %v13476_v13 = vpop.permute.xlu0 %539  ;;  %v13481_v12 = vpop.permute.xlu2 %844  ;;  %2345 = vmatmul.bf16.gmra.mxu3 %v9846_v31  ;;  %v331_v38 = vld [vmem:[%s16688_s2 + $0x290] sm:$0xff]  ;;  %v2127_v31 = vadd.f32 %v2126_v57, %v1798_v15  ;;  %v2122_v57 = vadd.f32 %v13434_v11, %v1793_v53  ;;  %v352_v11 = vld [vmem:[%s16688_s2 + $0x338] sm:$0xff] }
 0x12c   :  { %v13484_v14 = vpop.f32.mrf.mxu2  ;;  %v2425_v32 = vmax.f32 %v2127_v31, 0.0 }
 0x12d   :  { %16748 = vst [vmem:[#allocation70_spill] sm:$0xff] %v13484_v14  ;;  %v13492_v48 = vpop.f32.mrf.mxu3 }
 0x12e   :  { %v1799_v4 = vpop.f32.mrf.mxu0  ;;  %16749 = vst [vmem:[#allocation71_spill] sm:$0xff] %v13492_v48  ;;  %v9849_v48 = vld [vmem:[#allocation6 + $0x340] sm:$0xf] }
 0x12f   :  { %v1800_v45 = vadd.f32 %v1799_v4, %v13097_v16  ;;  %v2128_v9 = vpop.f32.mrf.mxu1  ;;  %789 = vperm.xlu1 %12741, %v331_v38   ;;  %v1788_v16 = vadd.f32 %v13381_v62, %v13069_v60  ;;  %v9851_v38 = vld [vmem:[#allocation6 + $0x348] sm:$0xf0]  ;;  %v2119_v4 = vadd.f32 %v13411_v51, %v1790_v61  ;;  %v9562_v62 = vor.u32 %v12105_v36, %v9561_v33 }
 0x130   :  { %984 = vperm.xlu0 %12740, %v370_v29   ;;  %794 = vperm.xlu2 %12742, %v332_v10   ;;  %v2424_v10 = vmax.f32 %v2124_v46, 0.0  ;;  %v351_v60 = vld [vmem:[%s16688_s2 + $0x330] sm:$0xff]  ;;  %v9850_v5 = vor.u32 %v12177_v40, %v9849_v48  ;;  %v9566_v51 = vor.u32 %v12104_v41, %v9563_v27  ;;  %v2423_v46 = vmax.f32 %v2122_v57, 0.0  ;;  %v314_v41 = vld [vmem:[%s16688_s2 + $0x208] sm:$0xff] }
 0x131   :  { %v2129_v47 = vadd.f32 %v2128_v9, %v1800_v45  ;;  %v13504_v58 = vpop.permute.xlu1 %769  ;;  %v2117_v61 = vadd.f32 %v13388_v43, %v1788_v16  ;;  %v2114_v36 = vadd.f32 %v13365_v1, %v1785_v52  ;;  %v2422_v33 = vmax.f32 %v2119_v4, 0.0  ;;  %v367_v27 = vld [vmem:[%s16688_s2 + $0x3b0] sm:$0xff] }
 0x132   :  { %v13502_v17 = vpop.permute.xlu0 %624  ;;  %v13509_v29 = vpop.permute.xlu2 %829  ;;  %v2545_v14 = vpack.c.bf16 %v2424_v10, %v2423_v46 }
 0x133   :  { %16750 = vst [vmem:[#allocation72_spill] sm:$0xff] %v13502_v17  ;;  %v2426_v15 = vmax.f32 %v2129_v47, 0.0  ;;  %v2421_v40 = vmax.f32 %v2117_v61, 0.0  ;;  %v2420_v16 = vmax.f32 %v2114_v36, 0.0  ;;  %v12178_v36 = vld [vmem:[#allocation6 + $0x354] sm:$0xf] }
 0x134   :  { %v13514_v45 = vpop.f32.mrf.mxu2 }
 0x135   :  { %v2546_v9 = vpack.c.bf16 %v2426_v15, %v2425_v32  ;;  %v13522_v31 = vpop.f32.mrf.mxu3  ;;  %v9854_v15 = vor.u32 %v12176_v44, %v9851_v38  ;;  %v2544_v1 = vpack.c.bf16 %v2422_v33, %v2421_v40  ;;  %v368_v38 = vld [vmem:[%s16688_s2 + $0x3b8] sm:$0xff]  ;;  %v9859_v33 = vld [vmem:[#allocation6 + $0x358] sm:$0xf0]  ;;  %v1763_v40 = vadd.f32 %v13167_v22, %v13369_v30 }
 0x136   :  { %v1802_v53 = vpop.f32.mrf.mxu0 }
 0x137   :  { %v1803_v47 = vadd.f32 %v1802_v53, %v13320_v21  ;;  %v2131_v32 = vpop.f32.mrf.mxu1  ;;  %6443 = vmatpush.bf16.msrb.mxu2 %v2546_v9  ;;  %894 = vperm.xlu1 %12741, %v352_v11   ;;  %v9569_v11 = vld [vmem:[#allocation6 + $0x110] sm:$0xf] }
 0x138   :  { %889 = vperm.xlu0 %12740, %v351_v60   ;;  %699 = vperm.xlu2 %12742, %v313_v3   ;;  %v12107_v3 = vld [vmem:[#allocation6 + $0x114] sm:$0xf0] }
 0x139   :  { %v2132_v17 = vadd.f32 %v2131_v32, %v1803_v47  ;;  %1841 = vmatmul.bf16.gmra.mxu0 %v9562_v62  ;;  %2021 = vmatmul.bf16.gmra.mxu2 %v9850_v5  ;;  %v13532_v43 = vpop.permute.xlu1 %854  ;;  %v9857_v5 = vld [vmem:[#allocation6 + $0x350] sm:$0xf]  ;;  %v9571_v47 = vld [vmem:[#allocation6 + $0x118] sm:$0xf0]  ;;  %v1960_v32 = vadd.f32 %v13323_v37, %v13440_v34 }
 0x13a   :  { %2170 = vmatmul.bf16.gmra.mxu1 %v9566_v51  ;;  %v13530_v48 = vpop.permute.xlu0 %849  ;;  %v13534_v21 = vpop.permute.xlu2 %934  ;;  %2350 = vmatmul.bf16.gmra.mxu3 %v9854_v15  ;;  %v12179_v51 = vld [vmem:[#allocation6 + $0x354] sm:$0xf0]  ;;  %v1958_v15 = vadd.f32 %v13300_v56, %v13504_v58 }
 0x13b   :  { %16751 = vst [vmem:[#allocation73_spill] sm:$0xff] %v13534_v21  ;;  %6444 = vmatpush.bf16.msrb.mxu2 %v2545_v14  ;;  %v2419_v14 = vmax.f32 %v13339_v28, 0.0  ;;  %v2427_v61 = vmax.f32 %v2132_v17, 0.0  ;;  %v329_v17 = vld [vmem:[%s16688_s2 + $0x280] sm:$0xff]  ;;  %v9858_v58 = vor.u32 %v12179_v51, %v9857_v5 }
 0x13c   :  { %v13536_v57 = vpop.f32.mrf.mxu2  ;;  %v349_v56 = vld [vmem:[%s16688_s2 + $0x320] sm:$0xff] }
 0x13d   :  { %v13544_v44 = vpop.f32.mrf.mxu3  ;;  %v2543_v60 = vpack.c.bf16 %v2420_v16, %v2419_v14  ;;  %v2289_v14 = vadd.f32 %v13333_v54, %v1960_v32  ;;  %v365_v5 = vld [vmem:[%s16688_s2 + $0x3a0] sm:$0xff] }
 0x13e   :  { %v1804_v52 = vpop.f32.mrf.mxu0 }
 0x13f   :  { %v1805_v4 = vadd.f32 %v1804_v52, %v13413_v39  ;;  %v2133_v10 = vpop.f32.mrf.mxu1  ;;  %6445 = vmatpush.bf16.msrb.mxu2 %v2544_v1  ;;  %969 = vperm.xlu1 %12741, %v367_v27   ;;  %v12106_v39 = vld [vmem:[#allocation6 + $0x114] sm:$0xf]  ;;  %v330_v1 = vld [vmem:[%s16688_s2 + $0x288] sm:$0xff] }
 0x140   :  { %704 = vperm.xlu0 %12740, %v314_v41   ;;  %974 = vperm.xlu2 %12742, %v368_v38   ;;  %v9570_v41 = vor.u32 %v12107_v3, %v9569_v11  ;;  %v9574_v22 = vor.u32 %v12106_v39, %v9571_v47  ;;  %v9862_v38 = vor.u32 %v12178_v36, %v9859_v33  ;;  %v2412_v36 = vmax.f32 %v13309_v59, 0.0  ;;  %v12108_v59 = vld [vmem:[#allocation6 + $0x124] sm:$0xf] }
 0x141   :  { %v2134_v9 = vadd.f32 %v2133_v10, %v1805_v4  ;;  %v13553_v53 = vpop.permute.xlu1 %839  ;;  %v2287_v4 = vadd.f32 %v13311_v42, %v1958_v15  ;;  %v2092_v10 = vadd.f32 %v13172_v26, %v1763_v40  ;;  %v350_v26 = vld [vmem:[%s16688_s2 + $0x328] sm:$0xff] }
 0x142   :  { %v13551_v62 = vpop.permute.xlu0 %764  ;;  %v13555_v28 = vpop.permute.xlu2 %1009 }
 0x143   :  { %v2428_v46 = vmax.f32 %v2134_v9, 0.0  ;;  %16752 = vst [vmem:[#allocation74_spill] sm:$0xff] %v13555_v28  ;;  %6446 = vmatpush.bf16.msrb.mxu2 %v2543_v60  ;;  %v2489_v54 = vmax.f32 %v2287_v4, 0.0  ;;  %v2411_v51 = vmax.f32 %v2092_v10, 0.0  ;;  %v348_v4 = vld [vmem:[%s16688_s2 + $0x318] sm:$0xff] }
 0x144   :  { %v1984_v16 = vpop.f32.mrf.mxu2 }
 0x145   :  { %v13569_v27 = vpack.c.bf16 %v2428_v46, %v2427_v61  ;;  %v2313_v37 = vpop.f32.mrf.mxu3 }
 0x146   :  { %v1807_v34 = vpop.f32.mrf.mxu0 }
 0x147   :  { %16753 = vst [vmem:[#allocation75_spill] sm:$0xff] %v13569_v27  ;;  %v1808_v30 = vadd.f32 %v1807_v34, %v13344_v50  ;;  %v2136_v52 = vpop.f32.mrf.mxu1  ;;  %6447 = vmatpush.bf16.msrb.mxu2 %v13331_v24  ;;  %784 = vperm.xlu1 %12741, %v330_v1   ;;  %v2490_v24 = vmax.f32 %v2289_v14, 0.0  ;;  %v12109_v34 = vld [vmem:[#allocation6 + $0x124] sm:$0xf0] }
 0x148   :  { %779 = vperm.xlu0 %12740, %v329_v17   ;;  %879 = vperm.xlu2 %12742, %v349_v56   ;;  %v9577_v17 = vld [vmem:[#allocation6 + $0x120] sm:$0xf]  ;;  %v347_v14 = vld [vmem:[%s16688_s2 + $0x310] sm:$0xff] }
 0x149   :  { %v2137_v9 = vadd.f32 %v2136_v52, %v1808_v30  ;;  %1846 = vmatmul.bf16.gmra.mxu0 %v9570_v41  ;;  %2026 = vmatmul.bf16.gmra.mxu2 %v9858_v58  ;;  %v13581_v50 = vpop.permute.xlu1 %754  ;;  %v2578_v33 = vpack.c.bf16 %v2490_v24, %v2489_v54  ;;  %v12180_v30 = vld [vmem:[#allocation6 + $0x364] sm:$0xf]  ;;  %v9867_v52 = vld [vmem:[#allocation6 + $0x368] sm:$0xf0]  ;;  %v9578_v10 = vor.u32 %v12109_v34, %v9577_v17 }
 0x14a   :  { %2175 = vmatmul.bf16.gmra.mxu1 %v9574_v22  ;;  %v13579_v60 = vpop.permute.xlu0 %749  ;;  %v825_v11 = vpop.permute.xlu2 %824  ;;  %2355 = vmatmul.bf16.gmra.mxu3 %v9862_v38  ;;  %v9579_v22 = vld [vmem:[#allocation6 + $0x128] sm:$0xf0] }
 0x14b   :  { %6448 = vmatpush.bf16.msrb.mxu2 %v13287_v35  ;;  %v1985_v42 = vadd.f32 %v1984_v16, %v825_v11  ;;  %v366_v35 = vld [vmem:[%s16688_s2 + $0x3a8] sm:$0xff]  ;;  %v2429_v56 = vmax.f32 %v2137_v9, 0.0 }
 0x14c   :  { %v1987_v3 = vpop.f32.mrf.mxu2 }
 0x14d   :  { %v13590_v61 = vadd.f32 %v2313_v37, %v1985_v42  ;;  %v1988_v46 = vadd.f32 %v1987_v3, %v13509_v29  ;;  %v2316_v47 = vpop.f32.mrf.mxu3  ;;  %v2539_v29 = vpack.c.bf16 %v2412_v36, %v2411_v51  ;;  %v9865_v37 = vld [vmem:[#allocation6 + $0x360] sm:$0xf]  ;;  %v363_v42 = vld [vmem:[%s16688_s2 + $0x390] sm:$0xff] }
 0x14e   :  { %v1809_v39 = vpop.f32.mrf.mxu0 }
 0x14f   :  { %v1810_v32 = vadd.f32 %v1809_v39, %v13342_v63  ;;  %v2138_v15 = vpop.f32.mrf.mxu1  ;;  %6449 = vmatpush.bf16.msrb.mxu2 %v13348_v20  ;;  %v13599_v40 = vadd.f32 %v2316_v47, %v1988_v46  ;;  %959 = vperm.xlu1 %12741, %v365_v5   ;;  %v12181_v63 = vld [vmem:[#allocation6 + $0x364] sm:$0xf0]  ;;  %v9870_v46 = vor.u32 %v12180_v30, %v9867_v52  ;;  %v9873_v30 = vld [vmem:[#allocation6 + $0x370] sm:$0xf]  ;;  %v12183_v52 = vld [vmem:[#allocation6 + $0x374] sm:$0xf0] }
 0x150   :  { %884 = vperm.xlu0 %12740, %v350_v26   ;;  %964 = vperm.xlu2 %12742, %v366_v35   ;;  %v9866_v3 = vor.u32 %v12181_v63, %v9865_v37  ;;  %v9582_v26 = vor.u32 %v12108_v59, %v9579_v22 }
 0x151   :  { %v2139_v16 = vadd.f32 %v2138_v15, %v1810_v32  ;;  %v13601_v41 = vpop.permute.xlu1 %929 }
 0x152   :  { %v835_v1 = vpop.permute.xlu0 %834  ;;  %16754 = vst [vmem:[#allocation76_spill] sm:$0xff] %v13601_v41  ;;  %v13603_v20 = vpop.permute.xlu2 %729 }
 0x153   :  { %v2430_v58 = vmax.f32 %v2139_v16, 0.0  ;;  %16755 = vst [vmem:[#allocation77_spill] sm:$0xff] %v13603_v20  ;;  %6450 = vmatpush.bf16.msrb.mxu2 %v2539_v29  ;;  %v12188_v20 = vld [vmem:[#allocation6 + $0x3a4] sm:$0xf] }
 0x154   :  { %v1989_v38 = vpop.f32.mrf.mxu2 }
 0x155   :  { %v13611_v9 = vpack.c.bf16 %v2430_v58, %v2429_v56  ;;  %v1990_v11 = vadd.f32 %v1989_v38, %v835_v1  ;;  %v2318_v54 = vpop.f32.mrf.mxu3  ;;  %v346_v1 = vld [vmem:[%s16688_s2 + $0x308] sm:$0xff]  ;;  %v9585_v58 = vld [vmem:[#allocation6 + $0x130] sm:$0xf] }
 0x156   :  { %v1812_v24 = vpop.f32.mrf.mxu0 }
 0x157   :  { %7759 = vmatpush.bf16.msra.mxu2 %v2578_v33  ;;  %v1813_v5 = vadd.f32 %v1812_v24, %v13273_v6  ;;  %v2141_v51 = vpop.f32.mrf.mxu1  ;;  %v13617_v39 = vadd.f32 %v2318_v54, %v1990_v11  ;;  %874 = vperm.xlu1 %12741, %v348_v4   ;;  %v364_v6 = vld [vmem:[%s16688_s2 + $0x398] sm:$0xff]  ;;  %v345_v33 = vld [vmem:[%s16688_s2 + $0x300] sm:$0xff]  ;;  %v1955_v24 = vadd.f32 %v13279_v49, %v13551_v62 }
 0x158   :  { %869 = vperm.xlu0 %12740, %v347_v14   ;;  %949 = vperm.xlu2 %12742, %v363_v42   ;;  %v9587_v11 = vld [vmem:[#allocation6 + $0x138] sm:$0xf0]  ;;  %v12182_v54 = vld [vmem:[#allocation6 + $0x374] sm:$0xf]  ;;  %v9874_v62 = vor.u32 %v12183_v52, %v9873_v30 }
 0x159   :  { %v2142_v47 = vadd.f32 %v2141_v51, %v1813_v5  ;;  %1851 = vmatmul.bf16.gmra.mxu0 %v9578_v10  ;;  %2031 = vmatmul.bf16.gmra.mxu2 %v9866_v3  ;;  %v13621_v32 = vpop.permute.xlu1 %744  ;;  %v12110_v10 = vld [vmem:[#allocation6 + $0x134] sm:$0xf]  ;;  %v9875_v42 = vld [vmem:[#allocation6 + $0x378] sm:$0xf0] }
 0x15a   :  { %2180 = vmatmul.bf16.gmra.mxu1 %v9582_v26  ;;  %v13619_v35 = vpop.permute.xlu0 %739  ;;  %v13623_v15 = vpop.permute.xlu2 %1004  ;;  %2360 = vmatmul.bf16.gmra.mxu3 %v9870_v46  ;;  %v361_v5 = vld [vmem:[%s16688_s2 + $0x380] sm:$0xff] }
 0x15b   :  { %16756 = vst [vmem:[#allocation78_spill] sm:$0xff] %v13623_v15  ;;  %v2431_v38 = vmax.f32 %v2142_v47, 0.0 }
 0x15c   :  { %v1992_v36 = vpop.f32.mrf.mxu2 }
 0x15d   :  { %v1993_v16 = vadd.f32 %v1992_v36, %v13553_v53  ;;  %v2321_v17 = vpop.f32.mrf.mxu3  ;;  %v12111_v53 = vld [vmem:[#allocation6 + $0x134] sm:$0xf0]  ;;  %v9590_v36 = vor.u32 %v12110_v10, %v9587_v11  ;;  %v16765_v11 = vld [vmem:[#allocation31_spill] sm:$0xff] }
 0x15e   :  { %v1814_v29 = vpop.f32.mrf.mxu0  ;;  %v9586_v51 = vor.u32 %v12111_v53, %v9585_v58 }
 0x15f   :  { %v1815_v34 = vadd.f32 %v1814_v29, %v13220_v18  ;;  %v2143_v37 = vpop.f32.mrf.mxu1  ;;  %v13636_v63 = vadd.f32 %v2321_v17, %v1993_v16  ;;  %859 = vperm.xlu1 %12741, %v345_v33   ;;  %v9878_v29 = vor.u32 %v12182_v54, %v9875_v42  ;;  %v2284_v17 = vadd.f32 %v13289_v8, %v1955_v24  ;;  %v16766_v54 = vld [vmem:[#allocation35_spill] sm:$0xff] }
 0x160   :  { %954 = vperm.xlu0 %12740, %v364_v6   ;;  %864 = vperm.xlu2 %12742, %v346_v1   ;;  %v1948_v6 = vadd.f32 %v13222_v19, %v13579_v60  ;;  %v1950_v1 = vadd.f32 %v13243_v0, %v13581_v50  ;;  %v16762_v50 = vld [vmem:[#allocation30_spill] sm:$0xff] }
 0x161   :  { %16757 = vst [vmem:[#allocation79_spill] sm:$0xff] %v13636_v63  ;;  %v2144_v56 = vadd.f32 %v2143_v37, %v1815_v34  ;;  %v820_v22 = vpop.permute.xlu1 %819  ;;  %v2488_v8 = vmax.f32 %v2284_v17, 0.0  ;;  %v1943_v58 = vadd.f32 %v16762_v50, %v13619_v35  ;;  %v12112_v17 = vld [vmem:[#allocation6 + $0x144] sm:$0xf] }
 0x162   :  { %v13638_v59 = vpop.permute.xlu0 %1014  ;;  %v13640_v4 = vpop.permute.xlu2 %909  ;;  %v1983_v18 = vadd.f32 %v13536_v57, %v820_v22  ;;  %v362_v57 = vld [vmem:[%s16688_s2 + $0x388] sm:$0xff]  ;;  %v2277_v19 = vadd.f32 %v13232_v25, %v1948_v6  ;;  %v2279_v0 = vadd.f32 %v13253_v23, %v1950_v1  ;;  %v3117_v25 = vld [vmem:[%s16690_s4 + $0x10] sm:$0xff]  ;;  %v3118_v23 = vld [vmem:[%s16690_s4 + $0x18] sm:$0xff] }
 0x163   :  { %16758 = vst [vmem:[#allocation80_spill] sm:$0xff] %v13638_v59  ;;  %v2432_v14 = vmax.f32 %v2144_v56, 0.0  ;;  %v16763_v22 = vld [vmem:[#allocation34_spill] sm:$0xff]  ;;  %v2272_v24 = vadd.f32 %v16765_v11, %v1943_v58  ;;  %v12185_v6 = vld [vmem:[#allocation6 + $0x384] sm:$0xf0] }
 0x164   :  { %v13646_v3 = vadd.f32 %v13544_v44, %v1983_v18  ;;  %v13648_v26 = vpop.f32.mrf.mxu2  ;;  %v3115_v44 = vld [vmem:[%s16690_s4] sm:$0xff]  ;;  %v1945_v53 = vadd.f32 %v16763_v22, %v13621_v32  ;;  %v2485_v35 = vmax.f32 %v2277_v19, 0.0  ;;  %v2486_v10 = vmax.f32 %v2279_v0, 0.0  ;;  %v9595_v1 = vld [vmem:[#allocation6 + $0x148] sm:$0xf0] }
 0x165   :  { %v13656_v46 = vpack.c.bf16 %v2432_v14, %v2431_v38  ;;  %v13658_v49 = vpop.f32.mrf.mxu3  ;;  %v16764_v14 = vld [vmem:[#allocation38_spill] sm:$0xff]  ;;  %v2483_v19 = vmax.f32 %v2272_v24, 0.0 }
 0x166   :  { %v1817_v47 = vpop.f32.mrf.mxu0  ;;  %v2274_v42 = vadd.f32 %v16766_v54, %v1945_v53  ;;  %v2576_v50 = vpack.c.bf16 %v2486_v10, %v2485_v35  ;;  %v3119_v22 = vld [vmem:[%s16690_s4 + $0x20] sm:$0xff] }
 0x167   :  { %v1818_v33 = vadd.f32 %v1817_v47, %v13159_v7  ;;  %v2146_v16 = vpop.f32.mrf.mxu1  ;;  %944 = vperm.xlu1 %12741, %v362_v57   ;;  %v2487_v7 = vmax.f32 %v13469_v2, 0.0  ;;  %v3116_v2 = vld [vmem:[%s16690_s4 + $0x8] sm:$0xff] }
 0x168   :  { %939 = vperm.xlu0 %12740, %v361_v5   ;;  %3245 = vperm.xlu2 %12742, %v3115_v44   ;;  %v2484_v0 = vmax.f32 %v2274_v42, 0.0 }
 0x169   :  { %v2147_v34 = vadd.f32 %v2146_v16, %v1818_v33  ;;  %1856 = vmatmul.bf16.gmra.mxu0 %v9586_v51  ;;  %2036 = vmatmul.bf16.gmra.mxu2 %v9874_v62  ;;  %v13671_v56 = vpop.permute.xlu1 %924  ;;  %v2577_v5 = vpack.c.bf16 %v2488_v8, %v2487_v7  ;;  %v9593_v51 = vld [vmem:[#allocation6 + $0x140] sm:$0xf]  ;;  %v12113_v62 = vld [vmem:[#allocation6 + $0x144] sm:$0xf0]  ;;  %v12184_v7 = vld [vmem:[#allocation6 + $0x384] sm:$0xf] }
 0x16a   :  { %2185 = vmatmul.bf16.gmra.mxu1 %v9590_v36  ;;  %v13669_v37 = vpop.permute.xlu0 %919  ;;  %16760 = vst [vmem:[#allocation82_spill] sm:$0xff] %v13671_v56  ;;  %v13675_v60 = vpop.permute.xlu2 %724  ;;  %2365 = vmatmul.bf16.gmra.mxu3 %v9878_v29  ;;  %v9881_v36 = vld [vmem:[#allocation6 + $0x380] sm:$0xf]  ;;  %v9883_v8 = vld [vmem:[#allocation6 + $0x388] sm:$0xf0]  ;;  %v9594_v53 = vor.u32 %v12113_v62, %v9593_v51  ;;  %v2575_v24 = vpack.c.bf16 %v2484_v0, %v2483_v19 }
 0x16b   :  { %16759 = vst [vmem:[#allocation81_spill] sm:$0xff] %v13669_v37  ;;  %7760 = vmatpush.bf16.msra.mxu2 %v2577_v5  ;;  %v2433_v33 = vmax.f32 %v2147_v34, 0.0  ;;  %v3120_v34 = vld [vmem:[%s16690_s4 + $0x28] sm:$0xff]  ;;  %v9882_v35 = vor.u32 %v12185_v6, %v9881_v36  ;;  %v9886_v11 = vor.u32 %v12184_v7, %v9883_v8  ;;  %v3122_v6 = vld [vmem:[%s16690_s4 + $0x38] sm:$0xff]  ;;  %v12115_v7 = vld [vmem:[#allocation6 + $0x154] sm:$0xf0] }
 0x16c   :  { %16761 = vst [vmem:[#allocation83_spill] sm:$0xff] %v13675_v60  ;;  %v13682_v30 = vpop.f32.mrf.mxu2  ;;  %v9601_v0 = vld [vmem:[#allocation6 + $0x150] sm:$0xf]  ;;  %v9611_v60 = vld [vmem:[#allocation6 + $0x168] sm:$0xf0] }
 0x16d   :  { %v13690_v38 = vpop.f32.mrf.mxu3  ;;  %v9889_v8 = vld [vmem:[#allocation6 + $0x390] sm:$0xf] }
 0x16e   :  { %v1819_v52 = vpop.f32.mrf.mxu0 }
 0x16f   :  { %v1820_v32 = vadd.f32 %v1819_v52, %v16764_v14  ;;  %v2148_v18 = vpop.f32.mrf.mxu1  ;;  %3255 = vperm.xlu1 %12741, %v3117_v25   ;;  %v9598_v14 = vor.u32 %v12112_v17, %v9595_v1  ;;  %7761 = vmatpush.bf16.msra.mxu2 %v2576_v50 }
 0x170   :  { %3250 = vperm.xlu0 %12740, %v3116_v2   ;;  %3260 = vperm.xlu2 %12742, %v3118_v23   ;;  %v3121_v23 = vld [vmem:[%s16690_s4 + $0x30] sm:$0xff] }
 0x171   :  { %v2149_v57 = vadd.f32 %v2148_v18, %v1820_v32  ;;  %v13700_v44 = vpop.permute.xlu1 %999  ;;  %v16770_v32 = vld [vmem:[#allocation28_spill] sm:$0xff] }
 0x172   :  { %v13698_v47 = vpop.permute.xlu0 %734  ;;  %16768 = vst [vmem:[#allocation34_spill] sm:$0xff] %v13700_v44  ;;  %v13702_v29 = vpop.permute.xlu2 %799  ;;  %v9899_v44 = vld [vmem:[#allocation6 + $0x3a8] sm:$0xf0] }
 0x173   :  { %16767 = vst [vmem:[#allocation30_spill] sm:$0xff] %v13698_v47  ;;  %v2434_v16 = vmax.f32 %v2149_v57, 0.0  ;;  %7762 = vmatpush.bf16.msra.mxu2 %v2575_v24  ;;  %v3127_v24 = vld [vmem:[%s16690_s4 + $0x60] sm:$0xff] }
 0x174   :  { %16769 = vst [vmem:[#allocation38_spill] sm:$0xff] %v13702_v29  ;;  %v13704_v58 = vpop.f32.mrf.mxu2 }
 0x175   :  { %v13712_v2 = vpack.c.bf16 %v2434_v16, %v2433_v33  ;;  %v13714_v52 = vpop.f32.mrf.mxu3  ;;  %v3123_v33 = vld [vmem:[%s16690_s4 + $0x40] sm:$0xff] }
 0x176   :  { %v1822_v25 = vpop.f32.mrf.mxu0 }
 0x177   :  { %v1823_v18 = vadd.f32 %v1822_v25, %v16770_v32  ;;  %v2151_v10 = vpop.f32.mrf.mxu1  ;;  %3270 = vperm.xlu1 %12741, %v3120_v34   ;;  %v12114_v34 = vld [vmem:[#allocation6 + $0x154] sm:$0xf] }
 0x178   :  { %3265 = vperm.xlu0 %12740, %v3119_v22   ;;  %3275 = vperm.xlu2 %12742, %v3121_v23   ;;  %v12187_v22 = vld [vmem:[#allocation6 + $0x394] sm:$0xf0]  ;;  %v12186_v25 = vld [vmem:[#allocation6 + $0x394] sm:$0xf]  ;;  %v9891_v23 = vld [vmem:[#allocation6 + $0x398] sm:$0xf0] }
 0x179   :  { %v13720_v54 = vadd.f32 %v2151_v10, %v1823_v18  ;;  %1861 = vmatmul.bf16.gmra.mxu0 %v9594_v53  ;;  %2041 = vmatmul.bf16.gmra.mxu2 %v9882_v35  ;;  %v815_v5 = vpop.permute.xlu1 %814  ;;  %v9603_v53 = vld [vmem:[#allocation6 + $0x158] sm:$0xf0]  ;;  %v3126_v32 = vld [vmem:[%s16690_s4 + $0x58] sm:$0xff]  ;;  %v9602_v18 = vor.u32 %v12115_v7, %v9601_v0 }
 0x17a   :  { %2190 = vmatmul.bf16.gmra.mxu1 %v9598_v14  ;;  %v13722_v42 = vpop.permute.xlu0 %809  ;;  %v13724_v57 = vpop.permute.xlu2 %904  ;;  %v1980_v51 = vadd.f32 %v13514_v45, %v815_v5  ;;  %2370 = vmatmul.bf16.gmra.mxu3 %v9886_v11  ;;  %v3124_v45 = vld [vmem:[%s16690_s4 + $0x48] sm:$0xff]  ;;  %v3125_v14 = vld [vmem:[%s16690_s4 + $0x50] sm:$0xff]  ;;  %v9890_v5 = vor.u32 %v12187_v22, %v9889_v8 }
 0x17b   :  { %16771 = vst [vmem:[#allocation31_spill] sm:$0xff] %v13722_v42  ;;  %v3128_v8 = vld [vmem:[%s16690_s4 + $0x68] sm:$0xff]  ;;  %v3129_v22 = vld [vmem:[%s16690_s4 + $0x70] sm:$0xff] }
 0x17c   :  { %v13728_v62 = vadd.f32 %v13522_v31, %v1980_v51  ;;  %v13730_v36 = vpop.f32.mrf.mxu2  ;;  %v9606_v51 = vor.u32 %v12114_v34, %v9603_v53 }
 0x17d   :  { %16773 = vst [vmem:[#allocation28_spill] sm:$0xff] %v13730_v36  ;;  %v13740_v17 = vpop.f32.mrf.mxu3 }
 0x17e   :  { %16772 = vst [vmem:[#allocation35_spill] sm:$0xff] %v13728_v62  ;;  %v13738_v16 = vpop.f32.mrf.mxu0 }
 0x17f   :  { %16774 = vst [vmem:[#allocation84_spill] sm:$0xff] %v13740_v17  ;;  %v13745_v31 = vpop.f32.mrf.mxu1  ;;  %3285 = vperm.xlu1 %12741, %v3123_v33   ;;  %v9894_v33 = vor.u32 %v12186_v25, %v9891_v23  ;;  %v3130_v25 = vld [vmem:[%s16690_s4 + $0x78] sm:$0xff] }
 0x180   :  { %3280 = vperm.xlu0 %12740, %v3122_v6   ;;  %3290 = vperm.xlu2 %12742, %v3124_v45  }
 0x181   :  { %v13749_v19 = vpop.permute.xlu1 %719 }
 0x182   :  { %v13747_v1 = vpop.permute.xlu0 %914  ;;  %16776 = vst [vmem:[#allocation86_spill] sm:$0xff] %v13749_v19  ;;  %v13751_v50 = vpop.permute.xlu2 %979  ;;  %v12116_v19 = vld [vmem:[#allocation6 + $0x164] sm:$0xf] }
 0x183   :  { %16775 = vst [vmem:[#allocation85_spill] sm:$0xff] %v13747_v1  ;;  %v9614_v36 = vor.u32 %v12116_v19, %v9611_v60  ;;  %v3134_v60 = vld [vmem:[%s16690_s4 + $0x98] sm:$0xff] }
 0x184   :  { %16777 = vst [vmem:[#allocation87_spill] sm:$0xff] %v13751_v50  ;;  %v13753_v35 = vpop.f32.mrf.mxu2  ;;  %v12190_v50 = vld [vmem:[#allocation6 + $0x3b4] sm:$0xf] }
 0x185   :  { %v13763_v11 = vpop.f32.mrf.mxu3 }
 0x186   :  { %v13761_v10 = vpop.f32.mrf.mxu0 }
 0x187   :  { %v13768_v6 = vpop.f32.mrf.mxu1  ;;  %3300 = vperm.xlu1 %12741, %v3126_v32  }
 0x188   :  { %3295 = vperm.xlu0 %12740, %v3125_v14   ;;  %3305 = vperm.xlu2 %12742, %v3127_v24   ;;  %v12117_v24 = vld [vmem:[#allocation6 + $0x164] sm:$0xf0] }
 0x189   :  { %1866 = vmatmul.bf16.gmra.mxu0 %v9602_v18  ;;  %2046 = vmatmul.bf16.gmra.mxu2 %v9890_v5  ;;  %v13772_v0 = vpop.permute.xlu1 %994  ;;  %v9609_v18 = vld [vmem:[#allocation6 + $0x160] sm:$0xf] }
 0x18a   :  { %2195 = vmatmul.bf16.gmra.mxu1 %v9606_v51  ;;  %v13770_v45 = vpop.permute.xlu0 %989  ;;  %16779 = vst [vmem:[#allocation89_spill] sm:$0xff] %v13772_v0  ;;  %v13774_v7 = vpop.permute.xlu2 %794  ;;  %2375 = vmatmul.bf16.gmra.mxu3 %v9894_v33  ;;  %v9897_v5 = vld [vmem:[#allocation6 + $0x3a0] sm:$0xf]  ;;  %v12189_v33 = vld [vmem:[#allocation6 + $0x3a4] sm:$0xf0] }
 0x18b   :  { %16778 = vst [vmem:[#allocation88_spill] sm:$0xff] %v13770_v45  ;;  %v9898_v17 = vor.u32 %v12189_v33, %v9897_v5  ;;  %v9902_v45 = vor.u32 %v12188_v20, %v9899_v44  ;;  %v3135_v20 = vld [vmem:[%s16690_s4 + $0xa0] sm:$0xff] }
 0x18c   :  { %16780 = vst [vmem:[#allocation90_spill] sm:$0xff] %v13774_v7  ;;  %v13776_v47 = vpop.f32.mrf.mxu2  ;;  %v12119_v33 = vld [vmem:[#allocation6 + $0x174] sm:$0xf0] }
 0x18d   :  { %v13786_v53 = vpop.f32.mrf.mxu3 }
 0x18e   :  { %v13784_v34 = vpop.f32.mrf.mxu0 }
 0x18f   :  { %v13791_v23 = vpop.f32.mrf.mxu1  ;;  %3315 = vperm.xlu1 %12741, %v3129_v22   ;;  %v3132_v22 = vld [vmem:[%s16690_s4 + $0x88] sm:$0xff] }
 0x190   :  { %3310 = vperm.xlu0 %12740, %v3128_v8   ;;  %3320 = vperm.xlu2 %12742, %v3130_v25   ;;  %v3131_v8 = vld [vmem:[%s16690_s4 + $0x80] sm:$0xff]  ;;  %v9610_v25 = vor.u32 %v12117_v24, %v9609_v18 }
 0x191   :  { %v13795_v32 = vpop.permute.xlu1 %899 }
 0x192   :  { %v13793_v14 = vpop.permute.xlu0 %804  ;;  %v13797_v51 = vpop.permute.xlu2 %699 }
 0x193   :  { %16781 = vst [vmem:[#allocation91_spill] sm:$0xff] %v13793_v14 }
 0x194   :  { %16782 = vst [vmem:[#allocation92_spill] sm:$0xff] %v13797_v51  ;;  %v13799_v15 = vpop.f32.mrf.mxu2  ;;  %v3133_v51 = vld [vmem:[%s16690_s4 + $0x90] sm:$0xff] }
 0x195   :  { %v13809_v59 = vpop.f32.mrf.mxu3 }
 0x196   :  { %v13807_v28 = vpop.f32.mrf.mxu0 }
 0x197   :  { %v13814_v0 = vpop.f32.mrf.mxu1  ;;  %3330 = vperm.xlu1 %12741, %v3132_v22  }
 0x198   :  { %3325 = vperm.xlu0 %12740, %v3131_v8   ;;  %3335 = vperm.xlu2 %12742, %v3133_v51   ;;  %v9617_v51 = vld [vmem:[#allocation6 + $0x170] sm:$0xf] }
 0x199   :  { %1871 = vmatmul.bf16.gmra.mxu0 %v9610_v25  ;;  %2051 = vmatmul.bf16.gmra.mxu2 %v9898_v17  ;;  %v13818_v24 = vpop.permute.xlu1 %714  ;;  %v9905_v8 = vld [vmem:[#allocation6 + $0x3b0] sm:$0xf]  ;;  %v12191_v25 = vld [vmem:[#allocation6 + $0x3b4] sm:$0xf0] }
 0x19a   :  { %2200 = vmatmul.bf16.gmra.mxu1 %v9614_v36  ;;  %v13816_v18 = vpop.permute.xlu0 %709  ;;  %16784 = vst [vmem:[#allocation94_spill] sm:$0xff] %v13818_v24  ;;  %v13820_v56 = vpop.permute.xlu2 %974  ;;  %2380 = vmatmul.bf16.gmra.mxu3 %v9902_v45  ;;  %v3136_v36 = vld [vmem:[%s16690_s4 + $0xa8] sm:$0xff]  ;;  %v9619_v24 = vld [vmem:[#allocation6 + $0x178] sm:$0xf0] }
 0x19b   :  { %16783 = vst [vmem:[#allocation93_spill] sm:$0xff] %v13816_v18  ;;  %v12118_v18 = vld [vmem:[#allocation6 + $0x174] sm:$0xf] }
 0x19c   :  { %16785 = vst [vmem:[#allocation95_spill] sm:$0xff] %v13820_v56  ;;  %v2012_v21 = vpop.f32.mrf.mxu2  ;;  %v9907_v56 = vld [vmem:[#allocation6 + $0x3b8] sm:$0xf0]  ;;  %v9622_v37 = vor.u32 %v12118_v18, %v9619_v24  ;;  %v3140_v18 = vld [vmem:[%s16690_s4 + $0xc8] sm:$0xff] }
 0x19d   :  { %v2341_v19 = vpop.f32.mrf.mxu3  ;;  %v9910_v42 = vor.u32 %v12190_v50, %v9907_v56  ;;  %v3141_v56 = vld [vmem:[%s16690_s4 + $0xd0] sm:$0xff] }
 0x19e   :  { %v1834_v44 = vpop.f32.mrf.mxu0  ;;  %v16791_v50 = vld [vmem:[#allocation19_spill] sm:$0xff] }
 0x19f   :  { %v2163_v17 = vpop.f32.mrf.mxu1  ;;  %3345 = vperm.xlu1 %12741, %v3135_v20   ;;  %v3138_v20 = vld [vmem:[%s16690_s4 + $0xb8] sm:$0xff]  ;;  %v1835_v24 = vadd.f32 %v1834_v44, %v16791_v50 }
 0x1a0   :  { %3340 = vperm.xlu0 %12740, %v3134_v60   ;;  %3350 = vperm.xlu2 %12742, %v3136_v36   ;;  %v3137_v60 = vld [vmem:[%s16690_s4 + $0xb0] sm:$0xff]  ;;  %v9618_v36 = vor.u32 %v12119_v33, %v9617_v51 }
 0x1a1   :  { %v13833_v5 = vpop.permute.xlu1 %789  ;;  %v2164_v50 = vadd.f32 %v2163_v17, %v1835_v24  ;;  %v9915_v17 = vld [vmem:[#allocation6 + $0x3c8] sm:$0xf0]  ;;  %v16800_v24 = vld [vmem:[#allocation27_spill] sm:$0xff] }
 0x1a2   :  { %v13831_v45 = vpop.permute.xlu0 %984  ;;  %16787 = vst [vmem:[#allocation97_spill] sm:$0xff] %v13833_v5  ;;  %v880_v22 = vpop.permute.xlu2 %879 }
 0x1a3   :  { %16786 = vst [vmem:[#allocation96_spill] sm:$0xff] %v13831_v45  ;;  %v2013_v41 = vadd.f32 %v2012_v21, %v880_v22  ;;  %v3139_v21 = vld [vmem:[%s16690_s4 + $0xc0] sm:$0xff]  ;;  %v9906_v22 = vor.u32 %v12191_v25, %v9905_v8 }
 0x1a4   :  { %v13835_v7 = vpop.f32.mrf.mxu2 }
 0x1a5   :  { %v13843_v45 = vadd.f32 %v2341_v19, %v2013_v41  ;;  %v13845_v62 = vpop.f32.mrf.mxu3  ;;  %v16789_v19 = vld [vmem:[#allocation16_spill] sm:$0xff] }
 0x1a6   :  { %v1837_v5 = vpop.f32.mrf.mxu0 }
 0x1a7   :  { %16788 = vst [vmem:[#allocation98_spill] sm:$0xff] %v13843_v45  ;;  %v2166_v14 = vpop.f32.mrf.mxu1  ;;  %3360 = vperm.xlu1 %12741, %v3138_v20   ;;  %v1838_v33 = vadd.f32 %v1837_v5, %v16789_v19  ;;  %v3142_v5 = vld [vmem:[%s16690_s4 + $0xd8] sm:$0xff] }
 0x1a8   :  { %3355 = vperm.xlu0 %12740, %v3137_v60   ;;  %3365 = vperm.xlu2 %12742, %v3139_v21   ;;  %v16793_v21 = vld [vmem:[#allocation20_spill] sm:$0xff] }
 0x1a9   :  { %1876 = vmatmul.bf16.gmra.mxu0 %v9618_v36  ;;  %2056 = vmatmul.bf16.gmra.mxu2 %v9906_v22  ;;  %v895_v41 = vpop.permute.xlu1 %894  ;;  %v2167_v60 = vadd.f32 %v2166_v14, %v1838_v33  ;;  %v1833_v22 = vadd.f32 %v13807_v28, %v16793_v21  ;;  %v12121_v33 = vld [vmem:[#allocation6 + $0x184] sm:$0xf0] }
 0x1aa   :  { %2205 = vmatmul.bf16.gmra.mxu1 %v9622_v37  ;;  %v890_v51 = vpop.permute.xlu0 %889  ;;  %v13851_v45 = vpop.permute.xlu2 %964  ;;  %2385 = vmatmul.bf16.gmra.mxu3 %v9910_v42  ;;  %v16792_v42 = vld [vmem:[#allocation18_spill] sm:$0xff] }
 0x1ab   :  { %16790 = vst [vmem:[#allocation16_spill] sm:$0xff] %v13851_v45  ;;  %v16795_v45 = vld [vmem:[#allocation17_spill] sm:$0xff]  ;;  %v2441_v27 = vmax.f32 %v2167_v60, 0.0 }
 0x1ac   :  { %v2017_v29 = vpop.f32.mrf.mxu2  ;;  %v3143_v60 = vld [vmem:[%s16690_s4 + $0xe0] sm:$0xff] }
 0x1ad   :  { %v2018_v8 = vadd.f32 %v2017_v29, %v890_v51  ;;  %v2346_v25 = vpop.f32.mrf.mxu3  ;;  %v1830_v29 = vadd.f32 %v13784_v34, %v16795_v45  ;;  %v9625_v51 = vld [vmem:[#allocation6 + $0x180] sm:$0xf]  ;;  %v2162_v45 = vadd.f32 %v13814_v0, %v1833_v22 }
 0x1ae   :  { %v1839_v37 = vpop.f32.mrf.mxu0 }
 0x1af   :  { %v1840_v20 = vadd.f32 %v1839_v37, %v16792_v42  ;;  %v2168_v36 = vpop.f32.mrf.mxu1  ;;  %v13866_v19 = vadd.f32 %v2346_v25, %v2018_v8  ;;  %3375 = vperm.xlu1 %12741, %v3141_v56   ;;  %v9913_v37 = vld [vmem:[#allocation6 + $0x3c0] sm:$0xf]  ;;  %v12193_v42 = vld [vmem:[#allocation6 + $0x3c4] sm:$0xf0]  ;;  %v9627_v56 = vld [vmem:[#allocation6 + $0x188] sm:$0xf0] }
 0x1b0   :  { %3370 = vperm.xlu0 %12740, %v3140_v18   ;;  %3380 = vperm.xlu2 %12742, %v3142_v5   ;;  %v12120_v18 = vld [vmem:[#allocation6 + $0x184] sm:$0xf]  ;;  %v16799_v25 = vld [vmem:[#allocation22_spill] sm:$0xff] }
 0x1b1   :  { %16794 = vst [vmem:[#allocation19_spill] sm:$0xff] %v13866_v19  ;;  %v2169_v44 = vadd.f32 %v2168_v36, %v1840_v20  ;;  %v13872_v14 = vpop.permute.xlu1 %969  ;;  %v1828_v34 = vadd.f32 %v13761_v10, %v16799_v25  ;;  %v12192_v5 = vld [vmem:[#allocation6 + $0x3c4] sm:$0xf]  ;;  %v1825_v20 = vadd.f32 %v13738_v16, %v16800_v24  ;;  %v2159_v36 = vadd.f32 %v13791_v23, %v1830_v29  ;;  %v3145_v16 = vld [vmem:[%s16690_s4 + $0xf0] sm:$0xff] }
 0x1b2   :  { %v13870_v1 = vpop.permute.xlu0 %704  ;;  %16797 = vst [vmem:[#allocation20_spill] sm:$0xff] %v13872_v14  ;;  %v13874_v8 = vpop.permute.xlu2 %949  ;;  %v9626_v10 = vor.u32 %v12121_v33, %v9625_v51  ;;  %v2440_v25 = vmax.f32 %v2164_v50, 0.0  ;;  %v9914_v23 = vor.u32 %v12193_v42, %v9913_v37  ;;  %v9630_v29 = vor.u32 %v12120_v18, %v9627_v56 }
 0x1b3   :  { %16796 = vst [vmem:[#allocation18_spill] sm:$0xff] %v13870_v1  ;;  %v2442_v28 = vmax.f32 %v2169_v44, 0.0  ;;  %v3144_v44 = vld [vmem:[%s16690_s4 + $0xe8] sm:$0xff]  ;;  %v9918_v24 = vor.u32 %v12192_v5, %v9915_v17  ;;  %v2439_v19 = vmax.f32 %v2162_v45, 0.0  ;;  %v2501_v50 = vmax.f32 %v13599_v40, 0.0 }
 0x1b4   :  { %16798 = vst [vmem:[#allocation17_spill] sm:$0xff] %v13874_v8  ;;  %v2019_v21 = vpop.f32.mrf.mxu2  ;;  %v2157_v8 = vadd.f32 %v13768_v6, %v1828_v34  ;;  %v2502_v33 = vmax.f32 %v13617_v39, 0.0  ;;  %v2500_v18 = vmax.f32 %v13590_v61, 0.0  ;;  %v2499_v40 = vmax.f32 %v13646_v3, 0.0  ;;  %v3146_v34 = vld [vmem:[%s16690_s4 + $0xf8] sm:$0xff]  ;;  %v3148_v61 = vld [vmem:[%s16690_s4 + $0x108] sm:$0xff] }
 0x1b5   :  { %v2554_v1 = vpack.c.bf16 %v2442_v28, %v2441_v27  ;;  %v2020_v0 = vadd.f32 %v2019_v21, %v895_v41  ;;  %v2348_v14 = vpop.f32.mrf.mxu3  ;;  %v2154_v41 = vadd.f32 %v13745_v31, %v1825_v20  ;;  %v3147_v3 = vld [vmem:[%s16690_s4 + $0x100] sm:$0xff] }
 0x1b6   :  { %v1842_v22 = vpop.f32.mrf.mxu0  ;;  %v2437_v42 = vmax.f32 %v2157_v8, 0.0 }
 0x1b7   :  { %v1843_v27 = vadd.f32 %v1842_v22, %v13476_v13  ;;  %v2171_v28 = vpop.f32.mrf.mxu1  ;;  %6772 = vmatpush.bf16.msrb.mxu3 %v2554_v1  ;;  %v13893_v63 = vadd.f32 %v2348_v14, %v2020_v0  ;;  %3390 = vperm.xlu1 %12741, %v3144_v44   ;;  %v2438_v13 = vmax.f32 %v2159_v36, 0.0  ;;  %v2553_v14 = vpack.c.bf16 %v2440_v25, %v2439_v19  ;;  %v9633_v25 = vld [vmem:[#allocation6 + $0x190] sm:$0xf]  ;;  %v12123_v0 = vld [vmem:[#allocation6 + $0x194] sm:$0xf0] }
 0x1b8   :  { %3385 = vperm.xlu0 %12740, %v3143_v60   ;;  %3395 = vperm.xlu2 %12742, %v3145_v16   ;;  %v2436_v56 = vmax.f32 %v2154_v41, 0.0  ;;  %v9921_v22 = vld [vmem:[#allocation6 + $0x3d0] sm:$0xf]  ;;  %v13926_v16 = vpack.c.bf16 %v2500_v18, %v2499_v40  ;;  %v9923_v41 = vld [vmem:[#allocation6 + $0x3d8] sm:$0xf0] }
 0x1b9   :  { %v2172_v51 = vadd.f32 %v2171_v28, %v1843_v27  ;;  %1881 = vmatmul.bf16.gmra.mxu0 %v9626_v10  ;;  %2061 = vmatmul.bf16.gmra.mxu2 %v9914_v23  ;;  %v13900_v6 = vpop.permute.xlu1 %784  ;;  %v2552_v17 = vpack.c.bf16 %v2438_v13, %v2437_v42  ;;  %v12122_v27 = vld [vmem:[#allocation6 + $0x194] sm:$0xf]  ;;  %v9635_v28 = vld [vmem:[#allocation6 + $0x198] sm:$0xf0] }
 0x1ba   :  { %2210 = vmatmul.bf16.gmra.mxu1 %v9630_v29  ;;  %v13898_v1 = vpop.permute.xlu0 %779  ;;  %v865_v37 = vpop.permute.xlu2 %864  ;;  %2390 = vmatmul.bf16.gmra.mxu3 %v9918_v24  ;;  %v12195_v29 = vld [vmem:[#allocation6 + $0x3d4] sm:$0xf0]  ;;  %v12194_v24 = vld [vmem:[#allocation6 + $0x3d4] sm:$0xf] }
 0x1bb   :  { %v2005_v31 = vadd.f32 %v13753_v35, %v865_v37  ;;  %6773 = vmatpush.bf16.msrb.mxu3 %v2553_v14  ;;  %v13918_v35 = vpack.c.bf16 %v2502_v33, %v2501_v50  ;;  %v1998_v50 = vadd.f32 %v13682_v30, %v13530_v48  ;;  %v2000_v33 = vadd.f32 %v13704_v58, %v13532_v43  ;;  %v3151_v48 = vld [vmem:[%s16690_s4 + $0x120] sm:$0xff]  ;;  %v3150_v43 = vld [vmem:[%s16690_s4 + $0x118] sm:$0xff] }
 0x1bc   :  { %v2022_v39 = vpop.f32.mrf.mxu2  ;;  %v9634_v30 = vor.u32 %v12123_v0, %v9633_v25  ;;  %v9922_v58 = vor.u32 %v12195_v29, %v9921_v22  ;;  %v16803_v25 = vld [vmem:[#allocation79_spill] sm:$0xff] }
 0x1bd   :  { %v13909_v45 = vadd.f32 %v13763_v11, %v2005_v31  ;;  %v2023_v19 = vadd.f32 %v2022_v39, %v13795_v32  ;;  %v2351_v8 = vpop.f32.mrf.mxu3  ;;  %v2435_v11 = vmax.f32 %v13720_v54, 0.0  ;;  %v9926_v39 = vor.u32 %v12194_v24, %v9923_v41  ;;  %v9929_v29 = vld [vmem:[#allocation6 + $0x3e0] sm:$0xf]  ;;  %v12197_v24 = vld [vmem:[#allocation6 + $0x3e4] sm:$0xf0] }
 0x1be   :  { %v1844_v5 = vpop.f32.mrf.mxu0  ;;  %v12124_v41 = vld [vmem:[#allocation6 + $0x1a4] sm:$0xf] }
 0x1bf   :  { %v1845_v20 = vadd.f32 %v1844_v5, %v13478_v55  ;;  %v2173_v36 = vpop.f32.mrf.mxu1  ;;  %v13922_v21 = vadd.f32 %v2351_v8, %v2023_v19  ;;  %6774 = vmatpush.bf16.msrb.mxu3 %v2552_v17  ;;  %3405 = vperm.xlu1 %12741, %v3147_v3   ;;  %v2551_v10 = vpack.c.bf16 %v2436_v56, %v2435_v11  ;;  %v2443_v55 = vmax.f32 %v2172_v51, 0.0 }
 0x1c0   :  { %3400 = vperm.xlu0 %12740, %v3146_v34   ;;  %3410 = vperm.xlu2 %12742, %v3148_v61   ;;  %v9638_v56 = vor.u32 %v12122_v27, %v9635_v28  ;;  %v2327_v19 = vadd.f32 %v13690_v38, %v1998_v50  ;;  %v2329_v5 = vadd.f32 %v13714_v52, %v2000_v33  ;;  %v16804_v50 = vld [vmem:[#allocation75_spill] sm:$0xff]  ;;  %v9643_v33 = vld [vmem:[#allocation6 + $0x1a8] sm:$0xf0] }
 0x1c1   :  { %v2174_v32 = vadd.f32 %v2173_v36, %v1845_v20  ;;  %v13924_v44 = vpop.permute.xlu1 %959 }
 0x1c2   :  { %v885_v60 = vpop.permute.xlu0 %884  ;;  %v2505_v38 = vmax.f32 %v2327_v19, 0.0  ;;  %v9646_v19 = vor.u32 %v12124_v41, %v9643_v33  ;;  %v16818_v33 = vld [vmem:[#allocation35_spill] sm:$0xff] }
 0x1c3   :  { %v2444_v23 = vmax.f32 %v2174_v32, 0.0  ;;  %v2015_v54 = vadd.f32 %v13835_v7, %v885_v60  ;;  %6775 = vmatpush.bf16.msrb.mxu3 %v2551_v10  ;;  %v3149_v7 = vld [vmem:[%s16690_s4 + $0x110] sm:$0xff] }
 0x1c4   :  { %v2024_v14 = vpop.f32.mrf.mxu2 }
 0x1c5   :  { %v13934_v13 = vadd.f32 %v13845_v62, %v2015_v54  ;;  %v13939_v51 = vpack.c.bf16 %v2444_v23, %v2443_v55  ;;  %v2025_v37 = vadd.f32 %v2024_v14, %v13724_v57  ;;  %v2353_v31 = vpop.f32.mrf.mxu3  ;;  %v16801_v62 = vld [vmem:[#allocation50_spill] sm:$0xff]  ;;  %v1995_v57 = vadd.f32 %v13648_v26, %v13481_v12  ;;  %v12125_v54 = vld [vmem:[#allocation6 + $0x1a4] sm:$0xf0]  ;;  %v12196_v14 = vld [vmem:[#allocation6 + $0x3e4] sm:$0xf] }
 0x1c6   :  { %v1847_v42 = vpop.f32.mrf.mxu0  ;;  %v9641_v23 = vld [vmem:[#allocation6 + $0x1a0] sm:$0xf] }
 0x1c7   :  { %v1848_v18 = vadd.f32 %v1847_v42, %v16801_v62  ;;  %v2176_v40 = vpop.f32.mrf.mxu1  ;;  %v13951_v34 = vadd.f32 %v2353_v31, %v2025_v37  ;;  %6776 = vmatpush.bf16.msrb.mxu3 %v13712_v2  ;;  %3420 = vperm.xlu1 %12741, %v3150_v43   ;;  %v2324_v26 = vadd.f32 %v13658_v49, %v1995_v57  ;;  %v2506_v2 = vmax.f32 %v2329_v5, 0.0  ;;  %v3153_v49 = vld [vmem:[%s16690_s4 + $0x130] sm:$0xff]  ;;  %v3155_v37 = vld [vmem:[%s16690_s4 + $0x140] sm:$0xff]  ;;  %v3156_v62 = vld [vmem:[%s16690_s4 + $0x148] sm:$0xff] }
 0x1c8   :  { %3415 = vperm.xlu0 %12740, %v3149_v7   ;;  %3425 = vperm.xlu2 %12742, %v3151_v48   ;;  %v16805_v31 = vld [vmem:[#allocation85_spill] sm:$0xff] }
 0x1c9   :  { %v2177_v8 = vadd.f32 %v2176_v40, %v1848_v18  ;;  %1886 = vmatmul.bf16.gmra.mxu0 %v9634_v30  ;;  %2066 = vmatmul.bf16.gmra.mxu2 %v9922_v58  ;;  %v875_v61 = vpop.permute.xlu1 %874  ;;  %v2504_v0 = vmax.f32 %v2324_v26, 0.0  ;;  %v2586_v22 = vpack.c.bf16 %v2506_v2, %v2505_v38  ;;  %v3157_v58 = vld [vmem:[%s16690_s4 + $0x150] sm:$0xff]  ;;  %v9642_v18 = vor.u32 %v12125_v54, %v9641_v23  ;;  %v3160_v54 = vld [vmem:[%s16690_s4 + $0x168] sm:$0xff] }
 0x1ca   :  { %v870_v17 = vpop.permute.xlu0 %869  ;;  %2215 = vmatmul.bf16.gmra.mxu1 %v9638_v56  ;;  %v2010_v12 = vadd.f32 %v13799_v15, %v875_v61  ;;  %2395 = vmatmul.bf16.gmra.mxu3 %v9926_v39  ;;  %v9930_v40 = vor.u32 %v12197_v24, %v9929_v29  ;;  %v16806_v56 = vld [vmem:[#allocation58_spill] sm:$0xff] }
 0x1cb   :  { %v2008_v3 = vadd.f32 %v13776_v47, %v870_v17  ;;  %6777 = vmatpush.bf16.msrb.mxu3 %v13656_v46  ;;  %v3152_v47 = vld [vmem:[%s16690_s4 + $0x128] sm:$0xff]  ;;  %v3154_v46 = vld [vmem:[%s16690_s4 + $0x138] sm:$0xff]  ;;  %v2445_v27 = vmax.f32 %v2177_v8, 0.0  ;;  %v3159_v29 = vld [vmem:[%s16690_s4 + $0x160] sm:$0xff] }
 0x1cc   :  { %v13964_v20 = vadd.f32 %v13809_v59, %v2010_v12  ;;  %v2027_v36 = vpop.f32.mrf.mxu2  ;;  %v16807_v8 = vld [vmem:[#allocation38_spill] sm:$0xff]  ;;  %v16808_v17 = vld [vmem:[#allocation64_spill] sm:$0xff] }
 0x1cd   :  { %v13961_v52 = vadd.f32 %v13786_v53, %v2008_v3  ;;  %v2028_v15 = vadd.f32 %v2027_v36, %v13640_v4  ;;  %v2356_v32 = vpop.f32.mrf.mxu3  ;;  %v16802_v53 = vld [vmem:[#allocation66_spill] sm:$0xff]  ;;  %v2503_v4 = vmax.f32 %v16803_v25, 0.0  ;;  %v1973_v61 = vadd.f32 %v16808_v17, %v16807_v8  ;;  %v16809_v3 = vld [vmem:[#allocation31_spill] sm:$0xff]  ;;  %v12198_v17 = vld [vmem:[#allocation6 + $0x3f4] sm:$0xf] }
 0x1ce   :  { %v1849_v11 = vpop.f32.mrf.mxu0  ;;  %v16810_v12 = vld [vmem:[#allocation70_spill] sm:$0xff]  ;;  %v16811_v36 = vld [vmem:[#allocation91_spill] sm:$0xff] }
 0x1cf   :  { %v1850_v59 = vadd.f32 %v1849_v11, %v16802_v53  ;;  %v2178_v60 = vpop.f32.mrf.mxu1  ;;  %v13977_v10 = vadd.f32 %v2356_v32, %v2028_v15  ;;  %6778 = vmatpush.bf16.msrb.mxu3 %v13611_v9  ;;  %3435 = vperm.xlu1 %12741, %v3153_v49   ;;  %v9931_v9 = vld [vmem:[#allocation6 + $0x3e8] sm:$0xf0]  ;;  %v1978_v26 = vadd.f32 %v16810_v12, %v16809_v3  ;;  %v16813_v32 = vld [vmem:[#allocation65_spill] sm:$0xff]  ;;  %v16814_v49 = vld [vmem:[#allocation71_spill] sm:$0xff] }
 0x1d0   :  { %3430 = vperm.xlu0 %12740, %v3152_v47   ;;  %3440 = vperm.xlu2 %12742, %v3154_v46   ;;  %v9934_v5 = vor.u32 %v12196_v14, %v9931_v9  ;;  %v2585_v2 = vpack.c.bf16 %v2504_v0, %v2503_v4  ;;  %v16812_v47 = vld [vmem:[#allocation68_spill] sm:$0xff]  ;;  %v2302_v46 = vadd.f32 %v16813_v32, %v1973_v61  ;;  %v16816_v0 = vld [vmem:[#allocation81_spill] sm:$0xff]  ;;  %v2498_v14 = vmax.f32 %v16818_v33, 0.0  ;;  %v9651_v8 = vld [vmem:[#allocation6 + $0x1b8] sm:$0xf0] }
 0x1d1   :  { %v2179_v55 = vadd.f32 %v2178_v60, %v1850_v59  ;;  %v1975_v15 = vadd.f32 %v16812_v47, %v16811_v36  ;;  %v2307_v53 = vadd.f32 %v16814_v49, %v1978_v26  ;;  %v16815_v59 = vld [vmem:[#allocation69_spill] sm:$0xff]  ;;  %v3161_v47 = vld [vmem:[%s16690_s4 + $0x170] sm:$0xff] }
 0x1d2   :  { %v3158_v4 = vld [vmem:[%s16690_s4 + $0x158] sm:$0xff]  ;;  %v2495_v41 = vmax.f32 %v2302_v46, 0.0  ;;  %v16826_v46 = vld [vmem:[#allocation51_spill] sm:$0xff] }
 0x1d3   :  { %v2446_v28 = vmax.f32 %v2179_v55, 0.0  ;;  %6779 = vmatpush.bf16.msrb.mxu3 %v16804_v50  ;;  %v2304_v60 = vadd.f32 %v16815_v59, %v1975_v15  ;;  %v2497_v50 = vmax.f32 %v2307_v53, 0.0  ;;  %v16823_v3 = vld [vmem:[#allocation61_spill] sm:$0xff]  ;;  %v1965_v49 = vadd.f32 %v16826_v46, %v13900_v6 }
 0x1d4   :  { %v2029_v7 = vpop.f32.mrf.mxu2  ;;  %v16824_v26 = vld [vmem:[#allocation57_spill] sm:$0xff] }
 0x1d5   :  { %v13985_v42 = vpack.c.bf16 %v2446_v28, %v2445_v27  ;;  %v2030_v48 = vadd.f32 %v2029_v7, %v16805_v31  ;;  %v2358_v30 = vpop.f32.mrf.mxu3  ;;  %v16817_v27 = vld [vmem:[#allocation46_spill] sm:$0xff]  ;;  %v2582_v61 = vpack.c.bf16 %v2498_v14, %v2497_v50  ;;  %v16829_v50 = vld [vmem:[#allocation52_spill] sm:$0xff] }
 0x1d6   :  { %v1852_v43 = vpop.f32.mrf.mxu0  ;;  %v16819_v7 = vld [vmem:[#allocation90_spill] sm:$0xff]  ;;  %v2294_v33 = vadd.f32 %v16829_v50, %v1965_v49 }
 0x1d7   :  { %8088 = vmatpush.bf16.msra.mxu3 %v2586_v22  ;;  %v1853_v39 = vadd.f32 %v1852_v43, %v16806_v56  ;;  %v2181_v57 = vpop.f32.mrf.mxu1  ;;  %v13999_v38 = vadd.f32 %v2358_v30, %v2030_v48  ;;  %3450 = vperm.xlu1 %12741, %v3156_v62   ;;  %v2496_v48 = vmax.f32 %v2304_v60, 0.0  ;;  %v16821_v43 = vld [vmem:[#allocation97_spill] sm:$0xff]  ;;  %v16822_v30 = vld [vmem:[#allocation56_spill] sm:$0xff] }
 0x1d8   :  { %3445 = vperm.xlu0 %12740, %v3155_v37   ;;  %3455 = vperm.xlu2 %12742, %v3157_v58   ;;  %v16820_v37 = vld [vmem:[#allocation60_spill] sm:$0xff]  ;;  %v1968_v58 = vadd.f32 %v16822_v30, %v16821_v43  ;;  %v3163_v59 = vld [vmem:[%s16690_s4 + $0x180] sm:$0xff] }
 0x1d9   :  { %v2182_v11 = vadd.f32 %v2181_v57, %v1853_v39  ;;  %1891 = vmatmul.bf16.gmra.mxu0 %v9642_v18  ;;  %2071 = vmatmul.bf16.gmra.mxu2 %v9930_v40  ;;  %v1970_v31 = vadd.f32 %v16820_v37, %v16819_v7  ;;  %v9649_v18 = vld [vmem:[#allocation6 + $0x1b0] sm:$0xf]  ;;  %v12127_v40 = vld [vmem:[#allocation6 + $0x1b4] sm:$0xf0]  ;;  %v2581_v6 = vpack.c.bf16 %v2496_v48, %v2495_v41  ;;  %v3164_v41 = vld [vmem:[%s16690_s4 + $0x188] sm:$0xff]  ;;  %v2492_v37 = vmax.f32 %v2294_v33, 0.0 }
 0x1da   :  { %2220 = vmatmul.bf16.gmra.mxu1 %v9646_v19  ;;  %2400 = vmatmul.bf16.gmra.mxu3 %v9934_v5  ;;  %v9937_v56 = vld [vmem:[#allocation6 + $0x3f0] sm:$0xf]  ;;  %v12199_v19 = vld [vmem:[#allocation6 + $0x3f4] sm:$0xf0]  ;;  %v12126_v5 = vld [vmem:[#allocation6 + $0x1b4] sm:$0xf] }
 0x1db   :  { %8089 = vmatpush.bf16.msra.mxu3 %v2585_v2  ;;  %v2447_v39 = vmax.f32 %v2182_v11, 0.0  ;;  %v2299_v12 = vadd.f32 %v16823_v3, %v1970_v31  ;;  %v2297_v2 = vadd.f32 %v16824_v26, %v1968_v58  ;;  %v16825_v11 = vld [vmem:[#allocation47_spill] sm:$0xff]  ;;  %v3162_v60 = vld [vmem:[%s16690_s4 + $0x178] sm:$0xff] }
 0x1dc   :  { %v2032_v25 = vpop.f32.mrf.mxu2  ;;  %v1963_v32 = vadd.f32 %v16825_v11, %v13898_v1  ;;  %v9654_v1 = vor.u32 %v12126_v5, %v9651_v8  ;;  %v3166_v43 = vld [vmem:[%s16690_s4 + $0x198] sm:$0xff]  ;;  %v3165_v30 = vld [vmem:[%s16690_s4 + $0x190] sm:$0xff]  ;;  %v14064_v8 = vpop.permute.xlu0 %954  ;;  %v12204_v3 = vld [vmem:[#allocation8 + $0x1c] sm:$0xf0] }
 0x1dd   :  { %v2033_v22 = vadd.f32 %v2032_v25, %v16816_v0  ;;  %v2361_v23 = vpop.f32.mrf.mxu3  ;;  %v9650_v25 = vor.u32 %v12127_v40, %v9649_v18  ;;  %v16827_v0 = vld [vmem:[#allocation42_spill] sm:$0xff]  ;;  %v12200_v26 = vld [vmem:[#allocation8 + $0x4] sm:$0xf] }
 0x1de   :  { %v1854_v55 = vpop.f32.mrf.mxu0  ;;  %v3167_v11 = vld [vmem:[%s16690_s4 + $0x1a0] sm:$0xff]  ;;  %v3172_v33 = vld [vmem:[%s16690_s4 + $0x1c8] sm:$0xff] }
 0x1df   :  { %v1855_v28 = vadd.f32 %v1854_v55, %v16817_v27  ;;  %v2183_v24 = vpop.f32.mrf.mxu1  ;;  %v14018_v9 = vadd.f32 %v2361_v23, %v2033_v22  ;;  %8090 = vmatpush.bf16.msra.mxu3 %v13918_v35  ;;  %3465 = vperm.xlu1 %12741, %v3159_v29   ;;  %v9939_v35 = vld [vmem:[#allocation6 + $0x3f8] sm:$0xf0]  ;;  %v2494_v29 = vmax.f32 %v2299_v12, 0.0  ;;  %v2493_v27 = vmax.f32 %v2297_v2, 0.0  ;;  %v9659_v12 = vld [vmem:[#allocation6 + $0x1c8] sm:$0xf0] }
 0x1e0   :  { %3460 = vperm.xlu0 %12740, %v3158_v4   ;;  %3470 = vperm.xlu2 %12742, %v3160_v54   ;;  %v9938_v4 = vor.u32 %v12199_v19, %v9937_v56  ;;  %v9942_v23 = vor.u32 %v12198_v17, %v9939_v35  ;;  %v12128_v19 = vld [vmem:[#allocation6 + $0x1c4] sm:$0xf] }
 0x1e1   :  { %v2184_v62 = vadd.f32 %v2183_v24, %v1855_v28  ;;  %v16828_v28 = vld [vmem:[#allocation48_spill] sm:$0xff]  ;;  %v2580_v58 = vpack.c.bf16 %v2494_v29, %v2493_v27  ;;  %v10011_v2 = vld [vmem:[#allocation8 + $0x20] sm:$0xf0] }
 0x1e2   :  { %v2292_v24 = vadd.f32 %v16828_v28, %v1963_v32  ;;  %v3170_v27 = vld [vmem:[%s16690_s4 + $0x1b8] sm:$0xff] }
 0x1e3   :  { %v2448_v57 = vmax.f32 %v2184_v62, 0.0  ;;  %8091 = vmatpush.bf16.msra.mxu3 %v13926_v16  ;;  %v16830_v62 = vld [vmem:[#allocation49_spill] sm:$0xff] }
 0x1e4   :  { %v14028_v36 = vpop.f32.mrf.mxu2  ;;  %v2491_v7 = vmax.f32 %v2292_v24, 0.0 }
 0x1e5   :  { %v14033_v15 = vpack.c.bf16 %v2448_v57, %v2447_v39  ;;  %v14039_v53 = vpop.f32.mrf.mxu3  ;;  %v9657_v39 = vld [vmem:[#allocation6 + $0x1c0] sm:$0xf]  ;;  %v12129_v57 = vld [vmem:[#allocation6 + $0x1c4] sm:$0xf0] }
 0x1e6   :  { %v1857_v16 = vpop.f32.mrf.mxu0  ;;  %v2579_v5 = vpack.c.bf16 %v2492_v37, %v2491_v7 }
 0x1e7   :  { %v1858_v22 = vadd.f32 %v1857_v16, %v16827_v0  ;;  %v2186_v55 = vpop.f32.mrf.mxu1  ;;  %8092 = vmatpush.bf16.msra.mxu3 %v2582_v61  ;;  %3480 = vperm.xlu1 %12741, %v3162_v60   ;;  %v10009_v61 = vld [vmem:[#allocation8] sm:$0xf]  ;;  %v3169_v16 = vld [vmem:[%s16690_s4 + $0x1b0] sm:$0xff]  ;;  %v9658_v60 = vor.u32 %v12129_v57, %v9657_v39 }
 0x1e8   :  { %3475 = vperm.xlu0 %12740, %v3161_v47   ;;  %3485 = vperm.xlu2 %12742, %v3163_v59   ;;  %v3168_v59 = vld [vmem:[%s16690_s4 + $0x1a8] sm:$0xff] }
 0x1e9   :  { %v2187_v54 = vadd.f32 %v2186_v55, %v1858_v22  ;;  %1896 = vmatmul.bf16.gmra.mxu0 %v9650_v25  ;;  %2076 = vmatmul.bf16.gmra.mxu2 %v9938_v4  ;;  %v10010_v25 = vor.u32 %v12204_v3, %v10009_v61  ;;  %v16831_v4 = vld [vmem:[#allocation44_spill] sm:$0xff]  ;;  %v9662_v55 = vor.u32 %v12128_v19, %v9659_v12  ;;  %v3175_v61 = vld [vmem:[%s16690_s4 + $0x1e0] sm:$0xff] }
 0x1ea   :  { %2225 = vmatmul.bf16.gmra.mxu1 %v9654_v1  ;;  %2405 = vmatmul.bf16.gmra.mxu3 %v9942_v23  ;;  %v10014_v1 = vor.u32 %v12200_v26, %v10011_v2  ;;  %v3173_v19 = vld [vmem:[%s16690_s4 + $0x1d0] sm:$0xff]  ;;  %v3174_v3 = vld [vmem:[%s16690_s4 + $0x1d8] sm:$0xff] }
 0x1eb   :  { %8093 = vmatpush.bf16.msra.mxu3 %v2581_v6  ;;  %v2449_v17 = vmax.f32 %v2187_v54, 0.0  ;;  %v14084_v6 = vpop.permute.xlu1 %859  ;;  %v940_v54 = vpop.permute.xlu0 %939 }
 0x1ec   :  { %v14050_v14 = vpop.f32.mrf.mxu2 }
 0x1ed   :  { %v14055_v48 = vpop.f32.mrf.mxu3 }
 0x1ee   :  { %v1859_v31 = vpop.f32.mrf.mxu0 }
 0x1ef   :  { %v1860_v18 = vadd.f32 %v1859_v31, %v16830_v62  ;;  %v2188_v40 = vpop.f32.mrf.mxu1  ;;  %8094 = vmatpush.bf16.msra.mxu3 %v2580_v58  ;;  %3495 = vperm.xlu1 %12741, %v3165_v30   ;;  %v9665_v31 = vld [vmem:[#allocation6 + $0x1d0] sm:$0xf]  ;;  %v12130_v30 = vld [vmem:[#allocation6 + $0x1d4] sm:$0xf]  ;;  %v10041_v58 = vld [vmem:[#allocation8 + $0x40] sm:$0xf] }
 0x1f0   :  { %3490 = vperm.xlu0 %12740, %v3164_v41   ;;  %3500 = vperm.xlu2 %12742, %v3166_v43   ;;  %v3171_v41 = vld [vmem:[%s16690_s4 + $0x1c0] sm:$0xff]  ;;  %v12212_v62 = vld [vmem:[#allocation8 + $0x5c] sm:$0xf0] }
 0x1f1   :  { %v2189_v56 = vadd.f32 %v2188_v40, %v1860_v18  ;;  %v12131_v43 = vld [vmem:[#allocation6 + $0x1d4] sm:$0xf0]  ;;  %v9667_v18 = vld [vmem:[#allocation6 + $0x1d8] sm:$0xf0]  ;;  %v12208_v40 = vld [vmem:[#allocation8 + $0x44] sm:$0xf]  ;;  %v10042_v26 = vor.u32 %v12212_v62, %v10041_v58 }
 0x1f2   :  { %v9666_v12 = vor.u32 %v12131_v43, %v9665_v31  ;;  %v3177_v31 = vld [vmem:[%s16690_s4 + $0x1f0] sm:$0xff]  ;;  %v2515_v58 = vmax.f32 %v13922_v21, 0.0  ;;  %v2516_v62 = vmax.f32 %v13951_v34, 0.0  ;;  %v3179_v21 = vld [vmem:[%s16690_s4 + $0x200] sm:$0xff] }
 0x1f3   :  { %v2450_v35 = vmax.f32 %v2189_v56, 0.0  ;;  %8095 = vmatpush.bf16.msra.mxu3 %v2579_v5  ;;  %v10043_v56 = vld [vmem:[#allocation8 + $0x60] sm:$0xf0]  ;;  %v945_v39 = vpop.permute.xlu1 %944 }
 0x1f4   :  { %v14066_v47 = vpop.f32.mrf.mxu2 }
 0x1f5   :  { %v14071_v32 = vpack.c.bf16 %v2450_v35, %v2449_v17  ;;  %v14073_v49 = vpop.f32.mrf.mxu3 }
 0x1f6   :  { %v1862_v46 = vpop.f32.mrf.mxu0 }
 0x1f7   :  { %v1863_v0 = vadd.f32 %v1862_v46, %v16831_v4  ;;  %v2191_v22 = vpop.f32.mrf.mxu1  ;;  %3510 = vperm.xlu1 %12741, %v3168_v59   ;;  %v10046_v46 = vor.u32 %v12208_v40, %v10043_v56  ;;  %v9673_v56 = vld [vmem:[#allocation6 + $0x1e0] sm:$0xf] }
 0x1f8   :  { %3505 = vperm.xlu0 %12740, %v3167_v11   ;;  %3515 = vperm.xlu2 %12742, %v3169_v16   ;;  %v9670_v11 = vor.u32 %v12130_v30, %v9667_v18  ;;  %v16832_v16 = vld [vmem:[#allocation98_spill] sm:$0xff] }
 0x1f9   :  { %v14082_v23 = vadd.f32 %v2191_v22, %v1863_v0  ;;  %1901 = vmatmul.bf16.gmra.mxu0 %v9658_v60  ;;  %6451 = vmatmul.bf16.vlgmr.msrb.gmra.mxu2 %v10010_v25  ;;  %v2511_v59 = vmax.f32 %v16832_v16, 0.0  ;;  %v16833_v60 = vld [vmem:[#allocation19_spill] sm:$0xff]  ;;  %v2514_v0 = vmax.f32 %v13893_v63, 0.0  ;;  %v2512_v22 = vmax.f32 %v13934_v13, 0.0 }
 0x1fa   :  { %2230 = vmatmul.bf16.gmra.mxu1 %v9662_v55  ;;  %6780 = vmatmul.bf16.vlgmr.msrb.gmra.mxu3 %v10014_v1  ;;  %v2513_v25 = vmax.f32 %v16833_v60, 0.0  ;;  %v2517_v55 = vmax.f32 %v13977_v10, 0.0  ;;  %v2518_v1 = vmax.f32 %v13999_v38, 0.0  ;;  %v3176_v63 = vld [vmem:[%s16690_s4 + $0x1e8] sm:$0xff]  ;;  %v3181_v16 = vld [vmem:[%s16690_s4 + $0x210] sm:$0xff] }
 0x1fb   :  { %v14127_v38 = vpack.c.bf16 %v2512_v22, %v2511_v59  ;;  %v3180_v59 = vld [vmem:[%s16690_s4 + $0x208] sm:$0xff] }
 0x1fc   :  { %v2042_v29 = vpop.f32.mrf.mxu2  ;;  %v14123_v13 = vpack.c.bf16 %v2518_v1, %v2517_v55  ;;  %v14125_v10 = vpack.c.bf16 %v2514_v0, %v2513_v25 }
 0x1fd   :  { %v2043_v28 = vadd.f32 %v2042_v29, %v940_v54  ;;  %v2371_v50 = vpop.f32.mrf.mxu3  ;;  %v2509_v54 = vmax.f32 %v13961_v52, 0.0  ;;  %v2510_v29 = vmax.f32 %v13964_v20, 0.0  ;;  %v16834_v52 = vld [vmem:[#allocation17_spill] sm:$0xff] }
 0x1fe   :  { %v14089_v24 = vpop.f32.mrf.mxu0 }
 0x1ff   :  { %v14097_v7 = vpop.f32.mrf.mxu1  ;;  %v2372_v37 = vadd.f32 %v2371_v50, %v2043_v28  ;;  %3525 = vperm.xlu1 %12741, %v3171_v41   ;;  %v14138_v43 = vpack.c.bf16 %v2510_v29, %v2509_v54 }
 0x200   :  { %3520 = vperm.xlu0 %12740, %v3170_v27   ;;  %3530 = vperm.xlu2 %12742, %v3172_v33  }
 0x201   :  { %v2523_v27 = vmax.f32 %v2372_v37, 0.0  ;;  %v3178_v37 = vld [vmem:[%s16690_s4 + $0x1f8] sm:$0xff] }
 0x204   :  { %v2044_v57 = vpop.f32.mrf.mxu2 }
 0x205   :  { %v2045_v5 = vadd.f32 %v2044_v57, %v945_v39  ;;  %v2373_v35 = vpop.f32.mrf.mxu3  ;;  %v12133_v39 = vld [vmem:[#allocation6 + $0x1e4] sm:$0xf0]  ;;  %v12132_v57 = vld [vmem:[#allocation6 + $0x1e4] sm:$0xf] }
 0x206   :  { %v14102_v17 = vpop.f32.mrf.mxu0  ;;  %v9674_v60 = vor.u32 %v12133_v39, %v9673_v56  ;;  %v9683_v56 = vld [vmem:[#allocation6 + $0x1f8] sm:$0xf0]  ;;  %v12224_v39 = vld [vmem:[#allocation8 + $0xc4] sm:$0xf] }
 0x207   :  { %v14110_v2 = vpop.f32.mrf.mxu1  ;;  %v2374_v4 = vadd.f32 %v2373_v35, %v2045_v5  ;;  %3540 = vperm.xlu1 %12741, %v3174_v3   ;;  %v12220_v5 = vld [vmem:[#allocation8 + $0x9c] sm:$0xf0]  ;;  %v14146_v35 = vpack.c.bf16 %v2516_v62, %v2515_v58  ;;  %v12216_v3 = vld [vmem:[#allocation8 + $0x84] sm:$0xf]  ;;  %v12135_v58 = vld [vmem:[#allocation6 + $0x1f4] sm:$0xf0] }
 0x208   :  { %3535 = vperm.xlu0 %12740, %v3173_v19   ;;  %3545 = vperm.xlu2 %12742, %v3175_v61   ;;  %v10073_v19 = vld [vmem:[#allocation8 + $0x80] sm:$0xf]  ;;  %v9675_v61 = vld [vmem:[#allocation6 + $0x1e8] sm:$0xf0]  ;;  %v12134_v62 = vld [vmem:[#allocation6 + $0x1f4] sm:$0xf] }
 0x209   :  { %v2524_v28 = vmax.f32 %v2374_v4, 0.0  ;;  %1906 = vmatmul.bf16.gmra.mxu0 %v9666_v12  ;;  %6456 = vmatmul.bf16.gmra.mxu2 %v10042_v26  ;;  %v10075_v12 = vld [vmem:[#allocation8 + $0xa0] sm:$0xf0]  ;;  %v10074_v25 = vor.u32 %v12220_v5, %v10073_v19  ;;  %v9678_v0 = vor.u32 %v12132_v57, %v9675_v61  ;;  %v3185_v5 = vld [vmem:[%s16690_s4 + $0x230] sm:$0xff] }
 0x20a   :  { %2235 = vmatmul.bf16.gmra.mxu1 %v9670_v11  ;;  %6785 = vmatmul.bf16.gmra.mxu3 %v10046_v46  ;;  %v10078_v22 = vor.u32 %v12216_v3, %v10075_v12  ;;  %v10107_v57 = vld [vmem:[#allocation8 + $0xe0] sm:$0xf0]  ;;  %v16835_v61 = vld [vmem:[#allocation16_spill] sm:$0xff] }
 0x20b   :  { %v14140_v30 = vpack.c.bf16 %v2524_v28, %v2523_v27  ;;  %v3182_v27 = vld [vmem:[%s16690_s4 + $0x218] sm:$0xff] }
 0x20c   :  { %v2047_v50 = vpop.f32.mrf.mxu2 }
 0x20d   :  { %v2048_v33 = vadd.f32 %v2047_v50, %v16834_v52  ;;  %v2376_v41 = vpop.f32.mrf.mxu3  ;;  %v3184_v52 = vld [vmem:[%s16690_s4 + $0x228] sm:$0xff] }
 0x20e   :  { %v14130_v20 = vpop.f32.mrf.mxu0 }
 0x20f   :  { %v14144_v18 = vpop.f32.mrf.mxu1  ;;  %v2377_v40 = vadd.f32 %v2376_v41, %v2048_v33  ;;  %3555 = vperm.xlu1 %12741, %v3177_v31   ;;  %v3183_v33 = vld [vmem:[%s16690_s4 + $0x220] sm:$0xff]  ;;  %v9681_v31 = vld [vmem:[#allocation6 + $0x1f0] sm:$0xf] }
 0x210   :  { %3550 = vperm.xlu0 %12740, %v3176_v63   ;;  %3560 = vperm.xlu2 %12742, %v3178_v37  }
 0x211   :  { %v2525_v55 = vmax.f32 %v2377_v40, 0.0  ;;  %v10105_v40 = vld [vmem:[#allocation8 + $0xc0] sm:$0xf] }
 0x214   :  { %v2049_v26 = vpop.f32.mrf.mxu2 }
 0x215   :  { %v2050_v34 = vadd.f32 %v2049_v26, %v14064_v8  ;;  %v2378_v46 = vpop.f32.mrf.mxu3 }
 0x216   :  { %v14152_v11 = vpop.f32.mrf.mxu0 }
 0x217   :  { %v14160_v4 = vpop.f32.mrf.mxu1  ;;  %v2379_v1 = vadd.f32 %v2378_v46, %v2050_v34  ;;  %3570 = vperm.xlu1 %12741, %v3180_v59   ;;  %v3186_v34 = vld [vmem:[%s16690_s4 + $0x238] sm:$0xff]  ;;  %v9682_v46 = vor.u32 %v12135_v58, %v9681_v31 }
 0x218   :  { %3565 = vperm.xlu0 %12740, %v3179_v21   ;;  %3575 = vperm.xlu2 %12742, %v3181_v16   ;;  %v3187_v21 = vld [vmem:[%s16690_s4 + $0x240] sm:$0xff] }
 0x219   :  { %v2526_v8 = vmax.f32 %v2379_v1, 0.0  ;;  %1911 = vmatmul.bf16.gmra.mxu0 %v9674_v60  ;;  %6461 = vmatmul.bf16.gmra.mxu2 %v10074_v25  ;;  %v9686_v60 = vor.u32 %v12134_v62, %v9683_v56  ;;  %v10110_v25 = vor.u32 %v12224_v39, %v10107_v57  ;;  %v16836_v1 = vld [vmem:[#allocation25_spill] sm:$0xff]  ;;  %v16839_v56 = vld [vmem:[#allocation24_spill] sm:$0xff] }
 0x21a   :  { %2240 = vmatmul.bf16.gmra.mxu1 %v9678_v0  ;;  %6790 = vmatmul.bf16.gmra.mxu3 %v10078_v22  ;;  %v3190_v62 = vld [vmem:[%s16690_s4 + $0x258] sm:$0xff] }
 0x21b   :  { %v14162_v54 = vpack.c.bf16 %v2526_v8, %v2525_v55 }
 0x21c   :  { %v2052_v29 = vpop.f32.mrf.mxu2 }
 0x21d   :  { %v2053_v28 = vadd.f32 %v2052_v29, %v13924_v44  ;;  %v2381_v63 = vpop.f32.mrf.mxu3  ;;  %v12228_v44 = vld [vmem:[#allocation8 + $0xdc] sm:$0xf0] }
 0x21e   :  { %v1874_v50 = vpop.f32.mrf.mxu0  ;;  %v10106_v16 = vor.u32 %v12228_v44, %v10105_v40  ;;  %v3189_v40 = vld [vmem:[%s16690_s4 + $0x250] sm:$0xff] }
 0x21f   :  { %v2203_v41 = vpop.f32.mrf.mxu1  ;;  %v2382_v37 = vadd.f32 %v2381_v63, %v2053_v28  ;;  %3585 = vperm.xlu1 %12741, %v3183_v33   ;;  %v3188_v28 = vld [vmem:[%s16690_s4 + $0x248] sm:$0xff]  ;;  %v16837_v63 = vld [vmem:[#allocation32_spill] sm:$0xff] }
 0x220   :  { %3580 = vperm.xlu0 %12740, %v3182_v27   ;;  %3590 = vperm.xlu2 %12742, %v3184_v52   ;;  %v1875_v52 = vadd.f32 %v1874_v50, %v16837_v63  ;;  %v16838_v33 = vld [vmem:[#allocation20_spill] sm:$0xff] }
 0x221   :  { %v2527_v0 = vmax.f32 %v2382_v37, 0.0 }
 0x224   :  { %v2054_v19 = vpop.f32.mrf.mxu2 }
 0x225   :  { %v2055_v3 = vadd.f32 %v2054_v19, %v16835_v61  ;;  %v2383_v26 = vpop.f32.mrf.mxu3  ;;  %v16840_v19 = vld [vmem:[#allocation23_spill] sm:$0xff]  ;;  %v16841_v61 = vld [vmem:[#allocation29_spill] sm:$0xff] }
 0x226   :  { %v1877_v12 = vpop.f32.mrf.mxu0 }
 0x227   :  { %v2206_v59 = vpop.f32.mrf.mxu1  ;;  %v2384_v22 = vadd.f32 %v2383_v26, %v2055_v3  ;;  %3600 = vperm.xlu1 %12741, %v3186_v34   ;;  %v1878_v8 = vadd.f32 %v1877_v12, %v16836_v1  ;;  %v1870_v3 = vadd.f32 %v14130_v20, %v16841_v61  ;;  %v2204_v26 = vadd.f32 %v2203_v41, %v1875_v52  ;;  %v12137_v34 = vld [vmem:[#allocation6 + $0x204] sm:$0xf0]  ;;  %v12232_v1 = vld [vmem:[#allocation8 + $0x104] sm:$0xf]  ;;  %v3191_v52 = vld [vmem:[%s16690_s4 + $0x260] sm:$0xff] }
 0x228   :  { %3595 = vperm.xlu0 %12740, %v3185_v5   ;;  %3605 = vperm.xlu2 %12742, %v3187_v21   ;;  %v1873_v5 = vadd.f32 %v14152_v11, %v16840_v19  ;;  %v9689_v21 = vld [vmem:[#allocation6 + $0x200] sm:$0xf] }
 0x229   :  { %v2528_v55 = vmax.f32 %v2384_v22, 0.0  ;;  %1916 = vmatmul.bf16.gmra.mxu0 %v9682_v46  ;;  %6466 = vmatmul.bf16.gmra.mxu2 %v10106_v16  ;;  %v2207_v44 = vadd.f32 %v2206_v59, %v1878_v8  ;;  %v10137_v46 = vld [vmem:[#allocation8 + $0x100] sm:$0xf]  ;;  %v10139_v8 = vld [vmem:[#allocation8 + $0x120] sm:$0xf0]  ;;  %v2199_v41 = vadd.f32 %v14144_v18, %v1870_v3  ;;  %v9690_v18 = vor.u32 %v12137_v34, %v9689_v21 }
 0x22a   :  { %2245 = vmatmul.bf16.gmra.mxu1 %v9686_v60  ;;  %6795 = vmatmul.bf16.gmra.mxu3 %v10110_v25  ;;  %v12236_v60 = vld [vmem:[#allocation8 + $0x11c] sm:$0xf0]  ;;  %v12136_v25 = vld [vmem:[#allocation6 + $0x204] sm:$0xf]  ;;  %v2202_v11 = vadd.f32 %v14160_v4, %v1873_v5  ;;  %v3193_v4 = vld [vmem:[%s16690_s4 + $0x270] sm:$0xff] }
 0x22b   :  { %v14185_v29 = vpack.c.bf16 %v2528_v55, %v2527_v0  ;;  %v2457_v16 = vmax.f32 %v2207_v44, 0.0  ;;  %v16842_v0 = vld [vmem:[#allocation39_spill] sm:$0xff]  ;;  %v9691_v55 = vld [vmem:[#allocation6 + $0x208] sm:$0xf0] }
 0x22c   :  { %v2057_v27 = vpop.f32.mrf.mxu2  ;;  %v1868_v22 = vadd.f32 %v14102_v17, %v16842_v0  ;;  %v16843_v20 = vld [vmem:[#allocation43_spill] sm:$0xff]  ;;  %v2455_v5 = vmax.f32 %v2202_v11, 0.0 }
 0x22d   :  { %v2058_v37 = vadd.f32 %v2057_v27, %v16838_v33  ;;  %v2386_v58 = vpop.f32.mrf.mxu3  ;;  %v1865_v27 = vadd.f32 %v14089_v24, %v16843_v20  ;;  %v2456_v33 = vmax.f32 %v2204_v26, 0.0  ;;  %v3192_v24 = vld [vmem:[%s16690_s4 + $0x268] sm:$0xff]  ;;  %v2454_v26 = vmax.f32 %v2199_v41, 0.0 }
 0x22e   :  { %v1879_v31 = vpop.f32.mrf.mxu0  ;;  %v2197_v19 = vadd.f32 %v14110_v2, %v1868_v22  ;;  %v2451_v41 = vmax.f32 %v14082_v23, 0.0  ;;  %v3197_v23 = vld [vmem:[%s16690_s4 + $0x290] sm:$0xff] }
 0x22f   :  { %v1880_v39 = vadd.f32 %v1879_v31, %v16839_v56  ;;  %v2208_v57 = vpop.f32.mrf.mxu1  ;;  %v2387_v50 = vadd.f32 %v2386_v58, %v2058_v37  ;;  %3615 = vperm.xlu1 %12741, %v3189_v40   ;;  %v16844_v37 = vld [vmem:[#allocation95_spill] sm:$0xff]  ;;  %v2194_v3 = vadd.f32 %v14097_v7, %v1865_v27  ;;  %v2561_v34 = vpack.c.bf16 %v2456_v33, %v2455_v5  ;;  %v3194_v7 = vld [vmem:[%s16690_s4 + $0x278] sm:$0xff] }
 0x230   :  { %3610 = vperm.xlu0 %12740, %v3188_v28   ;;  %3620 = vperm.xlu2 %12742, %v3190_v62   ;;  %v10138_v62 = vor.u32 %v12236_v60, %v10137_v46  ;;  %v16845_v40 = vld [vmem:[#allocation59_spill] sm:$0xff]  ;;  %v2453_v46 = vmax.f32 %v2197_v19, 0.0  ;;  %v9697_v33 = vld [vmem:[#allocation6 + $0x210] sm:$0xf] }
 0x231   :  { %v2209_v12 = vadd.f32 %v2208_v57, %v1880_v39  ;;  %v9694_v39 = vor.u32 %v12136_v25, %v9691_v55  ;;  %v10142_v57 = vor.u32 %v12232_v1, %v10139_v8  ;;  %v2452_v60 = vmax.f32 %v2194_v3, 0.0  ;;  %v16846_v25 = vld [vmem:[#allocation87_spill] sm:$0xff]  ;;  %v3195_v1 = vld [vmem:[%s16690_s4 + $0x280] sm:$0xff]  ;;  %v16847_v8 = vld [vmem:[#allocation72_spill] sm:$0xff] }
 0x232   :  { %v2560_v11 = vpack.c.bf16 %v2454_v26, %v2453_v46  ;;  %v3196_v55 = vld [vmem:[%s16690_s4 + $0x288] sm:$0xff]  ;;  %v3209_v5 = vld [vmem:[%s16690_s4 + $0x2f0] sm:$0xff] }
 0x233   :  { %v2458_v59 = vmax.f32 %v2209_v12, 0.0  ;;  %v16849_v26 = vld [vmem:[#allocation76_spill] sm:$0xff] }
 0x234   :  { %v2059_v28 = vpop.f32.mrf.mxu2 }
 0x235   :  { %v2562_v63 = vpack.c.bf16 %v2458_v59, %v2457_v16  ;;  %v2060_v31 = vadd.f32 %v2059_v28, %v16844_v37  ;;  %v2388_v58 = vpop.f32.mrf.mxu3  ;;  %v2529_v16 = vmax.f32 %v2387_v50, 0.0  ;;  %v12139_v37 = vld [vmem:[#allocation6 + $0x214] sm:$0xf0] }
 0x236   :  { %v1882_v17 = vpop.f32.mrf.mxu0  ;;  %v9698_v3 = vor.u32 %v12139_v37, %v9697_v33 }
 0x237   :  { %v1883_v44 = vadd.f32 %v1882_v17, %v16845_v40  ;;  %v2211_v56 = vpop.f32.mrf.mxu1  ;;  %7101 = vmatpush.bf16.msrb.mxu0 %v2562_v63  ;;  %v2389_v61 = vadd.f32 %v2388_v58, %v2060_v31  ;;  %3630 = vperm.xlu1 %12741, %v3192_v24   ;;  %v10169_v31 = vld [vmem:[#allocation8 + $0x140] sm:$0xf]  ;;  %v12138_v24 = vld [vmem:[#allocation6 + $0x214] sm:$0xf]  ;;  %v10171_v40 = vld [vmem:[#allocation8 + $0x160] sm:$0xf0] }
 0x238   :  { %3625 = vperm.xlu0 %12740, %v3191_v52   ;;  %3635 = vperm.xlu2 %12742, %v3193_v4   ;;  %v2559_v52 = vpack.c.bf16 %v2452_v60, %v2451_v41  ;;  %v12244_v4 = vld [vmem:[#allocation8 + $0x15c] sm:$0xf0]  ;;  %v16853_v41 = vld [vmem:[#allocation88_spill] sm:$0xff] }
 0x239   :  { %v2212_v12 = vadd.f32 %v2211_v56, %v1883_v44  ;;  %v2530_v21 = vmax.f32 %v2389_v61, 0.0  ;;  %1921 = vmatmul.bf16.gmra.mxu0 %v9690_v18  ;;  %6471 = vmatmul.bf16.gmra.mxu2 %v10138_v62  ;;  %v9699_v18 = vld [vmem:[#allocation6 + $0x218] sm:$0xf0]  ;;  %v12240_v62 = vld [vmem:[#allocation8 + $0x144] sm:$0xf]  ;;  %v3198_v61 = vld [vmem:[%s16690_s4 + $0x298] sm:$0xff] }
 0x23a   :  { %2250 = vmatmul.bf16.gmra.mxu1 %v9694_v39  ;;  %6800 = vmatmul.bf16.gmra.mxu3 %v10142_v57  ;;  %v16848_v39 = vld [vmem:[#allocation96_spill] sm:$0xff]  ;;  %v16851_v60 = vld [vmem:[#allocation67_spill] sm:$0xff] }
 0x23b   :  { %7102 = vmatpush.bf16.msrb.mxu0 %v2561_v34  ;;  %v14222_v59 = vpack.c.bf16 %v2530_v21, %v2529_v16  ;;  %v2459_v17 = vmax.f32 %v2212_v12, 0.0  ;;  %v10170_v12 = vor.u32 %v12244_v4, %v10169_v31  ;;  %v2038_v16 = vadd.f32 %v14050_v14, %v16849_v26  ;;  %v16850_v21 = vld [vmem:[#allocation73_spill] sm:$0xff] }
 0x23c   :  { %v2062_v2 = vpop.f32.mrf.mxu2  ;;  %v2040_v34 = vadd.f32 %v14066_v47, %v16850_v21  ;;  %v16855_v26 = vld [vmem:[#allocation89_spill] sm:$0xff] }
 0x23d   :  { %v2063_v0 = vadd.f32 %v2062_v2, %v16846_v25  ;;  %v2391_v50 = vpop.f32.mrf.mxu3  ;;  %v9702_v2 = vor.u32 %v12138_v24, %v9699_v18  ;;  %v2367_v14 = vadd.f32 %v14055_v48, %v2038_v16  ;;  %v3208_v48 = vld [vmem:[%s16690_s4 + $0x2e8] sm:$0xff]  ;;  %v12141_v18 = vld [vmem:[#allocation6 + $0x224] sm:$0xf0] }
 0x23e   :  { %v1884_v22 = vpop.f32.mrf.mxu0  ;;  %v2369_v47 = vadd.f32 %v14073_v49, %v2040_v34  ;;  %v9705_v24 = vld [vmem:[#allocation6 + $0x220] sm:$0xf]  ;;  %v3203_v34 = vld [vmem:[%s16690_s4 + $0x2c0] sm:$0xff] }
 0x23f   :  { %v1885_v20 = vadd.f32 %v1884_v22, %v16847_v8  ;;  %v2213_v27 = vpop.f32.mrf.mxu1  ;;  %v2392_v28 = vadd.f32 %v2391_v50, %v2063_v0  ;;  %7103 = vmatpush.bf16.msrb.mxu0 %v2560_v11  ;;  %3645 = vperm.xlu1 %12741, %v3195_v1   ;;  %v16852_v8 = vld [vmem:[#allocation82_spill] sm:$0xff]  ;;  %v2521_v49 = vmax.f32 %v2367_v14, 0.0 }
 0x240   :  { %3640 = vperm.xlu0 %12740, %v3194_v7   ;;  %3650 = vperm.xlu2 %12742, %v3196_v55   ;;  %v10174_v7 = vor.u32 %v12240_v62, %v10171_v40  ;;  %v10201_v62 = vld [vmem:[#allocation8 + $0x180] sm:$0xf] }
 0x241   :  { %v2214_v63 = vadd.f32 %v2213_v27, %v1885_v20  ;;  %v2531_v50 = vmax.f32 %v2392_v28, 0.0  ;;  %v3210_v27 = vld [vmem:[%s16690_s4 + $0x2f8] sm:$0xff] }
 0x243   :  { %v2460_v58 = vmax.f32 %v2214_v63, 0.0  ;;  %7104 = vmatpush.bf16.msrb.mxu0 %v2559_v52  ;;  %v2522_v52 = vmax.f32 %v2369_v47, 0.0 }
 0x244   :  { %v2064_v44 = vpop.f32.mrf.mxu2 }
 0x245   :  { %v14239_v56 = vpack.c.bf16 %v2460_v58, %v2459_v17  ;;  %v2065_v57 = vadd.f32 %v2064_v44, %v16848_v39  ;;  %v2393_v19 = vpop.f32.mrf.mxu3  ;;  %v2594_v40 = vpack.c.bf16 %v2522_v52, %v2521_v49  ;;  %v12252_v44 = vld [vmem:[#allocation8 + $0x19c] sm:$0xf0]  ;;  %v9707_v39 = vld [vmem:[#allocation6 + $0x228] sm:$0xf0] }
 0x246   :  { %v1887_v46 = vpop.f32.mrf.mxu0 }
 0x247   :  { %v1888_v25 = vadd.f32 %v1887_v46, %v16851_v60  ;;  %v2216_v0 = vpop.f32.mrf.mxu1  ;;  %v2394_v22 = vadd.f32 %v2393_v19, %v2065_v57  ;;  %7105 = vmatpush.bf16.msrb.mxu0 %v14071_v32  ;;  %3660 = vperm.xlu1 %12741, %v3198_v61   ;;  %v2035_v32 = vadd.f32 %v14028_v36, %v16852_v8  ;;  %v16854_v36 = vld [vmem:[#allocation55_spill] sm:$0xff] }
 0x248   :  { %3655 = vperm.xlu0 %12740, %v3197_v23   ;;  %3715 = vperm.xlu2 %12742, %v3209_v5   ;;  %v12140_v23 = vld [vmem:[#allocation6 + $0x224] sm:$0xf]  ;;  %v9706_v46 = vor.u32 %v12141_v18, %v9705_v24 }
 0x249   :  { %v2217_v11 = vadd.f32 %v2216_v0, %v1888_v25  ;;  %v2532_v55 = vmax.f32 %v2394_v22, 0.0  ;;  %1926 = vmatmul.bf16.gmra.mxu0 %v9698_v3  ;;  %6476 = vmatmul.bf16.gmra.mxu2 %v10170_v12  ;;  %v2364_v58 = vadd.f32 %v14039_v53, %v2035_v32  ;;  %v12248_v5 = vld [vmem:[#allocation8 + $0x184] sm:$0xf]  ;;  %v3205_v12 = vld [vmem:[%s16690_s4 + $0x2d0] sm:$0xff]  ;;  %v9710_v60 = vor.u32 %v12140_v23, %v9707_v39  ;;  %v16856_v0 = vld [vmem:[#allocation62_spill] sm:$0xff] }
 0x24a   :  { %2255 = vmatmul.bf16.gmra.mxu1 %v9702_v2  ;;  %6805 = vmatmul.bf16.gmra.mxu3 %v10174_v7  ;;  %v10203_v61 = vld [vmem:[#allocation8 + $0x1a0] sm:$0xf0]  ;;  %v16858_v23 = vld [vmem:[#allocation28_spill] sm:$0xff] }
 0x24b   :  { %7106 = vmatpush.bf16.msrb.mxu0 %v14033_v15  ;;  %v14257_v1 = vpack.c.bf16 %v2532_v55, %v2531_v50  ;;  %v3207_v15 = vld [vmem:[%s16690_s4 + $0x2e0] sm:$0xff]  ;;  %v2461_v57 = vmax.f32 %v2217_v11, 0.0  ;;  %v2520_v3 = vmax.f32 %v2364_v58, 0.0  ;;  %v10206_v25 = vor.u32 %v12248_v5, %v10203_v61  ;;  %v12142_v58 = vld [vmem:[#allocation6 + $0x234] sm:$0xf] }
 0x24c   :  { %v2067_v20 = vpop.f32.mrf.mxu2  ;;  %v2003_v39 = vadd.f32 %v16858_v23, %v14084_v6  ;;  %v3202_v5 = vld [vmem:[%s16690_s4 + $0x2b8] sm:$0xff] }
 0x24d   :  { %v2068_v28 = vadd.f32 %v2067_v20, %v16853_v41  ;;  %v2396_v63 = vpop.f32.mrf.mxu3 }
 0x24e   :  { %v1889_v33 = vpop.f32.mrf.mxu0 }
 0x24f   :  { %v1890_v37 = vadd.f32 %v1889_v33, %v16854_v36  ;;  %v2218_v31 = vpop.f32.mrf.mxu1  ;;  %v2397_v17 = vadd.f32 %v2396_v63, %v2068_v28  ;;  %7107 = vmatpush.bf16.msrb.mxu0 %v13985_v42  ;;  %3705 = vperm.xlu1 %12741, %v3207_v15   ;;  %v2519_v42 = vmax.f32 %v14018_v9, 0.0  ;;  %v10202_v9 = vor.u32 %v12252_v44, %v10201_v62  ;;  %v3226_v28 = vld [vmem:[%s16690_s4 + $0x378] sm:$0xff]  ;;  %v3225_v63 = vld [vmem:[%s16690_s4 + $0x370] sm:$0xff]  ;;  %v12256_v62 = vld [vmem:[#allocation8 + $0x1c4] sm:$0xf] }
 0x250   :  { %3720 = vperm.xlu0 %12740, %v3210_v27   ;;  %3710 = vperm.xlu2 %12742, %v3208_v48   ;;  %v3204_v27 = vld [vmem:[%s16690_s4 + $0x2c8] sm:$0xff]  ;;  %v9713_v36 = vld [vmem:[#allocation6 + $0x230] sm:$0xf] }
 0x251   :  { %v2219_v4 = vadd.f32 %v2218_v31, %v1890_v37  ;;  %v2533_v55 = vmax.f32 %v2397_v17, 0.0  ;;  %v2593_v8 = vpack.c.bf16 %v2520_v3, %v2519_v42  ;;  %v16857_v15 = vld [vmem:[#allocation63_spill] sm:$0xff]  ;;  %v12143_v37 = vld [vmem:[#allocation6 + $0x234] sm:$0xf0] }
 0x252   :  { %v10233_v31 = vld [vmem:[#allocation8 + $0x1c0] sm:$0xf] }
 0x253   :  { %v2462_v19 = vmax.f32 %v2219_v4, 0.0  ;;  %7108 = vmatpush.bf16.msrb.mxu0 %v13939_v51  ;;  %v3206_v51 = vld [vmem:[%s16690_s4 + $0x2d8] sm:$0xff]  ;;  %v12260_v17 = vld [vmem:[#allocation8 + $0x1dc] sm:$0xf0]  ;;  %v9715_v4 = vld [vmem:[#allocation6 + $0x238] sm:$0xf0] }
 0x254   :  { %v2069_v53 = vpop.f32.mrf.mxu2  ;;  %v10234_v61 = vor.u32 %v12260_v17, %v10233_v31 }
 0x255   :  { %v2070_v16 = vadd.f32 %v2069_v53, %v16855_v26  ;;  %v2398_v21 = vpop.f32.mrf.mxu3  ;;  %v14286_v2 = vpack.c.bf16 %v2462_v19, %v2461_v57  ;;  %v3241_v19 = vld [vmem:[%s16690_s4 + $0x3f0] sm:$0xff]  ;;  %v9718_v53 = vor.u32 %v12142_v58, %v9715_v4  ;;  %v16859_v26 = vld [vmem:[#allocation53_spill] sm:$0xff] }
 0x256   :  { %v1892_v7 = vpop.f32.mrf.mxu0 }
 0x257   :  { %8417 = vmatpush.bf16.msra.mxu0 %v2594_v40  ;;  %v1893_v22 = vadd.f32 %v1892_v7, %v16856_v0  ;;  %v2221_v50 = vpop.f32.mrf.mxu1  ;;  %v2399_v11 = vadd.f32 %v2398_v21, %v2070_v16  ;;  %3700 = vperm.xlu1 %12741, %v3206_v51   ;;  %v10235_v40 = vld [vmem:[#allocation8 + $0x1e0] sm:$0xf0]  ;;  %v16860_v21 = vld [vmem:[#allocation84_spill] sm:$0xff]  ;;  %v2508_v7 = vmax.f32 %v13909_v45, 0.0  ;;  %v3223_v0 = vld [vmem:[%s16690_s4 + $0x360] sm:$0xff] }
 0x258   :  { %3695 = vperm.xlu0 %12740, %v3205_v12   ;;  %3685 = vperm.xlu2 %12742, %v3203_v34   ;;  %v10238_v12 = vor.u32 %v12256_v62, %v10235_v40  ;;  %v2332_v34 = vadd.f32 %v16860_v21, %v2003_v39  ;;  %v3240_v39 = vld [vmem:[%s16690_s4 + $0x3e8] sm:$0xff]  ;;  %v12213_v21 = vld [vmem:[#allocation8 + $0x64] sm:$0xf0] }
 0x259   :  { %v2222_v14 = vadd.f32 %v2221_v50, %v1893_v22  ;;  %v2534_v47 = vmax.f32 %v2399_v11, 0.0  ;;  %1931 = vmatmul.bf16.gmra.mxu0 %v9706_v46  ;;  %6481 = vmatmul.bf16.gmra.mxu2 %v10202_v9  ;;  %v3242_v9 = vld [vmem:[%s16690_s4 + $0x3f8] sm:$0xff]  ;;  %v16861_v22 = vld [vmem:[#allocation54_spill] sm:$0xff] }
 0x25a   :  { %2260 = vmatmul.bf16.gmra.mxu1 %v9710_v60  ;;  %6810 = vmatmul.bf16.gmra.mxu3 %v10206_v25  ;;  %v3224_v25 = vld [vmem:[%s16690_s4 + $0x368] sm:$0xff] }
 0x25b   :  { %8418 = vmatpush.bf16.msra.mxu0 %v2593_v8  ;;  %v14289_v32 = vpack.c.bf16 %v2534_v47, %v2533_v55  ;;  %v2463_v24 = vmax.f32 %v2222_v14, 0.0  ;;  %v10265_v55 = vld [vmem:[#allocation8 + $0x200] sm:$0xf]  ;;  %v10017_v8 = vld [vmem:[#allocation8 + $0x8] sm:$0xf] }
 0x25c   :  { %v14291_v20 = vpop.f32.mrf.mxu2  ;;  %v12268_v47 = vld [vmem:[#allocation8 + $0x21c] sm:$0xf0] }
 0x25d   :  { %v14296_v41 = vpop.f32.mrf.mxu3 }
 0x25e   :  { %v1894_v48 = vpop.f32.mrf.mxu0 }
 0x25f   :  { %v1895_v49 = vadd.f32 %v1894_v48, %v16857_v15  ;;  %v2223_v52 = vpop.f32.mrf.mxu1  ;;  %8419 = vmatpush.bf16.msra.mxu0 %v14123_v13  ;;  %3795 = vperm.xlu1 %12741, %v3225_v63   ;;  %v3201_v13 = vld [vmem:[%s16690_s4 + $0x2b0] sm:$0xff]  ;;  %v12264_v48 = vld [vmem:[#allocation8 + $0x204] sm:$0xf] }
 0x260   :  { %3690 = vperm.xlu0 %12740, %v3204_v27   ;;  %3800 = vperm.xlu2 %12742, %v3226_v28   ;;  %v12205_v27 = vld [vmem:[#allocation8 + $0x24] sm:$0xf0]  ;;  %v10267_v15 = vld [vmem:[#allocation8 + $0x220] sm:$0xf0] }
 0x261   :  { %v2224_v33 = vadd.f32 %v2223_v52, %v1895_v49  ;;  %v3199_v52 = vld [vmem:[%s16690_s4 + $0x2a0] sm:$0xff]  ;;  %v10018_v31 = vor.u32 %v12205_v27, %v10017_v8  ;;  %v10270_v4 = vor.u32 %v12264_v48, %v10267_v15  ;;  %v3256_v8 = vpop.permute.xlu1 %3255  ;;  %v3236_v15 = vld [vmem:[%s16690_s4 + $0x3c8] sm:$0xff] }
 0x263   :  { %v2464_v18 = vmax.f32 %v2224_v33, 0.0  ;;  %8420 = vmatpush.bf16.msra.mxu0 %v14146_v35  ;;  %v9714_v35 = vor.u32 %v12143_v37, %v9713_v36  ;;  %v3239_v33 = vld [vmem:[%s16690_s4 + $0x3e0] sm:$0xff]  ;;  %v3200_v36 = vld [vmem:[%s16690_s4 + $0x2a8] sm:$0xff]  ;;  %v10266_v37 = vor.u32 %v12268_v47, %v10265_v55 }
 0x264   :  { %v14307_v44 = vpop.f32.mrf.mxu2 }
 0x265   :  { %v14314_v57 = vpop.f32.mrf.mxu3  ;;  %v14322_v42 = vpack.c.bf16 %v2464_v18, %v2463_v24  ;;  %v16862_v24 = vld [vmem:[#allocation45_spill] sm:$0xff] }
 0x266   :  { %v1897_v3 = vpop.f32.mrf.mxu0 }
 0x267   :  { %v1898_v16 = vadd.f32 %v1897_v3, %v16859_v26  ;;  %v2226_v6 = vpop.f32.mrf.mxu1  ;;  %8421 = vmatpush.bf16.msra.mxu0 %v14125_v10  ;;  %3680 = vperm.xlu1 %12741, %v3202_v5   ;;  %v2507_v10 = vmax.f32 %v2332_v34, 0.0  ;;  %v10297_v26 = vld [vmem:[#allocation8 + $0x240] sm:$0xf]  ;;  %v12272_v34 = vld [vmem:[#allocation8 + $0x244] sm:$0xf] }
 0x268   :  { %3675 = vperm.xlu0 %12740, %v3201_v13   ;;  %3875 = vperm.xlu2 %12742, %v3241_v19   ;;  %v3246_v13 = vpop.permute.xlu2 %3245 }
 0x269   :  { %v2227_v51 = vadd.f32 %v2226_v6, %v1898_v16  ;;  %1936 = vmatmul.bf16.gmra.mxu0 %v9714_v35  ;;  %6486 = vmatmul.bf16.gmra.mxu2 %v10234_v61  ;;  %v2587_v14 = vpack.c.bf16 %v2508_v7, %v2507_v10  ;;  %v3222_v35 = vld [vmem:[%s16690_s4 + $0x358] sm:$0xff]  ;;  %v3221_v61 = vld [vmem:[%s16690_s4 + $0x350] sm:$0xff]  ;;  %v12276_v16 = vld [vmem:[#allocation8 + $0x25c] sm:$0xf0] }
 0x26a   :  { %2265 = vmatmul.bf16.gmra.mxu1 %v9718_v53  ;;  %6815 = vmatmul.bf16.gmra.mxu3 %v10238_v12  ;;  %v10049_v6 = vld [vmem:[#allocation8 + $0x48] sm:$0xf] }
 0x26b   :  { %8422 = vmatpush.bf16.msra.mxu0 %v14127_v38  ;;  %v2465_v28 = vmax.f32 %v2227_v51, 0.0  ;;  %v10299_v51 = vld [vmem:[#allocation8 + $0x260] sm:$0xf0]  ;;  %v3237_v10 = vld [vmem:[%s16690_s4 + $0x3d0] sm:$0xff] }
 0x26c   :  { %v14328_v46 = vpop.f32.mrf.mxu2  ;;  %v10302_v55 = vor.u32 %v12272_v34, %v10299_v51 }
 0x26d   :  { %v14334_v60 = vpop.f32.mrf.mxu3 }
 0x26e   :  { %v1899_v38 = vpop.f32.mrf.mxu0 }
 0x26f   :  { %v1900_v50 = vadd.f32 %v1899_v38, %v16861_v22  ;;  %v2228_v11 = vpop.f32.mrf.mxu1  ;;  %8423 = vmatpush.bf16.msra.mxu0 %v14138_v43  ;;  %3785 = vperm.xlu1 %12741, %v3223_v0   ;;  %v3219_v38 = vld [vmem:[%s16690_s4 + $0x340] sm:$0xff]  ;;  %v3238_v22 = vld [vmem:[%s16690_s4 + $0x3d8] sm:$0xff] }
 0x270   :  { %3880 = vperm.xlu0 %12740, %v3242_v9   ;;  %3790 = vperm.xlu2 %12742, %v3224_v25   ;;  %v3251_v9 = vpop.permute.xlu0 %3250 }
 0x271   :  { %v2229_v45 = vadd.f32 %v2228_v11, %v1900_v50  ;;  %v10298_v50 = vor.u32 %v12276_v16, %v10297_v26  ;;  %v10050_v11 = vor.u32 %v12213_v21, %v10049_v6 }
 0x273   :  { %v2466_v63 = vmax.f32 %v2229_v45, 0.0  ;;  %8424 = vmatpush.bf16.msra.mxu0 %v2587_v14 }
 0x274   :  { %v14344_v49 = vpop.f32.mrf.mxu2 }
 0x275   :  { %v14349_v43 = vpop.f32.mrf.mxu3  ;;  %v14357_v17 = vpack.c.bf16 %v2466_v63, %v2465_v28  ;;  %v3220_v28 = vld [vmem:[%s16690_s4 + $0x348] sm:$0xff] }
 0x276   :  { %v1902_v58 = vpop.f32.mrf.mxu0 }
 0x277   :  { %v1903_v18 = vadd.f32 %v1902_v58, %v16862_v24  ;;  %v2231_v62 = vpop.f32.mrf.mxu1  ;;  %3670 = vperm.xlu1 %12741, %v3200_v36   ;;  %v12284_v58 = vld [vmem:[#allocation8 + $0x29c] sm:$0xf0]  ;;  %v12221_v24 = vld [vmem:[#allocation8 + $0xa4] sm:$0xf0] }
 0x278   :  { %3665 = vperm.xlu0 %12740, %v3199_v52   ;;  %3865 = vperm.xlu2 %12742, %v3239_v33   ;;  %v3235_v52 = vld [vmem:[%s16690_s4 + $0x3c0] sm:$0xff] }
 0x279   :  { %v14360_v40 = vadd.f32 %v2231_v62, %v1903_v18  ;;  %6491 = vmatmul.bf16.gmra.mxu2 %v10266_v37  ;;  %7109 = vmatmul.bf16.vlgmr.msrb.gmra.mxu0 %v10018_v31  ;;  %v10329_v31 = vld [vmem:[#allocation8 + $0x280] sm:$0xf]  ;;  %v12280_v18 = vld [vmem:[#allocation8 + $0x284] sm:$0xf] }
 0x27a   :  { %6820 = vmatmul.bf16.gmra.mxu3 %v10270_v4  ;;  %v10081_v4 = vld [vmem:[#allocation8 + $0x88] sm:$0xf]  ;;  %v10331_v62 = vld [vmem:[#allocation8 + $0x2a0] sm:$0xf0]  ;;  %v10330_v26 = vor.u32 %v12284_v58, %v10329_v31  ;;  %v3231_v58 = vld [vmem:[%s16690_s4 + $0x3a0] sm:$0xff] }
 0x27b   :  { %v10082_v16 = vor.u32 %v12221_v24, %v10081_v4  ;;  %v10334_v21 = vor.u32 %v12280_v18, %v10331_v62  ;;  %v3213_v18 = vld [vmem:[%s16690_s4 + $0x310] sm:$0xff]  ;;  %v3232_v62 = vld [vmem:[%s16690_s4 + $0x3a8] sm:$0xff] }
 0x27c   :  { %v6452_v23 = vpop.f32.mrf.mxu2 }
 0x27d   :  { %v6453_v19 = vadd.f32 %v6452_v23, %v3246_v13  ;;  %v6781_v5 = vpop.f32.mrf.mxu3  ;;  %v3261_v13 = vpop.permute.xlu2 %3260 }
 0x27e   :  { %v14371_v3 = vpop.f32.mrf.mxu0 }
 0x27f   :  { %v14373_v53 = vpop.f32.mrf.mxu1  ;;  %v14375_v12 = vadd.f32 %v6781_v5, %v6453_v19  ;;  %3775 = vperm.xlu1 %12741, %v3221_v61   ;;  %v3218_v61 = vld [vmem:[%s16690_s4 + $0x338] sm:$0xff] }
 0x280   :  { %3870 = vperm.xlu0 %12740, %v3240_v39   ;;  %3780 = vperm.xlu2 %12742, %v3222_v35   ;;  %v3217_v39 = vld [vmem:[%s16690_s4 + $0x330] sm:$0xff] }
 0x281   :  { %v3233_v35 = vld [vmem:[%s16690_s4 + $0x3b0] sm:$0xff] }
 0x284   :  { %v6454_v7 = vpop.f32.mrf.mxu2 }
 0x285   :  { %v6455_v25 = vadd.f32 %v6454_v7, %v3251_v9  ;;  %v6783_v0 = vpop.f32.mrf.mxu3  ;;  %v3266_v9 = vpop.permute.xlu0 %3265 }
 0x286   :  { %v14386_v45 = vpop.f32.mrf.mxu0 }
 0x287   :  { %v14388_v14 = vpop.f32.mrf.mxu1  ;;  %v14390_v47 = vadd.f32 %v6783_v0, %v6455_v25  ;;  %3860 = vperm.xlu1 %12741, %v3238_v22   ;;  %v3215_v22 = vld [vmem:[%s16690_s4 + $0x320] sm:$0xff] }
 0x288   :  { %3855 = vperm.xlu0 %12740, %v3237_v10   ;;  %3765 = vperm.xlu2 %12742, %v3219_v38   ;;  %v3234_v10 = vld [vmem:[%s16690_s4 + $0x3b8] sm:$0xff]  ;;  %v3216_v38 = vld [vmem:[%s16690_s4 + $0x328] sm:$0xff] }
 0x289   :  { %6496 = vmatmul.bf16.gmra.mxu2 %v10298_v50  ;;  %7114 = vmatmul.bf16.gmra.mxu0 %v10050_v11 }
 0x28a   :  { %6825 = vmatmul.bf16.gmra.mxu3 %v10302_v55 }
 0x28c   :  { %v6457_v27 = vpop.f32.mrf.mxu2 }
 0x28d   :  { %v6458_v63 = vadd.f32 %v6457_v27, %v3256_v8  ;;  %v6786_v48 = vpop.f32.mrf.mxu3  ;;  %v10361_v8 = vld [vmem:[#allocation8 + $0x2c0] sm:$0xf] }
 0x28e   :  { %v14401_v33 = vpop.f32.mrf.mxu0  ;;  %v12292_v27 = vld [vmem:[#allocation8 + $0x2dc] sm:$0xf0] }
 0x28f   :  { %v14403_v36 = vpop.f32.mrf.mxu1  ;;  %v14405_v37 = vadd.f32 %v6786_v48, %v6458_v63  ;;  %3845 = vperm.xlu1 %12741, %v3235_v52   ;;  %v12229_v63 = vld [vmem:[#allocation8 + $0xe4] sm:$0xf0]  ;;  %v12288_v48 = vld [vmem:[#allocation8 + $0x2c4] sm:$0xf]  ;;  %v3271_v52 = vpop.permute.xlu1 %3270 }
 0x290   :  { %3770 = vperm.xlu0 %12740, %v3220_v28   ;;  %3850 = vperm.xlu2 %12742, %v3236_v15   ;;  %v10113_v28 = vld [vmem:[#allocation8 + $0xc8] sm:$0xf]  ;;  %v10363_v15 = vld [vmem:[#allocation8 + $0x2e0] sm:$0xf0] }
 0x294   :  { %v6459_v23 = vpop.f32.mrf.mxu2 }
 0x295   :  { %v6460_v19 = vadd.f32 %v6459_v23, %v3261_v13  ;;  %v6788_v5 = vpop.f32.mrf.mxu3  ;;  %v10362_v13 = vor.u32 %v12292_v27, %v10361_v8  ;;  %v10114_v23 = vor.u32 %v12229_v63, %v10113_v28  ;;  %v16865_v27 = vld [vmem:[#allocation36_spill] sm:$0xff] }
 0x296   :  { %v1912_v6 = vpop.f32.mrf.mxu0 }
 0x297   :  { %v14416_v34 = vpop.f32.mrf.mxu1  ;;  %v14418_v51 = vadd.f32 %v6788_v5, %v6460_v19  ;;  %3760 = vperm.xlu1 %12741, %v3218_v61   ;;  %v10366_v19 = vor.u32 %v12288_v48, %v10363_v15  ;;  %v16863_v61 = vld [vmem:[#allocation26_spill] sm:$0xff]  ;;  %v1913_v28 = vadd.f32 %v1912_v6, %v16865_v27  ;;  %v16866_v48 = vld [vmem:[#allocation21_spill] sm:$0xff] }
 0x298   :  { %3755 = vperm.xlu0 %12740, %v3217_v39   ;;  %3835 = vperm.xlu2 %12742, %v3233_v35  }
 0x299   :  { %6501 = vmatmul.bf16.gmra.mxu2 %v10330_v26  ;;  %7119 = vmatmul.bf16.gmra.mxu0 %v10082_v16  ;;  %v3276_v16 = vpop.permute.xlu2 %3275 }
 0x29a   :  { %6830 = vmatmul.bf16.gmra.mxu3 %v10334_v21 }
 0x29c   :  { %v6462_v7 = vpop.f32.mrf.mxu2 }
 0x29d   :  { %v6463_v25 = vadd.f32 %v6462_v7, %v3266_v9  ;;  %v6791_v0 = vpop.f32.mrf.mxu3  ;;  %v3214_v9 = vld [vmem:[%s16690_s4 + $0x318] sm:$0xff] }
 0x29e   :  { %v1914_v50 = vpop.f32.mrf.mxu0  ;;  %v16864_v7 = vld [vmem:[#allocation37_spill] sm:$0xff] }
 0x29f   :  { %v2243_v11 = vpop.f32.mrf.mxu1  ;;  %v14429_v55 = vadd.f32 %v6791_v0, %v6463_v25  ;;  %3745 = vperm.xlu1 %12741, %v3215_v22   ;;  %v3229_v22 = vld [vmem:[%s16690_s4 + $0x390] sm:$0xff] }
 0x2a0   :  { %3840 = vperm.xlu0 %12740, %v3234_v10   ;;  %3750 = vperm.xlu2 %12742, %v3216_v38   ;;  %v1915_v10 = vadd.f32 %v1914_v50, %v16864_v7  ;;  %v3230_v38 = vld [vmem:[%s16690_s4 + $0x398] sm:$0xff] }
 0x2a1   :  { %v16867_v50 = vld [vmem:[#allocation41_spill] sm:$0xff] }
 0x2a4   :  { %v6464_v31 = vpop.f32.mrf.mxu2 }
 0x2a5   :  { %v6465_v4 = vadd.f32 %v6464_v31, %v3271_v52  ;;  %v6793_v24 = vpop.f32.mrf.mxu3 }
 0x2a6   :  { %v1917_v39 = vpop.f32.mrf.mxu0 }
 0x2a7   :  { %v2246_v5 = vpop.f32.mrf.mxu1  ;;  %v14440_v35 = vadd.f32 %v6793_v24, %v6465_v4  ;;  %3830 = vperm.xlu1 %12741, %v3232_v62   ;;  %v1918_v26 = vadd.f32 %v1917_v39, %v16863_v61  ;;  %v2244_v4 = vadd.f32 %v2243_v11, %v1915_v10  ;;  %v12300_v62 = vld [vmem:[#allocation8 + $0x31c] sm:$0xf0]  ;;  %v16868_v39 = vld [vmem:[#allocation33_spill] sm:$0xff] }
 0x2a8   :  { %3825 = vperm.xlu0 %12740, %v3231_v58   ;;  %3735 = vperm.xlu2 %12742, %v3213_v18   ;;  %v1910_v58 = vadd.f32 %v14401_v33, %v16867_v50  ;;  %v10393_v18 = vld [vmem:[#allocation8 + $0x300] sm:$0xf]  ;;  %v1908_v6 = vadd.f32 %v14386_v45, %v16868_v39  ;;  %v3211_v10 = vld [vmem:[%s16690_s4 + $0x300] sm:$0xff] }
 0x2a9   :  { %6506 = vmatmul.bf16.gmra.mxu2 %v10362_v13  ;;  %7124 = vmatmul.bf16.gmra.mxu0 %v10114_v23  ;;  %v2247_v63 = vadd.f32 %v2246_v5, %v1918_v26  ;;  %v10145_v13 = vld [vmem:[#allocation8 + $0x108] sm:$0xf]  ;;  %v12296_v26 = vld [vmem:[#allocation8 + $0x304] sm:$0xf] }
 0x2aa   :  { %6835 = vmatmul.bf16.gmra.mxu3 %v10366_v19  ;;  %v12237_v23 = vld [vmem:[#allocation8 + $0x124] sm:$0xf0]  ;;  %v2242_v19 = vadd.f32 %v14416_v34, %v1913_v28  ;;  %v2239_v11 = vadd.f32 %v14403_v36, %v1910_v58  ;;  %v2237_v28 = vadd.f32 %v14388_v14, %v1908_v6 }
 0x2ab   :  { %v2473_v5 = vmax.f32 %v2247_v63, 0.0 }
 0x2ac   :  { %v6467_v21 = vpop.f32.mrf.mxu2  ;;  %v2471_v63 = vmax.f32 %v2242_v19, 0.0  ;;  %v2469_v14 = vmax.f32 %v2237_v28, 0.0 }
 0x2ad   :  { %v6468_v25 = vadd.f32 %v6467_v21, %v3276_v16  ;;  %v6796_v0 = vpop.f32.mrf.mxu3  ;;  %v10395_v16 = vld [vmem:[#allocation8 + $0x320] sm:$0xf0]  ;;  %v3281_v21 = vpop.permute.xlu0 %3280 }
 0x2ae   :  { %v1919_v8 = vpop.f32.mrf.mxu0  ;;  %v10398_v27 = vor.u32 %v12296_v26, %v10395_v16 }
 0x2af   :  { %v1920_v15 = vadd.f32 %v1919_v8, %v16866_v48  ;;  %v2248_v52 = vpop.f32.mrf.mxu1  ;;  %v14455_v31 = vadd.f32 %v6796_v0, %v6468_v25  ;;  %3815 = vperm.xlu1 %12741, %v3229_v22   ;;  %v10394_v25 = vor.u32 %v12300_v62, %v10393_v18  ;;  %v2472_v0 = vmax.f32 %v2244_v4, 0.0  ;;  %v3227_v22 = vld [vmem:[%s16690_s4 + $0x380] sm:$0xff]  ;;  %v16870_v48 = vld [vmem:[#allocation92_spill] sm:$0xff]  ;;  %v3286_v62 = vpop.permute.xlu1 %3285 }
 0x2b0   :  { %3740 = vperm.xlu0 %12740, %v3214_v9   ;;  %3820 = vperm.xlu2 %12742, %v3230_v38   ;;  %v16869_v9 = vld [vmem:[#allocation40_spill] sm:$0xff]  ;;  %v10146_v8 = vor.u32 %v12237_v23, %v10145_v13  ;;  %v2470_v4 = vmax.f32 %v2239_v11, 0.0  ;;  %v3228_v23 = vld [vmem:[%s16690_s4 + $0x388] sm:$0xff] }
 0x2b1   :  { %v2249_v24 = vadd.f32 %v2248_v52, %v1920_v15  ;;  %v1905_v33 = vadd.f32 %v14371_v3, %v16869_v9  ;;  %v3212_v3 = vld [vmem:[%s16690_s4 + $0x308] sm:$0xff]  ;;  %v2569_v18 = vpack.c.bf16 %v2472_v0, %v2471_v63  ;;  %v10177_v11 = vld [vmem:[#allocation8 + $0x148] sm:$0xf]  ;;  %v3291_v0 = vpop.permute.xlu2 %3290 }
 0x2b2   :  { %v10425_v9 = vld [vmem:[#allocation8 + $0x340] sm:$0xf] }
 0x2b3   :  { %v2474_v61 = vmax.f32 %v2249_v24, 0.0  ;;  %v2234_v58 = vadd.f32 %v14373_v53, %v1905_v33  ;;  %v12308_v33 = vld [vmem:[#allocation8 + $0x35c] sm:$0xf0] }
 0x2b4   :  { %v6469_v7 = vpop.f32.mrf.mxu2 }
 0x2b5   :  { %v6470_v45 = vadd.f32 %v6469_v7, %v3281_v21  ;;  %v6798_v38 = vpop.f32.mrf.mxu3  ;;  %v2570_v34 = vpack.c.bf16 %v2474_v61, %v2473_v5  ;;  %v2468_v39 = vmax.f32 %v2234_v58, 0.0  ;;  %v2568_v5 = vpack.c.bf16 %v2470_v4, %v2469_v14  ;;  %v12245_v7 = vld [vmem:[#allocation8 + $0x164] sm:$0xf0] }
 0x2b6   :  { %v1922_v36 = vpop.f32.mrf.mxu0  ;;  %v2467_v61 = vmax.f32 %v14360_v40, 0.0  ;;  %v10178_v40 = vor.u32 %v12245_v7, %v10177_v11  ;;  %v12253_v11 = vld [vmem:[#allocation8 + $0x1a4] sm:$0xf0]  ;;  %v12312_v7 = vld [vmem:[#allocation8 + $0x384] sm:$0xf] }
 0x2b7   :  { %v1923_v15 = vadd.f32 %v1922_v36, %v16870_v48  ;;  %v14476_v52 = vadd.f32 %v6798_v38, %v6470_v45  ;;  %7430 = vmatpush.bf16.msrb.mxu1 %v2570_v34  ;;  %v2251_v50 = vpop.f32.mrf.mxu1  ;;  %3730 = vperm.xlu1 %12741, %v3212_v3   ;;  %v16871_v3 = vld [vmem:[#allocation80_spill] sm:$0xff]  ;;  %v16872_v48 = vld [vmem:[#allocation74_spill] sm:$0xff] }
 0x2b8   :  { %3725 = vperm.xlu0 %12740, %v3211_v10   ;;  %3805 = vperm.xlu2 %12742, %v3227_v22   ;;  %v2567_v21 = vpack.c.bf16 %v2468_v39, %v2467_v61  ;;  %v12304_v10 = vld [vmem:[#allocation8 + $0x344] sm:$0xf]  ;;  %v10426_v22 = vor.u32 %v12308_v33, %v10425_v9  ;;  %v10457_v61 = vld [vmem:[#allocation8 + $0x380] sm:$0xf]  ;;  %v10209_v33 = vld [vmem:[#allocation8 + $0x188] sm:$0xf] }
 0x2b9   :  { %v14479_v24 = vadd.f32 %v2251_v50, %v1923_v15  ;;  %6511 = vmatmul.bf16.gmra.mxu2 %v10394_v25  ;;  %7129 = vmatmul.bf16.gmra.mxu0 %v10146_v8  ;;  %v10427_v25 = vld [vmem:[#allocation8 + $0x360] sm:$0xf0]  ;;  %v2080_v8 = vadd.f32 %v14344_v49, %v16871_v3  ;;  %v2078_v15 = vadd.f32 %v14328_v46, %v16872_v48  ;;  %v16873_v50 = vld [vmem:[#allocation78_spill] sm:$0xff]  ;;  %v3296_v49 = vpop.permute.xlu0 %3295 }
 0x2ba   :  { %6840 = vmatmul.bf16.gmra.mxu3 %v10398_v27  ;;  %v10430_v27 = vor.u32 %v12304_v10, %v10427_v25  ;;  %v2075_v58 = vadd.f32 %v14307_v44, %v16873_v50  ;;  %v12316_v9 = vld [vmem:[#allocation8 + $0x39c] sm:$0xf0]  ;;  %v10459_v10 = vld [vmem:[#allocation8 + $0x3a0] sm:$0xf0]  ;;  %v3301_v25 = vpop.permute.xlu1 %3300 }
 0x2bb   :  { %7431 = vmatpush.bf16.msrb.mxu1 %v2569_v18  ;;  %v2409_v4 = vadd.f32 %v14349_v43, %v2080_v8  ;;  %v16874_v18 = vld [vmem:[#allocation34_spill] sm:$0xff]  ;;  %v10462_v3 = vor.u32 %v12312_v7, %v10459_v10 }
 0x2bc   :  { %v6472_v13 = vpop.f32.mrf.mxu2  ;;  %v2073_v14 = vadd.f32 %v14291_v20, %v16874_v18  ;;  %v12209_v18 = vld [vmem:[#allocation8 + $0x4c] sm:$0xf] }
 0x2bd   :  { %v6473_v6 = vadd.f32 %v6472_v13, %v3286_v62  ;;  %v6801_v19 = vpop.f32.mrf.mxu3  ;;  %v2404_v13 = vadd.f32 %v14314_v57, %v2075_v58  ;;  %v2538_v39 = vmax.f32 %v2409_v4, 0.0 }
 0x2be   :  { %v14484_v53 = vpop.f32.mrf.mxu0  ;;  %v2402_v20 = vadd.f32 %v14296_v41, %v2073_v14  ;;  %v10210_v41 = vor.u32 %v12253_v11, %v10209_v33  ;;  %v10051_v14 = vld [vmem:[#allocation8 + $0x68] sm:$0xf0]  ;;  %v16875_v33 = vld [vmem:[#allocation77_spill] sm:$0xff] }
 0x2bf   :  { %v14487_v26 = vadd.f32 %v6801_v19, %v6473_v6  ;;  %7432 = vmatpush.bf16.msrb.mxu1 %v2568_v5  ;;  %v14489_v16 = vpop.f32.mrf.mxu1  ;;  %v10019_v19 = vld [vmem:[#allocation8 + $0x28] sm:$0xf0] }
 0x2c0   :  { %3810 = vperm.xlu0 %12740, %v3228_v23  }
 0x2c2   :  { %v3316_v7 = vpop.permute.xlu1 %3315 }
 0x2c3   :  { %7433 = vmatpush.bf16.msrb.mxu1 %v2567_v21 }
 0x2c4   :  { %v6474_v45 = vpop.f32.mrf.mxu2 }
 0x2c5   :  { %v6475_v38 = vadd.f32 %v6474_v45, %v3291_v0  ;;  %v6803_v34 = vpop.f32.mrf.mxu3 }
 0x2c6   :  { %v14493_v36 = vpop.f32.mrf.mxu0 }
 0x2c7   :  { %v14495_v28 = vadd.f32 %v6803_v34, %v6475_v38  ;;  %7434 = vmatpush.bf16.msrb.mxu1 %v14357_v17  ;;  %v14498_v63 = vpop.f32.mrf.mxu1  ;;  %v2407_v17 = vadd.f32 %v14334_v60, %v2078_v15  ;;  %v2536_v60 = vmax.f32 %v2404_v13, 0.0  ;;  %v10458_v34 = vor.u32 %v12316_v9, %v10457_v61  ;;  %v12324_v13 = vld [vmem:[#allocation8 + $0x3dc] sm:$0xf0] }
 0x2c9   :  { %6516 = vmatmul.bf16.gmra.mxu2 %v10426_v22  ;;  %7134 = vmatmul.bf16.gmra.mxu0 %v10178_v40  ;;  %v2537_v5 = vmax.f32 %v2407_v17, 0.0  ;;  %v10489_v17 = vld [vmem:[#allocation8 + $0x3c0] sm:$0xf] }
 0x2ca   :  { %6845 = vmatmul.bf16.gmra.mxu3 %v10430_v27 }
 0x2cb   :  { %7435 = vmatpush.bf16.msrb.mxu1 %v14322_v42  ;;  %v12201_v42 = vld [vmem:[#allocation8 + $0xc] sm:$0xf]  ;;  %v2602_v21 = vpack.c.bf16 %v2538_v39, %v2537_v5  ;;  %v12320_v39 = vld [vmem:[#allocation8 + $0x3c4] sm:$0xf] }
 0x2cc   :  { %v6477_v62 = vpop.f32.mrf.mxu2  ;;  %v10022_v57 = vor.u32 %v12201_v42, %v10019_v19  ;;  %v10491_v42 = vld [vmem:[#allocation8 + $0x3e0] sm:$0xf0]  ;;  %v3311_v19 = vpop.permute.xlu0 %3310 }
 0x2cd   :  { %v6478_v46 = vadd.f32 %v6477_v62, %v3296_v49  ;;  %v6806_v23 = vpop.f32.mrf.mxu3  ;;  %v10054_v62 = vor.u32 %v12209_v18, %v10051_v14  ;;  %v10521_v14 = vld [vmem:[#allocation8 + $0x400] sm:$0xf] }
 0x2ce   :  { %v14510_v44 = vpop.f32.mrf.mxu0 }
 0x2cf   :  { %v14512_v6 = vadd.f32 %v6806_v23, %v6478_v46  ;;  %7436 = vmatpush.bf16.msrb.mxu1 %v14286_v2  ;;  %v14515_v43 = vpop.f32.mrf.mxu1  ;;  %v2535_v2 = vmax.f32 %v2402_v20, 0.0  ;;  %v10241_v46 = vld [vmem:[#allocation8 + $0x1c8] sm:$0xf] }
 0x2d0   :  { %v12261_v23 = vld [vmem:[#allocation8 + $0x1e4] sm:$0xf0] }
 0x2d1   :  { %v2601_v40 = vpack.c.bf16 %v2536_v60, %v2535_v2  ;;  %v10490_v60 = vor.u32 %v12324_v13, %v10489_v17  ;;  %v10242_v61 = vor.u32 %v12261_v23, %v10241_v46  ;;  %v12332_v17 = vld [vmem:[#allocation8 + $0x41c] sm:$0xf0]  ;;  %v10273_v13 = vld [vmem:[#allocation8 + $0x208] sm:$0xf]  ;;  %v16880_v46 = vld [vmem:[#allocation93_spill] sm:$0xff] }
 0x2d2   :  { %v1928_v23 = vadd.f32 %v14493_v36, %v16880_v46 }
 0x2d3   :  { %7437 = vmatpush.bf16.msrb.mxu1 %v14239_v56  ;;  %v3306_v56 = vpop.permute.xlu2 %3305 }
 0x2d4   :  { %v6479_v0 = vpop.f32.mrf.mxu2 }
 0x2d5   :  { %v6480_v45 = vadd.f32 %v6479_v0, %v3301_v25  ;;  %v6808_v38 = vpop.f32.mrf.mxu3 }
 0x2d6   :  { %v1932_v22 = vpop.f32.mrf.mxu0  ;;  %7438 = vmatmul.bf16.vlgmr.msrb.gmra.mxu1 %v10022_v57  ;;  %v10494_v57 = vor.u32 %v12320_v39, %v10491_v42 }
 0x2d7   :  { %8746 = vmatpush.bf16.msra.mxu1 %v2602_v21  ;;  %v14519_v8 = vadd.f32 %v6808_v38, %v6480_v45  ;;  %v14521_v27 = vpop.f32.mrf.mxu1  ;;  %v16877_v38 = vld [vmem:[#allocation86_spill] sm:$0xff] }
 0x2d9   :  { %6521 = vmatmul.bf16.gmra.mxu2 %v10458_v34  ;;  %7139 = vmatmul.bf16.gmra.mxu0 %v10210_v41  ;;  %v1933_v34 = vadd.f32 %v1932_v22, %v16877_v38  ;;  %v12269_v22 = vld [vmem:[#allocation8 + $0x224] sm:$0xf0] }
 0x2da   :  { %6850 = vmatmul.bf16.gmra.mxu3 %v10462_v3 }
 0x2db   :  { %8747 = vmatpush.bf16.msra.mxu1 %v2601_v40  ;;  %v16878_v40 = vld [vmem:[#allocation30_spill] sm:$0xff]  ;;  %v2262_v39 = vadd.f32 %v14521_v27, %v1933_v34 }
 0x2dc   :  { %v6482_v48 = vpop.f32.mrf.mxu2 }
 0x2dd   :  { %v6483_v15 = vadd.f32 %v6482_v48, %v3306_v56  ;;  %v6811_v50 = vpop.f32.mrf.mxu3  ;;  %v12217_v48 = vld [vmem:[#allocation8 + $0x8c] sm:$0xf] }
 0x2de   :  { %v1934_v58 = vpop.f32.mrf.mxu0 }
 0x2df   :  { %8748 = vmatpush.bf16.msra.mxu1 %v14289_v32  ;;  %v14524_v4 = vadd.f32 %v6811_v50, %v6483_v15  ;;  %v2263_v49 = vpop.f32.mrf.mxu1  ;;  %v10083_v15 = vld [vmem:[#allocation8 + $0xa8] sm:$0xf0]  ;;  %v16879_v50 = vld [vmem:[#allocation94_spill] sm:$0xff] }
 0x2e0   :  { %v1930_v18 = vadd.f32 %v14510_v44, %v16879_v50  ;;  %v16881_v44 = vld [vmem:[#allocation18_spill] sm:$0xff] }
 0x2e3   :  { %8749 = vmatpush.bf16.msra.mxu1 %v14257_v1 }
 0x2e4   :  { %v6484_v20 = vpop.f32.mrf.mxu2 }
 0x2e5   :  { %v6485_v32 = vadd.f32 %v6484_v20, %v3311_v19  ;;  %v6813_v5 = vpop.f32.mrf.mxu3  ;;  %v12328_v20 = vld [vmem:[#allocation8 + $0x404] sm:$0xf] }
 0x2e6   :  { %v1937_v21 = vpop.f32.mrf.mxu0  ;;  %7443 = vmatmul.bf16.gmra.mxu1 %v10054_v62  ;;  %v10086_v62 = vor.u32 %v12217_v48, %v10083_v15  ;;  %v12225_v48 = vld [vmem:[#allocation8 + $0xcc] sm:$0xf] }
 0x2e7   :  { %8750 = vmatpush.bf16.msra.mxu1 %v14222_v59  ;;  %v14528_v9 = vadd.f32 %v6813_v5, %v6485_v32  ;;  %v2266_v1 = vpop.f32.mrf.mxu1  ;;  %v1938_v11 = vadd.f32 %v1937_v21, %v16875_v33  ;;  %v16876_v59 = vld [vmem:[#allocation83_spill] sm:$0xff]  ;;  %v3321_v5 = vpop.permute.xlu2 %3320  ;;  %v10115_v15 = vld [vmem:[#allocation8 + $0xe8] sm:$0xf0] }
 0x2e8   :  { %v1935_v25 = vadd.f32 %v1934_v58, %v16876_v59  ;;  %v10523_v32 = vld [vmem:[#allocation8 + $0x420] sm:$0xf0] }
 0x2e9   :  { %6526 = vmatmul.bf16.gmra.mxu2 %v10490_v60  ;;  %7144 = vmatmul.bf16.gmra.mxu0 %v10242_v61  ;;  %v2267_v41 = vadd.f32 %v2266_v1, %v1938_v11  ;;  %v10522_v61 = vor.u32 %v12332_v17, %v10521_v14  ;;  %v10274_v11 = vor.u32 %v12269_v22, %v10273_v13  ;;  %v10305_v14 = vld [vmem:[#allocation8 + $0x248] sm:$0xf]  ;;  %v10555_v13 = vld [vmem:[#allocation8 + $0x460] sm:$0xf0]  ;;  %v3331_v22 = vpop.permute.xlu1 %3330 }
 0x2ea   :  { %6855 = vmatmul.bf16.gmra.mxu3 %v10494_v57  ;;  %v10526_v27 = vor.u32 %v12328_v20, %v10523_v32  ;;  %v12277_v17 = vld [vmem:[#allocation8 + $0x264] sm:$0xf0] }
 0x2eb   :  { %8751 = vmatpush.bf16.msra.mxu1 %v14185_v29  ;;  %v2481_v42 = vmax.f32 %v2267_v41, 0.0 }
 0x2ec   :  { %v6487_v10 = vpop.f32.mrf.mxu2 }
 0x2ed   :  { %v6488_v2 = vadd.f32 %v6487_v10, %v3316_v7  ;;  %v6816_v0 = vpop.f32.mrf.mxu3  ;;  %v2257_v7 = vadd.f32 %v14498_v63, %v1928_v23  ;;  %v2479_v10 = vmax.f32 %v2262_v39, 0.0 }
 0x2ee   :  { %v1939_v45 = vpop.f32.mrf.mxu0 }
 0x2ef   :  { %8752 = vmatpush.bf16.msra.mxu1 %v14162_v54  ;;  %v1940_v3 = vadd.f32 %v1939_v45, %v16878_v40  ;;  %v14536_v29 = vadd.f32 %v6816_v0, %v6488_v2  ;;  %v2268_v56 = vpop.f32.mrf.mxu1  ;;  %v2264_v54 = vadd.f32 %v2263_v49, %v1935_v25  ;;  %v2259_v49 = vadd.f32 %v14515_v43, %v1930_v18  ;;  %v3326_v45 = vpop.permute.xlu0 %3325  ;;  %v10553_v18 = vld [vmem:[#allocation8 + $0x440] sm:$0xf] }
 0x2f0   :  { %v2477_v0 = vmax.f32 %v2257_v7, 0.0  ;;  %v12344_v7 = vld [vmem:[#allocation8 + $0x484] sm:$0xf] }
 0x2f1   :  { %v2269_v58 = vadd.f32 %v2268_v56, %v1940_v3  ;;  %v2480_v21 = vmax.f32 %v2264_v54, 0.0  ;;  %v2478_v43 = vmax.f32 %v2259_v49, 0.0  ;;  %v10118_v54 = vor.u32 %v12225_v48, %v10115_v15 }
 0x2f3   :  { %8753 = vmatpush.bf16.msra.mxu1 %v14140_v30  ;;  %v2482_v19 = vmax.f32 %v2269_v58, 0.0  ;;  %v1925_v30 = vadd.f32 %v14484_v53, %v16881_v44  ;;  %v2573_v2 = vpack.c.bf16 %v2480_v21, %v2479_v10  ;;  %v2572_v40 = vpack.c.bf16 %v2478_v43, %v2477_v0  ;;  %v12340_v58 = vld [vmem:[#allocation8 + $0x45c] sm:$0xf0]  ;;  %v10587_v10 = vld [vmem:[#allocation8 + $0x4a0] sm:$0xf0] }
 0x2f4   :  { %v6489_v60 = vpop.f32.mrf.mxu2  ;;  %v10554_v39 = vor.u32 %v12340_v58, %v10553_v18  ;;  %v10179_v58 = vld [vmem:[#allocation8 + $0x168] sm:$0xf0] }
 0x2f5   :  { %v6490_v57 = vadd.f32 %v6489_v60, %v3321_v5  ;;  %v6818_v1 = vpop.f32.mrf.mxu3  ;;  %v2574_v33 = vpack.c.bf16 %v2482_v19, %v2481_v42  ;;  %v2254_v53 = vadd.f32 %v14489_v16, %v1925_v30  ;;  %v10306_v42 = vor.u32 %v12277_v17, %v10305_v14  ;;  %v3336_v5 = vpop.permute.xlu2 %3335  ;;  %v10617_v14 = vld [vmem:[#allocation8 + $0x4c0] sm:$0xf] }
 0x2f6   :  { %v7110_v36 = vpop.f32.mrf.mxu0  ;;  %7448 = vmatmul.bf16.gmra.mxu1 %v10086_v62  ;;  %v12336_v62 = vld [vmem:[#allocation8 + $0x444] sm:$0xf] }
 0x2f7   :  { %v14548_v59 = vadd.f32 %v6818_v1, %v6490_v57  ;;  %v14551_v25 = vadd.f32 %v7110_v36, %v14375_v12  ;;  %7763 = vmatpush.bf16.msra.mxu2 %v2574_v33  ;;  %v2476_v34 = vmax.f32 %v2254_v53, 0.0  ;;  %v2475_v12 = vmax.f32 %v14479_v24, 0.0  ;;  %v12233_v57 = vld [vmem:[#allocation8 + $0x10c] sm:$0xf]  ;;  %v10585_v33 = vld [vmem:[#allocation8 + $0x480] sm:$0xf]  ;;  %v3341_v53 = vpop.permute.xlu0 %3340 }
 0x2f8   :  { %v10558_v19 = vor.u32 %v12336_v62, %v10555_v13  ;;  %v10147_v1 = vld [vmem:[#allocation8 + $0x128] sm:$0xf0]  ;;  %v12348_v36 = vld [vmem:[#allocation8 + $0x49c] sm:$0xf0]  ;;  %v12293_v13 = vld [vmem:[#allocation8 + $0x2e4] sm:$0xf0] }
 0x2f9   :  { %6531 = vmatmul.bf16.gmra.mxu2 %v10522_v61  ;;  %7149 = vmatmul.bf16.gmra.mxu0 %v10274_v11  ;;  %v2571_v50 = vpack.c.bf16 %v2476_v34, %v2475_v12  ;;  %v10150_v11 = vor.u32 %v12233_v57, %v10147_v1  ;;  %v12356_v62 = vld [vmem:[#allocation8 + $0x4dc] sm:$0xf0] }
 0x2fa   :  { %6860 = vmatmul.bf16.gmra.mxu3 %v10526_v27  ;;  %v12285_v27 = vld [vmem:[#allocation8 + $0x2a4] sm:$0xf0] }
 0x2fb   :  { %7764 = vmatpush.bf16.msra.mxu2 %v2573_v2 }
 0x2fc   :  { %v6492_v38 = vpop.f32.mrf.mxu2 }
 0x2fd   :  { %v6493_v63 = vadd.f32 %v6492_v38, %v3326_v45  ;;  %v6821_v41 = vpop.f32.mrf.mxu3  ;;  %v10586_v45 = vor.u32 %v12348_v36, %v10585_v33 }
 0x2fe   :  { %v7112_v3 = vpop.f32.mrf.mxu0 }
 0x2ff   :  { %v14555_v56 = vadd.f32 %v6821_v41, %v6493_v63  ;;  %v14558_v16 = vadd.f32 %v7112_v3, %v14390_v47  ;;  %7765 = vmatpush.bf16.msra.mxu2 %v2572_v40  ;;  %v10590_v63 = vor.u32 %v12344_v7, %v10587_v10  ;;  %v3346_v40 = vpop.permute.xlu1 %3345  ;;  %v10649_v7 = vld [vmem:[#allocation8 + $0x500] sm:$0xf] }
 0x303   :  { %7766 = vmatpush.bf16.msra.mxu2 %v2571_v50 }
 0x304   :  { %v6494_v46 = vpop.f32.mrf.mxu2 }
 0x305   :  { %v6495_v24 = vadd.f32 %v6494_v46, %v3331_v22  ;;  %v6823_v23 = vpop.f32.mrf.mxu3  ;;  %v12352_v22 = vld [vmem:[#allocation8 + $0x4c4] sm:$0xf] }
 0x306   :  { %v7115_v47 = vpop.f32.mrf.mxu0  ;;  %7453 = vmatmul.bf16.gmra.mxu1 %v10118_v54  ;;  %v12241_v54 = vld [vmem:[#allocation8 + $0x14c] sm:$0xf]  ;;  %v10619_v46 = vld [vmem:[#allocation8 + $0x4e0] sm:$0xf0] }
 0x307   :  { %v14560_v20 = vadd.f32 %v6823_v23, %v6495_v24  ;;  %v14563_v32 = vadd.f32 %v7115_v47, %v14405_v37  ;;  %v10337_v37 = vld [vmem:[#allocation8 + $0x288] sm:$0xf]  ;;  %v10182_v17 = vor.u32 %v12241_v54, %v10179_v58  ;;  %v3351_v24 = vpop.permute.xlu2 %3350  ;;  %v10618_v47 = vor.u32 %v12356_v62, %v10617_v14 }
 0x308   :  { %v10338_v38 = vor.u32 %v12285_v27, %v10337_v37  ;;  %v12249_v37 = vld [vmem:[#allocation8 + $0x18c] sm:$0xf] }
 0x309   :  { %6536 = vmatmul.bf16.gmra.mxu2 %v10554_v39  ;;  %7154 = vmatmul.bf16.gmra.mxu0 %v10306_v42  ;;  %v10211_v27 = vld [vmem:[#allocation8 + $0x1a8] sm:$0xf0] }
 0x30a   :  { %6865 = vmatmul.bf16.gmra.mxu3 %v10558_v19  ;;  %v10214_v10 = vor.u32 %v12249_v37, %v10211_v27 }
 0x30c   :  { %v6497_v44 = vpop.f32.mrf.mxu2 }
 0x30d   :  { %v6498_v30 = vadd.f32 %v6497_v44, %v3336_v5  ;;  %v6826_v49 = vpop.f32.mrf.mxu3  ;;  %v10622_v44 = vor.u32 %v12352_v22, %v10619_v46  ;;  %v12257_v22 = vld [vmem:[#allocation8 + $0x1cc] sm:$0xf] }
 0x30e   :  { %v7117_v60 = vpop.f32.mrf.mxu0  ;;  %v10243_v46 = vld [vmem:[#allocation8 + $0x1e8] sm:$0xf0] }
 0x30f   :  { %v14565_v61 = vadd.f32 %v6826_v49, %v6498_v30  ;;  %v14568_v21 = vadd.f32 %v7117_v60, %v14418_v51  ;;  %v3356_v49 = vpop.permute.xlu0 %3355  ;;  %v3366_v54 = vpop.permute.xlu2 %3365 }
 0x314   :  { %v6499_v43 = vpop.f32.mrf.mxu2 }
 0x315   :  { %v6500_v2 = vadd.f32 %v6499_v43, %v3341_v53  ;;  %v6828_v0 = vpop.f32.mrf.mxu3  ;;  %v12364_v53 = vld [vmem:[#allocation8 + $0x51c] sm:$0xf0]  ;;  %v12301_v43 = vld [vmem:[#allocation8 + $0x324] sm:$0xf0] }
 0x316   :  { %v7120_v34 = vpop.f32.mrf.mxu0  ;;  %7458 = vmatmul.bf16.gmra.mxu1 %v10150_v11 }
 0x317   :  { %v14570_v51 = vadd.f32 %v6828_v0, %v6500_v2  ;;  %v14573_v41 = vadd.f32 %v7120_v34, %v14429_v55  ;;  %v10369_v55 = vld [vmem:[#allocation8 + $0x2c8] sm:$0xf]  ;;  %v12360_v2 = vld [vmem:[#allocation8 + $0x504] sm:$0xf] }
 0x318   :  { %v10370_v19 = vor.u32 %v12293_v13, %v10369_v55  ;;  %v10651_v0 = vld [vmem:[#allocation8 + $0x520] sm:$0xf0] }
 0x319   :  { %6541 = vmatmul.bf16.gmra.mxu2 %v10586_v45  ;;  %7159 = vmatmul.bf16.gmra.mxu0 %v10338_v38  ;;  %v3361_v45 = vpop.permute.xlu1 %3360 }
 0x31a   :  { %6870 = vmatmul.bf16.gmra.mxu3 %v10590_v63 }
 0x31c   :  { %v6502_v3 = vpop.f32.mrf.mxu2 }
 0x31d   :  { %v6503_v12 = vadd.f32 %v6502_v3, %v3346_v40  ;;  %v6831_v48 = vpop.f32.mrf.mxu3  ;;  %v10650_v40 = vor.u32 %v12364_v53, %v10649_v7 }
 0x31e   :  { %v7122_v15 = vpop.f32.mrf.mxu0 }
 0x31f   :  { %v14575_v50 = vadd.f32 %v6831_v48, %v6503_v12  ;;  %v14578_v18 = vadd.f32 %v7122_v15, %v14440_v35  ;;  %v10654_v48 = vor.u32 %v12360_v2, %v10651_v0 }
 0x321   :  { %v3376_v7 = vpop.permute.xlu1 %3375 }
 0x324   :  { %v6504_v23 = vpop.f32.mrf.mxu2 }
 0x325   :  { %v6505_v39 = vadd.f32 %v6504_v23, %v3351_v24  ;;  %v6833_v42 = vpop.f32.mrf.mxu3  ;;  %v10681_v24 = vld [vmem:[#allocation8 + $0x540] sm:$0xf]  ;;  %v10246_v23 = vor.u32 %v12257_v22, %v10243_v46 }
 0x326   :  { %v7125_v5 = vpop.f32.mrf.mxu0  ;;  %7463 = vmatmul.bf16.gmra.mxu1 %v10182_v17 }
 0x327   :  { %v14580_v35 = vadd.f32 %v6833_v42, %v6505_v39  ;;  %v14583_v30 = vadd.f32 %v7125_v5, %v14455_v31  ;;  %v10401_v31 = vld [vmem:[#allocation8 + $0x308] sm:$0xf]  ;;  %v12372_v39 = vld [vmem:[#allocation8 + $0x55c] sm:$0xf0]  ;;  %v3371_v5 = vpop.permute.xlu0 %3370 }
 0x328   :  { %v10402_v3 = vor.u32 %v12301_v43, %v10401_v31  ;;  %v12309_v42 = vld [vmem:[#allocation8 + $0x364] sm:$0xf0] }
 0x329   :  { %6546 = vmatmul.bf16.gmra.mxu2 %v10618_v47  ;;  %7164 = vmatmul.bf16.gmra.mxu0 %v10370_v19  ;;  %v12368_v47 = vld [vmem:[#allocation8 + $0x544] sm:$0xf] }
 0x32a   :  { %6875 = vmatmul.bf16.gmra.mxu3 %v10622_v44  ;;  %v10683_v19 = vld [vmem:[#allocation8 + $0x560] sm:$0xf0] }
 0x32b   :  { %v10686_v37 = vor.u32 %v12368_v47, %v10683_v19 }
 0x32c   :  { %v6507_v60 = vpop.f32.mrf.mxu2 }
 0x32d   :  { %v6508_v57 = vadd.f32 %v6507_v60, %v3356_v49  ;;  %v6836_v1 = vpop.f32.mrf.mxu3 }
 0x32e   :  { %v7127_v33 = vpop.f32.mrf.mxu0 }
 0x32f   :  { %v14585_v11 = vadd.f32 %v6836_v1, %v6508_v57  ;;  %v14588_v36 = vadd.f32 %v7127_v33, %v14476_v52  ;;  %v10682_v57 = vor.u32 %v12372_v39, %v10681_v24  ;;  %v3386_v47 = vpop.permute.xlu0 %3385 }
 0x334   :  { %v6509_v38 = vpop.f32.mrf.mxu2 }
 0x335   :  { %v6510_v34 = vadd.f32 %v6509_v38, %v3361_v45  ;;  %v6838_v63 = vpop.f32.mrf.mxu3  ;;  %v12265_v45 = vld [vmem:[#allocation8 + $0x20c] sm:$0xf] }
 0x336   :  { %v7130_v12 = vpop.f32.mrf.mxu0  ;;  %7468 = vmatmul.bf16.gmra.mxu1 %v10214_v10  ;;  %v10275_v38 = vld [vmem:[#allocation8 + $0x228] sm:$0xf0] }
 0x337   :  { %v14590_v52 = vadd.f32 %v6838_v63, %v6510_v34  ;;  %v14593_v15 = vadd.f32 %v7130_v12, %v14487_v26  ;;  %v10433_v26 = vld [vmem:[#allocation8 + $0x348] sm:$0xf]  ;;  %v10713_v34 = vld [vmem:[#allocation8 + $0x580] sm:$0xf]  ;;  %v10278_v63 = vor.u32 %v12265_v45, %v10275_v38  ;;  %v3391_v45 = vpop.permute.xlu1 %3390 }
 0x338   :  { %v10434_v1 = vor.u32 %v12309_v42, %v10433_v26 }
 0x339   :  { %6551 = vmatmul.bf16.gmra.mxu2 %v10650_v40  ;;  %7169 = vmatmul.bf16.gmra.mxu0 %v10402_v3  ;;  %v12380_v40 = vld [vmem:[#allocation8 + $0x59c] sm:$0xf0]  ;;  %v12317_v3 = vld [vmem:[#allocation8 + $0x3a4] sm:$0xf0] }
 0x33a   :  { %6880 = vmatmul.bf16.gmra.mxu3 %v10654_v48  ;;  %v12376_v48 = vld [vmem:[#allocation8 + $0x584] sm:$0xf]  ;;  %v10714_v46 = vor.u32 %v12380_v40, %v10713_v34 }
 0x33c   :  { %v6512_v58 = vpop.f32.mrf.mxu2 }
 0x33d   :  { %v6513_v14 = vadd.f32 %v6512_v58, %v3366_v54  ;;  %v6841_v17 = vpop.f32.mrf.mxu3  ;;  %v10715_v54 = vld [vmem:[#allocation8 + $0x5a0] sm:$0xf0]  ;;  %v3381_v58 = vpop.permute.xlu2 %3380 }
 0x33e   :  { %v7132_v62 = vpop.f32.mrf.mxu0 }
 0x33f   :  { %v14595_v55 = vadd.f32 %v6841_v17, %v6513_v14  ;;  %v14598_v13 = vadd.f32 %v7132_v62, %v14495_v28 }
 0x344   :  { %v6514_v44 = vpop.f32.mrf.mxu2 }
 0x345   :  { %v6515_v49 = vadd.f32 %v6514_v44, %v3371_v5  ;;  %v6843_v60 = vpop.f32.mrf.mxu3 }
 0x346   :  { %v7135_v33 = vpop.f32.mrf.mxu0  ;;  %7473 = vmatmul.bf16.gmra.mxu1 %v10246_v23  ;;  %v10718_v23 = vor.u32 %v12376_v48, %v10715_v54 }
 0x347   :  { %v14600_v28 = vadd.f32 %v6843_v60, %v6515_v49  ;;  %v14603_v27 = vadd.f32 %v7135_v33, %v14512_v6  ;;  %v10465_v6 = vld [vmem:[#allocation8 + $0x388] sm:$0xf]  ;;  %v10745_v33 = vld [vmem:[#allocation8 + $0x5c0] sm:$0xf] }
 0x349   :  { %6556 = vmatmul.bf16.gmra.mxu2 %v10682_v57  ;;  %7174 = vmatmul.bf16.gmra.mxu0 %v10434_v1  ;;  %v12273_v1 = vld [vmem:[#allocation8 + $0x24c] sm:$0xf] }
 0x34a   :  { %6885 = vmatmul.bf16.gmra.mxu3 %v10686_v37 }
 0x34c   :  { %v6517_v10 = vpop.f32.mrf.mxu2 }
 0x34d   :  { %v6518_v53 = vadd.f32 %v6517_v10, %v3376_v7  ;;  %v6846_v31 = vpop.f32.mrf.mxu3  ;;  %v12388_v7 = vld [vmem:[#allocation8 + $0x5dc] sm:$0xf0]  ;;  %v10497_v10 = vld [vmem:[#allocation8 + $0x3c8] sm:$0xf] }
 0x34e   :  { %v7137_v43 = vpop.f32.mrf.mxu0 }
 0x34f   :  { %v14605_v2 = vadd.f32 %v6846_v31, %v6518_v53  ;;  %v14608_v0 = vadd.f32 %v7137_v43, %v14519_v8  ;;  %v10466_v8 = vor.u32 %v12317_v3, %v10465_v6  ;;  %v12325_v53 = vld [vmem:[#allocation8 + $0x3e4] sm:$0xf0]  ;;  %v12384_v43 = vld [vmem:[#allocation8 + $0x5c4] sm:$0xf]  ;;  %v10746_v6 = vor.u32 %v12388_v7, %v10745_v33  ;;  %v3401_v33 = vpop.permute.xlu0 %3400 }
 0x353   :  { %v7439_v12 = vpop.f32.mrf.mxu1 }
 0x354   :  { %v14611_v14 = vadd.f32 %v7439_v12, %v14551_v25  ;;  %v6519_v17 = vpop.f32.mrf.mxu2 }
 0x355   :  { %v6520_v62 = vadd.f32 %v6519_v17, %v3381_v58  ;;  %v6848_v22 = vpop.f32.mrf.mxu3  ;;  %v3396_v17 = vpop.permute.xlu2 %3395 }
 0x356   :  { %16882 = vst [vmem:[#allocation22_spill] sm:$0xff] %v14611_v14  ;;  %v7140_v24 = vpop.f32.mrf.mxu0  ;;  %7478 = vmatmul.bf16.gmra.mxu1 %v10278_v63 }
 0x357   :  { %v14613_v39 = vadd.f32 %v6848_v22, %v6520_v62  ;;  %v14616_v26 = vadd.f32 %v7140_v24, %v14524_v4  ;;  %v10307_v4 = vld [vmem:[#allocation8 + $0x268] sm:$0xf0] }
 0x358   :  { %v10310_v37 = vor.u32 %v12273_v1, %v10307_v4  ;;  %v12392_v4 = vld [vmem:[#allocation8 + $0x604] sm:$0xf] }
 0x359   :  { %6561 = vmatmul.bf16.gmra.mxu2 %v10714_v46  ;;  %7179 = vmatmul.bf16.gmra.mxu0 %v10466_v8 }
 0x35a   :  { %6890 = vmatmul.bf16.gmra.mxu3 %v10718_v23 }
 0x35b   :  { %v7441_v42 = vpop.f32.mrf.mxu1 }
 0x35c   :  { %v14619_v25 = vadd.f32 %v7441_v42, %v14558_v16  ;;  %v6522_v19 = vpop.f32.mrf.mxu2  ;;  %v10747_v16 = vld [vmem:[#allocation8 + $0x5e0] sm:$0xf0]  ;;  %v12281_v42 = vld [vmem:[#allocation8 + $0x28c] sm:$0xf] }
 0x35d   :  { %v6523_v5 = vadd.f32 %v6522_v19, %v3386_v47  ;;  %v6851_v44 = vpop.f32.mrf.mxu3  ;;  %v10750_v12 = vor.u32 %v12384_v43, %v10747_v16  ;;  %v10777_v47 = vld [vmem:[#allocation8 + $0x600] sm:$0xf] }
 0x35e   :  { %16883 = vst [vmem:[#allocation27_spill] sm:$0xff] %v14619_v25  ;;  %v7142_v49 = vpop.f32.mrf.mxu0 }
 0x35f   :  { %v14621_v60 = vadd.f32 %v6851_v44, %v6523_v5  ;;  %v14624_v57 = vadd.f32 %v7142_v49, %v14528_v9  ;;  %v10498_v9 = vor.u32 %v12325_v53, %v10497_v10  ;;  %v12396_v5 = vld [vmem:[#allocation8 + $0x61c] sm:$0xf0]  ;;  %v10529_v44 = vld [vmem:[#allocation8 + $0x408] sm:$0xf] }
 0x360   :  { %v12333_v49 = vld [vmem:[#allocation8 + $0x424] sm:$0xf0] }
 0x363   :  { %v7444_v31 = vpop.f32.mrf.mxu1 }
 0x364   :  { %v14627_v38 = vadd.f32 %v7444_v31, %v14563_v32  ;;  %v6524_v34 = vpop.f32.mrf.mxu2  ;;  %v10778_v31 = vor.u32 %v12396_v5, %v10777_v47  ;;  %v3411_v5 = vpop.permute.xlu2 %3410 }
 0x365   :  { %v6525_v63 = vadd.f32 %v6524_v34, %v3391_v45  ;;  %v6853_v40 = vpop.f32.mrf.mxu3 }
 0x366   :  { %16884 = vst [vmem:[#allocation50_spill] sm:$0xff] %v14627_v38  ;;  %v7145_v3 = vpop.f32.mrf.mxu0  ;;  %7483 = vmatmul.bf16.gmra.mxu1 %v10310_v37 }
 0x367   :  { %v14629_v48 = vadd.f32 %v6853_v40, %v6525_v63  ;;  %v14632_v54 = vadd.f32 %v7145_v3, %v14536_v29  ;;  %v10339_v29 = vld [vmem:[#allocation8 + $0x2a8] sm:$0xf0]  ;;  %v3406_v40 = vpop.permute.xlu1 %3405 }
 0x368   :  { %v10342_v19 = vor.u32 %v12281_v42, %v10339_v29  ;;  %v10561_v42 = vld [vmem:[#allocation8 + $0x448] sm:$0xf] }
 0x369   :  { %6566 = vmatmul.bf16.gmra.mxu2 %v10746_v6  ;;  %7184 = vmatmul.bf16.gmra.mxu0 %v10498_v9  ;;  %v12341_v29 = vld [vmem:[#allocation8 + $0x464] sm:$0xf0] }
 0x36a   :  { %6895 = vmatmul.bf16.gmra.mxu3 %v10750_v12 }
 0x36b   :  { %v7446_v58 = vpop.f32.mrf.mxu1 }
 0x36c   :  { %v14635_v32 = vadd.f32 %v7446_v58, %v14568_v21  ;;  %v6527_v62 = vpop.f32.mrf.mxu2  ;;  %v10779_v21 = vld [vmem:[#allocation8 + $0x620] sm:$0xf0] }
 0x36d   :  { %v6528_v22 = vadd.f32 %v6527_v62, %v3396_v17  ;;  %v6856_v46 = vpop.f32.mrf.mxu3  ;;  %v10782_v16 = vor.u32 %v12392_v4, %v10779_v21  ;;  %v12289_v62 = vld [vmem:[#allocation8 + $0x2cc] sm:$0xf] }
 0x36e   :  { %16885 = vst [vmem:[#allocation66_spill] sm:$0xff] %v14635_v32  ;;  %v7147_v8 = vpop.f32.mrf.mxu0 }
 0x36f   :  { %v14637_v24 = vadd.f32 %v6856_v46, %v6528_v22  ;;  %v14640_v23 = vadd.f32 %v7147_v8, %v14548_v59  ;;  %v10530_v59 = vor.u32 %v12333_v49, %v10529_v44  ;;  %v10809_v22 = vld [vmem:[#allocation8 + $0x640] sm:$0xf] }
 0x370   :  { %v12404_v8 = vld [vmem:[#allocation8 + $0x65c] sm:$0xf0] }
 0x371   :  { %v10810_v21 = vor.u32 %v12404_v8, %v10809_v22  ;;  %v10593_v22 = vld [vmem:[#allocation8 + $0x488] sm:$0xf] }
 0x373   :  { %v7449_v1 = vpop.f32.mrf.mxu1 }
 0x374   :  { %v14643_v37 = vadd.f32 %v7449_v1, %v14573_v41  ;;  %v6529_v7 = vpop.f32.mrf.mxu2 }
 0x375   :  { %v6530_v10 = vadd.f32 %v6529_v7, %v3401_v33  ;;  %v6858_v53 = vpop.f32.mrf.mxu3 }
 0x376   :  { %16886 = vst [vmem:[#allocation79_spill] sm:$0xff] %v14643_v37  ;;  %v7150_v43 = vpop.f32.mrf.mxu0  ;;  %7488 = vmatmul.bf16.gmra.mxu1 %v10342_v19  ;;  %v12400_v19 = vld [vmem:[#allocation8 + $0x644] sm:$0xf] }
 0x377   :  { %v14645_v45 = vadd.f32 %v6858_v53, %v6530_v10  ;;  %v14648_v34 = vadd.f32 %v7150_v43, %v14555_v56  ;;  %v10371_v56 = vld [vmem:[#allocation8 + $0x2e8] sm:$0xf0] }
 0x378   :  { %v10374_v46 = vor.u32 %v12289_v62, %v10371_v56  ;;  %v12412_v56 = vld [vmem:[#allocation8 + $0x69c] sm:$0xf0] }
 0x379   :  { %6571 = vmatmul.bf16.gmra.mxu2 %v10778_v31  ;;  %7189 = vmatmul.bf16.gmra.mxu0 %v10530_v59  ;;  %v3416_v59 = vpop.permute.xlu0 %3415 }
 0x37a   :  { %6900 = vmatmul.bf16.gmra.mxu3 %v10782_v16 }
 0x37b   :  { %v7451_v63 = vpop.f32.mrf.mxu1 }
 0x37c   :  { %v14651_v41 = vadd.f32 %v7451_v63, %v14578_v18  ;;  %v6532_v6 = vpop.f32.mrf.mxu2  ;;  %v10811_v18 = vld [vmem:[#allocation8 + $0x660] sm:$0xf0] }
 0x37d   :  { %v6533_v9 = vadd.f32 %v6532_v6, %v3406_v40  ;;  %v6861_v3 = vpop.f32.mrf.mxu3  ;;  %v10814_v7 = vor.u32 %v12400_v19, %v10811_v18 }
 0x37e   :  { %16887 = vst [vmem:[#allocation75_spill] sm:$0xff] %v14651_v41  ;;  %v7152_v12 = vpop.f32.mrf.mxu0 }
 0x37f   :  { %v14653_v58 = vadd.f32 %v6861_v3, %v6533_v9  ;;  %v14656_v17 = vadd.f32 %v7152_v12, %v14560_v20  ;;  %v10562_v20 = vor.u32 %v12341_v29, %v10561_v42  ;;  %v12297_v3 = vld [vmem:[#allocation8 + $0x30c] sm:$0xf]  ;;  %v10841_v12 = vld [vmem:[#allocation8 + $0x680] sm:$0xf]  ;;  %v12408_v42 = vld [vmem:[#allocation8 + $0x684] sm:$0xf]  ;;  %v3421_v29 = vpop.permute.xlu1 %3420 }
 0x383   :  { %v7454_v47 = vpop.f32.mrf.mxu1 }
 0x384   :  { %v14659_v44 = vadd.f32 %v7454_v47, %v14583_v30  ;;  %v6534_v49 = vpop.f32.mrf.mxu2 }
 0x385   :  { %v6535_v1 = vadd.f32 %v6534_v49, %v3411_v5  ;;  %v6863_v4 = vpop.f32.mrf.mxu3  ;;  %v10842_v49 = vor.u32 %v12412_v56, %v10841_v12  ;;  %v10625_v56 = vld [vmem:[#allocation8 + $0x4c8] sm:$0xf] }
 0x386   :  { %16888 = vst [vmem:[#allocation85_spill] sm:$0xff] %v14659_v44  ;;  %v7155_v33 = vpop.f32.mrf.mxu0  ;;  %7493 = vmatmul.bf16.gmra.mxu1 %v10374_v46  ;;  %v12349_v46 = vld [vmem:[#allocation8 + $0x4a4] sm:$0xf0] }
 0x387   :  { %v14661_v10 = vadd.f32 %v6863_v4, %v6535_v1  ;;  %v14664_v53 = vadd.f32 %v7155_v33, %v14565_v61  ;;  %v10403_v61 = vld [vmem:[#allocation8 + $0x328] sm:$0xf0] }
 0x388   :  { %v10406_v62 = vor.u32 %v12297_v3, %v10403_v61  ;;  %v12305_v3 = vld [vmem:[#allocation8 + $0x34c] sm:$0xf]  ;;  %v10873_v61 = vld [vmem:[#allocation8 + $0x6c0] sm:$0xf] }
 0x389   :  { %6576 = vmatmul.bf16.gmra.mxu2 %v10810_v21  ;;  %7194 = vmatmul.bf16.gmra.mxu0 %v10562_v20 }
 0x38a   :  { %6905 = vmatmul.bf16.gmra.mxu3 %v10814_v7  ;;  %v3426_v7 = vpop.permute.xlu2 %3425 }
 0x38b   :  { %v7456_v31 = vpop.f32.mrf.mxu1 }
 0x38c   :  { %v14667_v30 = vadd.f32 %v7456_v31, %v14588_v36  ;;  %v6537_v43 = vpop.f32.mrf.mxu2  ;;  %v10843_v36 = vld [vmem:[#allocation8 + $0x6a0] sm:$0xf0] }
 0x38d   :  { %v6538_v16 = vadd.f32 %v6537_v43, %v3416_v59  ;;  %v6866_v63 = vpop.f32.mrf.mxu3  ;;  %v10846_v4 = vor.u32 %v12408_v42, %v10843_v36  ;;  %v3431_v42 = vpop.permute.xlu0 %3430 }
 0x38e   :  { %16889 = vst [vmem:[#allocation58_spill] sm:$0xff] %v14667_v30  ;;  %v7157_v40 = vpop.f32.mrf.mxu0 }
 0x38f   :  { %v14669_v6 = vadd.f32 %v6866_v63, %v6538_v16  ;;  %v14672_v9 = vadd.f32 %v7157_v40, %v14570_v51  ;;  %v10594_v51 = vor.u32 %v12349_v46, %v10593_v22  ;;  %v12357_v22 = vld [vmem:[#allocation8 + $0x4e4] sm:$0xf0] }
 0x393   :  { %v7459_v8 = vpop.f32.mrf.mxu1 }
 0x394   :  { %v14675_v47 = vadd.f32 %v7459_v8, %v14593_v15  ;;  %v6539_v19 = vpop.f32.mrf.mxu2  ;;  %v12416_v8 = vld [vmem:[#allocation8 + $0x6c4] sm:$0xf] }
 0x395   :  { %v6540_v18 = vadd.f32 %v6539_v19, %v3421_v29  ;;  %v6868_v5 = vpop.f32.mrf.mxu3 }
 0x396   :  { %16890 = vst [vmem:[#allocation38_spill] sm:$0xff] %v14675_v47  ;;  %v7160_v1 = vpop.f32.mrf.mxu0  ;;  %7498 = vmatmul.bf16.gmra.mxu1 %v10406_v62  ;;  %v12420_v62 = vld [vmem:[#allocation8 + $0x6dc] sm:$0xf0] }
 0x397   :  { %v14677_v21 = vadd.f32 %v6868_v5, %v6540_v18  ;;  %v14680_v20 = vadd.f32 %v7160_v1, %v14575_v50  ;;  %v10435_v50 = vld [vmem:[#allocation8 + $0x368] sm:$0xf0]  ;;  %v10874_v5 = vor.u32 %v12420_v62, %v10873_v61 }
 0x398   :  { %v10438_v12 = vor.u32 %v12305_v3, %v10435_v50  ;;  %v12313_v61 = vld [vmem:[#allocation8 + $0x38c] sm:$0xf] }
 0x399   :  { %6581 = vmatmul.bf16.gmra.mxu2 %v10842_v49  ;;  %7199 = vmatmul.bf16.gmra.mxu0 %v10594_v51 }
 0x39a   :  { %6910 = vmatmul.bf16.gmra.mxu3 %v10846_v4 }
 0x39b   :  { %v7461_v33 = vpop.f32.mrf.mxu1 }
 0x39c   :  { %v14683_v15 = vadd.f32 %v7461_v33, %v14598_v13  ;;  %v6542_v31 = vpop.f32.mrf.mxu2  ;;  %v10875_v13 = vld [vmem:[#allocation8 + $0x6e0] sm:$0xf0] }
 0x39d   :  { %v6543_v59 = vadd.f32 %v6542_v31, %v3426_v7  ;;  %v6871_v43 = vpop.f32.mrf.mxu3  ;;  %v10878_v51 = vor.u32 %v12416_v8, %v10875_v13  ;;  %v3436_v7 = vpop.permute.xlu1 %3435  ;;  %v12424_v13 = vld [vmem:[#allocation8 + $0x704] sm:$0xf] }
 0x39e   :  { %16891 = vst [vmem:[#allocation64_spill] sm:$0xff] %v14683_v15  ;;  %v7162_v16 = vpop.f32.mrf.mxu0 }
 0x39f   :  { %v14685_v63 = vadd.f32 %v6871_v43, %v6543_v59  ;;  %v14688_v40 = vadd.f32 %v7162_v16, %v14580_v35  ;;  %v10626_v35 = vor.u32 %v12357_v22, %v10625_v56  ;;  %v12428_v56 = vld [vmem:[#allocation8 + $0x71c] sm:$0xf0]  ;;  %v10657_v22 = vld [vmem:[#allocation8 + $0x508] sm:$0xf] }
 0x3a3   :  { %v7464_v46 = vpop.f32.mrf.mxu1 }
 0x3a4   :  { %v14691_v36 = vadd.f32 %v7464_v46, %v14603_v27  ;;  %v6544_v29 = vpop.f32.mrf.mxu2  ;;  %v12365_v46 = vld [vmem:[#allocation8 + $0x524] sm:$0xf0] }
 0x3a5   :  { %v6545_v19 = vadd.f32 %v6544_v29, %v3431_v42  ;;  %v6873_v18 = vpop.f32.mrf.mxu3  ;;  %v3441_v42 = vpop.permute.xlu2 %3440 }
 0x3a6   :  { %16892 = vst [vmem:[#allocation31_spill] sm:$0xff] %v14691_v36  ;;  %v7165_v49 = vpop.f32.mrf.mxu0  ;;  %7503 = vmatmul.bf16.gmra.mxu1 %v10438_v12  ;;  %v10905_v12 = vld [vmem:[#allocation8 + $0x700] sm:$0xf] }
 0x3a7   :  { %v14693_v1 = vadd.f32 %v6873_v18, %v6545_v19  ;;  %v14696_v4 = vadd.f32 %v7165_v49, %v14585_v11  ;;  %v10467_v11 = vld [vmem:[#allocation8 + $0x3a8] sm:$0xf0] }
 0x3a8   :  { %v10470_v62 = vor.u32 %v12313_v61, %v10467_v11 }
 0x3a9   :  { %6586 = vmatmul.bf16.gmra.mxu2 %v10874_v5  ;;  %7204 = vmatmul.bf16.gmra.mxu0 %v10626_v35  ;;  %v10906_v35 = vor.u32 %v12428_v56, %v10905_v12  ;;  %v12321_v56 = vld [vmem:[#allocation8 + $0x3cc] sm:$0xf] }
 0x3aa   :  { %6915 = vmatmul.bf16.gmra.mxu3 %v10878_v51 }
 0x3ab   :  { %v7466_v33 = vpop.f32.mrf.mxu1 }
 0x3ac   :  { %v14699_v27 = vadd.f32 %v7466_v33, %v14608_v0  ;;  %v6547_v31 = vpop.f32.mrf.mxu2  ;;  %v10907_v0 = vld [vmem:[#allocation8 + $0x720] sm:$0xf0] }
 0x3ad   :  { %v6548_v59 = vadd.f32 %v6547_v31, %v3436_v7  ;;  %v6876_v43 = vpop.f32.mrf.mxu3  ;;  %v10910_v51 = vor.u32 %v12424_v13, %v10907_v0  ;;  %v10689_v13 = vld [vmem:[#allocation8 + $0x548] sm:$0xf] }
 0x3ae   :  { %16893 = vst [vmem:[#allocation70_spill] sm:$0xff] %v14699_v27  ;;  %v7167_v16 = vpop.f32.mrf.mxu0  ;;  %v12373_v0 = vld [vmem:[#allocation8 + $0x564] sm:$0xf0] }
 0x3af   :  { %v14701_v3 = vadd.f32 %v6876_v43, %v6548_v59  ;;  %v14704_v50 = vadd.f32 %v7167_v16, %v14590_v52  ;;  %v10658_v52 = vor.u32 %v12365_v46, %v10657_v22  ;;  %v3446_v59 = vpop.permute.xlu0 %3445  ;;  %v10937_v22 = vld [vmem:[#allocation8 + $0x740] sm:$0xf] }
 0x3b3   :  { %v7469_v8 = vpop.f32.mrf.mxu1 }
 0x3b4   :  { %v14707_v29 = vadd.f32 %v7469_v8, %v14616_v26  ;;  %v6549_v19 = vpop.f32.mrf.mxu2  ;;  %v12436_v8 = vld [vmem:[#allocation8 + $0x75c] sm:$0xf0] }
 0x3b5   :  { %v6550_v18 = vadd.f32 %v6549_v19, %v3441_v42  ;;  %v6878_v5 = vpop.f32.mrf.mxu3  ;;  %v12432_v19 = vld [vmem:[#allocation8 + $0x744] sm:$0xf] }
 0x3b6   :  { %16894 = vst [vmem:[#allocation91_spill] sm:$0xff] %v14707_v29  ;;  %v7170_v49 = vpop.f32.mrf.mxu0  ;;  %7508 = vmatmul.bf16.gmra.mxu1 %v10470_v62 }
 0x3b7   :  { %v14709_v33 = vadd.f32 %v6878_v5, %v6550_v18  ;;  %v14712_v7 = vadd.f32 %v7170_v49, %v14595_v55  ;;  %v10499_v55 = vld [vmem:[#allocation8 + $0x3e8] sm:$0xf0]  ;;  %v3451_v18 = vpop.permute.xlu1 %3450 }
 0x3b8   :  { %v10502_v46 = vor.u32 %v12321_v56, %v10499_v55 }
 0x3b9   :  { %6591 = vmatmul.bf16.gmra.mxu2 %v10906_v35  ;;  %7209 = vmatmul.bf16.gmra.mxu0 %v10658_v52 }
 0x3ba   :  { %6920 = vmatmul.bf16.gmra.mxu3 %v10910_v51  ;;  %v10938_v51 = vor.u32 %v12436_v8, %v10937_v22 }
 0x3bb   :  { %v7471_v31 = vpop.f32.mrf.mxu1 }
 0x3bc   :  { %v14715_v26 = vadd.f32 %v7471_v31, %v14624_v57  ;;  %v6552_v43 = vpop.f32.mrf.mxu2  ;;  %v10939_v57 = vld [vmem:[#allocation8 + $0x760] sm:$0xf0] }
 0x3bd   :  { %v6553_v16 = vadd.f32 %v6552_v43, %v3446_v59  ;;  %v6881_v61 = vpop.f32.mrf.mxu3  ;;  %v10942_v59 = vor.u32 %v12432_v19, %v10939_v57  ;;  %v12444_v57 = vld [vmem:[#allocation8 + $0x79c] sm:$0xf0] }
 0x3be   :  { %16895 = vst [vmem:[#allocation68_spill] sm:$0xff] %v14715_v26  ;;  %v7172_v11 = vpop.f32.mrf.mxu0 }
 0x3bf   :  { %v14717_v12 = vadd.f32 %v6881_v61, %v6553_v16  ;;  %v14720_v62 = vadd.f32 %v7172_v11, %v14600_v28  ;;  %v10690_v28 = vor.u32 %v12373_v0, %v10689_v13  ;;  %v3456_v11 = vpop.permute.xlu2 %3455  ;;  %v12329_v0 = vld [vmem:[#allocation8 + $0x40c] sm:$0xf] }
 0x3c3   :  { %v7474_v42 = vpop.f32.mrf.mxu1 }
 0x3c4   :  { %v14723_v5 = vadd.f32 %v7474_v42, %v14632_v54  ;;  %v6554_v35 = vpop.f32.mrf.mxu2  ;;  %v10969_v42 = vld [vmem:[#allocation8 + $0x780] sm:$0xf] }
 0x3c5   :  { %v6555_v52 = vadd.f32 %v6554_v35, %v3451_v18  ;;  %v6883_v49 = vpop.f32.mrf.mxu3  ;;  %v10721_v18 = vld [vmem:[#allocation8 + $0x588] sm:$0xf] }
 0x3c6   :  { %16896 = vst [vmem:[#allocation65_spill] sm:$0xff] %v14723_v5  ;;  %v7175_v31 = vpop.f32.mrf.mxu0  ;;  %7513 = vmatmul.bf16.gmra.mxu1 %v10502_v46  ;;  %v12381_v35 = vld [vmem:[#allocation8 + $0x5a4] sm:$0xf0] }
 0x3c7   :  { %v14725_v43 = vadd.f32 %v6883_v49, %v6555_v52  ;;  %v14728_v16 = vadd.f32 %v7175_v31, %v14605_v2  ;;  %v10531_v2 = vld [vmem:[#allocation8 + $0x428] sm:$0xf0]  ;;  %v12440_v49 = vld [vmem:[#allocation8 + $0x784] sm:$0xf] }
 0x3c8   :  { %v10534_v19 = vor.u32 %v12329_v0, %v10531_v2  ;;  %v3466_v2 = vpop.permute.xlu1 %3465 }
 0x3c9   :  { %6596 = vmatmul.bf16.gmra.mxu2 %v10938_v51  ;;  %7214 = vmatmul.bf16.gmra.mxu0 %v10690_v28  ;;  %v3461_v51 = vpop.permute.xlu0 %3460 }
 0x3ca   :  { %6925 = vmatmul.bf16.gmra.mxu3 %v10942_v59 }
 0x3cb   :  { %v7476_v61 = vpop.f32.mrf.mxu1 }
 0x3cc   :  { %v14731_v54 = vadd.f32 %v7476_v61, %v14640_v23  ;;  %v6557_v56 = vpop.f32.mrf.mxu2  ;;  %v10971_v23 = vld [vmem:[#allocation8 + $0x7a0] sm:$0xf0] }
 0x3cd   :  { %v6558_v55 = vadd.f32 %v6557_v56, %v3456_v11  ;;  %v6886_v22 = vpop.f32.mrf.mxu3  ;;  %v10970_v11 = vor.u32 %v12444_v57, %v10969_v42 }
 0x3ce   :  { %16897 = vst [vmem:[#allocation71_spill] sm:$0xff] %v14731_v54  ;;  %v7177_v8 = vpop.f32.mrf.mxu0 }
 0x3cf   :  { %v14733_v13 = vadd.f32 %v6886_v22, %v6558_v55  ;;  %v14736_v46 = vadd.f32 %v7177_v8, %v14613_v39  ;;  %v10722_v39 = vor.u32 %v12381_v35, %v10721_v18  ;;  %v10974_v55 = vor.u32 %v12440_v49, %v10971_v23  ;;  %v12337_v35 = vld [vmem:[#allocation8 + $0x44c] sm:$0xf]  ;;  %v11001_v49 = vld [vmem:[#allocation8 + $0x7c0] sm:$0xf] }
 0x3d3   :  { %v7479_v52 = vpop.f32.mrf.mxu1 }
 0x3d4   :  { %v14739_v28 = vadd.f32 %v7479_v52, %v14648_v34  ;;  %v6559_v31 = vpop.f32.mrf.mxu2 }
 0x3d5   :  { %v6560_v59 = vadd.f32 %v6559_v31, %v3461_v51  ;;  %v6888_v61 = vpop.f32.mrf.mxu3  ;;  %v12452_v31 = vld [vmem:[#allocation8 + $0x7dc] sm:$0xf0] }
 0x3d6   :  { %16898 = vst [vmem:[#allocation69_spill] sm:$0xff] %v14739_v28  ;;  %v7180_v56 = vpop.f32.mrf.mxu0  ;;  %7518 = vmatmul.bf16.gmra.mxu1 %v10534_v19  ;;  %v3476_v28 = vpop.permute.xlu0 %3475 }
 0x3d7   :  { %v14741_v22 = vadd.f32 %v6888_v61, %v6560_v59  ;;  %v14744_v8 = vadd.f32 %v7180_v56, %v14621_v60  ;;  %v10563_v60 = vld [vmem:[#allocation8 + $0x468] sm:$0xf0]  ;;  %v10753_v59 = vld [vmem:[#allocation8 + $0x5c8] sm:$0xf]  ;;  %v3471_v56 = vpop.permute.xlu2 %3470 }
 0x3d8   :  { %v10566_v23 = vor.u32 %v12337_v35, %v10563_v60  ;;  %v12389_v61 = vld [vmem:[#allocation8 + $0x5e4] sm:$0xf0] }
 0x3d9   :  { %6601 = vmatmul.bf16.gmra.mxu2 %v10970_v11  ;;  %7219 = vmatmul.bf16.gmra.mxu0 %v10722_v39  ;;  %v12448_v39 = vld [vmem:[#allocation8 + $0x7c4] sm:$0xf] }
 0x3da   :  { %6930 = vmatmul.bf16.gmra.mxu3 %v10974_v55 }
 0x3db   :  { %v7481_v0 = vpop.f32.mrf.mxu1 }
 0x3dc   :  { %v14747_v34 = vadd.f32 %v7481_v0, %v14656_v17  ;;  %v6562_v52 = vpop.f32.mrf.mxu2  ;;  %v11003_v17 = vld [vmem:[#allocation8 + $0x7e0] sm:$0xf0] }
 0x3dd   :  { %v6563_v51 = vadd.f32 %v6562_v52, %v3466_v2  ;;  %v6891_v42 = vpop.f32.mrf.mxu3 }
 0x3de   :  { %16899 = vst [vmem:[#allocation81_spill] sm:$0xff] %v14747_v34  ;;  %v7182_v57 = vpop.f32.mrf.mxu0 }
 0x3df   :  { %v14749_v18 = vadd.f32 %v6891_v42, %v6563_v51  ;;  %v14752_v19 = vadd.f32 %v7182_v57, %v14629_v48  ;;  %v11002_v51 = vor.u32 %v12452_v31, %v11001_v49  ;;  %v10754_v48 = vor.u32 %v12389_v61, %v10753_v59  ;;  %v12345_v61 = vld [vmem:[#allocation8 + $0x48c] sm:$0xf] }
 0x3e0   :  { %v11006_v57 = vor.u32 %v12448_v39, %v11003_v17  ;;  %v11033_v39 = vld [vmem:[#allocation8 + $0x800] sm:$0xf] }
 0x3e3   :  { %v7484_v11 = vpop.f32.mrf.mxu1 }
 0x3e4   :  { %v14755_v55 = vadd.f32 %v7484_v11, %v14664_v53  ;;  %v6564_v0 = vpop.f32.mrf.mxu2 }
 0x3e5   :  { %v6565_v2 = vadd.f32 %v6564_v0, %v3471_v56  ;;  %v6893_v52 = vpop.f32.mrf.mxu3  ;;  %v12460_v0 = vld [vmem:[#allocation8 + $0x81c] sm:$0xf0] }
 0x3e6   :  { %16900 = vst [vmem:[#allocation46_spill] sm:$0xff] %v14755_v55  ;;  %v7185_v42 = vpop.f32.mrf.mxu0  ;;  %7523 = vmatmul.bf16.gmra.mxu1 %v10566_v23  ;;  %v3486_v55 = vpop.permute.xlu2 %3485 }
 0x3e7   :  { %v14757_v34 = vadd.f32 %v6893_v52, %v6565_v2  ;;  %v14760_v35 = vadd.f32 %v7185_v42, %v14637_v24  ;;  %v10595_v24 = vld [vmem:[#allocation8 + $0x4a8] sm:$0xf0]  ;;  %v10785_v2 = vld [vmem:[#allocation8 + $0x608] sm:$0xf]  ;;  %v3481_v42 = vpop.permute.xlu1 %3480 }
 0x3e8   :  { %v10598_v17 = vor.u32 %v12345_v61, %v10595_v24  ;;  %v12397_v52 = vld [vmem:[#allocation8 + $0x624] sm:$0xf0] }
 0x3e9   :  { %6606 = vmatmul.bf16.gmra.mxu2 %v11002_v51  ;;  %7224 = vmatmul.bf16.gmra.mxu0 %v10754_v48  ;;  %v12456_v48 = vld [vmem:[#allocation8 + $0x804] sm:$0xf] }
 0x3ea   :  { %6935 = vmatmul.bf16.gmra.mxu3 %v11006_v57 }
 0x3eb   :  { %v7486_v60 = vpop.f32.mrf.mxu1 }
 0x3ec   :  { %v14763_v53 = vadd.f32 %v7486_v60, %v14672_v9  ;;  %v6567_v11 = vpop.f32.mrf.mxu2  ;;  %v11035_v9 = vld [vmem:[#allocation8 + $0x820] sm:$0xf0] }
 0x3ed   :  { %v6568_v56 = vadd.f32 %v6567_v11, %v3476_v28  ;;  %v6896_v49 = vpop.f32.mrf.mxu3 }
 0x3ee   :  { %16901 = vst [vmem:[#allocation35_spill] sm:$0xff] %v14763_v53  ;;  %v7187_v31 = vpop.f32.mrf.mxu0 }
 0x3ef   :  { %v14765_v59 = vadd.f32 %v6896_v49, %v6568_v56  ;;  %v14768_v23 = vadd.f32 %v7187_v31, %v14645_v45  ;;  %v11034_v56 = vor.u32 %v12460_v0, %v11033_v39  ;;  %v10786_v45 = vor.u32 %v12397_v52, %v10785_v2  ;;  %v12353_v52 = vld [vmem:[#allocation8 + $0x4cc] sm:$0xf] }
 0x3f0   :  { %v11038_v31 = vor.u32 %v12456_v48, %v11035_v9  ;;  %v11065_v48 = vld [vmem:[#allocation8 + $0x840] sm:$0xf] }
 0x3f3   :  { %v7489_v51 = vpop.f32.mrf.mxu1 }
 0x3f4   :  { %v14771_v28 = vadd.f32 %v7489_v51, %v14680_v20  ;;  %v6569_v57 = vpop.f32.mrf.mxu2 }
 0x3f5   :  { %v6570_v60 = vadd.f32 %v6569_v57, %v3481_v42  ;;  %v6898_v11 = vpop.f32.mrf.mxu3  ;;  %v12468_v57 = vld [vmem:[#allocation8 + $0x85c] sm:$0xf0] }
 0x3f6   :  { %16902 = vst [vmem:[#allocation90_spill] sm:$0xff] %v14771_v28  ;;  %v7190_v49 = vpop.f32.mrf.mxu0  ;;  %7528 = vmatmul.bf16.gmra.mxu1 %v10598_v17  ;;  %v3496_v28 = vpop.permute.xlu1 %3495 }
 0x3f7   :  { %v14773_v53 = vadd.f32 %v6898_v11, %v6570_v60  ;;  %v14776_v61 = vadd.f32 %v7190_v49, %v14653_v58  ;;  %v10627_v58 = vld [vmem:[#allocation8 + $0x4e8] sm:$0xf0]  ;;  %v10817_v60 = vld [vmem:[#allocation8 + $0x648] sm:$0xf]  ;;  %v3491_v49 = vpop.permute.xlu0 %3490 }
 0x3f8   :  { %v10630_v9 = vor.u32 %v12353_v52, %v10627_v58  ;;  %v12405_v11 = vld [vmem:[#allocation8 + $0x664] sm:$0xf0] }
 0x3f9   :  { %6611 = vmatmul.bf16.gmra.mxu2 %v11034_v56  ;;  %7229 = vmatmul.bf16.gmra.mxu0 %v10786_v45  ;;  %v12464_v45 = vld [vmem:[#allocation8 + $0x844] sm:$0xf] }
 0x3fa   :  { %6940 = vmatmul.bf16.gmra.mxu3 %v11038_v31 }
 0x3fb   :  { %v7491_v24 = vpop.f32.mrf.mxu1 }
 0x3fc   :  { %v14779_v20 = vadd.f32 %v7491_v24, %v14688_v40  ;;  %v6572_v51 = vpop.f32.mrf.mxu2  ;;  %v11067_v40 = vld [vmem:[#allocation8 + $0x860] sm:$0xf0] }
 0x3fd   :  { %v6573_v42 = vadd.f32 %v6572_v51, %v3486_v55  ;;  %v6901_v39 = vpop.f32.mrf.mxu3 }
 0x3fe   :  { %16903 = vst [vmem:[#allocation60_spill] sm:$0xff] %v14779_v20  ;;  %v7192_v0 = vpop.f32.mrf.mxu0 }
 0x3ff   :  { %v14781_v2 = vadd.f32 %v6901_v39, %v6573_v42  ;;  %v14784_v17 = vadd.f32 %v7192_v0, %v14661_v10  ;;  %v11066_v42 = vor.u32 %v12468_v57, %v11065_v48  ;;  %v10818_v10 = vor.u32 %v12405_v11, %v10817_v60  ;;  %v12361_v11 = vld [vmem:[#allocation8 + $0x50c] sm:$0xf] }
 0x400   :  { %v11070_v0 = vor.u32 %v12464_v45, %v11067_v40  ;;  %v11097_v45 = vld [vmem:[#allocation8 + $0x880] sm:$0xf] }
 0x403   :  { %v7494_v56 = vpop.f32.mrf.mxu1 }
 0x404   :  { %v14787_v55 = vadd.f32 %v7494_v56, %v14696_v4  ;;  %v6574_v31 = vpop.f32.mrf.mxu2 }
 0x405   :  { %v6575_v24 = vadd.f32 %v6574_v31, %v3491_v49  ;;  %v6903_v51 = vpop.f32.mrf.mxu3  ;;  %v12476_v31 = vld [vmem:[#allocation8 + $0x89c] sm:$0xf0] }
 0x406   :  { %16904 = vst [vmem:[#allocation97_spill] sm:$0xff] %v14787_v55  ;;  %v7195_v39 = vpop.f32.mrf.mxu0  ;;  %7533 = vmatmul.bf16.gmra.mxu1 %v10630_v9  ;;  %v3506_v55 = vpop.permute.xlu0 %3505 }
 0x407   :  { %v14789_v20 = vadd.f32 %v6903_v51, %v6575_v24  ;;  %v14792_v52 = vadd.f32 %v7195_v39, %v14669_v6  ;;  %v10659_v6 = vld [vmem:[#allocation8 + $0x528] sm:$0xf0]  ;;  %v10849_v24 = vld [vmem:[#allocation8 + $0x688] sm:$0xf]  ;;  %v3501_v39 = vpop.permute.xlu2 %3500 }
 0x408   :  { %v10662_v40 = vor.u32 %v12361_v11, %v10659_v6  ;;  %v12413_v51 = vld [vmem:[#allocation8 + $0x6a4] sm:$0xf0] }
 0x409   :  { %6616 = vmatmul.bf16.gmra.mxu2 %v11066_v42  ;;  %7234 = vmatmul.bf16.gmra.mxu0 %v10818_v10  ;;  %v12472_v10 = vld [vmem:[#allocation8 + $0x884] sm:$0xf] }
 0x40a   :  { %6945 = vmatmul.bf16.gmra.mxu3 %v11070_v0 }
 0x40b   :  { %v7496_v58 = vpop.f32.mrf.mxu1 }
 0x40c   :  { %v14795_v4 = vadd.f32 %v7496_v58, %v14704_v50  ;;  %v6577_v56 = vpop.f32.mrf.mxu2  ;;  %v11099_v50 = vld [vmem:[#allocation8 + $0x8a0] sm:$0xf0] }
 0x40d   :  { %v6578_v49 = vadd.f32 %v6577_v56, %v3496_v28  ;;  %v6906_v48 = vpop.f32.mrf.mxu3 }
 0x40e   :  { %16905 = vst [vmem:[#allocation56_spill] sm:$0xff] %v14795_v4  ;;  %v7197_v57 = vpop.f32.mrf.mxu0 }
 0x40f   :  { %v14797_v60 = vadd.f32 %v6906_v48, %v6578_v49  ;;  %v14800_v9 = vadd.f32 %v7197_v57, %v14677_v21  ;;  %v11098_v49 = vor.u32 %v12476_v31, %v11097_v45  ;;  %v10850_v21 = vor.u32 %v12413_v51, %v10849_v24  ;;  %v12369_v51 = vld [vmem:[#allocation8 + $0x54c] sm:$0xf] }
 0x410   :  { %v11102_v57 = vor.u32 %v12472_v10, %v11099_v50  ;;  %v11129_v10 = vld [vmem:[#allocation8 + $0x8c0] sm:$0xf] }
 0x413   :  { %v7499_v42 = vpop.f32.mrf.mxu1 }
 0x414   :  { %v14803_v28 = vadd.f32 %v7499_v42, %v14712_v7  ;;  %v6579_v0 = vpop.f32.mrf.mxu2 }
 0x415   :  { %v6580_v58 = vadd.f32 %v6579_v0, %v3501_v39  ;;  %v6908_v56 = vpop.f32.mrf.mxu3  ;;  %v12484_v0 = vld [vmem:[#allocation8 + $0x8dc] sm:$0xf0] }
 0x416   :  { %16906 = vst [vmem:[#allocation61_spill] sm:$0xff] %v14803_v28  ;;  %v7200_v48 = vpop.f32.mrf.mxu0  ;;  %7538 = vmatmul.bf16.gmra.mxu1 %v10662_v40  ;;  %v3516_v28 = vpop.permute.xlu2 %3515 }
 0x417   :  { %v14805_v4 = vadd.f32 %v6908_v56, %v6580_v58  ;;  %v14808_v11 = vadd.f32 %v7200_v48, %v14685_v63  ;;  %v10691_v63 = vld [vmem:[#allocation8 + $0x568] sm:$0xf0]  ;;  %v10881_v58 = vld [vmem:[#allocation8 + $0x6c8] sm:$0xf]  ;;  %v3511_v48 = vpop.permute.xlu1 %3510 }
 0x418   :  { %v10694_v50 = vor.u32 %v12369_v51, %v10691_v63  ;;  %v12421_v56 = vld [vmem:[#allocation8 + $0x6e4] sm:$0xf0] }
 0x419   :  { %6621 = vmatmul.bf16.gmra.mxu2 %v11098_v49  ;;  %7239 = vmatmul.bf16.gmra.mxu0 %v10850_v21  ;;  %v12480_v21 = vld [vmem:[#allocation8 + $0x8c4] sm:$0xf] }
 0x41a   :  { %6950 = vmatmul.bf16.gmra.mxu3 %v11102_v57 }
 0x41b   :  { %v7501_v6 = vpop.f32.mrf.mxu1 }
 0x41c   :  { %v14811_v7 = vadd.f32 %v7501_v6, %v14720_v62  ;;  %v6582_v42 = vpop.f32.mrf.mxu2  ;;  %v11131_v62 = vld [vmem:[#allocation8 + $0x8e0] sm:$0xf0] }
 0x41d   :  { %v6583_v39 = vadd.f32 %v6582_v42, %v3506_v55  ;;  %v6911_v45 = vpop.f32.mrf.mxu3 }
 0x41e   :  { %16907 = vst [vmem:[#allocation57_spill] sm:$0xff] %v14811_v7  ;;  %v7202_v31 = vpop.f32.mrf.mxu0 }
 0x41f   :  { %v14813_v24 = vadd.f32 %v6911_v45, %v6583_v39  ;;  %v14816_v40 = vadd.f32 %v7202_v31, %v14693_v1  ;;  %v11130_v39 = vor.u32 %v12484_v0, %v11129_v10  ;;  %v10882_v1 = vor.u32 %v12421_v56, %v10881_v58  ;;  %v12377_v56 = vld [vmem:[#allocation8 + $0x58c] sm:$0xf] }
 0x420   :  { %v11134_v31 = vor.u32 %v12480_v21, %v11131_v62  ;;  %v11161_v21 = vld [vmem:[#allocation8 + $0x900] sm:$0xf] }
 0x423   :  { %v7504_v49 = vpop.f32.mrf.mxu1 }
 0x424   :  { %v14819_v55 = vadd.f32 %v7504_v49, %v14728_v16  ;;  %v6584_v57 = vpop.f32.mrf.mxu2 }
 0x425   :  { %v6585_v6 = vadd.f32 %v6584_v57, %v3511_v48  ;;  %v6913_v42 = vpop.f32.mrf.mxu3  ;;  %v12492_v57 = vld [vmem:[#allocation8 + $0x91c] sm:$0xf0] }
 0x426   :  { %16908 = vst [vmem:[#allocation47_spill] sm:$0xff] %v14819_v55  ;;  %v7205_v45 = vpop.f32.mrf.mxu0  ;;  %7543 = vmatmul.bf16.gmra.mxu1 %v10694_v50  ;;  %v3526_v55 = vpop.permute.xlu1 %3525 }
 0x427   :  { %v14821_v7 = vadd.f32 %v6913_v42, %v6585_v6  ;;  %v14824_v51 = vadd.f32 %v7205_v45, %v14701_v3  ;;  %v10723_v3 = vld [vmem:[#allocation8 + $0x5a8] sm:$0xf0]  ;;  %v10913_v6 = vld [vmem:[#allocation8 + $0x708] sm:$0xf]  ;;  %v3521_v45 = vpop.permute.xlu0 %3520 }
 0x428   :  { %v10726_v62 = vor.u32 %v12377_v56, %v10723_v3  ;;  %v12429_v42 = vld [vmem:[#allocation8 + $0x724] sm:$0xf0] }
 0x429   :  { %6626 = vmatmul.bf16.gmra.mxu2 %v11130_v39  ;;  %7244 = vmatmul.bf16.gmra.mxu0 %v10882_v1  ;;  %v12488_v1 = vld [vmem:[#allocation8 + $0x904] sm:$0xf] }
 0x42a   :  { %6955 = vmatmul.bf16.gmra.mxu3 %v11134_v31 }
 0x42b   :  { %v7506_v63 = vpop.f32.mrf.mxu1 }
 0x42c   :  { %v14827_v16 = vadd.f32 %v7506_v63, %v14736_v46  ;;  %v6587_v49 = vpop.f32.mrf.mxu2  ;;  %v11163_v46 = vld [vmem:[#allocation8 + $0x920] sm:$0xf0] }
 0x42d   :  { %v6588_v48 = vadd.f32 %v6587_v49, %v3516_v28  ;;  %v6916_v10 = vpop.f32.mrf.mxu3 }
 0x42e   :  { %16909 = vst [vmem:[#allocation51_spill] sm:$0xff] %v14827_v16  ;;  %v7207_v0 = vpop.f32.mrf.mxu0 }
 0x42f   :  { %v14829_v58 = vadd.f32 %v6916_v10, %v6588_v48  ;;  %v14832_v50 = vadd.f32 %v7207_v0, %v14709_v33  ;;  %v11162_v48 = vor.u32 %v12492_v57, %v11161_v21  ;;  %v10914_v33 = vor.u32 %v12429_v42, %v10913_v6  ;;  %v12385_v42 = vld [vmem:[#allocation8 + $0x5cc] sm:$0xf] }
 0x430   :  { %v11166_v0 = vor.u32 %v12488_v1, %v11163_v46  ;;  %v11193_v1 = vld [vmem:[#allocation8 + $0x940] sm:$0xf] }
 0x433   :  { %v7509_v39 = vpop.f32.mrf.mxu1 }
 0x434   :  { %v14835_v28 = vadd.f32 %v7509_v39, %v14744_v8  ;;  %v6589_v31 = vpop.f32.mrf.mxu2 }
 0x435   :  { %v6590_v63 = vadd.f32 %v6589_v31, %v3521_v45  ;;  %v6918_v49 = vpop.f32.mrf.mxu3  ;;  %v12500_v31 = vld [vmem:[#allocation8 + $0x95c] sm:$0xf0] }
 0x436   :  { %16910 = vst [vmem:[#allocation42_spill] sm:$0xff] %v14835_v28  ;;  %v7210_v10 = vpop.f32.mrf.mxu0  ;;  %7548 = vmatmul.bf16.gmra.mxu1 %v10726_v62  ;;  %v3536_v28 = vpop.permute.xlu0 %3535 }
 0x437   :  { %v14837_v16 = vadd.f32 %v6918_v49, %v6590_v63  ;;  %v14840_v56 = vadd.f32 %v7210_v10, %v14717_v12  ;;  %v10755_v12 = vld [vmem:[#allocation8 + $0x5e8] sm:$0xf0]  ;;  %v10945_v63 = vld [vmem:[#allocation8 + $0x748] sm:$0xf]  ;;  %v3531_v10 = vpop.permute.xlu2 %3530 }
 0x438   :  { %v10758_v46 = vor.u32 %v12385_v42, %v10755_v12  ;;  %v12437_v49 = vld [vmem:[#allocation8 + $0x764] sm:$0xf0] }
 0x439   :  { %6631 = vmatmul.bf16.gmra.mxu2 %v11162_v48  ;;  %7249 = vmatmul.bf16.gmra.mxu0 %v10914_v33  ;;  %v12496_v33 = vld [vmem:[#allocation8 + $0x944] sm:$0xf] }
 0x43a   :  { %6960 = vmatmul.bf16.gmra.mxu3 %v11166_v0 }
 0x43b   :  { %v7511_v3 = vpop.f32.mrf.mxu1 }
 0x43c   :  { %v14843_v8 = vadd.f32 %v7511_v3, %v14752_v19  ;;  %v6592_v39 = vpop.f32.mrf.mxu2  ;;  %v11195_v19 = vld [vmem:[#allocation8 + $0x960] sm:$0xf0] }
 0x43d   :  { %v6593_v45 = vadd.f32 %v6592_v39, %v3526_v55  ;;  %v6921_v21 = vpop.f32.mrf.mxu3 }
 0x43e   :  { %16911 = vst [vmem:[#allocation48_spill] sm:$0xff] %v14843_v8  ;;  %v7212_v57 = vpop.f32.mrf.mxu0 }
 0x43f   :  { %v14845_v6 = vadd.f32 %v6921_v21, %v6593_v45  ;;  %v14848_v62 = vadd.f32 %v7212_v57, %v14725_v43  ;;  %v11194_v45 = vor.u32 %v12500_v31, %v11193_v1  ;;  %v10946_v43 = vor.u32 %v12437_v49, %v10945_v63  ;;  %v12393_v49 = vld [vmem:[#allocation8 + $0x60c] sm:$0xf] }
 0x440   :  { %v11198_v57 = vor.u32 %v12496_v33, %v11195_v19  ;;  %v11225_v33 = vld [vmem:[#allocation8 + $0x980] sm:$0xf] }
 0x443   :  { %v7514_v48 = vpop.f32.mrf.mxu1 }
 0x444   :  { %v14851_v55 = vadd.f32 %v7514_v48, %v14760_v35  ;;  %v6594_v0 = vpop.f32.mrf.mxu2 }
 0x445   :  { %v6595_v3 = vadd.f32 %v6594_v0, %v3531_v10  ;;  %v6923_v39 = vpop.f32.mrf.mxu3  ;;  %v12508_v0 = vld [vmem:[#allocation8 + $0x99c] sm:$0xf0] }
 0x446   :  { %16912 = vst [vmem:[#allocation52_spill] sm:$0xff] %v14851_v55  ;;  %v7215_v21 = vpop.f32.mrf.mxu0  ;;  %7553 = vmatmul.bf16.gmra.mxu1 %v10758_v46  ;;  %v3546_v55 = vpop.permute.xlu2 %3545 }
 0x447   :  { %v14853_v8 = vadd.f32 %v6923_v39, %v6595_v3  ;;  %v14856_v42 = vadd.f32 %v7215_v21, %v14733_v13  ;;  %v10787_v13 = vld [vmem:[#allocation8 + $0x628] sm:$0xf0]  ;;  %v10977_v3 = vld [vmem:[#allocation8 + $0x788] sm:$0xf]  ;;  %v3541_v21 = vpop.permute.xlu1 %3540 }
 0x448   :  { %v10790_v19 = vor.u32 %v12393_v49, %v10787_v13  ;;  %v12445_v39 = vld [vmem:[#allocation8 + $0x7a4] sm:$0xf0] }
 0x449   :  { %6636 = vmatmul.bf16.gmra.mxu2 %v11194_v45  ;;  %7254 = vmatmul.bf16.gmra.mxu0 %v10946_v43  ;;  %v12504_v43 = vld [vmem:[#allocation8 + $0x984] sm:$0xf] }
 0x44a   :  { %6965 = vmatmul.bf16.gmra.mxu3 %v11198_v57 }
 0x44b   :  { %v7516_v12 = vpop.f32.mrf.mxu1 }
 0x44c   :  { %v14859_v35 = vadd.f32 %v7516_v12, %v14768_v23  ;;  %v6597_v48 = vpop.f32.mrf.mxu2  ;;  %v11227_v23 = vld [vmem:[#allocation8 + $0x9a0] sm:$0xf0] }
 0x44d   :  { %v6598_v10 = vadd.f32 %v6597_v48, %v3536_v28  ;;  %v6926_v1 = vpop.f32.mrf.mxu3 }
 0x44e   :  { %16913 = vst [vmem:[#allocation49_spill] sm:$0xff] %v14859_v35  ;;  %v7217_v31 = vpop.f32.mrf.mxu0 }
 0x44f   :  { %v14861_v63 = vadd.f32 %v6926_v1, %v6598_v10  ;;  %v14864_v46 = vadd.f32 %v7217_v31, %v14741_v22  ;;  %v11226_v10 = vor.u32 %v12508_v0, %v11225_v33  ;;  %v10978_v22 = vor.u32 %v12445_v39, %v10977_v3  ;;  %v12401_v39 = vld [vmem:[#allocation8 + $0x64c] sm:$0xf] }
 0x450   :  { %v11230_v31 = vor.u32 %v12504_v43, %v11227_v23  ;;  %v11257_v43 = vld [vmem:[#allocation8 + $0x9c0] sm:$0xf] }
 0x453   :  { %v7519_v45 = vpop.f32.mrf.mxu1 }
 0x454   :  { %v14867_v28 = vadd.f32 %v7519_v45, %v14776_v61  ;;  %v6599_v57 = vpop.f32.mrf.mxu2 }
 0x455   :  { %v6600_v12 = vadd.f32 %v6599_v57, %v3541_v21  ;;  %v6928_v48 = vpop.f32.mrf.mxu3  ;;  %v12516_v57 = vld [vmem:[#allocation8 + $0x9dc] sm:$0xf0] }
 0x456   :  { %16914 = vst [vmem:[#allocation44_spill] sm:$0xff] %v14867_v28  ;;  %v7220_v1 = vpop.f32.mrf.mxu0  ;;  %7558 = vmatmul.bf16.gmra.mxu1 %v10790_v19  ;;  %v3556_v28 = vpop.permute.xlu1 %3555 }
 0x457   :  { %v14869_v35 = vadd.f32 %v6928_v48, %v6600_v12  ;;  %v14872_v49 = vadd.f32 %v7220_v1, %v14749_v18  ;;  %v10819_v18 = vld [vmem:[#allocation8 + $0x668] sm:$0xf0]  ;;  %v11009_v12 = vld [vmem:[#allocation8 + $0x7c8] sm:$0xf]  ;;  %v3551_v1 = vpop.permute.xlu0 %3550 }
 0x458   :  { %v10822_v23 = vor.u32 %v12401_v39, %v10819_v18  ;;  %v12453_v48 = vld [vmem:[#allocation8 + $0x7e4] sm:$0xf0] }
 0x459   :  { %6641 = vmatmul.bf16.gmra.mxu2 %v11226_v10  ;;  %7259 = vmatmul.bf16.gmra.mxu0 %v10978_v22  ;;  %v12512_v22 = vld [vmem:[#allocation8 + $0x9c4] sm:$0xf] }
 0x45a   :  { %6970 = vmatmul.bf16.gmra.mxu3 %v11230_v31 }
 0x45b   :  { %v7521_v13 = vpop.f32.mrf.mxu1 }
 0x45c   :  { %v14875_v61 = vadd.f32 %v7521_v13, %v14784_v17  ;;  %v6602_v45 = vpop.f32.mrf.mxu2  ;;  %v11259_v17 = vld [vmem:[#allocation8 + $0x9e0] sm:$0xf0] }
 0x45d   :  { %v6603_v21 = vadd.f32 %v6602_v45, %v3546_v55  ;;  %v6931_v33 = vpop.f32.mrf.mxu3 }
 0x45e   :  { %16915 = vst [vmem:[#allocation98_spill] sm:$0xff] %v14875_v61  ;;  %v7222_v0 = vpop.f32.mrf.mxu0 }
 0x45f   :  { %v14877_v3 = vadd.f32 %v6931_v33, %v6603_v21  ;;  %v14880_v19 = vadd.f32 %v7222_v0, %v14757_v34  ;;  %v11258_v21 = vor.u32 %v12516_v57, %v11257_v43  ;;  %v11010_v34 = vor.u32 %v12453_v48, %v11009_v12  ;;  %v12409_v48 = vld [vmem:[#allocation8 + $0x68c] sm:$0xf] }
 0x460   :  { %v11262_v0 = vor.u32 %v12512_v22, %v11259_v17  ;;  %v11289_v22 = vld [vmem:[#allocation8 + $0xa00] sm:$0xf] }
 0x463   :  { %v7524_v10 = vpop.f32.mrf.mxu1 }
 0x464   :  { %v14883_v55 = vadd.f32 %v7524_v10, %v14792_v52  ;;  %v6604_v31 = vpop.f32.mrf.mxu2 }
 0x465   :  { %v6605_v13 = vadd.f32 %v6604_v31, %v3551_v1  ;;  %v6933_v45 = vpop.f32.mrf.mxu3  ;;  %v12524_v31 = vld [vmem:[#allocation8 + $0xa1c] sm:$0xf0] }
 0x466   :  { %16916 = vst [vmem:[#allocation19_spill] sm:$0xff] %v14883_v55  ;;  %v7225_v33 = vpop.f32.mrf.mxu0  ;;  %7563 = vmatmul.bf16.gmra.mxu1 %v10822_v23  ;;  %v3566_v55 = vpop.permute.xlu0 %3565 }
 0x467   :  { %v14885_v61 = vadd.f32 %v6933_v45, %v6605_v13  ;;  %v14888_v39 = vadd.f32 %v7225_v33, %v14765_v59  ;;  %v10851_v59 = vld [vmem:[#allocation8 + $0x6a8] sm:$0xf0]  ;;  %v11041_v13 = vld [vmem:[#allocation8 + $0x808] sm:$0xf]  ;;  %v3561_v33 = vpop.permute.xlu2 %3560 }
 0x468   :  { %v10854_v17 = vor.u32 %v12409_v48, %v10851_v59  ;;  %v12461_v45 = vld [vmem:[#allocation8 + $0x824] sm:$0xf0] }
 0x469   :  { %6646 = vmatmul.bf16.gmra.mxu2 %v11258_v21  ;;  %7264 = vmatmul.bf16.gmra.mxu0 %v11010_v34  ;;  %v12520_v34 = vld [vmem:[#allocation8 + $0xa04] sm:$0xf] }
 0x46a   :  { %6975 = vmatmul.bf16.gmra.mxu3 %v11262_v0 }
 0x46b   :  { %v7526_v18 = vpop.f32.mrf.mxu1 }
 0x46c   :  { %v14891_v52 = vadd.f32 %v7526_v18, %v14800_v9  ;;  %v6607_v10 = vpop.f32.mrf.mxu2  ;;  %v11291_v9 = vld [vmem:[#allocation8 + $0xa20] sm:$0xf0] }
 0x46d   :  { %v6608_v1 = vadd.f32 %v6607_v10, %v3556_v28  ;;  %v6936_v43 = vpop.f32.mrf.mxu3 }
 0x46e   :  { %16917 = vst [vmem:[#allocation17_spill] sm:$0xff] %v14891_v52  ;;  %v7227_v57 = vpop.f32.mrf.mxu0 }
 0x46f   :  { %v14893_v12 = vadd.f32 %v6936_v43, %v6608_v1  ;;  %v14896_v23 = vadd.f32 %v7227_v57, %v14773_v53  ;;  %v11290_v1 = vor.u32 %v12524_v31, %v11289_v22  ;;  %v11042_v53 = vor.u32 %v12461_v45, %v11041_v13  ;;  %v12417_v45 = vld [vmem:[#allocation8 + $0x6cc] sm:$0xf] }
 0x470   :  { %v11294_v57 = vor.u32 %v12520_v34, %v11291_v9  ;;  %v11321_v34 = vld [vmem:[#allocation8 + $0xa40] sm:$0xf] }
 0x473   :  { %v7529_v21 = vpop.f32.mrf.mxu1 }
 0x474   :  { %v14899_v28 = vadd.f32 %v7529_v21, %v14808_v11  ;;  %v6609_v0 = vpop.f32.mrf.mxu2 }
 0x475   :  { %v6610_v18 = vadd.f32 %v6609_v0, %v3561_v33  ;;  %v6938_v10 = vpop.f32.mrf.mxu3  ;;  %v12532_v0 = vld [vmem:[#allocation8 + $0xa5c] sm:$0xf0] }
 0x476   :  { %16918 = vst [vmem:[#allocation16_spill] sm:$0xff] %v14899_v28  ;;  %v7230_v43 = vpop.f32.mrf.mxu0  ;;  %7568 = vmatmul.bf16.gmra.mxu1 %v10854_v17  ;;  %v3576_v28 = vpop.permute.xlu2 %3575 }
 0x477   :  { %v14901_v52 = vadd.f32 %v6938_v10, %v6610_v18  ;;  %v14904_v48 = vadd.f32 %v7230_v43, %v14781_v2  ;;  %v10883_v2 = vld [vmem:[#allocation8 + $0x6e8] sm:$0xf0]  ;;  %v11073_v18 = vld [vmem:[#allocation8 + $0x848] sm:$0xf]  ;;  %v3571_v43 = vpop.permute.xlu1 %3570 }
 0x478   :  { %v10886_v9 = vor.u32 %v12417_v45, %v10883_v2  ;;  %v12469_v10 = vld [vmem:[#allocation8 + $0x864] sm:$0xf0] }
 0x479   :  { %6651 = vmatmul.bf16.gmra.mxu2 %v11290_v1  ;;  %7269 = vmatmul.bf16.gmra.mxu0 %v11042_v53  ;;  %v12528_v53 = vld [vmem:[#allocation8 + $0xa44] sm:$0xf] }
 0x47a   :  { %6980 = vmatmul.bf16.gmra.mxu3 %v11294_v57 }
 0x47b   :  { %v7531_v59 = vpop.f32.mrf.mxu1 }
 0x47c   :  { %v14907_v11 = vadd.f32 %v7531_v59, %v14816_v40  ;;  %v6612_v21 = vpop.f32.mrf.mxu2  ;;  %v11323_v40 = vld [vmem:[#allocation8 + $0xa60] sm:$0xf0] }
 0x47d   :  { %v6613_v33 = vadd.f32 %v6612_v21, %v3566_v55  ;;  %v6941_v22 = vpop.f32.mrf.mxu3 }
 0x47e   :  { %16919 = vst [vmem:[#allocation25_spill] sm:$0xff] %v14907_v11  ;;  %v7232_v31 = vpop.f32.mrf.mxu0 }
 0x47f   :  { %v14909_v13 = vadd.f32 %v6941_v22, %v6613_v33  ;;  %v14912_v17 = vadd.f32 %v7232_v31, %v14789_v20  ;;  %v11322_v33 = vor.u32 %v12532_v0, %v11321_v34  ;;  %v11074_v20 = vor.u32 %v12469_v10, %v11073_v18  ;;  %v12425_v10 = vld [vmem:[#allocation8 + $0x70c] sm:$0xf] }
 0x480   :  { %v11326_v31 = vor.u32 %v12528_v53, %v11323_v40  ;;  %v11353_v53 = vld [vmem:[#allocation8 + $0xa80] sm:$0xf] }
 0x483   :  { %v7534_v1 = vpop.f32.mrf.mxu1 }
 0x484   :  { %v14915_v55 = vadd.f32 %v7534_v1, %v14824_v51  ;;  %v6614_v57 = vpop.f32.mrf.mxu2 }
 0x485   :  { %v6615_v59 = vadd.f32 %v6614_v57, %v3571_v43  ;;  %v6943_v21 = vpop.f32.mrf.mxu3  ;;  %v12540_v57 = vld [vmem:[#allocation8 + $0xa9c] sm:$0xf0] }
 0x486   :  { %16920 = vst [vmem:[#allocation32_spill] sm:$0xff] %v14915_v55  ;;  %v7235_v22 = vpop.f32.mrf.mxu0  ;;  %7573 = vmatmul.bf16.gmra.mxu1 %v10886_v9  ;;  %v3586_v55 = vpop.permute.xlu1 %3585 }
 0x487   :  { %v14917_v11 = vadd.f32 %v6943_v21, %v6615_v59  ;;  %v14920_v45 = vadd.f32 %v7235_v22, %v14797_v60  ;;  %v10915_v60 = vld [vmem:[#allocation8 + $0x728] sm:$0xf0]  ;;  %v11105_v59 = vld [vmem:[#allocation8 + $0x888] sm:$0xf]  ;;  %v3581_v22 = vpop.permute.xlu0 %3580 }
 0x488   :  { %v10918_v40 = vor.u32 %v12425_v10, %v10915_v60  ;;  %v12477_v21 = vld [vmem:[#allocation8 + $0x8a4] sm:$0xf0] }
 0x489   :  { %6656 = vmatmul.bf16.gmra.mxu2 %v11322_v33  ;;  %7274 = vmatmul.bf16.gmra.mxu0 %v11074_v20  ;;  %v12536_v20 = vld [vmem:[#allocation8 + $0xa84] sm:$0xf] }
 0x48a   :  { %6985 = vmatmul.bf16.gmra.mxu3 %v11326_v31 }
 0x48b   :  { %v7536_v2 = vpop.f32.mrf.mxu1 }
 0x48c   :  { %v14923_v51 = vadd.f32 %v7536_v2, %v14832_v50  ;;  %v6617_v1 = vpop.f32.mrf.mxu2  ;;  %v11355_v50 = vld [vmem:[#allocation8 + $0xaa0] sm:$0xf0] }
 0x48d   :  { %v6618_v43 = vadd.f32 %v6617_v1, %v3576_v28  ;;  %v6946_v34 = vpop.f32.mrf.mxu3 }
 0x48e   :  { %16921 = vst [vmem:[#allocation20_spill] sm:$0xff] %v14923_v51  ;;  %v7237_v0 = vpop.f32.mrf.mxu0 }
 0x48f   :  { %v14925_v18 = vadd.f32 %v6946_v34, %v6618_v43  ;;  %v14928_v9 = vadd.f32 %v7237_v0, %v14805_v4  ;;  %v11354_v43 = vor.u32 %v12540_v57, %v11353_v53  ;;  %v11106_v4 = vor.u32 %v12477_v21, %v11105_v59  ;;  %v12433_v21 = vld [vmem:[#allocation8 + $0x74c] sm:$0xf] }
 0x490   :  { %v11358_v0 = vor.u32 %v12536_v20, %v11355_v50  ;;  %v11385_v20 = vld [vmem:[#allocation8 + $0xac0] sm:$0xf] }
 0x493   :  { %v7539_v33 = vpop.f32.mrf.mxu1 }
 0x494   :  { %v14931_v28 = vadd.f32 %v7539_v33, %v14840_v56  ;;  %v6619_v31 = vpop.f32.mrf.mxu2 }
 0x495   :  { %v6620_v2 = vadd.f32 %v6619_v31, %v3581_v22  ;;  %v6948_v1 = vpop.f32.mrf.mxu3  ;;  %v12548_v31 = vld [vmem:[#allocation8 + $0xadc] sm:$0xf0] }
 0x496   :  { %16922 = vst [vmem:[#allocation24_spill] sm:$0xff] %v14931_v28  ;;  %v7240_v34 = vpop.f32.mrf.mxu0  ;;  %7578 = vmatmul.bf16.gmra.mxu1 %v10918_v40  ;;  %v3596_v28 = vpop.permute.xlu0 %3595 }
 0x497   :  { %v14933_v51 = vadd.f32 %v6948_v1, %v6620_v2  ;;  %v14936_v10 = vadd.f32 %v7240_v34, %v14813_v24  ;;  %v10947_v24 = vld [vmem:[#allocation8 + $0x768] sm:$0xf0]  ;;  %v11137_v2 = vld [vmem:[#allocation8 + $0x8c8] sm:$0xf]  ;;  %v3591_v34 = vpop.permute.xlu2 %3590 }
 0x498   :  { %v10950_v50 = vor.u32 %v12433_v21, %v10947_v24  ;;  %v12485_v1 = vld [vmem:[#allocation8 + $0x8e4] sm:$0xf0] }
 0x499   :  { %6661 = vmatmul.bf16.gmra.mxu2 %v11354_v43  ;;  %7279 = vmatmul.bf16.gmra.mxu0 %v11106_v4  ;;  %v12544_v4 = vld [vmem:[#allocation8 + $0xac4] sm:$0xf] }
 0x49a   :  { %6990 = vmatmul.bf16.gmra.mxu3 %v11358_v0 }
 0x49b   :  { %v7541_v60 = vpop.f32.mrf.mxu1 }
 0x49c   :  { %v14939_v56 = vadd.f32 %v7541_v60, %v14848_v62  ;;  %v6622_v33 = vpop.f32.mrf.mxu2  ;;  %v11387_v62 = vld [vmem:[#allocation8 + $0xae0] sm:$0xf0] }
 0x49d   :  { %v6623_v22 = vadd.f32 %v6622_v33, %v3586_v55  ;;  %v6951_v53 = vpop.f32.mrf.mxu3 }
 0x49e   :  { %16923 = vst [vmem:[#allocation23_spill] sm:$0xff] %v14939_v56  ;;  %v7242_v57 = vpop.f32.mrf.mxu0 }
 0x49f   :  { %v14941_v59 = vadd.f32 %v6951_v53, %v6623_v22  ;;  %v14944_v40 = vadd.f32 %v7242_v57, %v14821_v7  ;;  %v11386_v22 = vor.u32 %v12548_v31, %v11385_v20  ;;  %v11138_v7 = vor.u32 %v12485_v1, %v11137_v2  ;;  %v12441_v1 = vld [vmem:[#allocation8 + $0x78c] sm:$0xf] }
 0x4a0   :  { %v11390_v57 = vor.u32 %v12544_v4, %v11387_v62  ;;  %v11417_v4 = vld [vmem:[#allocation8 + $0xb00] sm:$0xf] }
 0x4a3   :  { %v7544_v43 = vpop.f32.mrf.mxu1 }
 0x4a4   :  { %v14947_v55 = vadd.f32 %v7544_v43, %v14856_v42  ;;  %v6624_v0 = vpop.f32.mrf.mxu2 }
 0x4a5   :  { %v6625_v60 = vadd.f32 %v6624_v0, %v3591_v34  ;;  %v6953_v33 = vpop.f32.mrf.mxu3  ;;  %v12556_v0 = vld [vmem:[#allocation8 + $0xb1c] sm:$0xf0] }
 0x4a6   :  { %16924 = vst [vmem:[#allocation29_spill] sm:$0xff] %v14947_v55  ;;  %v7245_v53 = vpop.f32.mrf.mxu0  ;;  %7583 = vmatmul.bf16.gmra.mxu1 %v10950_v50  ;;  %v3606_v55 = vpop.permute.xlu2 %3605 }
 0x4a7   :  { %v14949_v56 = vadd.f32 %v6953_v33, %v6625_v60  ;;  %v14952_v21 = vadd.f32 %v7245_v53, %v14829_v58  ;;  %v10979_v58 = vld [vmem:[#allocation8 + $0x7a8] sm:$0xf0]  ;;  %v11169_v60 = vld [vmem:[#allocation8 + $0x908] sm:$0xf]  ;;  %v3601_v53 = vpop.permute.xlu1 %3600 }
 0x4a8   :  { %v10982_v62 = vor.u32 %v12441_v1, %v10979_v58  ;;  %v12493_v33 = vld [vmem:[#allocation8 + $0x924] sm:$0xf0] }
 0x4a9   :  { %6666 = vmatmul.bf16.gmra.mxu2 %v11386_v22  ;;  %7284 = vmatmul.bf16.gmra.mxu0 %v11138_v7  ;;  %v12552_v7 = vld [vmem:[#allocation8 + $0xb04] sm:$0xf] }
 0x4aa   :  { %6995 = vmatmul.bf16.gmra.mxu3 %v11390_v57 }
 0x4ab   :  { %v7546_v24 = vpop.f32.mrf.mxu1 }
 0x4ac   :  { %v14955_v42 = vadd.f32 %v7546_v24, %v14864_v46  ;;  %v6627_v43 = vpop.f32.mrf.mxu2  ;;  %v11419_v46 = vld [vmem:[#allocation8 + $0xb20] sm:$0xf0] }
 0x4ad   :  { %v6628_v34 = vadd.f32 %v6627_v43, %v3596_v28  ;;  %v6956_v20 = vpop.f32.mrf.mxu3 }
 0x4ae   :  { %16925 = vst [vmem:[#allocation39_spill] sm:$0xff] %v14955_v42  ;;  %v7247_v31 = vpop.f32.mrf.mxu0 }
 0x4af   :  { %v14957_v2 = vadd.f32 %v6956_v20, %v6628_v34  ;;  %v14960_v50 = vadd.f32 %v7247_v31, %v14837_v16  ;;  %v11418_v34 = vor.u32 %v12556_v0, %v11417_v4  ;;  %v11170_v16 = vor.u32 %v12493_v33, %v11169_v60  ;;  %v12449_v33 = vld [vmem:[#allocation8 + $0x7cc] sm:$0xf] }
 0x4b0   :  { %v11422_v31 = vor.u32 %v12552_v7, %v11419_v46  ;;  %v11449_v7 = vld [vmem:[#allocation8 + $0xb40] sm:$0xf]  ;;  %v3611_v46 = vpop.permute.xlu0 %3610 }
 0x4b3   :  { %v7549_v22 = vpop.f32.mrf.mxu1 }
 0x4b4   :  { %v14963_v28 = vadd.f32 %v7549_v22, %v14872_v49  ;;  %v6629_v57 = vpop.f32.mrf.mxu2 }
 0x4b5   :  { %v6630_v24 = vadd.f32 %v6629_v57, %v3601_v53  ;;  %v6958_v43 = vpop.f32.mrf.mxu3 }
 0x4b6   :  { %16926 = vst [vmem:[#allocation43_spill] sm:$0xff] %v14963_v28  ;;  %v7250_v20 = vpop.f32.mrf.mxu0  ;;  %7588 = vmatmul.bf16.gmra.mxu1 %v10982_v62 }
 0x4b7   :  { %v14965_v42 = vadd.f32 %v6958_v43, %v6630_v24  ;;  %v14968_v1 = vadd.f32 %v7250_v20, %v14845_v6  ;;  %v11011_v6 = vld [vmem:[#allocation8 + $0x7e8] sm:$0xf0]  ;;  %v12564_v24 = vld [vmem:[#allocation8 + $0xb5c] sm:$0xf0]  ;;  %v11201_v43 = vld [vmem:[#allocation8 + $0x948] sm:$0xf] }
 0x4b8   :  { %v11014_v57 = vor.u32 %v12449_v33, %v11011_v6  ;;  %v11451_v20 = vld [vmem:[#allocation8 + $0xb60] sm:$0xf0]  ;;  %v3616_v6 = vpop.permute.xlu1 %3615 }
 0x4b9   :  { %6671 = vmatmul.bf16.gmra.mxu2 %v11418_v34  ;;  %7289 = vmatmul.bf16.gmra.mxu0 %v11170_v16  ;;  %v12501_v34 = vld [vmem:[#allocation8 + $0x964] sm:$0xf0] }
 0x4ba   :  { %7000 = vmatmul.bf16.gmra.mxu3 %v11422_v31 }
 0x4bb   :  { %v7551_v58 = vpop.f32.mrf.mxu1 }
 0x4bc   :  { %v14971_v49 = vadd.f32 %v7551_v58, %v14880_v19  ;;  %v6632_v22 = vpop.f32.mrf.mxu2  ;;  %v12560_v19 = vld [vmem:[#allocation8 + $0xb44] sm:$0xf] }
 0x4bd   :  { %v6633_v53 = vadd.f32 %v6632_v22, %v3606_v55  ;;  %v6961_v4 = vpop.f32.mrf.mxu3 }
 0x4be   :  { %16927 = vst [vmem:[#allocation95_spill] sm:$0xff] %v14971_v49  ;;  %v7252_v0 = vpop.f32.mrf.mxu0 }
 0x4bf   :  { %v14973_v60 = vadd.f32 %v6961_v4, %v6633_v53  ;;  %v14976_v62 = vadd.f32 %v7252_v0, %v14853_v8  ;;  %v11450_v53 = vor.u32 %v12564_v24, %v11449_v7  ;;  %v11202_v8 = vor.u32 %v12501_v34, %v11201_v43 }
 0x4c0   :  { %v11454_v0 = vor.u32 %v12560_v19, %v11451_v20  ;;  %v11043_v19 = vld [vmem:[#allocation8 + $0x828] sm:$0xf0]  ;;  %v11481_v20 = vld [vmem:[#allocation8 + $0xb80] sm:$0xf] }
 0x4c3   :  { %v7554_v16 = vpop.f32.mrf.mxu1 }
 0x4c4   :  { %v14979_v55 = vadd.f32 %v7554_v16, %v14888_v39  ;;  %v6634_v31 = vpop.f32.mrf.mxu2  ;;  %v3626_v39 = vpop.permute.xlu0 %3625 }
 0x4c5   :  { %v6635_v58 = vadd.f32 %v6634_v31, %v3611_v46  ;;  %v6963_v22 = vpop.f32.mrf.mxu3 }
 0x4c6   :  { %16928 = vst [vmem:[#allocation59_spill] sm:$0xff] %v14979_v55  ;;  %v7255_v4 = vpop.f32.mrf.mxu0  ;;  %7593 = vmatmul.bf16.gmra.mxu1 %v11014_v57 }
 0x4c7   :  { %v14981_v49 = vadd.f32 %v6963_v22, %v6635_v58  ;;  %v14984_v33 = vadd.f32 %v7255_v4, %v14861_v63  ;;  %v12457_v63 = vld [vmem:[#allocation8 + $0x80c] sm:$0xf]  ;;  %v12572_v58 = vld [vmem:[#allocation8 + $0xb9c] sm:$0xf0]  ;;  %v11233_v22 = vld [vmem:[#allocation8 + $0x988] sm:$0xf] }
 0x4c8   :  { %v11046_v31 = vor.u32 %v12457_v63, %v11043_v19 }
 0x4c9   :  { %6676 = vmatmul.bf16.gmra.mxu2 %v11450_v53  ;;  %7294 = vmatmul.bf16.gmra.mxu0 %v11202_v8  ;;  %v12509_v53 = vld [vmem:[#allocation8 + $0x9a4] sm:$0xf0]  ;;  %v3621_v8 = vpop.permute.xlu2 %3620 }
 0x4ca   :  { %7005 = vmatmul.bf16.gmra.mxu3 %v11454_v0  ;;  %v3631_v0 = vpop.permute.xlu1 %3630 }
 0x4cb   :  { %v7556_v28 = vpop.f32.mrf.mxu1 }
 0x4cc   :  { %v14987_v16 = vadd.f32 %v7556_v28, %v14896_v23  ;;  %v6637_v46 = vpop.f32.mrf.mxu2  ;;  %v12568_v23 = vld [vmem:[#allocation8 + $0xb84] sm:$0xf] }
 0x4cd   :  { %v6638_v7 = vadd.f32 %v6637_v46, %v3616_v6  ;;  %v6966_v24 = vpop.f32.mrf.mxu3  ;;  %v11483_v28 = vld [vmem:[#allocation8 + $0xba0] sm:$0xf0] }
 0x4ce   :  { %16929 = vst [vmem:[#allocation87_spill] sm:$0xff] %v14987_v16  ;;  %v7257_v43 = vpop.f32.mrf.mxu0  ;;  %v14997_v16 = vpop.permute.xlu0 %3640  ;;  %v11486_v63 = vor.u32 %v12568_v23, %v11483_v28 }
 0x4cf   :  { %v14989_v57 = vadd.f32 %v6966_v24, %v6638_v7  ;;  %v14992_v34 = vadd.f32 %v7257_v43, %v14869_v35  ;;  %v11482_v35 = vor.u32 %v12572_v58, %v11481_v20  ;;  %v11234_v43 = vor.u32 %v12509_v53, %v11233_v22 }
 0x4d2   :  { %v15007_v22 = vpop.permute.xlu1 %3645 }
 0x4d3   :  { %v7559_v4 = vpop.f32.mrf.mxu1 }
 0x4d4   :  { %v14995_v6 = vadd.f32 %v7559_v4, %v14904_v48  ;;  %v6639_v46 = vpop.f32.mrf.mxu2 }
 0x4d5   :  { %v6640_v7 = vadd.f32 %v6639_v46, %v3621_v8  ;;  %v6968_v24 = vpop.f32.mrf.mxu3  ;;  %v11513_v46 = vld [vmem:[#allocation8 + $0xbc0] sm:$0xf] }
 0x4d6   :  { %16930 = vst [vmem:[#allocation72_spill] sm:$0xff] %v14995_v6  ;;  %v7260_v55 = vpop.f32.mrf.mxu0  ;;  %7598 = vmatmul.bf16.gmra.mxu1 %v11046_v31  ;;  %v15014_v28 = vpop.permute.xlu0 %3655 }
 0x4d7   :  { %v14999_v19 = vadd.f32 %v6968_v24, %v6640_v7  ;;  %v15002_v54 = vadd.f32 %v7260_v55, %v14877_v3  ;;  %v12465_v3 = vld [vmem:[#allocation8 + $0x84c] sm:$0xf]  ;;  %v12580_v24 = vld [vmem:[#allocation8 + $0xbdc] sm:$0xf0] }
 0x4d8   :  { %v11075_v55 = vld [vmem:[#allocation8 + $0x868] sm:$0xf0] }
 0x4d9   :  { %6681 = vmatmul.bf16.gmra.mxu2 %v11482_v35  ;;  %7299 = vmatmul.bf16.gmra.mxu0 %v11234_v43  ;;  %v11078_v7 = vor.u32 %v12465_v3, %v11075_v55  ;;  %v12517_v35 = vld [vmem:[#allocation8 + $0x9e4] sm:$0xf0] }
 0x4da   :  { %7010 = vmatmul.bf16.gmra.mxu3 %v11486_v63  ;;  %v11515_v63 = vld [vmem:[#allocation8 + $0xbe0] sm:$0xf0]  ;;  %v15024_v55 = vpop.permute.xlu1 %3660 }
 0x4db   :  { %v7561_v48 = vpop.f32.mrf.mxu1 }
 0x4dc   :  { %v15005_v4 = vadd.f32 %v7561_v48, %v14912_v17  ;;  %v6642_v8 = vpop.f32.mrf.mxu2  ;;  %v11265_v17 = vld [vmem:[#allocation8 + $0x9c8] sm:$0xf] }
 0x4dd   :  { %v6643_v20 = vadd.f32 %v6642_v8, %v3626_v39  ;;  %v6971_v58 = vpop.f32.mrf.mxu3  ;;  %v12576_v39 = vld [vmem:[#allocation8 + $0xbc4] sm:$0xf] }
 0x4de   :  { %16931 = vst [vmem:[#allocation96_spill] sm:$0xff] %v15005_v4  ;;  %v7262_v53 = vpop.f32.mrf.mxu0  ;;  %v11518_v6 = vor.u32 %v12576_v39, %v11515_v63  ;;  %v15026_v26 = vpop.permute.xlu0 %3720  ;;  %v11107_v39 = vld [vmem:[#allocation8 + $0x8a8] sm:$0xf0]  ;;  %v11545_v63 = vld [vmem:[#allocation8 + $0xc00] sm:$0xf] }
 0x4df   :  { %v15009_v31 = vadd.f32 %v6971_v58, %v6643_v20  ;;  %v15012_v23 = vadd.f32 %v7262_v53, %v14885_v61  ;;  %v11514_v61 = vor.u32 %v12580_v24, %v11513_v46  ;;  %v11266_v53 = vor.u32 %v12517_v35, %v11265_v17 }
 0x4e3   :  { %v7564_v43 = vpop.f32.mrf.mxu1 }
 0x4e4   :  { %v15017_v48 = vadd.f32 %v7564_v43, %v14920_v45  ;;  %v6644_v8 = vpop.f32.mrf.mxu2 }
 0x4e5   :  { %v6645_v20 = vadd.f32 %v6644_v8, %v3631_v0  ;;  %v6973_v58 = vpop.f32.mrf.mxu3  ;;  %v3636_v0 = vpop.permute.xlu2 %3635 }
 0x4e6   :  { %16932 = vst [vmem:[#allocation76_spill] sm:$0xff] %v15017_v48  ;;  %v7265_v4 = vpop.f32.mrf.mxu0  ;;  %7603 = vmatmul.bf16.gmra.mxu1 %v11078_v7  ;;  %v15036_v8 = vpop.permute.xlu1 %3705 }
 0x4e7   :  { %v15019_v5 = vadd.f32 %v6973_v58, %v6645_v20  ;;  %v15022_v3 = vadd.f32 %v7265_v4, %v14893_v12  ;;  %v12473_v4 = vld [vmem:[#allocation8 + $0x88c] sm:$0xf]  ;;  %v12588_v20 = vld [vmem:[#allocation8 + $0xc1c] sm:$0xf0]  ;;  %v11297_v58 = vld [vmem:[#allocation8 + $0xa08] sm:$0xf] }
 0x4e9   :  { %6686 = vmatmul.bf16.gmra.mxu2 %v11514_v61  ;;  %7304 = vmatmul.bf16.gmra.mxu0 %v11266_v53  ;;  %v12525_v61 = vld [vmem:[#allocation8 + $0xa24] sm:$0xf0]  ;;  %v12584_v53 = vld [vmem:[#allocation8 + $0xc04] sm:$0xf] }
 0x4ea   :  { %7015 = vmatmul.bf16.gmra.mxu3 %v11518_v6  ;;  %v11110_v6 = vor.u32 %v12473_v4, %v11107_v39 }
 0x4eb   :  { %v7566_v45 = vpop.f32.mrf.mxu1 }
 0x4ec   :  { %v15029_v46 = vadd.f32 %v7566_v45, %v14928_v9  ;;  %v6647_v24 = vpop.f32.mrf.mxu2  ;;  %v11547_v45 = vld [vmem:[#allocation8 + $0xc20] sm:$0xf0] }
 0x4ed   :  { %v6648_v7 = vadd.f32 %v6647_v24, %v3636_v0  ;;  %v6976_v17 = vpop.f32.mrf.mxu3  ;;  %v15038_v0 = vpop.permute.xlu0 %3695  ;;  %v11550_v4 = vor.u32 %v12584_v53, %v11547_v45  ;;  %v11577_v53 = vld [vmem:[#allocation8 + $0xc40] sm:$0xf] }
 0x4ee   :  { %16933 = vst [vmem:[#allocation73_spill] sm:$0xff] %v15029_v46  ;;  %v7267_v35 = vpop.f32.mrf.mxu0  ;;  %v11298_v46 = vor.u32 %v12525_v61, %v11297_v58 }
 0x4ef   :  { %v15031_v43 = vadd.f32 %v6976_v17, %v6648_v7  ;;  %v15034_v12 = vadd.f32 %v7267_v35, %v14901_v52  ;;  %v11546_v35 = vor.u32 %v12588_v20, %v11545_v63 }
 0x4f3   :  { %v7569_v9 = vpop.f32.mrf.mxu1 }
 0x4f4   :  { %v15041_v24 = vadd.f32 %v7569_v9, %v14936_v10  ;;  %v6649_v7 = vpop.f32.mrf.mxu2  ;;  %v15049_v10 = vpop.permute.xlu1 %3700 }
 0x4f5   :  { %v6650_v52 = vadd.f32 %v6649_v7, %v14997_v16  ;;  %v6978_v17 = vpop.f32.mrf.mxu3  ;;  %v12596_v7 = vld [vmem:[#allocation8 + $0xc5c] sm:$0xf0] }
 0x4f6   :  { %16934 = vst [vmem:[#allocation67_spill] sm:$0xff] %v15041_v24  ;;  %v7270_v48 = vpop.f32.mrf.mxu0  ;;  %7608 = vmatmul.bf16.gmra.mxu1 %v11110_v6  ;;  %v15055_v6 = vpop.permute.xlu0 %3690 }
 0x4f7   :  { %v15044_v39 = vadd.f32 %v6978_v17, %v6650_v52  ;;  %v15047_v29 = vadd.f32 %v7270_v48, %v14909_v13  ;;  %v12481_v48 = vld [vmem:[#allocation8 + $0x8cc] sm:$0xf]  ;;  %v11329_v52 = vld [vmem:[#allocation8 + $0xa48] sm:$0xf]  ;;  %v12592_v17 = vld [vmem:[#allocation8 + $0xc44] sm:$0xf] }
 0x4f9   :  { %6691 = vmatmul.bf16.gmra.mxu2 %v11546_v35  ;;  %7309 = vmatmul.bf16.gmra.mxu0 %v11298_v46  ;;  %v11139_v46 = vld [vmem:[#allocation8 + $0x8e8] sm:$0xf0]  ;;  %v11579_v35 = vld [vmem:[#allocation8 + $0xc60] sm:$0xf0] }
 0x4fa   :  { %7020 = vmatmul.bf16.gmra.mxu3 %v11550_v4  ;;  %v11142_v45 = vor.u32 %v12481_v48, %v11139_v46  ;;  %v11582_v48 = vor.u32 %v12592_v17, %v11579_v35 }
 0x4fb   :  { %v7571_v27 = vpop.f32.mrf.mxu1 }
 0x4fc   :  { %v15052_v9 = vadd.f32 %v7571_v27, %v14944_v40  ;;  %v6652_v16 = vpop.f32.mrf.mxu2  ;;  %v12533_v27 = vld [vmem:[#allocation8 + $0xa64] sm:$0xf0] }
 0x4fd   :  { %v6653_v63 = vadd.f32 %v6652_v16, %v15007_v22  ;;  %v6981_v20 = vpop.f32.mrf.mxu3  ;;  %v3651_v22 = vpop.permute.xlu2 %3650 }
 0x4fe   :  { %16935 = vst [vmem:[#allocation82_spill] sm:$0xff] %v15052_v9  ;;  %v7272_v58 = vpop.f32.mrf.mxu0  ;;  %v11578_v9 = vor.u32 %v12596_v7, %v11577_v53  ;;  %v15072_v15 = vpop.permute.xlu0 %3675 }
 0x4ff   :  { %v15057_v61 = vadd.f32 %v6981_v20, %v6653_v63  ;;  %v15060_v13 = vadd.f32 %v7272_v58, %v14917_v11  ;;  %v11330_v11 = vor.u32 %v12533_v27, %v11329_v52  ;;  %v15065_v58 = vpop.permute.xlu1 %3795 }
 0x503   :  { %v7574_v40 = vpop.f32.mrf.mxu1 }
 0x504   :  { %v15063_v4 = vadd.f32 %v7574_v40, %v14952_v21  ;;  %v6654_v16 = vpop.f32.mrf.mxu2 }
 0x505   :  { %v6655_v63 = vadd.f32 %v6654_v16, %v3651_v22  ;;  %v6983_v20 = vpop.f32.mrf.mxu3 }
 0x506   :  { %16936 = vst [vmem:[#allocation88_spill] sm:$0xff] %v15063_v4  ;;  %v7275_v24 = vpop.f32.mrf.mxu0  ;;  %7613 = vmatmul.bf16.gmra.mxu1 %v11142_v45  ;;  %v15085_v22 = vpop.permute.xlu0 %3880 }
 0x507   :  { %v15067_v46 = vadd.f32 %v6983_v20, %v6655_v63  ;;  %v15070_v36 = vadd.f32 %v7275_v24, %v14925_v18  ;;  %v12489_v18 = vld [vmem:[#allocation8 + $0x90c] sm:$0xf]  ;;  %v15083_v35 = vpop.permute.xlu1 %3680  ;;  %16938 = vst [vmem:[#allocation89_spill] sm:$0xff] %v15085_v22  ;;  %v11361_v63 = vld [vmem:[#allocation8 + $0xa88] sm:$0xf] }
 0x508   :  { %v11171_v24 = vld [vmem:[#allocation8 + $0x928] sm:$0xf0]  ;;  %v12541_v20 = vld [vmem:[#allocation8 + $0xaa4] sm:$0xf0] }
 0x509   :  { %6696 = vmatmul.bf16.gmra.mxu2 %v11578_v9  ;;  %7314 = vmatmul.bf16.gmra.mxu0 %v11330_v11  ;;  %v11609_v9 = vld [vmem:[#allocation8 + $0xc80] sm:$0xf]  ;;  %v11174_v16 = vor.u32 %v12489_v18, %v11171_v24 }
 0x50a   :  { %7025 = vmatmul.bf16.gmra.mxu3 %v11582_v48  ;;  %v11611_v48 = vld [vmem:[#allocation8 + $0xca0] sm:$0xf0] }
 0x50b   :  { %v7576_v21 = vpop.f32.mrf.mxu1 }
 0x50c   :  { %v15075_v40 = vadd.f32 %v7576_v21, %v14960_v50  ;;  %v6657_v53 = vpop.f32.mrf.mxu2  ;;  %v12604_v50 = vld [vmem:[#allocation8 + $0xc9c] sm:$0xf0]  ;;  %v15087_v21 = vpop.permute.xlu2 %3715 }
 0x50d   :  { %v6658_v7 = vadd.f32 %v6657_v53, %v15014_v28  ;;  %v6986_v52 = vpop.f32.mrf.mxu3  ;;  %v12600_v28 = vld [vmem:[#allocation8 + $0xc84] sm:$0xf] }
 0x50e   :  { %16937 = vst [vmem:[#allocation55_spill] sm:$0xff] %v15075_v40  ;;  %v7277_v45 = vpop.f32.mrf.mxu0  ;;  %v11362_v40 = vor.u32 %v12541_v20, %v11361_v63  ;;  %v11614_v18 = vor.u32 %v12600_v28, %v11611_v48  ;;  %v11641_v48 = vld [vmem:[#allocation8 + $0xcc0] sm:$0xf] }
 0x50f   :  { %v15078_v27 = vadd.f32 %v6986_v52, %v6658_v7  ;;  %v15081_v17 = vadd.f32 %v7277_v45, %v14933_v51  ;;  %v11610_v45 = vor.u32 %v12604_v50, %v11609_v9  ;;  %v15098_v30 = vpop.permute.xlu1 %3785 }
 0x513   :  { %v7579_v11 = vpop.f32.mrf.mxu1 }
 0x514   :  { %v15090_v53 = vadd.f32 %v7579_v11, %v14968_v1  ;;  %v6659_v51 = vpop.f32.mrf.mxu2  ;;  %v3666_v11 = vpop.permute.xlu0 %3665 }
 0x515   :  { %v6660_v7 = vadd.f32 %v6659_v51, %v15024_v55  ;;  %v6988_v52 = vpop.f32.mrf.mxu3 }
 0x516   :  { %16939 = vst [vmem:[#allocation62_spill] sm:$0xff] %v15090_v53  ;;  %v7280_v4 = vpop.f32.mrf.mxu0  ;;  %7618 = vmatmul.bf16.gmra.mxu1 %v11174_v16  ;;  %v15103_v16 = vpop.permute.xlu2 %3710 }
 0x517   :  { %v15093_v24 = vadd.f32 %v6988_v52, %v6660_v7  ;;  %v15096_v47 = vadd.f32 %v7280_v4, %v14941_v59  ;;  %v12497_v4 = vld [vmem:[#allocation8 + $0x94c] sm:$0xf]  ;;  %v12612_v7 = vld [vmem:[#allocation8 + $0xcdc] sm:$0xf0]  ;;  %v11393_v52 = vld [vmem:[#allocation8 + $0xac8] sm:$0xf] }
 0x518   :  { %v11642_v53 = vor.u32 %v12612_v7, %v11641_v48 }
 0x519   :  { %6701 = vmatmul.bf16.gmra.mxu2 %v11610_v45  ;;  %7319 = vmatmul.bf16.gmra.mxu0 %v11362_v40  ;;  %v11203_v40 = vld [vmem:[#allocation8 + $0x968] sm:$0xf0]  ;;  %v12549_v45 = vld [vmem:[#allocation8 + $0xae4] sm:$0xf0] }
 0x51a   :  { %7030 = vmatmul.bf16.gmra.mxu3 %v11614_v18  ;;  %v11206_v51 = vor.u32 %v12497_v4, %v11203_v40  ;;  %v12608_v18 = vld [vmem:[#allocation8 + $0xcc4] sm:$0xf] }
 0x51b   :  { %v7581_v1 = vpop.f32.mrf.mxu1 }
 0x51c   :  { %v15101_v55 = vadd.f32 %v7581_v1, %v14976_v62  ;;  %v6662_v9 = vpop.f32.mrf.mxu2  ;;  %v11643_v1 = vld [vmem:[#allocation8 + $0xce0] sm:$0xf0] }
 0x51d   :  { %v6663_v50 = vadd.f32 %v6662_v9, %v3666_v11  ;;  %v6991_v63 = vpop.f32.mrf.mxu3  ;;  %v3671_v11 = vpop.permute.xlu1 %3670  ;;  %v11646_v44 = vor.u32 %v12608_v18, %v11643_v1  ;;  %v11673_v18 = vld [vmem:[#allocation8 + $0xd00] sm:$0xf] }
 0x51e   :  { %16940 = vst [vmem:[#allocation63_spill] sm:$0xff] %v15101_v55  ;;  %v7282_v20 = vpop.f32.mrf.mxu0  ;;  %v3686_v40 = vpop.permute.xlu2 %3685  ;;  %v12620_v1 = vld [vmem:[#allocation8 + $0xd1c] sm:$0xf0] }
 0x51f   :  { %v15105_v28 = vadd.f32 %v6991_v63, %v6663_v50  ;;  %v15108_v59 = vadd.f32 %v7282_v20, %v14949_v56  ;;  %v11394_v56 = vor.u32 %v12549_v45, %v11393_v52 }
 0x523   :  { %v7584_v62 = vpop.f32.mrf.mxu1 }
 0x524   :  { %v15111_v9 = vadd.f32 %v7584_v62, %v14984_v33  ;;  %v6664_v55 = vpop.f32.mrf.mxu2  ;;  %v11235_v62 = vld [vmem:[#allocation8 + $0x9a8] sm:$0xf0] }
 0x525   :  { %v6665_v50 = vadd.f32 %v6664_v55, %v3671_v11  ;;  %v6993_v63 = vpop.f32.mrf.mxu3  ;;  %v11425_v11 = vld [vmem:[#allocation8 + $0xb08] sm:$0xf] }
 0x526   :  { %16941 = vst [vmem:[#allocation28_spill] sm:$0xff] %v15111_v9  ;;  %v7285_v20 = vpop.f32.mrf.mxu0  ;;  %7623 = vmatmul.bf16.gmra.mxu1 %v11206_v51 }
 0x527   :  { %v15113_v41 = vadd.f32 %v6993_v63, %v6665_v50  ;;  %v15116_v4 = vadd.f32 %v7285_v20, %v14957_v2  ;;  %v12505_v2 = vld [vmem:[#allocation8 + $0x98c] sm:$0xf]  ;;  %v12616_v50 = vld [vmem:[#allocation8 + $0xd04] sm:$0xf] }
 0x528   :  { %v11675_v63 = vld [vmem:[#allocation8 + $0xd20] sm:$0xf0] }
 0x529   :  { %6706 = vmatmul.bf16.gmra.mxu2 %v11642_v53  ;;  %7324 = vmatmul.bf16.gmra.mxu0 %v11394_v56  ;;  %v15127_v53 = vpop.permute.xlu2 %3800 }
 0x52a   :  { %7035 = vmatmul.bf16.gmra.mxu3 %v11646_v44  ;;  %v11238_v44 = vor.u32 %v12505_v2, %v11235_v62  ;;  %v11678_v2 = vor.u32 %v12616_v50, %v11675_v63  ;;  %v12513_v63 = vld [vmem:[#allocation8 + $0x9cc] sm:$0xf] }
 0x52b   :  { %v7586_v37 = vpop.f32.mrf.mxu1 }
 0x52c   :  { %v15119_v33 = vadd.f32 %v7586_v37, %v14992_v34  ;;  %v6667_v55 = vpop.f32.mrf.mxu2  ;;  %v12557_v37 = vld [vmem:[#allocation8 + $0xb24] sm:$0xf0] }
 0x52d   :  { %v6668_v48 = vadd.f32 %v6667_v55, %v15072_v15  ;;  %v6996_v7 = vpop.f32.mrf.mxu3  ;;  %v11674_v55 = vor.u32 %v12620_v1, %v11673_v18 }
 0x52e   :  { %16942 = vst [vmem:[#allocation53_spill] sm:$0xff] %v15119_v33  ;;  %v7287_v52 = vpop.f32.mrf.mxu0 }
 0x52f   :  { %v15122_v51 = vadd.f32 %v6996_v7, %v6668_v48  ;;  %v15125_v45 = vadd.f32 %v7287_v52, %v14965_v42  ;;  %v11426_v48 = vor.u32 %v12557_v37, %v11425_v11  ;;  %v15133_v7 = vpop.permute.xlu0 %3870  ;;  %v15145_v37 = vpop.permute.xlu1 %3775 }
 0x530   :  { %16944 = vst [vmem:[#allocation54_spill] sm:$0xff] %v15133_v7 }
 0x533   :  { %v7589_v34 = vpop.f32.mrf.mxu1 }
 0x534   :  { %v15130_v15 = vadd.f32 %v7589_v34, %v15002_v54  ;;  %v6669_v56 = vpop.f32.mrf.mxu2  ;;  %v15140_v34 = vpop.permute.xlu2 %3875 }
 0x535   :  { %v6670_v20 = vadd.f32 %v6669_v56, %v15083_v35  ;;  %v6998_v42 = vpop.f32.mrf.mxu3  ;;  %16945 = vst [vmem:[#allocation45_spill] sm:$0xff] %v15140_v34  ;;  %v11267_v56 = vld [vmem:[#allocation8 + $0x9e8] sm:$0xf0] }
 0x536   :  { %16943 = vst [vmem:[#allocation84_spill] sm:$0xff] %v15130_v15  ;;  %v7290_v52 = vpop.f32.mrf.mxu0  ;;  %7628 = vmatmul.bf16.gmra.mxu1 %v11238_v44 }
 0x537   :  { %v15135_v62 = vadd.f32 %v6998_v42, %v6670_v20  ;;  %v15138_v33 = vadd.f32 %v7290_v52, %v14973_v60  ;;  %v15152_v20 = vpop.permute.xlu0 %3855  ;;  %v11705_v42 = vld [vmem:[#allocation8 + $0xd40] sm:$0xf]  ;;  %v12565_v52 = vld [vmem:[#allocation8 + $0xb64] sm:$0xf0]  ;;  %v15165_v38 = vpop.permute.xlu1 %3860 }
 0x538   :  { %16947 = vst [vmem:[#allocation37_spill] sm:$0xff] %v15152_v20 }
 0x539   :  { %6711 = vmatmul.bf16.gmra.mxu2 %v11674_v55  ;;  %7329 = vmatmul.bf16.gmra.mxu0 %v11426_v48  ;;  %v11270_v55 = vor.u32 %v12513_v63, %v11267_v56  ;;  %v12628_v48 = vld [vmem:[#allocation8 + $0xd5c] sm:$0xf0]  ;;  %16949 = vst [vmem:[#allocation21_spill] sm:$0xff] %v15165_v38 }
 0x53a   :  { %7040 = vmatmul.bf16.gmra.mxu3 %v11678_v2 }
 0x53b   :  { %v7591_v54 = vpop.f32.mrf.mxu1 }
 0x53c   :  { %v15143_v35 = vadd.f32 %v7591_v54, %v15012_v23  ;;  %v6672_v18 = vpop.f32.mrf.mxu2  ;;  %v11457_v23 = vld [vmem:[#allocation8 + $0xb48] sm:$0xf]  ;;  %v11707_v54 = vld [vmem:[#allocation8 + $0xd60] sm:$0xf0]  ;;  %v15158_v15 = vpop.permute.xlu2 %3790 }
 0x53d   :  { %v6673_v1 = vadd.f32 %v6672_v18, %v3686_v40  ;;  %v7001_v11 = vpop.f32.mrf.mxu3  ;;  %v12624_v40 = vld [vmem:[#allocation8 + $0xd44] sm:$0xf] }
 0x53e   :  { %16946 = vst [vmem:[#allocation26_spill] sm:$0xff] %v15143_v35  ;;  %v7292_v44 = vpop.f32.mrf.mxu0  ;;  %v11458_v35 = vor.u32 %v12565_v52, %v11457_v23  ;;  %v11710_v63 = vor.u32 %v12624_v40, %v11707_v54  ;;  %v11299_v40 = vld [vmem:[#allocation8 + $0xa28] sm:$0xf0]  ;;  %v11737_v54 = vld [vmem:[#allocation8 + $0xd80] sm:$0xf] }
 0x53f   :  { %v15147_v50 = vadd.f32 %v7001_v11, %v6673_v1  ;;  %v15150_v60 = vadd.f32 %v7292_v44, %v14981_v49  ;;  %v11706_v44 = vor.u32 %v12628_v48, %v11705_v42 }
 0x543   :  { %v7594_v2 = vpop.f32.mrf.mxu1 }
 0x544   :  { %v15155_v18 = vadd.f32 %v7594_v2, %v15022_v3  ;;  %v6674_v1 = vpop.f32.mrf.mxu2  ;;  %v15167_v3 = vpop.permute.xlu0 %3770 }
 0x545   :  { %v6675_v11 = vadd.f32 %v6674_v1, %v15055_v6  ;;  %v7003_v49 = vpop.f32.mrf.mxu3  ;;  %v15180_v1 = vpop.permute.xlu1 %3845 }
 0x546   :  { %16948 = vst [vmem:[#allocation36_spill] sm:$0xff] %v15155_v18  ;;  %v7295_v9 = vpop.f32.mrf.mxu0  ;;  %7633 = vmatmul.bf16.gmra.mxu1 %v11270_v55 }
 0x547   :  { %v15160_v56 = vadd.f32 %v7003_v49, %v6675_v11  ;;  %v15163_v32 = vadd.f32 %v7295_v9, %v14989_v57  ;;  %v12521_v9 = vld [vmem:[#allocation8 + $0xa0c] sm:$0xf]  ;;  %16952 = vst [vmem:[#allocation40_spill] sm:$0xff] %v15180_v1  ;;  %v11489_v49 = vld [vmem:[#allocation8 + $0xb88] sm:$0xf] }
 0x548   :  { %v11302_v11 = vor.u32 %v12521_v9, %v11299_v40 }
 0x549   :  { %6716 = vmatmul.bf16.gmra.mxu2 %v11706_v44  ;;  %7334 = vmatmul.bf16.gmra.mxu0 %v11458_v35  ;;  %v15178_v35 = vpop.permute.xlu2 %3865  ;;  %v12573_v44 = vld [vmem:[#allocation8 + $0xba4] sm:$0xf0] }
 0x54a   :  { %7045 = vmatmul.bf16.gmra.mxu3 %v11710_v63  ;;  %16951 = vst [vmem:[#allocation33_spill] sm:$0xff] %v15178_v35  ;;  %v11490_v18 = vor.u32 %v12573_v44, %v11489_v49 }
 0x54b   :  { %v7596_v6 = vpop.f32.mrf.mxu1 }
 0x54c   :  { %v15170_v42 = vadd.f32 %v7596_v6, %v15034_v12  ;;  %v6677_v48 = vpop.f32.mrf.mxu2  ;;  %v12636_v12 = vld [vmem:[#allocation8 + $0xd9c] sm:$0xf0]  ;;  %v11739_v6 = vld [vmem:[#allocation8 + $0xda0] sm:$0xf0] }
 0x54d   :  { %v6678_v55 = vadd.f32 %v6677_v48, %v15038_v0  ;;  %v7006_v23 = vpop.f32.mrf.mxu3  ;;  %v12632_v0 = vld [vmem:[#allocation8 + $0xd84] sm:$0xf]  ;;  %v15182_v48 = vpop.permute.xlu0 %3755 }
 0x54e   :  { %16950 = vst [vmem:[#allocation41_spill] sm:$0xff] %v15170_v42  ;;  %v7297_v52 = vpop.f32.mrf.mxu0  ;;  %v11738_v42 = vor.u32 %v12636_v12, %v11737_v54  ;;  %v11742_v9 = vor.u32 %v12632_v0, %v11739_v6  ;;  %v11769_v0 = vld [vmem:[#allocation8 + $0xdc0] sm:$0xf] }
 0x54f   :  { %v15173_v2 = vadd.f32 %v7006_v23, %v6678_v55  ;;  %v15176_v57 = vadd.f32 %v7297_v52, %v14999_v19 }
 0x551   :  { %v15193_v22 = vpop.permute.xlu2 %3780 }
 0x553   :  { %v7599_v63 = vpop.f32.mrf.mxu1 }
 0x554   :  { %v15185_v55 = vadd.f32 %v7599_v63, %v15047_v29  ;;  %v6679_v19 = vpop.f32.mrf.mxu2  ;;  %v15195_v63 = vpop.permute.xlu1 %3760 }
 0x555   :  { %v6680_v23 = vadd.f32 %v6679_v19, %v15049_v10  ;;  %v7008_v52 = vpop.f32.mrf.mxu3  ;;  %v15201_v49 = vpop.permute.xlu0 %3840  ;;  %v12644_v19 = vld [vmem:[#allocation8 + $0xddc] sm:$0xf0] }
 0x556   :  { %16953 = vst [vmem:[#allocation92_spill] sm:$0xff] %v15185_v55  ;;  %v7300_v25 = vpop.f32.mrf.mxu0  ;;  %7638 = vmatmul.bf16.gmra.mxu1 %v11302_v11 }
 0x557   :  { %v15188_v40 = vadd.f32 %v7008_v52, %v6680_v23  ;;  %v15191_v14 = vadd.f32 %v7300_v25, %v15009_v31  ;;  %16955 = vst [vmem:[#allocation74_spill] sm:$0xff] %v15201_v49  ;;  %v11521_v23 = vld [vmem:[#allocation8 + $0xbc8] sm:$0xf] }
 0x559   :  { %6721 = vmatmul.bf16.gmra.mxu2 %v11738_v42  ;;  %7339 = vmatmul.bf16.gmra.mxu0 %v11490_v18  ;;  %v12529_v18 = vld [vmem:[#allocation8 + $0xa4c] sm:$0xf] }
 0x55a   :  { %7050 = vmatmul.bf16.gmra.mxu3 %v11742_v9  ;;  %v11331_v42 = vld [vmem:[#allocation8 + $0xa68] sm:$0xf0]  ;;  %v12640_v9 = vld [vmem:[#allocation8 + $0xdc4] sm:$0xf] }
 0x55b   :  { %v7601_v29 = vpop.f32.mrf.mxu1  ;;  %v11334_v6 = vor.u32 %v12529_v18, %v11331_v42 }
 0x55c   :  { %v15198_v10 = vadd.f32 %v7601_v29, %v15060_v13  ;;  %v6682_v54 = vpop.f32.mrf.mxu2  ;;  %v12581_v13 = vld [vmem:[#allocation8 + $0xbe4] sm:$0xf0]  ;;  %v11771_v29 = vld [vmem:[#allocation8 + $0xde0] sm:$0xf0]  ;;  %v15214_v55 = vpop.permute.xlu1 %3745 }
 0x55d   :  { %v6683_v11 = vadd.f32 %v6682_v54, %v15036_v8  ;;  %v7011_v12 = vpop.f32.mrf.mxu3  ;;  %v15208_v8 = vpop.permute.xlu2 %3765  ;;  %v11774_v42 = vor.u32 %v12640_v9, %v11771_v29  ;;  %v12537_v9 = vld [vmem:[#allocation8 + $0xa8c] sm:$0xf] }
 0x55e   :  { %16954 = vst [vmem:[#allocation80_spill] sm:$0xff] %v15198_v10  ;;  %v7302_v44 = vpop.f32.mrf.mxu0  ;;  %v11522_v10 = vor.u32 %v12581_v13, %v11521_v23  ;;  %v15221_v35 = vpop.permute.xlu0 %3825  ;;  %v11363_v29 = vld [vmem:[#allocation8 + $0xaa8] sm:$0xf0] }
 0x55f   :  { %v15203_v25 = vadd.f32 %v7011_v12, %v6683_v11  ;;  %v15206_v31 = vadd.f32 %v7302_v44, %v15019_v5  ;;  %v11770_v44 = vor.u32 %v12644_v19, %v11769_v0 }
 0x563   :  { %v7604_v52 = vpop.f32.mrf.mxu1 }
 0x564   :  { %v15211_v54 = vadd.f32 %v7604_v52, %v15070_v36  ;;  %v6684_v11 = vpop.f32.mrf.mxu2 }
 0x565   :  { %v6685_v12 = vadd.f32 %v6684_v11, %v15103_v16  ;;  %v7013_v5 = vpop.f32.mrf.mxu3  ;;  %v11801_v11 = vld [vmem:[#allocation8 + $0xe00] sm:$0xf] }
 0x566   :  { %16956 = vst [vmem:[#allocation78_spill] sm:$0xff] %v15211_v54  ;;  %v7305_v18 = vpop.f32.mrf.mxu0  ;;  %7643 = vmatmul.bf16.gmra.mxu1 %v11334_v6  ;;  %v15227_v6 = vpop.permute.xlu2 %3850 }
 0x567   :  { %v15216_v34 = vadd.f32 %v7013_v5, %v6685_v12  ;;  %v15219_v7 = vadd.f32 %v7305_v18, %v15031_v43  ;;  %16958 = vst [vmem:[#allocation77_spill] sm:$0xff] %v15227_v6  ;;  %v15236_v12 = vpop.permute.xlu0 %3740  ;;  %v12652_v5 = vld [vmem:[#allocation8 + $0xe1c] sm:$0xf0] }
 0x569   :  { %6726 = vmatmul.bf16.gmra.mxu2 %v11770_v44  ;;  %7344 = vmatmul.bf16.gmra.mxu0 %v11522_v10  ;;  %v15234_v10 = vpop.permute.xlu1 %3830  ;;  %v11553_v44 = vld [vmem:[#allocation8 + $0xc08] sm:$0xf] }
 0x56a   :  { %7055 = vmatmul.bf16.gmra.mxu3 %v11774_v42  ;;  %v12648_v42 = vld [vmem:[#allocation8 + $0xe04] sm:$0xf] }
 0x56b   :  { %v7606_v36 = vpop.f32.mrf.mxu1 }
 0x56c   :  { %v15224_v16 = vadd.f32 %v7606_v36, %v15081_v17  ;;  %v6687_v0 = vpop.f32.mrf.mxu2  ;;  %v11366_v17 = vor.u32 %v12537_v9, %v11363_v29  ;;  %v11803_v36 = vld [vmem:[#allocation8 + $0xe20] sm:$0xf0] }
 0x56d   :  { %v6688_v19 = vadd.f32 %v6687_v0, %v15087_v21  ;;  %v7016_v23 = vpop.f32.mrf.mxu3  ;;  %v12589_v21 = vld [vmem:[#allocation8 + $0xc24] sm:$0xf0]  ;;  %v11806_v38 = vor.u32 %v12648_v42, %v11803_v36  ;;  %v11395_v36 = vld [vmem:[#allocation8 + $0xae8] sm:$0xf0] }
 0x56e   :  { %16957 = vst [vmem:[#allocation34_spill] sm:$0xff] %v15224_v16  ;;  %v7307_v13 = vpop.f32.mrf.mxu0  ;;  %v11554_v16 = vor.u32 %v12589_v21, %v11553_v44  ;;  %v15247_v29 = vpop.permute.xlu2 %3835 }
 0x56f   :  { %v15229_v52 = vadd.f32 %v7016_v23, %v6688_v19  ;;  %v15232_v43 = vadd.f32 %v7307_v13, %v15044_v39  ;;  %v11802_v13 = vor.u32 %v12652_v5, %v11801_v11  ;;  %16960 = vst [vmem:[#allocation86_spill] sm:$0xff] %v15247_v29 }
 0x573   :  { %v7609_v18 = vpop.f32.mrf.mxu1 }
 0x574   :  { %v15239_v0 = vadd.f32 %v7609_v18, %v15096_v47  ;;  %v6689_v19 = vpop.f32.mrf.mxu2  ;;  %v15249_v47 = vpop.permute.xlu1 %3815 }
 0x575   :  { %v6690_v39 = vadd.f32 %v6689_v19, %v15026_v26  ;;  %v7018_v23 = vpop.f32.mrf.mxu3  ;;  %v3726_v26 = vpop.permute.xlu0 %3725 }
 0x576   :  { %16959 = vst [vmem:[#allocation83_spill] sm:$0xff] %v15239_v0  ;;  %v7310_v54 = vpop.f32.mrf.mxu0  ;;  %7648 = vmatmul.bf16.gmra.mxu1 %v11366_v17  ;;  %v15259_v19 = vpop.permute.xlu2 %3750 }
 0x577   :  { %v15242_v20 = vadd.f32 %v7018_v23, %v6690_v39  ;;  %v15245_v9 = vadd.f32 %v7310_v54, %v15057_v61  ;;  %v12545_v54 = vld [vmem:[#allocation8 + $0xacc] sm:$0xf]  ;;  %v12660_v39 = vld [vmem:[#allocation8 + $0xe5c] sm:$0xf0]  ;;  %v11585_v23 = vld [vmem:[#allocation8 + $0xc48] sm:$0xf] }
 0x579   :  { %6731 = vmatmul.bf16.gmra.mxu2 %v11802_v13  ;;  %7349 = vmatmul.bf16.gmra.mxu0 %v11554_v16  ;;  %v11833_v16 = vld [vmem:[#allocation8 + $0xe40] sm:$0xf]  ;;  %v12597_v13 = vld [vmem:[#allocation8 + $0xc64] sm:$0xf0] }
 0x57a   :  { %7060 = vmatmul.bf16.gmra.mxu3 %v11806_v38  ;;  %v11398_v38 = vor.u32 %v12545_v54, %v11395_v36  ;;  %v11586_v0 = vor.u32 %v12597_v13, %v11585_v23 }
 0x57b   :  { %v7611_v18 = vpop.f32.mrf.mxu1 }
 0x57c   :  { %v15252_v11 = vadd.f32 %v7611_v18, %v15108_v59  ;;  %v6692_v5 = vpop.f32.mrf.mxu2  ;;  %v12656_v18 = vld [vmem:[#allocation8 + $0xe44] sm:$0xf] }
 0x57d   :  { %v6693_v17 = vadd.f32 %v6692_v5, %v3726_v26  ;;  %v7021_v44 = vpop.f32.mrf.mxu3  ;;  %v3731_v26 = vpop.permute.xlu1 %3730 }
 0x57e   :  { %16961 = vst [vmem:[#allocation30_spill] sm:$0xff] %v15252_v11  ;;  %v7312_v21 = vpop.f32.mrf.mxu0  ;;  %v11835_v11 = vld [vmem:[#allocation8 + $0xe60] sm:$0xf0]  ;;  %v3736_v29 = vpop.permute.xlu2 %3735 }
 0x57f   :  { %v15254_v42 = vadd.f32 %v7021_v44, %v6693_v17  ;;  %v15257_v61 = vadd.f32 %v7312_v21, %v15067_v46  ;;  %v11834_v21 = vor.u32 %v12660_v39, %v11833_v16  ;;  %v11838_v1 = vor.u32 %v12656_v18, %v11835_v11  ;;  %v12605_v18 = vld [vmem:[#allocation8 + $0xca4] sm:$0xf0] }
 0x583   :  { %v7614_v59 = vpop.f32.mrf.mxu1 }
 0x584   :  { %v15262_v5 = vadd.f32 %v7614_v59, %v15116_v4  ;;  %v6694_v17 = vpop.f32.mrf.mxu2 }
 0x585   :  { %v6695_v44 = vadd.f32 %v6694_v17, %v3731_v26  ;;  %v7023_v46 = vpop.f32.mrf.mxu3 }
 0x586   :  { %v7315_v6 = vpop.f32.mrf.mxu0  ;;  %7653 = vmatmul.bf16.gmra.mxu1 %v11398_v38  ;;  %v12553_v38 = vld [vmem:[#allocation8 + $0xb0c] sm:$0xf] }
 0x587   :  { %v15264_v49 = vadd.f32 %v7023_v46, %v6695_v44  ;;  %v15267_v54 = vadd.f32 %v7315_v6, %v15078_v27  ;;  %v11427_v27 = vld [vmem:[#allocation8 + $0xb28] sm:$0xf0]  ;;  %v11865_v6 = vld [vmem:[#allocation8 + $0xe80] sm:$0xf]  ;;  %v12664_v44 = vld [vmem:[#allocation8 + $0xe84] sm:$0xf] }
 0x588   :  { %v11430_v13 = vor.u32 %v12553_v38, %v11427_v27 }
 0x589   :  { %6736 = vmatmul.bf16.gmra.mxu2 %v11834_v21  ;;  %7354 = vmatmul.bf16.gmra.mxu0 %v11586_v0  ;;  %v12668_v0 = vld [vmem:[#allocation8 + $0xe9c] sm:$0xf0] }
 0x58a   :  { %7065 = vmatmul.bf16.gmra.mxu3 %v11838_v1  ;;  %v11617_v1 = vld [vmem:[#allocation8 + $0xc88] sm:$0xf] }
 0x58b   :  { %v7616_v36 = vpop.f32.mrf.mxu1 }
 0x58c   :  { %v15270_v4 = vadd.f32 %v7616_v36, %v15125_v45  ;;  %v6697_v59 = vpop.f32.mrf.mxu2  ;;  %v11867_v45 = vld [vmem:[#allocation8 + $0xea0] sm:$0xf0] }
 0x58d   :  { %v6698_v26 = vadd.f32 %v6697_v59, %v3736_v29  ;;  %v7026_v16 = vpop.f32.mrf.mxu3  ;;  %v11866_v59 = vor.u32 %v12668_v0, %v11865_v6 }
 0x58e   :  { %v7317_v39 = vpop.f32.mrf.mxu0 }
 0x58f   :  { %v15272_v23 = vadd.f32 %v7026_v16, %v6698_v26  ;;  %v15275_v11 = vadd.f32 %v7317_v39, %v15093_v24  ;;  %v11618_v24 = vor.u32 %v12605_v18, %v11617_v1  ;;  %v11870_v16 = vor.u32 %v12664_v44, %v11867_v45  ;;  %v12561_v18 = vld [vmem:[#allocation8 + $0xb4c] sm:$0xf]  ;;  %v11897_v44 = vld [vmem:[#allocation8 + $0xec0] sm:$0xf] }
 0x593   :  { %v7619_v17 = vpop.f32.mrf.mxu1 }
 0x594   :  { %v15278_v46 = vadd.f32 %v7619_v17, %v15138_v33  ;;  %v6699_v29 = vpop.f32.mrf.mxu2 }
 0x595   :  { %v6700_v21 = vadd.f32 %v6699_v29, %v15236_v12  ;;  %v7028_v36 = vpop.f32.mrf.mxu3  ;;  %v12676_v29 = vld [vmem:[#allocation8 + $0xedc] sm:$0xf0] }
 0x596   :  { %v7320_v26 = vpop.f32.mrf.mxu0  ;;  %7658 = vmatmul.bf16.gmra.mxu1 %v11430_v13 }
 0x597   :  { %v15281_v39 = vadd.f32 %v7028_v36, %v6700_v21  ;;  %v15284_v38 = vadd.f32 %v7320_v26, %v15105_v28  ;;  %v11459_v28 = vld [vmem:[#allocation8 + $0xb68] sm:$0xf0]  ;;  %v11649_v21 = vld [vmem:[#allocation8 + $0xcc8] sm:$0xf] }
 0x598   :  { %v11462_v45 = vor.u32 %v12561_v18, %v11459_v28  ;;  %v12613_v36 = vld [vmem:[#allocation8 + $0xce4] sm:$0xf0] }
 0x599   :  { %6741 = vmatmul.bf16.gmra.mxu2 %v11866_v59  ;;  %7359 = vmatmul.bf16.gmra.mxu0 %v11618_v24  ;;  %v11899_v24 = vld [vmem:[#allocation8 + $0xee0] sm:$0xf0] }
 0x59a   :  { %7070 = vmatmul.bf16.gmra.mxu3 %v11870_v16 }
 0x59b   :  { %v7621_v27 = vpop.f32.mrf.mxu1 }
 0x59c   :  { %v15287_v33 = vadd.f32 %v7621_v27, %v15150_v60  ;;  %v6702_v17 = vpop.f32.mrf.mxu2  ;;  %v12672_v60 = vld [vmem:[#allocation8 + $0xec4] sm:$0xf] }
 0x59d   :  { %v6703_v12 = vadd.f32 %v6702_v17, %v15214_v55  ;;  %v7031_v6 = vpop.f32.mrf.mxu3  ;;  %v11898_v17 = vor.u32 %v12676_v29, %v11897_v44 }
 0x59e   :  { %v7322_v0 = vpop.f32.mrf.mxu0 }
 0x59f   :  { %v15290_v1 = vadd.f32 %v7031_v6, %v6703_v12  ;;  %v15293_v13 = vadd.f32 %v7322_v0, %v15113_v41  ;;  %v11650_v41 = vor.u32 %v12613_v36, %v11649_v21  ;;  %v11902_v6 = vor.u32 %v12672_v60, %v11899_v24  ;;  %v12569_v36 = vld [vmem:[#allocation8 + $0xb8c] sm:$0xf]  ;;  %v11929_v60 = vld [vmem:[#allocation8 + $0xf00] sm:$0xf] }
 0x5a3   :  { %v7624_v59 = vpop.f32.mrf.mxu1 }
 0x5a4   :  { %v15296_v26 = vadd.f32 %v7624_v59, %v15163_v32  ;;  %v6704_v55 = vpop.f32.mrf.mxu2 }
 0x5a5   :  { %v6705_v16 = vadd.f32 %v6704_v55, %v15259_v19  ;;  %v7033_v27 = vpop.f32.mrf.mxu3  ;;  %v12684_v55 = vld [vmem:[#allocation8 + $0xf1c] sm:$0xf0] }
 0x5a6   :  { %v7325_v12 = vpop.f32.mrf.mxu0  ;;  %7663 = vmatmul.bf16.gmra.mxu1 %v11462_v45 }
 0x5a7   :  { %v15299_v0 = vadd.f32 %v7033_v27, %v6705_v16  ;;  %v15302_v18 = vadd.f32 %v7325_v12, %v15122_v51  ;;  %v11491_v51 = vld [vmem:[#allocation8 + $0xba8] sm:$0xf0]  ;;  %v11681_v16 = vld [vmem:[#allocation8 + $0xd08] sm:$0xf] }
 0x5a8   :  { %v11494_v24 = vor.u32 %v12569_v36, %v11491_v51  ;;  %v12621_v27 = vld [vmem:[#allocation8 + $0xd24] sm:$0xf0] }
 0x5a9   :  { %6746 = vmatmul.bf16.gmra.mxu2 %v11898_v17  ;;  %7364 = vmatmul.bf16.gmra.mxu0 %v11650_v41  ;;  %v11931_v41 = vld [vmem:[#allocation8 + $0xf20] sm:$0xf0] }
 0x5aa   :  { %7075 = vmatmul.bf16.gmra.mxu3 %v11902_v6 }
 0x5ab   :  { %v7626_v28 = vpop.f32.mrf.mxu1 }
 0x5ac   :  { %v15305_v32 = vadd.f32 %v7626_v28, %v15176_v57  ;;  %v6707_v59 = vpop.f32.mrf.mxu2  ;;  %v12680_v57 = vld [vmem:[#allocation8 + $0xf04] sm:$0xf] }
 0x5ad   :  { %v6708_v19 = vadd.f32 %v6707_v59, %v15182_v48  ;;  %v7036_v44 = vpop.f32.mrf.mxu3  ;;  %v11930_v59 = vor.u32 %v12684_v55, %v11929_v60 }
 0x5ae   :  { %v7327_v29 = vpop.f32.mrf.mxu0 }
 0x5af   :  { %v15308_v21 = vadd.f32 %v7036_v44, %v6708_v19  ;;  %v15311_v45 = vadd.f32 %v7327_v29, %v15135_v62  ;;  %v11682_v62 = vor.u32 %v12621_v27, %v11681_v16  ;;  %v11934_v44 = vor.u32 %v12680_v57, %v11931_v41  ;;  %v12577_v27 = vld [vmem:[#allocation8 + $0xbcc] sm:$0xf]  ;;  %v11961_v57 = vld [vmem:[#allocation8 + $0xf40] sm:$0xf] }
 0x5b3   :  { %v7629_v17 = vpop.f32.mrf.mxu1 }
 0x5b4   :  { %v15314_v12 = vadd.f32 %v7629_v17, %v15191_v14  ;;  %v6709_v48 = vpop.f32.mrf.mxu2 }
 0x5b5   :  { %v6710_v6 = vadd.f32 %v6709_v48, %v15195_v63  ;;  %v7038_v28 = vpop.f32.mrf.mxu3  ;;  %v12692_v48 = vld [vmem:[#allocation8 + $0xf5c] sm:$0xf0] }
 0x5b6   :  { %16962 = vst [vmem:[#allocation94_spill] sm:$0xff] %v15314_v12  ;;  %v7330_v19 = vpop.f32.mrf.mxu0  ;;  %7668 = vmatmul.bf16.gmra.mxu1 %v11494_v24 }
 0x5b7   :  { %v15317_v29 = vadd.f32 %v7038_v28, %v6710_v6  ;;  %v15320_v36 = vadd.f32 %v7330_v19, %v15147_v50  ;;  %v11523_v50 = vld [vmem:[#allocation8 + $0xbe8] sm:$0xf0]  ;;  %v11713_v6 = vld [vmem:[#allocation8 + $0xd48] sm:$0xf] }
 0x5b8   :  { %v11526_v41 = vor.u32 %v12577_v27, %v11523_v50  ;;  %v12629_v28 = vld [vmem:[#allocation8 + $0xd64] sm:$0xf0] }
 0x5b9   :  { %6751 = vmatmul.bf16.gmra.mxu2 %v11930_v59  ;;  %7369 = vmatmul.bf16.gmra.mxu0 %v11682_v62  ;;  %v11963_v62 = vld [vmem:[#allocation8 + $0xf60] sm:$0xf0] }
 0x5ba   :  { %7080 = vmatmul.bf16.gmra.mxu3 %v11934_v44 }
 0x5bb   :  { %v7631_v51 = vpop.f32.mrf.mxu1 }
 0x5bc   :  { %v15323_v14 = vadd.f32 %v7631_v51, %v15206_v31  ;;  %v6712_v17 = vpop.f32.mrf.mxu2  ;;  %v12688_v31 = vld [vmem:[#allocation8 + $0xf44] sm:$0xf] }
 0x5bd   :  { %v6713_v63 = vadd.f32 %v6712_v17, %v15208_v8  ;;  %v7041_v60 = vpop.f32.mrf.mxu3  ;;  %v11962_v17 = vor.u32 %v12692_v48, %v11961_v57 }
 0x5be   :  { %16963 = vst [vmem:[#allocation93_spill] sm:$0xff] %v15323_v14  ;;  %v7332_v55 = vpop.f32.mrf.mxu0 }
 0x5bf   :  { %v15326_v16 = vadd.f32 %v7041_v60, %v6713_v63  ;;  %v15329_v24 = vadd.f32 %v7332_v55, %v15160_v56  ;;  %v11714_v56 = vor.u32 %v12629_v28, %v11713_v6  ;;  %v11966_v60 = vor.u32 %v12688_v31, %v11963_v62  ;;  %v12585_v28 = vld [vmem:[#allocation8 + $0xc0c] sm:$0xf]  ;;  %v11993_v31 = vld [vmem:[#allocation8 + $0xf80] sm:$0xf] }
 0x5c3   :  { %v7634_v59 = vpop.f32.mrf.mxu1 }
 0x5c4   :  { %v15332_v19 = vadd.f32 %v7634_v59, %v15219_v7  ;;  %v6714_v8 = vpop.f32.mrf.mxu2 }
 0x5c5   :  { %v6715_v44 = vadd.f32 %v6714_v8, %v15167_v3  ;;  %v7043_v51 = vpop.f32.mrf.mxu3  ;;  %v12700_v8 = vld [vmem:[#allocation8 + $0xf9c] sm:$0xf0] }
 0x5c6   :  { %16964 = vst [vmem:[#allocation18_spill] sm:$0xff] %v15332_v19  ;;  %v7335_v63 = vpop.f32.mrf.mxu0  ;;  %7673 = vmatmul.bf16.gmra.mxu1 %v11526_v41  ;;  %v17060_v19 = vld [vmem:[#allocation16_spill] sm:$0xff] }
 0x5c7   :  { %v15335_v55 = vadd.f32 %v7043_v51, %v6715_v44  ;;  %v15338_v27 = vadd.f32 %v7335_v63, %v15173_v2  ;;  %v11555_v2 = vld [vmem:[#allocation8 + $0xc28] sm:$0xf0]  ;;  %v11745_v44 = vld [vmem:[#allocation8 + $0xd88] sm:$0xf] }
 0x5c8   :  { %v11558_v62 = vor.u32 %v12585_v28, %v11555_v2  ;;  %v12637_v51 = vld [vmem:[#allocation8 + $0xda4] sm:$0xf0] }
 0x5c9   :  { %6756 = vmatmul.bf16.gmra.mxu2 %v11962_v17  ;;  %7374 = vmatmul.bf16.gmra.mxu0 %v11714_v56  ;;  %v11995_v56 = vld [vmem:[#allocation8 + $0xfa0] sm:$0xf0] }
 0x5ca   :  { %7085 = vmatmul.bf16.gmra.mxu3 %v11966_v60 }
 0x5cb   :  { %v7636_v50 = vpop.f32.mrf.mxu1 }
 0x5cc   :  { %v15341_v7 = vadd.f32 %v7636_v50, %v15232_v43  ;;  %v6717_v59 = vpop.f32.mrf.mxu2  ;;  %v12696_v43 = vld [vmem:[#allocation8 + $0xf84] sm:$0xf] }
 0x5cd   :  { %v6718_v3 = vadd.f32 %v6717_v59, %v15145_v37  ;;  %v7046_v57 = vpop.f32.mrf.mxu3  ;;  %v11994_v59 = vor.u32 %v12700_v8, %v11993_v31 }
 0x5ce   :  { %16965 = vst [vmem:[#allocation99_spill] sm:$0xff] %v15341_v7  ;;  %v7337_v48 = vpop.f32.mrf.mxu0  ;;  %v17058_v7 = vld [vmem:[#allocation19_spill] sm:$0xff] }
 0x5cf   :  { %v15344_v6 = vadd.f32 %v7046_v57, %v6718_v3  ;;  %v15347_v41 = vadd.f32 %v7337_v48, %v15188_v40  ;;  %v11746_v40 = vor.u32 %v12637_v51, %v11745_v44  ;;  %v11998_v57 = vor.u32 %v12696_v43, %v11995_v56  ;;  %v12593_v51 = vld [vmem:[#allocation8 + $0xc4c] sm:$0xf]  ;;  %v12025_v43 = vld [vmem:[#allocation8 + $0xfc0] sm:$0xf] }
 0x5d3   :  { %v7639_v17 = vpop.f32.mrf.mxu1 }
 0x5d4   :  { %v15350_v63 = vadd.f32 %v7639_v17, %v15245_v9  ;;  %v6719_v37 = vpop.f32.mrf.mxu2 }
 0x5d5   :  { %v6720_v60 = vadd.f32 %v6719_v37, %v15193_v22  ;;  %v7048_v50 = vpop.f32.mrf.mxu3  ;;  %v12708_v37 = vld [vmem:[#allocation8 + $0xfdc] sm:$0xf0] }
 0x5d6   :  { %16966 = vst [vmem:[#allocation100_spill] sm:$0xff] %v15350_v63  ;;  %v7340_v3 = vpop.f32.mrf.mxu0  ;;  %7678 = vmatmul.bf16.gmra.mxu1 %v11558_v62  ;;  %v17056_v63 = vld [vmem:[#allocation44_spill] sm:$0xff] }
 0x5d7   :  { %v15353_v48 = vadd.f32 %v7048_v50, %v6720_v60  ;;  %v15356_v28 = vadd.f32 %v7340_v3, %v15203_v25  ;;  %v11587_v25 = vld [vmem:[#allocation8 + $0xc68] sm:$0xf0]  ;;  %v11777_v60 = vld [vmem:[#allocation8 + $0xdc8] sm:$0xf] }
 0x5d8   :  { %v11590_v56 = vor.u32 %v12593_v51, %v11587_v25  ;;  %v12645_v50 = vld [vmem:[#allocation8 + $0xde4] sm:$0xf0] }
 0x5d9   :  { %6761 = vmatmul.bf16.gmra.mxu2 %v11994_v59  ;;  %7379 = vmatmul.bf16.gmra.mxu0 %v11746_v40  ;;  %v12027_v40 = vld [vmem:[#allocation8 + $0xfe0] sm:$0xf0] }
 0x5da   :  { %7090 = vmatmul.bf16.gmra.mxu3 %v11998_v57 }
 0x5db   :  { %v7641_v2 = vpop.f32.mrf.mxu1 }
 0x5dc   :  { %v15359_v9 = vadd.f32 %v7641_v2, %v15257_v61  ;;  %v6722_v17 = vpop.f32.mrf.mxu2  ;;  %v12704_v61 = vld [vmem:[#allocation8 + $0xfc4] sm:$0xf] }
 0x5dd   :  { %v6723_v22 = vadd.f32 %v6722_v17, %v15098_v30  ;;  %v7051_v31 = vpop.f32.mrf.mxu3  ;;  %v12026_v17 = vor.u32 %v12708_v37, %v12025_v43 }
 0x5de   :  { %16967 = vst [vmem:[#allocation101_spill] sm:$0xff] %v15359_v9  ;;  %v7342_v8 = vpop.f32.mrf.mxu0 }
 0x5df   :  { %v15362_v44 = vadd.f32 %v7051_v31, %v6723_v22  ;;  %v15365_v62 = vadd.f32 %v7342_v8, %v15216_v34  ;;  %v11778_v34 = vor.u32 %v12645_v50, %v11777_v60  ;;  %v12030_v31 = vor.u32 %v12704_v61, %v12027_v40  ;;  %v12601_v50 = vld [vmem:[#allocation8 + $0xc8c] sm:$0xf]  ;;  %v11809_v61 = vld [vmem:[#allocation8 + $0xe08] sm:$0xf]  ;;  %v15385_v40 = vpop.permute.xlu2 %3820 }
 0x5e3   :  { %v7644_v59 = vpop.f32.mrf.mxu1 }
 0x5e4   :  { %v15368_v3 = vadd.f32 %v7644_v59, %v15267_v54  ;;  %v6724_v30 = vpop.f32.mrf.mxu2 }
 0x5e5   :  { %v6725_v57 = vadd.f32 %v6724_v30, %v15158_v15  ;;  %v7053_v2 = vpop.f32.mrf.mxu3 }
 0x5e6   :  { %16968 = vst [vmem:[#allocation102_spill] sm:$0xff] %v15368_v3  ;;  %v7345_v22 = vpop.f32.mrf.mxu0  ;;  %7683 = vmatmul.bf16.gmra.mxu1 %v11590_v56 }
 0x5e7   :  { %v15371_v8 = vadd.f32 %v7053_v2, %v6725_v57  ;;  %v15374_v51 = vadd.f32 %v7345_v22, %v15229_v52  ;;  %v11619_v52 = vld [vmem:[#allocation8 + $0xca8] sm:$0xf0]  ;;  %v12653_v57 = vld [vmem:[#allocation8 + $0xe24] sm:$0xf0]  ;;  %v10025_v2 = vld [vmem:[#allocation8 + $0x10] sm:$0xf] }
 0x5e8   :  { %v11622_v30 = vor.u32 %v12601_v50, %v11619_v52  ;;  %v10027_v22 = vld [vmem:[#allocation8 + $0x30] sm:$0xf0] }
 0x5e9   :  { %6766 = vmatmul.bf16.gmra.mxu2 %v12026_v17  ;;  %7384 = vmatmul.bf16.gmra.mxu0 %v11778_v34  ;;  %v12202_v34 = vld [vmem:[#allocation8 + $0x14] sm:$0xf] }
 0x5ea   :  { %7095 = vmatmul.bf16.gmra.mxu3 %v12030_v31 }
 0x5eb   :  { %v7646_v25 = vpop.f32.mrf.mxu1 }
 0x5ec   :  { %v15377_v54 = vadd.f32 %v7646_v25, %v15275_v11  ;;  %v6727_v59 = vpop.f32.mrf.mxu2  ;;  %v12206_v11 = vld [vmem:[#allocation8 + $0x2c] sm:$0xf0] }
 0x5ed   :  { %v6728_v15 = vadd.f32 %v6727_v59, %v15065_v58  ;;  %v7056_v43 = vpop.f32.mrf.mxu3  ;;  %v11810_v59 = vor.u32 %v12653_v57, %v11809_v61 }
 0x5ee   :  { %16969 = vst [vmem:[#allocation103_spill] sm:$0xff] %v15377_v54  ;;  %v7347_v37 = vpop.f32.mrf.mxu0 }
 0x5ef   :  { %v15380_v60 = vadd.f32 %v7056_v43, %v6728_v15  ;;  %v15383_v56 = vadd.f32 %v7347_v37, %v15242_v20  ;;  %v10026_v15 = vor.u32 %v12206_v11, %v10025_v2  ;;  %v10030_v37 = vor.u32 %v12202_v34, %v10027_v22  ;;  %v12609_v11 = vld [vmem:[#allocation8 + $0xccc] sm:$0xf]  ;;  %v11841_v34 = vld [vmem:[#allocation8 + $0xe48] sm:$0xf] }
 0x5f3   :  { %v7649_v17 = vpop.f32.mrf.mxu1 }
 0x5f4   :  { %v15388_v58 = vadd.f32 %v7649_v17, %v15284_v38  ;;  %v6729_v31 = vpop.f32.mrf.mxu2  ;;  %v3806_v38 = vpop.permute.xlu2 %3805 }
 0x5f5   :  { %v6730_v25 = vadd.f32 %v6729_v31, %v15127_v53  ;;  %v7058_v20 = vpop.f32.mrf.mxu3 }
 0x5f6   :  { %16970 = vst [vmem:[#allocation104_spill] sm:$0xff] %v15388_v58  ;;  %v7350_v43 = vpop.f32.mrf.mxu0  ;;  %7688 = vmatmul.bf16.gmra.mxu1 %v11622_v30 }
 0x5f7   :  { %v15391_v54 = vadd.f32 %v7058_v20, %v6730_v25  ;;  %v15394_v50 = vadd.f32 %v7350_v43, %v15254_v42  ;;  %v11651_v42 = vld [vmem:[#allocation8 + $0xce8] sm:$0xf0]  ;;  %v12661_v25 = vld [vmem:[#allocation8 + $0xe64] sm:$0xf0]  ;;  %v10057_v20 = vld [vmem:[#allocation8 + $0x50] sm:$0xf] }
 0x5f8   :  { %v11654_v22 = vor.u32 %v12609_v11, %v11651_v42  ;;  %v12210_v43 = vld [vmem:[#allocation8 + $0x54] sm:$0xf] }
 0x5f9   :  { %7389 = vmatmul.bf16.gmra.mxu0 %v11810_v59  ;;  %7767 = vmatmul.bf16.vlgmr.msra.gmra.mxu2 %v10026_v15  ;;  %v12214_v59 = vld [vmem:[#allocation8 + $0x6c] sm:$0xf0] }
 0x5fa   :  { %8096 = vmatmul.bf16.vlgmr.msra.gmra.mxu3 %v10030_v37  ;;  %v3811_v37 = vpop.permute.xlu0 %3810 }
 0x5fb   :  { %v7651_v52 = vpop.f32.mrf.mxu1 }
 0x5fc   :  { %v15397_v17 = vadd.f32 %v7651_v52, %v15293_v13  ;;  %v6732_v53 = vpop.f32.mrf.mxu2  ;;  %v10059_v13 = vld [vmem:[#allocation8 + $0x70] sm:$0xf0] }
 0x5fd   :  { %v6733_v31 = vadd.f32 %v6732_v53, %v3806_v38  ;;  %v7061_v61 = vpop.f32.mrf.mxu3 }
 0x5fe   :  { %16971 = vst [vmem:[#allocation105_spill] sm:$0xff] %v15397_v17  ;;  %v7352_v57 = vpop.f32.mrf.mxu0  ;;  %v10062_v17 = vor.u32 %v12210_v43, %v10059_v13  ;;  %v11873_v43 = vld [vmem:[#allocation8 + $0xe88] sm:$0xf] }
 0x5ff   :  { %v15399_v2 = vadd.f32 %v7061_v61, %v6733_v31  ;;  %v15402_v30 = vadd.f32 %v7352_v57, %v15264_v49  ;;  %v11842_v61 = vor.u32 %v12661_v25, %v11841_v34  ;;  %v10058_v49 = vor.u32 %v12214_v59, %v10057_v20  ;;  %v12617_v59 = vld [vmem:[#allocation8 + $0xd0c] sm:$0xf] }
 0x603   :  { %v7654_v15 = vpop.f32.mrf.mxu1 }
 0x604   :  { %v15405_v52 = vadd.f32 %v7654_v15, %v15302_v18  ;;  %v6734_v38 = vpop.f32.mrf.mxu2 }
 0x605   :  { %v6735_v53 = vadd.f32 %v6734_v38, %v3811_v37  ;;  %v7063_v31 = vpop.f32.mrf.mxu3  ;;  %v12669_v38 = vld [vmem:[#allocation8 + $0xea4] sm:$0xf0] }
 0x606   :  { %16972 = vst [vmem:[#allocation106_spill] sm:$0xff] %v15405_v52  ;;  %v7355_v57 = vpop.f32.mrf.mxu0  ;;  %7693 = vmatmul.bf16.gmra.mxu1 %v11654_v22 }
 0x607   :  { %v15407_v58 = vadd.f32 %v7063_v31, %v6735_v53  ;;  %v15410_v11 = vadd.f32 %v7355_v57, %v15272_v23  ;;  %v11683_v23 = vld [vmem:[#allocation8 + $0xd28] sm:$0xf0]  ;;  %v12222_v53 = vld [vmem:[#allocation8 + $0xac] sm:$0xf0] }
 0x608   :  { %v11686_v13 = vor.u32 %v12617_v59, %v11683_v23 }
 0x609   :  { %7394 = vmatmul.bf16.gmra.mxu0 %v11842_v61  ;;  %7772 = vmatmul.bf16.gmra.mxu2 %v10058_v49  ;;  %v10091_v61 = vld [vmem:[#allocation8 + $0xb0] sm:$0xf0] }
 0x60a   :  { %8101 = vmatmul.bf16.gmra.mxu3 %v10062_v17  ;;  %v10089_v17 = vld [vmem:[#allocation8 + $0x90] sm:$0xf] }
 0x60b   :  { %v7656_v42 = vpop.f32.mrf.mxu1 }
 0x60c   :  { %v15413_v18 = vadd.f32 %v7656_v42, %v15311_v45  ;;  %v6737_v15 = vpop.f32.mrf.mxu2  ;;  %v12218_v45 = vld [vmem:[#allocation8 + $0x94] sm:$0xf] }
 0x60d   :  { %v6738_v37 = vadd.f32 %v6737_v15, %v15249_v47  ;;  %v7066_v34 = vpop.f32.mrf.mxu3  ;;  %v11874_v15 = vor.u32 %v12669_v38, %v11873_v43 }
 0x60e   :  { %16973 = vst [vmem:[#allocation107_spill] sm:$0xff] %v15413_v18  ;;  %v7357_v25 = vpop.f32.mrf.mxu0 }
 0x60f   :  { %v15416_v20 = vadd.f32 %v7066_v34, %v6738_v37  ;;  %v15419_v22 = vadd.f32 %v7357_v25, %v15281_v39  ;;  %v10090_v39 = vor.u32 %v12222_v53, %v10089_v17  ;;  %v10094_v34 = vor.u32 %v12218_v45, %v10091_v61  ;;  %v12625_v53 = vld [vmem:[#allocation8 + $0xd4c] sm:$0xf]  ;;  %v11905_v45 = vld [vmem:[#allocation8 + $0xec8] sm:$0xf] }
 0x613   :  { %v7659_v31 = vpop.f32.mrf.mxu1 }
 0x614   :  { %v15422_v49 = vadd.f32 %v7659_v31, %v15320_v36  ;;  %v6739_v47 = vpop.f32.mrf.mxu2 }
 0x615   :  { %v6740_v57 = vadd.f32 %v6739_v47, %v15385_v40  ;;  %v7068_v42 = vpop.f32.mrf.mxu3  ;;  %v12677_v47 = vld [vmem:[#allocation8 + $0xee4] sm:$0xf0] }
 0x616   :  { %16974 = vst [vmem:[#allocation108_spill] sm:$0xff] %v15422_v49  ;;  %v7360_v37 = vpop.f32.mrf.mxu0  ;;  %7698 = vmatmul.bf16.gmra.mxu1 %v11686_v13 }
 0x617   :  { %v15425_v25 = vadd.f32 %v7068_v42, %v6740_v57  ;;  %v15428_v59 = vadd.f32 %v7360_v37, %v15290_v1  ;;  %v11715_v1 = vld [vmem:[#allocation8 + $0xd68] sm:$0xf0]  ;;  %v10121_v57 = vld [vmem:[#allocation8 + $0xd0] sm:$0xf] }
 0x618   :  { %v11718_v61 = vor.u32 %v12625_v53, %v11715_v1  ;;  %v12230_v42 = vld [vmem:[#allocation8 + $0xec] sm:$0xf0] }
 0x619   :  { %7399 = vmatmul.bf16.gmra.mxu0 %v11874_v15  ;;  %7777 = vmatmul.bf16.gmra.mxu2 %v10090_v39  ;;  %v10123_v39 = vld [vmem:[#allocation8 + $0xf0] sm:$0xf0] }
 0x61a   :  { %8106 = vmatmul.bf16.gmra.mxu3 %v10094_v34 }
 0x61b   :  { %v7661_v23 = vpop.f32.mrf.mxu1 }
 0x61c   :  { %v15431_v36 = vadd.f32 %v7661_v23, %v15329_v24  ;;  %v6742_v31 = vpop.f32.mrf.mxu2  ;;  %v12226_v24 = vld [vmem:[#allocation8 + $0xd4] sm:$0xf] }
 0x61d   :  { %v6743_v40 = vadd.f32 %v6742_v31, %v15221_v35  ;;  %v7071_v43 = vpop.f32.mrf.mxu3  ;;  %v11906_v31 = vor.u32 %v12677_v47, %v11905_v45 }
 0x61e   :  { %16975 = vst [vmem:[#allocation109_spill] sm:$0xff] %v15431_v36  ;;  %v7362_v38 = vpop.f32.mrf.mxu0 }
 0x61f   :  { %v15434_v17 = vadd.f32 %v7071_v43, %v6743_v40  ;;  %v15437_v13 = vadd.f32 %v7362_v38, %v15299_v0  ;;  %v10122_v0 = vor.u32 %v12230_v42, %v10121_v57  ;;  %v10126_v43 = vor.u32 %v12226_v24, %v10123_v39  ;;  %v12633_v42 = vld [vmem:[#allocation8 + $0xd8c] sm:$0xf]  ;;  %v11937_v24 = vld [vmem:[#allocation8 + $0xf08] sm:$0xf] }
 0x623   :  { %v7664_v15 = vpop.f32.mrf.mxu1 }
 0x624   :  { %v15440_v37 = vadd.f32 %v7664_v15, %v15338_v27  ;;  %v6744_v35 = vpop.f32.mrf.mxu2 }
 0x625   :  { %v6745_v34 = vadd.f32 %v6744_v35, %v15234_v10  ;;  %v7073_v23 = vpop.f32.mrf.mxu3  ;;  %v16978_v10 = vld [vmem:[#allocation86_spill] sm:$0xff] }
 0x626   :  { %16976 = vst [vmem:[#allocation110_spill] sm:$0xff] %v15440_v37  ;;  %v7365_v40 = vpop.f32.mrf.mxu0  ;;  %7703 = vmatmul.bf16.gmra.mxu1 %v11718_v61 }
 0x627   :  { %v15443_v38 = vadd.f32 %v7073_v23, %v6745_v34  ;;  %v15446_v53 = vadd.f32 %v7365_v40, %v15308_v21  ;;  %v11747_v21 = vld [vmem:[#allocation8 + $0xda8] sm:$0xf0]  ;;  %v12685_v34 = vld [vmem:[#allocation8 + $0xf24] sm:$0xf0]  ;;  %v10153_v23 = vld [vmem:[#allocation8 + $0x110] sm:$0xf] }
 0x628   :  { %v11750_v39 = vor.u32 %v12633_v42, %v11747_v21  ;;  %v10155_v40 = vld [vmem:[#allocation8 + $0x130] sm:$0xf0] }
 0x629   :  { %7404 = vmatmul.bf16.gmra.mxu0 %v11906_v31  ;;  %7782 = vmatmul.bf16.gmra.mxu2 %v10122_v0  ;;  %v12238_v31 = vld [vmem:[#allocation8 + $0x12c] sm:$0xf0] }
 0x62a   :  { %8111 = vmatmul.bf16.gmra.mxu3 %v10126_v43 }
 0x62b   :  { %v7666_v1 = vpop.f32.mrf.mxu1 }
 0x62c   :  { %v15449_v27 = vadd.f32 %v7666_v1, %v15347_v41  ;;  %v6747_v15 = vpop.f32.mrf.mxu2  ;;  %v12234_v41 = vld [vmem:[#allocation8 + $0x114] sm:$0xf] }
 0x62d   :  { %v6748_v35 = vadd.f32 %v6747_v15, %v16978_v10  ;;  %v7076_v45 = vpop.f32.mrf.mxu3  ;;  %v16980_v15 = vld [vmem:[#allocation74_spill] sm:$0xff] }
 0x62e   :  { %16977 = vst [vmem:[#allocation111_spill] sm:$0xff] %v15449_v27  ;;  %v7367_v47 = vpop.f32.mrf.mxu0  ;;  %v10158_v27 = vor.u32 %v12234_v41, %v10155_v40  ;;  %v11969_v41 = vld [vmem:[#allocation8 + $0xf48] sm:$0xf] }
 0x62f   :  { %v15452_v57 = vadd.f32 %v7076_v45, %v6748_v35  ;;  %v15455_v61 = vadd.f32 %v7367_v47, %v15317_v29  ;;  %v11938_v45 = vor.u32 %v12685_v34, %v11937_v24  ;;  %v10154_v29 = vor.u32 %v12238_v31, %v10153_v23  ;;  %v12641_v31 = vld [vmem:[#allocation8 + $0xdcc] sm:$0xf] }
 0x633   :  { %v7669_v0 = vpop.f32.mrf.mxu1 }
 0x634   :  { %v15458_v43 = vadd.f32 %v7669_v0, %v15356_v28  ;;  %v6749_v1 = vpop.f32.mrf.mxu2 }
 0x635   :  { %v6750_v10 = vadd.f32 %v6749_v1, %v16980_v15  ;;  %v7078_v35 = vpop.f32.mrf.mxu3  ;;  %v16982_v1 = vld [vmem:[#allocation40_spill] sm:$0xff] }
 0x636   :  { %16979 = vst [vmem:[#allocation86_spill] sm:$0xff] %v15458_v43  ;;  %v7370_v47 = vpop.f32.mrf.mxu0  ;;  %7708 = vmatmul.bf16.gmra.mxu1 %v11750_v39 }
 0x637   :  { %v15461_v37 = vadd.f32 %v7078_v35, %v6750_v10  ;;  %v15464_v42 = vadd.f32 %v7370_v47, %v15326_v16  ;;  %v11779_v16 = vld [vmem:[#allocation8 + $0xde8] sm:$0xf0]  ;;  %v12693_v10 = vld [vmem:[#allocation8 + $0xf64] sm:$0xf0]  ;;  %v12246_v35 = vld [vmem:[#allocation8 + $0x16c] sm:$0xf0] }
 0x638   :  { %v11782_v40 = vor.u32 %v12641_v31, %v11779_v16 }
 0x639   :  { %7409 = vmatmul.bf16.gmra.mxu0 %v11938_v45  ;;  %7787 = vmatmul.bf16.gmra.mxu2 %v10154_v29  ;;  %v10187_v29 = vld [vmem:[#allocation8 + $0x170] sm:$0xf0] }
 0x63a   :  { %8116 = vmatmul.bf16.gmra.mxu3 %v10158_v27  ;;  %v10185_v27 = vld [vmem:[#allocation8 + $0x150] sm:$0xf] }
 0x63b   :  { %v7671_v21 = vpop.f32.mrf.mxu1 }
 0x63c   :  { %v15467_v28 = vadd.f32 %v7671_v21, %v15365_v62  ;;  %v6752_v0 = vpop.f32.mrf.mxu2  ;;  %v12242_v62 = vld [vmem:[#allocation8 + $0x154] sm:$0xf] }
 0x63d   :  { %v6753_v15 = vadd.f32 %v6752_v0, %v16982_v1  ;;  %v7081_v24 = vpop.f32.mrf.mxu3  ;;  %v16984_v0 = vld [vmem:[#allocation77_spill] sm:$0xff] }
 0x63e   :  { %16981 = vst [vmem:[#allocation74_spill] sm:$0xff] %v15467_v28  ;;  %v7372_v34 = vpop.f32.mrf.mxu0  ;;  %v10190_v28 = vor.u32 %v12242_v62, %v10187_v29  ;;  %v12001_v62 = vld [vmem:[#allocation8 + $0xf88] sm:$0xf] }
 0x63f   :  { %v15470_v23 = vadd.f32 %v7081_v24, %v6753_v15  ;;  %v15473_v39 = vadd.f32 %v7372_v34, %v15335_v55  ;;  %v11970_v24 = vor.u32 %v12693_v10, %v11969_v41  ;;  %v10186_v55 = vor.u32 %v12246_v35, %v10185_v27  ;;  %v12649_v35 = vld [vmem:[#allocation8 + $0xe0c] sm:$0xf] }
 0x643   :  { %v7674_v45 = vpop.f32.mrf.mxu1 }
 0x644   :  { %v15476_v47 = vadd.f32 %v7674_v45, %v15374_v51  ;;  %v6754_v21 = vpop.f32.mrf.mxu2 }
 0x645   :  { %v6755_v1 = vadd.f32 %v6754_v21, %v16984_v0  ;;  %v7083_v15 = vpop.f32.mrf.mxu3  ;;  %v16986_v21 = vld [vmem:[#allocation37_spill] sm:$0xff] }
 0x646   :  { %16983 = vst [vmem:[#allocation40_spill] sm:$0xff] %v15476_v47  ;;  %v7375_v34 = vpop.f32.mrf.mxu0  ;;  %7713 = vmatmul.bf16.gmra.mxu1 %v11782_v40 }
 0x647   :  { %v15479_v43 = vadd.f32 %v7083_v15, %v6755_v1  ;;  %v15482_v31 = vadd.f32 %v7375_v34, %v15344_v6  ;;  %v11811_v6 = vld [vmem:[#allocation8 + $0xe28] sm:$0xf0]  ;;  %v12701_v1 = vld [vmem:[#allocation8 + $0xfa4] sm:$0xf0]  ;;  %v12254_v15 = vld [vmem:[#allocation8 + $0x1ac] sm:$0xf0] }
 0x648   :  { %v11814_v29 = vor.u32 %v12649_v35, %v11811_v6 }
 0x649   :  { %7414 = vmatmul.bf16.gmra.mxu0 %v11970_v24  ;;  %7792 = vmatmul.bf16.gmra.mxu2 %v10186_v55  ;;  %v10219_v55 = vld [vmem:[#allocation8 + $0x1b0] sm:$0xf0] }
 0x64a   :  { %8121 = vmatmul.bf16.gmra.mxu3 %v10190_v28  ;;  %v10217_v28 = vld [vmem:[#allocation8 + $0x190] sm:$0xf] }
 0x64b   :  { %v7676_v16 = vpop.f32.mrf.mxu1 }
 0x64c   :  { %v15485_v51 = vadd.f32 %v7676_v16, %v15383_v56  ;;  %v6757_v45 = vpop.f32.mrf.mxu2  ;;  %v12250_v56 = vld [vmem:[#allocation8 + $0x194] sm:$0xf] }
 0x64d   :  { %v6758_v0 = vadd.f32 %v6757_v45, %v16986_v21  ;;  %v7086_v41 = vpop.f32.mrf.mxu3  ;;  %v16988_v45 = vld [vmem:[#allocation21_spill] sm:$0xff] }
 0x64e   :  { %16985 = vst [vmem:[#allocation77_spill] sm:$0xff] %v15485_v51  ;;  %v7377_v10 = vpop.f32.mrf.mxu0  ;;  %v10222_v51 = vor.u32 %v12250_v56, %v10219_v55  ;;  %v12033_v56 = vld [vmem:[#allocation8 + $0xfc8] sm:$0xf] }
 0x64f   :  { %v15488_v27 = vadd.f32 %v7086_v41, %v6758_v0  ;;  %v15491_v40 = vadd.f32 %v7377_v10, %v15353_v48  ;;  %v12002_v41 = vor.u32 %v12701_v1, %v12001_v62  ;;  %v10218_v48 = vor.u32 %v12254_v15, %v10217_v28  ;;  %v12657_v15 = vld [vmem:[#allocation8 + $0xe4c] sm:$0xf] }
 0x653   :  { %v7679_v24 = vpop.f32.mrf.mxu1 }
 0x654   :  { %v15494_v34 = vadd.f32 %v7679_v24, %v15394_v50  ;;  %v6759_v16 = vpop.f32.mrf.mxu2 }
 0x655   :  { %v6760_v21 = vadd.f32 %v6759_v16, %v16988_v45  ;;  %v7088_v0 = vpop.f32.mrf.mxu3  ;;  %v16990_v16 = vld [vmem:[#allocation33_spill] sm:$0xff] }
 0x656   :  { %16987 = vst [vmem:[#allocation37_spill] sm:$0xff] %v15494_v34  ;;  %v7380_v10 = vpop.f32.mrf.mxu0  ;;  %7718 = vmatmul.bf16.gmra.mxu1 %v11814_v29 }
 0x657   :  { %v15497_v47 = vadd.f32 %v7088_v0, %v6760_v21  ;;  %v15500_v35 = vadd.f32 %v7380_v10, %v15362_v44  ;;  %v11843_v44 = vld [vmem:[#allocation8 + $0xe68] sm:$0xf0]  ;;  %v12709_v21 = vld [vmem:[#allocation8 + $0xfe4] sm:$0xf0]  ;;  %v12262_v0 = vld [vmem:[#allocation8 + $0x1ec] sm:$0xf0] }
 0x658   :  { %v11846_v55 = vor.u32 %v12657_v15, %v11843_v44 }
 0x659   :  { %7419 = vmatmul.bf16.gmra.mxu0 %v12002_v41  ;;  %7797 = vmatmul.bf16.gmra.mxu2 %v10218_v48  ;;  %v10251_v48 = vld [vmem:[#allocation8 + $0x1f0] sm:$0xf0] }
 0x65a   :  { %8126 = vmatmul.bf16.gmra.mxu3 %v10222_v51  ;;  %v10249_v51 = vld [vmem:[#allocation8 + $0x1d0] sm:$0xf] }
 0x65b   :  { %v7681_v6 = vpop.f32.mrf.mxu1 }
 0x65c   :  { %v15503_v50 = vadd.f32 %v7681_v6, %v15402_v30  ;;  %v6762_v24 = vpop.f32.mrf.mxu2  ;;  %v12258_v30 = vld [vmem:[#allocation8 + $0x1d4] sm:$0xf] }
 0x65d   :  { %v6763_v45 = vadd.f32 %v6762_v24, %v16990_v16  ;;  %v7091_v62 = vpop.f32.mrf.mxu3  ;;  %v16992_v24 = vld [vmem:[#allocation54_spill] sm:$0xff] }
 0x65e   :  { %16989 = vst [vmem:[#allocation21_spill] sm:$0xff] %v15503_v50  ;;  %v7382_v1 = vpop.f32.mrf.mxu0  ;;  %v10254_v50 = vor.u32 %v12258_v30, %v10251_v48  ;;  %v10281_v30 = vld [vmem:[#allocation8 + $0x210] sm:$0xf] }
 0x65f   :  { %v15506_v28 = vadd.f32 %v7091_v62, %v6763_v45  ;;  %v15509_v29 = vadd.f32 %v7382_v1, %v15371_v8  ;;  %v12034_v62 = vor.u32 %v12709_v21, %v12033_v56  ;;  %v10250_v8 = vor.u32 %v12262_v0, %v10249_v51  ;;  %v12665_v0 = vld [vmem:[#allocation8 + $0xe8c] sm:$0xf] }
 0x663   :  { %v7684_v41 = vpop.f32.mrf.mxu1 }
 0x664   :  { %v15512_v10 = vadd.f32 %v7684_v41, %v15410_v11  ;;  %v6764_v6 = vpop.f32.mrf.mxu2 }
 0x665   :  { %v6765_v16 = vadd.f32 %v6764_v6, %v16992_v24  ;;  %v7093_v45 = vpop.f32.mrf.mxu3  ;;  %v16994_v6 = vld [vmem:[#allocation45_spill] sm:$0xff] }
 0x666   :  { %16991 = vst [vmem:[#allocation33_spill] sm:$0xff] %v15512_v10  ;;  %v7385_v1 = vpop.f32.mrf.mxu0  ;;  %7723 = vmatmul.bf16.gmra.mxu1 %v11846_v55 }
 0x667   :  { %v15515_v34 = vadd.f32 %v7093_v45, %v6765_v16  ;;  %v15518_v15 = vadd.f32 %v7385_v1, %v15380_v60  ;;  %v11875_v60 = vld [vmem:[#allocation8 + $0xea8] sm:$0xf0]  ;;  %v12270_v16 = vld [vmem:[#allocation8 + $0x22c] sm:$0xf0]  ;;  %v12207_v45 = vld [vmem:[#allocation8 + $0x34] sm:$0xf0] }
 0x668   :  { %v11878_v48 = vor.u32 %v12665_v0, %v11875_v60 }
 0x669   :  { %7424 = vmatmul.bf16.gmra.mxu0 %v12034_v62  ;;  %7802 = vmatmul.bf16.gmra.mxu2 %v10250_v8  ;;  %v10283_v8 = vld [vmem:[#allocation8 + $0x230] sm:$0xf0] }
 0x66a   :  { %8131 = vmatmul.bf16.gmra.mxu3 %v10254_v50  ;;  %v10033_v50 = vld [vmem:[#allocation8 + $0x18] sm:$0xf] }
 0x66b   :  { %v7686_v44 = vpop.f32.mrf.mxu1 }
 0x66c   :  { %v15521_v11 = vadd.f32 %v7686_v44, %v15419_v22  ;;  %v6767_v41 = vpop.f32.mrf.mxu2  ;;  %v12266_v22 = vld [vmem:[#allocation8 + $0x214] sm:$0xf] }
 0x66d   :  { %v6768_v24 = vadd.f32 %v6767_v41, %v16994_v6  ;;  %v7096_v56 = vpop.f32.mrf.mxu3  ;;  %v16996_v41 = vld [vmem:[#allocation89_spill] sm:$0xff] }
 0x66e   :  { %16993 = vst [vmem:[#allocation54_spill] sm:$0xff] %v15521_v11  ;;  %v7387_v21 = vpop.f32.mrf.mxu0  ;;  %v10286_v11 = vor.u32 %v12266_v22, %v10283_v8  ;;  %v10313_v22 = vld [vmem:[#allocation8 + $0x250] sm:$0xf] }
 0x66f   :  { %v15524_v51 = vadd.f32 %v7096_v56, %v6768_v24  ;;  %v15527_v55 = vadd.f32 %v7387_v21, %v15391_v54  ;;  %v10282_v56 = vor.u32 %v12270_v16, %v10281_v30  ;;  %v10034_v54 = vor.u32 %v12207_v45, %v10033_v50  ;;  %v12673_v45 = vld [vmem:[#allocation8 + $0xecc] sm:$0xf] }
 0x673   :  { %v7689_v62 = vpop.f32.mrf.mxu1 }
 0x674   :  { %v15530_v1 = vadd.f32 %v7689_v62, %v15428_v59  ;;  %v6769_v44 = vpop.f32.mrf.mxu2 }
 0x675   :  { %v6770_v6 = vadd.f32 %v6769_v44, %v16996_v41  ;;  %v7098_v24 = vpop.f32.mrf.mxu3  ;;  %v16998_v44 = vld [vmem:[#allocation22_spill] sm:$0xff] }
 0x676   :  { %16995 = vst [vmem:[#allocation45_spill] sm:$0xff] %v15530_v1  ;;  %v7390_v21 = vpop.f32.mrf.mxu0  ;;  %7728 = vmatmul.bf16.gmra.mxu1 %v11878_v48 }
 0x677   :  { %v15533_v10 = vadd.f32 %v7098_v24, %v6770_v6  ;;  %v15536_v0 = vadd.f32 %v7390_v21, %v15399_v2  ;;  %v11907_v2 = vld [vmem:[#allocation8 + $0xee8] sm:$0xf0]  ;;  %v12278_v6 = vld [vmem:[#allocation8 + $0x26c] sm:$0xf0]  ;;  %v12215_v24 = vld [vmem:[#allocation8 + $0x74] sm:$0xf0] }
 0x678   :  { %v11910_v8 = vor.u32 %v12673_v45, %v11907_v2 }
 0x679   :  { %7807 = vmatmul.bf16.gmra.mxu2 %v10282_v56  ;;  %8425 = vmatmul.bf16.vlgmr.msra.gmra.mxu0 %v10034_v54  ;;  %v10315_v54 = vld [vmem:[#allocation8 + $0x270] sm:$0xf0] }
 0x67a   :  { %8136 = vmatmul.bf16.gmra.mxu3 %v10286_v11  ;;  %v10065_v11 = vld [vmem:[#allocation8 + $0x58] sm:$0xf] }
 0x67b   :  { %v7691_v60 = vpop.f32.mrf.mxu1 }
 0x67c   :  { %v15539_v59 = vadd.f32 %v7691_v60, %v15437_v13  ;;  %v7768_v62 = vpop.f32.mrf.mxu2  ;;  %v12274_v13 = vld [vmem:[#allocation8 + $0x254] sm:$0xf] }
 0x67d   :  { %v7769_v41 = vadd.f32 %v7768_v62, %v16998_v44  ;;  %v8097_v30 = vpop.f32.mrf.mxu3  ;;  %v17000_v62 = vld [vmem:[#allocation27_spill] sm:$0xff] }
 0x67e   :  { %16997 = vst [vmem:[#allocation89_spill] sm:$0xff] %v15539_v59  ;;  %v7392_v16 = vpop.f32.mrf.mxu0  ;;  %v10318_v59 = vor.u32 %v12274_v13, %v10315_v54  ;;  %v10345_v13 = vld [vmem:[#allocation8 + $0x290] sm:$0xf] }
 0x67f   :  { %v15543_v48 = vadd.f32 %v7392_v16, %v15407_v58  ;;  %v15545_v50 = vadd.f32 %v8097_v30, %v7769_v41  ;;  %v10314_v16 = vor.u32 %v12278_v6, %v10313_v22  ;;  %v10066_v41 = vor.u32 %v12215_v24, %v10065_v11  ;;  %v11939_v24 = vld [vmem:[#allocation8 + $0xf28] sm:$0xf0] }
 0x683   :  { %v7694_v56 = vpop.f32.mrf.mxu1 }
 0x684   :  { %v15548_v21 = vadd.f32 %v7694_v56, %v15446_v53  ;;  %v7770_v60 = vpop.f32.mrf.mxu2 }
 0x685   :  { %v7771_v44 = vadd.f32 %v7770_v60, %v17000_v62  ;;  %v8099_v58 = vpop.f32.mrf.mxu3  ;;  %v17002_v60 = vld [vmem:[#allocation50_spill] sm:$0xff] }
 0x686   :  { %16999 = vst [vmem:[#allocation22_spill] sm:$0xff] %v15548_v21  ;;  %v7395_v30 = vpop.f32.mrf.mxu0  ;;  %7733 = vmatmul.bf16.gmra.mxu1 %v11910_v8 }
 0x687   :  { %v15552_v45 = vadd.f32 %v7395_v30, %v15416_v20  ;;  %v15554_v2 = vadd.f32 %v8099_v58, %v7771_v44  ;;  %v12681_v20 = vld [vmem:[#allocation8 + $0xf0c] sm:$0xf]  ;;  %v12286_v44 = vld [vmem:[#allocation8 + $0x2ac] sm:$0xf0]  ;;  %v12223_v58 = vld [vmem:[#allocation8 + $0xb4] sm:$0xf0] }
 0x688   :  { %v11942_v54 = vor.u32 %v12681_v20, %v11939_v24 }
 0x689   :  { %7812 = vmatmul.bf16.gmra.mxu2 %v10314_v16  ;;  %8430 = vmatmul.bf16.gmra.mxu0 %v10066_v41 }
 0x68a   :  { %8141 = vmatmul.bf16.gmra.mxu3 %v10318_v59  ;;  %v10097_v59 = vld [vmem:[#allocation8 + $0x98] sm:$0xf] }
 0x68b   :  { %v7696_v1 = vpop.f32.mrf.mxu1 }
 0x68c   :  { %v15557_v53 = vadd.f32 %v7696_v1, %v15455_v61  ;;  %v7773_v56 = vpop.f32.mrf.mxu2  ;;  %v12282_v61 = vld [vmem:[#allocation8 + $0x294] sm:$0xf] }
 0x68d   :  { %v7774_v62 = vadd.f32 %v7773_v56, %v17002_v60  ;;  %v8102_v22 = vpop.f32.mrf.mxu3  ;;  %v10347_v1 = vld [vmem:[#allocation8 + $0x2b0] sm:$0xf0]  ;;  %v17004_v56 = vld [vmem:[#allocation66_spill] sm:$0xff] }
 0x68e   :  { %17001 = vst [vmem:[#allocation27_spill] sm:$0xff] %v15557_v53  ;;  %v7397_v6 = vpop.f32.mrf.mxu0  ;;  %v10350_v53 = vor.u32 %v12282_v61, %v10347_v1  ;;  %v10377_v61 = vld [vmem:[#allocation8 + $0x2d0] sm:$0xf] }
 0x68f   :  { %v15561_v8 = vadd.f32 %v7397_v6, %v15425_v25  ;;  %v15563_v11 = vadd.f32 %v8102_v22, %v7774_v62  ;;  %v10346_v6 = vor.u32 %v12286_v44, %v10345_v13  ;;  %v10098_v62 = vor.u32 %v12223_v58, %v10097_v59  ;;  %v11971_v58 = vld [vmem:[#allocation8 + $0xf68] sm:$0xf0] }
 0x693   :  { %v7699_v16 = vpop.f32.mrf.mxu1 }
 0x694   :  { %v15566_v41 = vadd.f32 %v7699_v16, %v15464_v42  ;;  %v7775_v30 = vpop.f32.mrf.mxu2 }
 0x695   :  { %v7776_v60 = vadd.f32 %v7775_v30, %v17004_v56  ;;  %v8104_v25 = vpop.f32.mrf.mxu3  ;;  %v17006_v30 = vld [vmem:[#allocation79_spill] sm:$0xff] }
 0x696   :  { %17003 = vst [vmem:[#allocation50_spill] sm:$0xff] %v15566_v41  ;;  %v7400_v22 = vpop.f32.mrf.mxu0  ;;  %7738 = vmatmul.bf16.gmra.mxu1 %v11942_v54 }
 0x697   :  { %v15570_v20 = vadd.f32 %v7400_v22, %v15434_v17  ;;  %v15572_v24 = vadd.f32 %v8104_v25, %v7776_v60  ;;  %v12689_v17 = vld [vmem:[#allocation8 + $0xf4c] sm:$0xf]  ;;  %v12294_v60 = vld [vmem:[#allocation8 + $0x2ec] sm:$0xf0]  ;;  %v12231_v25 = vld [vmem:[#allocation8 + $0xf4] sm:$0xf0] }
 0x698   :  { %v11974_v1 = vor.u32 %v12689_v17, %v11971_v58 }
 0x699   :  { %7817 = vmatmul.bf16.gmra.mxu2 %v10346_v6  ;;  %8435 = vmatmul.bf16.gmra.mxu0 %v10098_v62 }
 0x69a   :  { %8146 = vmatmul.bf16.gmra.mxu3 %v10350_v53  ;;  %v10129_v53 = vld [vmem:[#allocation8 + $0xd8] sm:$0xf] }
 0x69b   :  { %v7701_v21 = vpop.f32.mrf.mxu1 }
 0x69c   :  { %v15575_v42 = vadd.f32 %v7701_v21, %v15473_v39  ;;  %v7778_v16 = vpop.f32.mrf.mxu2  ;;  %v12290_v39 = vld [vmem:[#allocation8 + $0x2d4] sm:$0xf] }
 0x69d   :  { %v7779_v56 = vadd.f32 %v7778_v16, %v17006_v30  ;;  %v8107_v13 = vpop.f32.mrf.mxu3  ;;  %v10379_v21 = vld [vmem:[#allocation8 + $0x2f0] sm:$0xf0]  ;;  %v17008_v16 = vld [vmem:[#allocation75_spill] sm:$0xff] }
 0x69e   :  { %17005 = vst [vmem:[#allocation66_spill] sm:$0xff] %v15575_v42  ;;  %v7402_v44 = vpop.f32.mrf.mxu0  ;;  %v10382_v42 = vor.u32 %v12290_v39, %v10379_v21  ;;  %v10409_v39 = vld [vmem:[#allocation8 + $0x310] sm:$0xf] }
 0x69f   :  { %v15579_v54 = vadd.f32 %v7402_v44, %v15443_v38  ;;  %v15581_v59 = vadd.f32 %v8107_v13, %v7779_v56  ;;  %v10378_v44 = vor.u32 %v12294_v60, %v10377_v61  ;;  %v10130_v56 = vor.u32 %v12231_v25, %v10129_v53  ;;  %v12003_v25 = vld [vmem:[#allocation8 + $0xfa8] sm:$0xf0] }
 0x6a3   :  { %v7704_v6 = vpop.f32.mrf.mxu1 }
 0x6a4   :  { %v15584_v62 = vadd.f32 %v7704_v6, %v15482_v31  ;;  %v7780_v22 = vpop.f32.mrf.mxu2 }
 0x6a5   :  { %v7781_v30 = vadd.f32 %v7780_v22, %v17008_v16  ;;  %v8109_v38 = vpop.f32.mrf.mxu3  ;;  %v17010_v22 = vld [vmem:[#allocation85_spill] sm:$0xff] }
 0x6a6   :  { %17007 = vst [vmem:[#allocation79_spill] sm:$0xff] %v15584_v62  ;;  %v7405_v13 = vpop.f32.mrf.mxu0  ;;  %7743 = vmatmul.bf16.gmra.mxu1 %v11974_v1 }
 0x6a7   :  { %v15588_v17 = vadd.f32 %v7405_v13, %v15452_v57  ;;  %v15590_v58 = vadd.f32 %v8109_v38, %v7781_v30  ;;  %v12697_v57 = vld [vmem:[#allocation8 + $0xf8c] sm:$0xf]  ;;  %v12302_v30 = vld [vmem:[#allocation8 + $0x32c] sm:$0xf0]  ;;  %v12239_v38 = vld [vmem:[#allocation8 + $0x134] sm:$0xf0] }
 0x6a8   :  { %v12006_v21 = vor.u32 %v12697_v57, %v12003_v25 }
 0x6a9   :  { %7822 = vmatmul.bf16.gmra.mxu2 %v10378_v44  ;;  %8440 = vmatmul.bf16.gmra.mxu0 %v10130_v56 }
 0x6aa   :  { %8151 = vmatmul.bf16.gmra.mxu3 %v10382_v42  ;;  %v10161_v42 = vld [vmem:[#allocation8 + $0x118] sm:$0xf] }
 0x6ab   :  { %v7706_v41 = vpop.f32.mrf.mxu1 }
 0x6ac   :  { %v15593_v31 = vadd.f32 %v7706_v41, %v15491_v40  ;;  %v7783_v6 = vpop.f32.mrf.mxu2  ;;  %v12298_v40 = vld [vmem:[#allocation8 + $0x314] sm:$0xf] }
 0x6ad   :  { %v7784_v16 = vadd.f32 %v7783_v6, %v17010_v22  ;;  %v8112_v61 = vpop.f32.mrf.mxu3  ;;  %v10411_v41 = vld [vmem:[#allocation8 + $0x330] sm:$0xf0]  ;;  %v17012_v6 = vld [vmem:[#allocation58_spill] sm:$0xff] }
 0x6ae   :  { %17009 = vst [vmem:[#allocation75_spill] sm:$0xff] %v15593_v31  ;;  %v7407_v60 = vpop.f32.mrf.mxu0  ;;  %v10414_v31 = vor.u32 %v12298_v40, %v10411_v41  ;;  %v10441_v40 = vld [vmem:[#allocation8 + $0x350] sm:$0xf] }
 0x6af   :  { %v15597_v1 = vadd.f32 %v7407_v60, %v15461_v37  ;;  %v15599_v53 = vadd.f32 %v8112_v61, %v7784_v16  ;;  %v10410_v60 = vor.u32 %v12302_v30, %v10409_v39  ;;  %v10162_v16 = vor.u32 %v12239_v38, %v10161_v42  ;;  %v12035_v38 = vld [vmem:[#allocation8 + $0xfe8] sm:$0xf0] }
 0x6b3   :  { %v7709_v44 = vpop.f32.mrf.mxu1 }
 0x6b4   :  { %v15602_v56 = vadd.f32 %v7709_v44, %v15500_v35  ;;  %v7785_v13 = vpop.f32.mrf.mxu2 }
 0x6b5   :  { %v7786_v22 = vadd.f32 %v7785_v13, %v17012_v6  ;;  %v8114_v37 = vpop.f32.mrf.mxu3  ;;  %v17014_v13 = vld [vmem:[#allocation38_spill] sm:$0xff] }
 0x6b6   :  { %17011 = vst [vmem:[#allocation85_spill] sm:$0xff] %v15602_v56  ;;  %v7410_v61 = vpop.f32.mrf.mxu0  ;;  %7748 = vmatmul.bf16.gmra.mxu1 %v12006_v21 }
 0x6b7   :  { %v15606_v57 = vadd.f32 %v7410_v61, %v15470_v23  ;;  %v15608_v25 = vadd.f32 %v8114_v37, %v7786_v22  ;;  %v12705_v23 = vld [vmem:[#allocation8 + $0xfcc] sm:$0xf]  ;;  %v12310_v22 = vld [vmem:[#allocation8 + $0x36c] sm:$0xf0]  ;;  %v12247_v37 = vld [vmem:[#allocation8 + $0x174] sm:$0xf0] }
 0x6b8   :  { %v12038_v41 = vor.u32 %v12705_v23, %v12035_v38 }
 0x6b9   :  { %7827 = vmatmul.bf16.gmra.mxu2 %v10410_v60  ;;  %8445 = vmatmul.bf16.gmra.mxu0 %v10162_v16 }
 0x6ba   :  { %8156 = vmatmul.bf16.gmra.mxu3 %v10414_v31  ;;  %v10193_v31 = vld [vmem:[#allocation8 + $0x158] sm:$0xf] }
 0x6bb   :  { %v7711_v62 = vpop.f32.mrf.mxu1 }
 0x6bc   :  { %v15611_v35 = vadd.f32 %v7711_v62, %v15509_v29  ;;  %v7788_v44 = vpop.f32.mrf.mxu2  ;;  %v12306_v29 = vld [vmem:[#allocation8 + $0x354] sm:$0xf] }
 0x6bd   :  { %v7789_v6 = vadd.f32 %v7788_v44, %v17014_v13  ;;  %v8117_v39 = vpop.f32.mrf.mxu3  ;;  %v10443_v62 = vld [vmem:[#allocation8 + $0x370] sm:$0xf0]  ;;  %v17016_v44 = vld [vmem:[#allocation64_spill] sm:$0xff] }
 0x6be   :  { %17013 = vst [vmem:[#allocation58_spill] sm:$0xff] %v15611_v35  ;;  %v7412_v30 = vpop.f32.mrf.mxu0  ;;  %v10446_v35 = vor.u32 %v12306_v29, %v10443_v62  ;;  %v10473_v29 = vld [vmem:[#allocation8 + $0x390] sm:$0xf] }
 0x6bf   :  { %v15615_v21 = vadd.f32 %v7412_v30, %v15479_v43  ;;  %v15617_v42 = vadd.f32 %v8117_v39, %v7789_v6  ;;  %v10442_v30 = vor.u32 %v12310_v22, %v10441_v40  ;;  %v10194_v6 = vor.u32 %v12247_v37, %v10193_v31  ;;  %v10035_v37 = vld [vmem:[#allocation8 + $0x38] sm:$0xf0] }
 0x6c3   :  { %v7714_v60 = vpop.f32.mrf.mxu1 }
 0x6c4   :  { %v15620_v16 = vadd.f32 %v7714_v60, %v15518_v15  ;;  %v7790_v61 = vpop.f32.mrf.mxu2 }
 0x6c5   :  { %v7791_v13 = vadd.f32 %v7790_v61, %v17016_v44  ;;  %v8119_v43 = vpop.f32.mrf.mxu3  ;;  %v17018_v61 = vld [vmem:[#allocation31_spill] sm:$0xff] }
 0x6c6   :  { %17015 = vst [vmem:[#allocation38_spill] sm:$0xff] %v15620_v16  ;;  %v7415_v39 = vpop.f32.mrf.mxu0  ;;  %7753 = vmatmul.bf16.gmra.mxu1 %v12038_v41 }
 0x6c7   :  { %v15624_v23 = vadd.f32 %v7415_v39, %v15488_v27  ;;  %v15626_v38 = vadd.f32 %v8119_v43, %v7791_v13  ;;  %v12203_v27 = vld [vmem:[#allocation8 + $0x1c] sm:$0xf]  ;;  %v12318_v13 = vld [vmem:[#allocation8 + $0x3ac] sm:$0xf0]  ;;  %v12255_v43 = vld [vmem:[#allocation8 + $0x1b4] sm:$0xf0] }
 0x6c8   :  { %v10038_v62 = vor.u32 %v12203_v27, %v10035_v37 }
 0x6c9   :  { %7832 = vmatmul.bf16.gmra.mxu2 %v10442_v30  ;;  %8450 = vmatmul.bf16.gmra.mxu0 %v10194_v6 }
 0x6ca   :  { %8161 = vmatmul.bf16.gmra.mxu3 %v10446_v35  ;;  %v10225_v35 = vld [vmem:[#allocation8 + $0x198] sm:$0xf] }
 0x6cb   :  { %v7716_v56 = vpop.f32.mrf.mxu1 }
 0x6cc   :  { %v15629_v15 = vadd.f32 %v7716_v56, %v15527_v55  ;;  %v7793_v60 = vpop.f32.mrf.mxu2  ;;  %v12314_v55 = vld [vmem:[#allocation8 + $0x394] sm:$0xf] }
 0x6cd   :  { %v7794_v44 = vadd.f32 %v7793_v60, %v17018_v61  ;;  %v8122_v40 = vpop.f32.mrf.mxu3  ;;  %v10475_v56 = vld [vmem:[#allocation8 + $0x3b0] sm:$0xf0]  ;;  %v17020_v60 = vld [vmem:[#allocation70_spill] sm:$0xff] }
 0x6ce   :  { %17017 = vst [vmem:[#allocation64_spill] sm:$0xff] %v15629_v15  ;;  %v7417_v22 = vpop.f32.mrf.mxu0  ;;  %v10478_v15 = vor.u32 %v12314_v55, %v10475_v56  ;;  %v10505_v55 = vld [vmem:[#allocation8 + $0x3d0] sm:$0xf] }
 0x6cf   :  { %v15633_v41 = vadd.f32 %v7417_v22, %v15497_v47  ;;  %v15635_v31 = vadd.f32 %v8122_v40, %v7794_v44  ;;  %v10474_v22 = vor.u32 %v12318_v13, %v10473_v29  ;;  %v10226_v44 = vor.u32 %v12255_v43, %v10225_v35  ;;  %v10067_v43 = vld [vmem:[#allocation8 + $0x78] sm:$0xf0] }
 0x6d3   :  { %v7719_v30 = vpop.f32.mrf.mxu1 }
 0x6d4   :  { %v15638_v6 = vadd.f32 %v7719_v30, %v15536_v0  ;;  %v7795_v39 = vpop.f32.mrf.mxu2 }
 0x6d5   :  { %v7796_v61 = vadd.f32 %v7795_v39, %v17020_v60  ;;  %v8124_v47 = vpop.f32.mrf.mxu3  ;;  %v17022_v39 = vld [vmem:[#allocation91_spill] sm:$0xff] }
 0x6d6   :  { %17019 = vst [vmem:[#allocation31_spill] sm:$0xff] %v15638_v6  ;;  %v7420_v40 = vpop.f32.mrf.mxu0  ;;  %8754 = vmatmul.bf16.vlgmr.msra.gmra.mxu1 %v10038_v62 }
 0x6d7   :  { %v15642_v27 = vadd.f32 %v7420_v40, %v15506_v28  ;;  %v15644_v37 = vadd.f32 %v8124_v47, %v7796_v61  ;;  %v12211_v28 = vld [vmem:[#allocation8 + $0x5c] sm:$0xf]  ;;  %v12326_v61 = vld [vmem:[#allocation8 + $0x3ec] sm:$0xf0]  ;;  %v12263_v47 = vld [vmem:[#allocation8 + $0x1f4] sm:$0xf0] }
 0x6d8   :  { %v10070_v56 = vor.u32 %v12211_v28, %v10067_v43 }
 0x6d9   :  { %7837 = vmatmul.bf16.gmra.mxu2 %v10474_v22  ;;  %8455 = vmatmul.bf16.gmra.mxu0 %v10226_v44 }
 0x6da   :  { %8166 = vmatmul.bf16.gmra.mxu3 %v10478_v15  ;;  %v10257_v15 = vld [vmem:[#allocation8 + $0x1d8] sm:$0xf] }
 0x6db   :  { %v7721_v16 = vpop.f32.mrf.mxu1 }
 0x6dc   :  { %v15647_v0 = vadd.f32 %v7721_v16, %v15543_v48  ;;  %v7798_v30 = vpop.f32.mrf.mxu2  ;;  %v12322_v48 = vld [vmem:[#allocation8 + $0x3d4] sm:$0xf] }
 0x6dd   :  { %v7799_v60 = vadd.f32 %v7798_v30, %v17022_v39  ;;  %v8127_v29 = vpop.f32.mrf.mxu3  ;;  %v10507_v16 = vld [vmem:[#allocation8 + $0x3f0] sm:$0xf0]  ;;  %v17024_v30 = vld [vmem:[#allocation68_spill] sm:$0xff] }
 0x6de   :  { %17021 = vst [vmem:[#allocation70_spill] sm:$0xff] %v15647_v0  ;;  %v7422_v13 = vpop.f32.mrf.mxu0  ;;  %v10510_v0 = vor.u32 %v12322_v48, %v10507_v16  ;;  %v10537_v48 = vld [vmem:[#allocation8 + $0x410] sm:$0xf] }
 0x6df   :  { %v15651_v62 = vadd.f32 %v7422_v13, %v15515_v34  ;;  %v15653_v35 = vadd.f32 %v8127_v29, %v7799_v60  ;;  %v10506_v13 = vor.u32 %v12326_v61, %v10505_v55  ;;  %v10258_v60 = vor.u32 %v12263_v47, %v10257_v15  ;;  %v10099_v47 = vld [vmem:[#allocation8 + $0xb8] sm:$0xf0] }
 0x6e3   :  { %v7724_v22 = vpop.f32.mrf.mxu1 }
 0x6e4   :  { %v15656_v44 = vadd.f32 %v7724_v22, %v15552_v45  ;;  %v7800_v40 = vpop.f32.mrf.mxu2 }
 0x6e5   :  { %v7801_v39 = vadd.f32 %v7800_v40, %v17024_v30  ;;  %v8129_v34 = vpop.f32.mrf.mxu3  ;;  %v17026_v40 = vld [vmem:[#allocation65_spill] sm:$0xff] }
 0x6e6   :  { %17023 = vst [vmem:[#allocation91_spill] sm:$0xff] %v15656_v44  ;;  %v7425_v29 = vpop.f32.mrf.mxu0  ;;  %8759 = vmatmul.bf16.gmra.mxu1 %v10070_v56 }
 0x6e7   :  { %v15660_v28 = vadd.f32 %v7425_v29, %v15524_v51  ;;  %v15662_v43 = vadd.f32 %v8129_v34, %v7801_v39  ;;  %v12219_v51 = vld [vmem:[#allocation8 + $0x9c] sm:$0xf]  ;;  %v12334_v39 = vld [vmem:[#allocation8 + $0x42c] sm:$0xf0]  ;;  %v12271_v34 = vld [vmem:[#allocation8 + $0x234] sm:$0xf0] }
 0x6e8   :  { %v10102_v16 = vor.u32 %v12219_v51, %v10099_v47 }
 0x6e9   :  { %7842 = vmatmul.bf16.gmra.mxu2 %v10506_v13  ;;  %8460 = vmatmul.bf16.gmra.mxu0 %v10258_v60 }
 0x6ea   :  { %8171 = vmatmul.bf16.gmra.mxu3 %v10510_v0  ;;  %v10289_v0 = vld [vmem:[#allocation8 + $0x218] sm:$0xf] }
 0x6eb   :  { %v7726_v6 = vpop.f32.mrf.mxu1 }
 0x6ec   :  { %v15665_v45 = vadd.f32 %v7726_v6, %v15561_v8  ;;  %v7803_v22 = vpop.f32.mrf.mxu2  ;;  %v12330_v8 = vld [vmem:[#allocation8 + $0x414] sm:$0xf] }
 0x6ed   :  { %v7804_v30 = vadd.f32 %v7803_v22, %v17026_v40  ;;  %v8132_v55 = vpop.f32.mrf.mxu3  ;;  %v10539_v6 = vld [vmem:[#allocation8 + $0x430] sm:$0xf0]  ;;  %v17028_v22 = vld [vmem:[#allocation71_spill] sm:$0xff] }
 0x6ee   :  { %17025 = vst [vmem:[#allocation68_spill] sm:$0xff] %v15665_v45  ;;  %v7427_v61 = vpop.f32.mrf.mxu0  ;;  %v10542_v45 = vor.u32 %v12330_v8, %v10539_v6  ;;  %v10569_v8 = vld [vmem:[#allocation8 + $0x450] sm:$0xf] }
 0x6ef   :  { %v15669_v56 = vadd.f32 %v7427_v61, %v15533_v10  ;;  %v15671_v15 = vadd.f32 %v8132_v55, %v7804_v30  ;;  %v10538_v61 = vor.u32 %v12334_v39, %v10537_v48  ;;  %v10290_v30 = vor.u32 %v12271_v34, %v10289_v0  ;;  %v12227_v34 = vld [vmem:[#allocation8 + $0xdc] sm:$0xf] }
 0x6f3   :  { %v7729_v13 = vpop.f32.mrf.mxu1 }
 0x6f4   :  { %v15674_v60 = vadd.f32 %v7729_v13, %v15570_v20  ;;  %v7805_v29 = vpop.f32.mrf.mxu2 }
 0x6f5   :  { %v7806_v40 = vadd.f32 %v7805_v29, %v17028_v22  ;;  %v8134_v10 = vpop.f32.mrf.mxu3  ;;  %v17030_v29 = vld [vmem:[#allocation69_spill] sm:$0xff] }
 0x6f6   :  { %17027 = vst [vmem:[#allocation65_spill] sm:$0xff] %v15674_v60  ;;  %v8426_v55 = vpop.f32.mrf.mxu0  ;;  %8764 = vmatmul.bf16.gmra.mxu1 %v10102_v16 }
 0x6f7   :  { %v15677_v44 = vadd.f32 %v8134_v10, %v7806_v40  ;;  %v15680_v51 = vadd.f32 %v8426_v55, %v15545_v50  ;;  %v10131_v50 = vld [vmem:[#allocation8 + $0xf8] sm:$0xf0]  ;;  %v12342_v40 = vld [vmem:[#allocation8 + $0x46c] sm:$0xf0]  ;;  %v12279_v10 = vld [vmem:[#allocation8 + $0x274] sm:$0xf0] }
 0x6f8   :  { %v10134_v6 = vor.u32 %v12227_v34, %v10131_v50 }
 0x6f9   :  { %7847 = vmatmul.bf16.gmra.mxu2 %v10538_v61  ;;  %8465 = vmatmul.bf16.gmra.mxu0 %v10290_v30  ;;  %v10571_v30 = vld [vmem:[#allocation8 + $0x470] sm:$0xf0] }
 0x6fa   :  { %8176 = vmatmul.bf16.gmra.mxu3 %v10542_v45  ;;  %v10321_v45 = vld [vmem:[#allocation8 + $0x258] sm:$0xf] }
 0x6fb   :  { %v7731_v47 = vpop.f32.mrf.mxu1 }
 0x6fc   :  { %v15683_v20 = vadd.f32 %v7731_v47, %v15579_v54  ;;  %v7808_v13 = vpop.f32.mrf.mxu2  ;;  %v12338_v54 = vld [vmem:[#allocation8 + $0x454] sm:$0xf] }
 0x6fd   :  { %v7809_v22 = vadd.f32 %v7808_v13, %v17030_v29  ;;  %v8137_v48 = vpop.f32.mrf.mxu3  ;;  %v17032_v13 = vld [vmem:[#allocation81_spill] sm:$0xff] }
 0x6fe   :  { %17029 = vst [vmem:[#allocation71_spill] sm:$0xff] %v15683_v20  ;;  %v8428_v39 = vpop.f32.mrf.mxu0  ;;  %v10574_v20 = vor.u32 %v12338_v54, %v10571_v30  ;;  %v10601_v54 = vld [vmem:[#allocation8 + $0x490] sm:$0xf] }
 0x6ff   :  { %v15686_v0 = vadd.f32 %v8137_v48, %v7809_v22  ;;  %v15689_v16 = vadd.f32 %v8428_v39, %v15554_v2  ;;  %v10570_v48 = vor.u32 %v12342_v40, %v10569_v8  ;;  %v10322_v2 = vor.u32 %v12279_v10, %v10321_v45  ;;  %v12235_v10 = vld [vmem:[#allocation8 + $0x11c] sm:$0xf] }
 0x703   :  { %v7734_v61 = vpop.f32.mrf.mxu1 }
 0x704   :  { %v15692_v55 = vadd.f32 %v7734_v61, %v15588_v17  ;;  %v7810_v47 = vpop.f32.mrf.mxu2 }
 0x705   :  { %v7811_v29 = vadd.f32 %v7810_v47, %v17032_v13  ;;  %v8139_v22 = vpop.f32.mrf.mxu3  ;;  %v17034_v47 = vld [vmem:[#allocation46_spill] sm:$0xff] }
 0x706   :  { %17031 = vst [vmem:[#allocation69_spill] sm:$0xff] %v15692_v55  ;;  %v8431_v39 = vpop.f32.mrf.mxu0  ;;  %8769 = vmatmul.bf16.gmra.mxu1 %v10134_v6 }
 0x707   :  { %v15695_v60 = vadd.f32 %v8139_v22, %v7811_v29  ;;  %v15698_v34 = vadd.f32 %v8431_v39, %v15563_v11  ;;  %v10163_v11 = vld [vmem:[#allocation8 + $0x138] sm:$0xf0]  ;;  %v12350_v29 = vld [vmem:[#allocation8 + $0x4ac] sm:$0xf0]  ;;  %v12287_v22 = vld [vmem:[#allocation8 + $0x2b4] sm:$0xf0] }
 0x708   :  { %v10166_v30 = vor.u32 %v12235_v10, %v10163_v11 }
 0x709   :  { %7852 = vmatmul.bf16.gmra.mxu2 %v10570_v48  ;;  %8470 = vmatmul.bf16.gmra.mxu0 %v10322_v2  ;;  %v10603_v2 = vld [vmem:[#allocation8 + $0x4b0] sm:$0xf0] }
 0x70a   :  { %8181 = vmatmul.bf16.gmra.mxu3 %v10574_v20  ;;  %v10353_v20 = vld [vmem:[#allocation8 + $0x298] sm:$0xf] }
 0x70b   :  { %v7736_v50 = vpop.f32.mrf.mxu1 }
 0x70c   :  { %v15701_v17 = vadd.f32 %v7736_v50, %v15597_v1  ;;  %v7813_v61 = vpop.f32.mrf.mxu2  ;;  %v12346_v1 = vld [vmem:[#allocation8 + $0x494] sm:$0xf] }
 0x70d   :  { %v7814_v13 = vadd.f32 %v7813_v61, %v17034_v47  ;;  %v8142_v8 = vpop.f32.mrf.mxu3  ;;  %v17036_v61 = vld [vmem:[#allocation35_spill] sm:$0xff] }
 0x70e   :  { %17033 = vst [vmem:[#allocation81_spill] sm:$0xff] %v15701_v17  ;;  %v8433_v40 = vpop.f32.mrf.mxu0  ;;  %v10606_v17 = vor.u32 %v12346_v1, %v10603_v2  ;;  %v10633_v1 = vld [vmem:[#allocation8 + $0x4d0] sm:$0xf] }
 0x70f   :  { %v15704_v45 = vadd.f32 %v8142_v8, %v7814_v13  ;;  %v15707_v6 = vadd.f32 %v8433_v40, %v15572_v24  ;;  %v10602_v8 = vor.u32 %v12350_v29, %v10601_v54  ;;  %v10354_v24 = vor.u32 %v12287_v22, %v10353_v20  ;;  %v12243_v22 = vld [vmem:[#allocation8 + $0x15c] sm:$0xf] }
 0x713   :  { %v7739_v48 = vpop.f32.mrf.mxu1 }
 0x714   :  { %v15710_v39 = vadd.f32 %v7739_v48, %v15606_v57  ;;  %v7815_v50 = vpop.f32.mrf.mxu2 }
 0x715   :  { %v7816_v47 = vadd.f32 %v7815_v50, %v17036_v61  ;;  %v8144_v13 = vpop.f32.mrf.mxu3  ;;  %v17038_v50 = vld [vmem:[#allocation90_spill] sm:$0xff] }
 0x716   :  { %17035 = vst [vmem:[#allocation46_spill] sm:$0xff] %v15710_v39  ;;  %v8436_v40 = vpop.f32.mrf.mxu0  ;;  %8774 = vmatmul.bf16.gmra.mxu1 %v10166_v30 }
 0x717   :  { %v15713_v55 = vadd.f32 %v8144_v13, %v7816_v47  ;;  %v15716_v10 = vadd.f32 %v8436_v40, %v15581_v59  ;;  %v10195_v59 = vld [vmem:[#allocation8 + $0x178] sm:$0xf0]  ;;  %v12358_v47 = vld [vmem:[#allocation8 + $0x4ec] sm:$0xf0]  ;;  %v12295_v13 = vld [vmem:[#allocation8 + $0x2f4] sm:$0xf0] }
 0x718   :  { %v10198_v2 = vor.u32 %v12243_v22, %v10195_v59 }
 0x719   :  { %7857 = vmatmul.bf16.gmra.mxu2 %v10602_v8  ;;  %8475 = vmatmul.bf16.gmra.mxu0 %v10354_v24  ;;  %v10635_v24 = vld [vmem:[#allocation8 + $0x4f0] sm:$0xf0] }
 0x71a   :  { %8186 = vmatmul.bf16.gmra.mxu3 %v10606_v17  ;;  %v10385_v17 = vld [vmem:[#allocation8 + $0x2d8] sm:$0xf] }
 0x71b   :  { %v7741_v11 = vpop.f32.mrf.mxu1 }
 0x71c   :  { %v15719_v57 = vadd.f32 %v7741_v11, %v15615_v21  ;;  %v7818_v48 = vpop.f32.mrf.mxu2  ;;  %v12354_v21 = vld [vmem:[#allocation8 + $0x4d4] sm:$0xf] }
 0x71d   :  { %v7819_v61 = vadd.f32 %v7818_v48, %v17038_v50  ;;  %v8147_v54 = vpop.f32.mrf.mxu3  ;;  %v17040_v48 = vld [vmem:[#allocation60_spill] sm:$0xff] }
 0x71e   :  { %17037 = vst [vmem:[#allocation35_spill] sm:$0xff] %v15719_v57  ;;  %v8438_v29 = vpop.f32.mrf.mxu0  ;;  %v10638_v57 = vor.u32 %v12354_v21, %v10635_v24  ;;  %v10665_v21 = vld [vmem:[#allocation8 + $0x510] sm:$0xf] }
 0x71f   :  { %v15722_v20 = vadd.f32 %v8147_v54, %v7819_v61  ;;  %v15725_v30 = vadd.f32 %v8438_v29, %v15590_v58  ;;  %v10634_v54 = vor.u32 %v12358_v47, %v10633_v1  ;;  %v10386_v58 = vor.u32 %v12295_v13, %v10385_v17  ;;  %v12251_v13 = vld [vmem:[#allocation8 + $0x19c] sm:$0xf] }
 0x723   :  { %v7744_v8 = vpop.f32.mrf.mxu1 }
 0x724   :  { %v15728_v40 = vadd.f32 %v7744_v8, %v15624_v23  ;;  %v7820_v11 = vpop.f32.mrf.mxu2 }
 0x725   :  { %v7821_v50 = vadd.f32 %v7820_v11, %v17040_v48  ;;  %v8149_v61 = vpop.f32.mrf.mxu3  ;;  %v17042_v11 = vld [vmem:[#allocation97_spill] sm:$0xff] }
 0x726   :  { %17039 = vst [vmem:[#allocation90_spill] sm:$0xff] %v15728_v40  ;;  %v8441_v29 = vpop.f32.mrf.mxu0  ;;  %8779 = vmatmul.bf16.gmra.mxu1 %v10198_v2 }
 0x727   :  { %v15731_v39 = vadd.f32 %v8149_v61, %v7821_v50  ;;  %v15734_v22 = vadd.f32 %v8441_v29, %v15599_v53  ;;  %v10227_v53 = vld [vmem:[#allocation8 + $0x1b8] sm:$0xf0]  ;;  %v12366_v50 = vld [vmem:[#allocation8 + $0x52c] sm:$0xf0]  ;;  %v12303_v61 = vld [vmem:[#allocation8 + $0x334] sm:$0xf0] }
 0x728   :  { %v10230_v24 = vor.u32 %v12251_v13, %v10227_v53 }
 0x729   :  { %7862 = vmatmul.bf16.gmra.mxu2 %v10634_v54  ;;  %8480 = vmatmul.bf16.gmra.mxu0 %v10386_v58  ;;  %v10667_v58 = vld [vmem:[#allocation8 + $0x530] sm:$0xf0] }
 0x72a   :  { %8191 = vmatmul.bf16.gmra.mxu3 %v10638_v57  ;;  %v10417_v57 = vld [vmem:[#allocation8 + $0x318] sm:$0xf] }
 0x72b   :  { %v7746_v59 = vpop.f32.mrf.mxu1 }
 0x72c   :  { %v15737_v23 = vadd.f32 %v7746_v59, %v15633_v41  ;;  %v7823_v8 = vpop.f32.mrf.mxu2  ;;  %v12362_v41 = vld [vmem:[#allocation8 + $0x514] sm:$0xf] }
 0x72d   :  { %v7824_v48 = vadd.f32 %v7823_v8, %v17042_v11  ;;  %v8152_v1 = vpop.f32.mrf.mxu3  ;;  %v17044_v8 = vld [vmem:[#allocation56_spill] sm:$0xff] }
 0x72e   :  { %17041 = vst [vmem:[#allocation60_spill] sm:$0xff] %v15737_v23  ;;  %v8443_v47 = vpop.f32.mrf.mxu0  ;;  %v10670_v23 = vor.u32 %v12362_v41, %v10667_v58  ;;  %v10697_v41 = vld [vmem:[#allocation8 + $0x550] sm:$0xf] }
 0x72f   :  { %v15740_v17 = vadd.f32 %v8152_v1, %v7824_v48  ;;  %v15743_v2 = vadd.f32 %v8443_v47, %v15608_v25  ;;  %v10666_v1 = vor.u32 %v12366_v50, %v10665_v21  ;;  %v10418_v25 = vor.u32 %v12303_v61, %v10417_v57  ;;  %v12259_v61 = vld [vmem:[#allocation8 + $0x1dc] sm:$0xf] }
 0x733   :  { %v7749_v54 = vpop.f32.mrf.mxu1 }
 0x734   :  { %v15746_v29 = vadd.f32 %v7749_v54, %v15642_v27  ;;  %v7825_v59 = vpop.f32.mrf.mxu2 }
 0x735   :  { %v7826_v11 = vadd.f32 %v7825_v59, %v17044_v8  ;;  %v8154_v48 = vpop.f32.mrf.mxu3  ;;  %v17046_v59 = vld [vmem:[#allocation61_spill] sm:$0xff] }
 0x736   :  { %17043 = vst [vmem:[#allocation97_spill] sm:$0xff] %v15746_v29  ;;  %v8446_v47 = vpop.f32.mrf.mxu0  ;;  %8784 = vmatmul.bf16.gmra.mxu1 %v10230_v24 }
 0x737   :  { %v15749_v40 = vadd.f32 %v8154_v48, %v7826_v11  ;;  %v15752_v13 = vadd.f32 %v8446_v47, %v15617_v42  ;;  %v10259_v42 = vld [vmem:[#allocation8 + $0x1f8] sm:$0xf0]  ;;  %v12374_v11 = vld [vmem:[#allocation8 + $0x56c] sm:$0xf0]  ;;  %v12311_v48 = vld [vmem:[#allocation8 + $0x374] sm:$0xf0] }
 0x738   :  { %v10262_v58 = vor.u32 %v12259_v61, %v10259_v42 }
 0x739   :  { %7867 = vmatmul.bf16.gmra.mxu2 %v10666_v1  ;;  %8485 = vmatmul.bf16.gmra.mxu0 %v10418_v25  ;;  %v10699_v25 = vld [vmem:[#allocation8 + $0x570] sm:$0xf0] }
 0x73a   :  { %8196 = vmatmul.bf16.gmra.mxu3 %v10670_v23  ;;  %v10449_v23 = vld [vmem:[#allocation8 + $0x358] sm:$0xf] }
 0x73b   :  { %v7751_v53 = vpop.f32.mrf.mxu1 }
 0x73c   :  { %v15755_v27 = vadd.f32 %v7751_v53, %v15651_v62  ;;  %v7828_v54 = vpop.f32.mrf.mxu2  ;;  %v12370_v62 = vld [vmem:[#allocation8 + $0x554] sm:$0xf] }
 0x73d   :  { %v7829_v8 = vadd.f32 %v7828_v54, %v17046_v59  ;;  %v8157_v21 = vpop.f32.mrf.mxu3  ;;  %v17048_v54 = vld [vmem:[#allocation57_spill] sm:$0xff] }
 0x73e   :  { %17045 = vst [vmem:[#allocation56_spill] sm:$0xff] %v15755_v27  ;;  %v8448_v50 = vpop.f32.mrf.mxu0  ;;  %v10702_v27 = vor.u32 %v12370_v62, %v10699_v25  ;;  %v10729_v62 = vld [vmem:[#allocation8 + $0x590] sm:$0xf] }
 0x73f   :  { %v15758_v57 = vadd.f32 %v8157_v21, %v7829_v8  ;;  %v15761_v24 = vadd.f32 %v8448_v50, %v15626_v38  ;;  %v10698_v21 = vor.u32 %v12374_v11, %v10697_v41  ;;  %v10450_v38 = vor.u32 %v12311_v48, %v10449_v23  ;;  %v12267_v48 = vld [vmem:[#allocation8 + $0x21c] sm:$0xf] }
 0x743   :  { %v7754_v1 = vpop.f32.mrf.mxu1 }
 0x744   :  { %v15764_v47 = vadd.f32 %v7754_v1, %v15660_v28  ;;  %v7830_v53 = vpop.f32.mrf.mxu2 }
 0x745   :  { %v7831_v59 = vadd.f32 %v7830_v53, %v17048_v54  ;;  %v8159_v8 = vpop.f32.mrf.mxu3  ;;  %v17050_v53 = vld [vmem:[#allocation47_spill] sm:$0xff] }
 0x746   :  { %17047 = vst [vmem:[#allocation61_spill] sm:$0xff] %v15764_v47  ;;  %v8451_v50 = vpop.f32.mrf.mxu0  ;;  %8789 = vmatmul.bf16.gmra.mxu1 %v10262_v58 }
 0x747   :  { %v15767_v29 = vadd.f32 %v8159_v8, %v7831_v59  ;;  %v15770_v61 = vadd.f32 %v8451_v50, %v15635_v31  ;;  %v10291_v31 = vld [vmem:[#allocation8 + $0x238] sm:$0xf0]  ;;  %v12382_v59 = vld [vmem:[#allocation8 + $0x5ac] sm:$0xf0]  ;;  %v12319_v8 = vld [vmem:[#allocation8 + $0x3b4] sm:$0xf0] }
 0x748   :  { %v10294_v25 = vor.u32 %v12267_v48, %v10291_v31 }
 0x749   :  { %7872 = vmatmul.bf16.gmra.mxu2 %v10698_v21  ;;  %8490 = vmatmul.bf16.gmra.mxu0 %v10450_v38  ;;  %v10731_v38 = vld [vmem:[#allocation8 + $0x5b0] sm:$0xf0] }
 0x74a   :  { %8201 = vmatmul.bf16.gmra.mxu3 %v10702_v27  ;;  %v10481_v27 = vld [vmem:[#allocation8 + $0x398] sm:$0xf] }
 0x74b   :  { %v7756_v42 = vpop.f32.mrf.mxu1 }
 0x74c   :  { %v15773_v28 = vadd.f32 %v7756_v42, %v15669_v56  ;;  %v7833_v1 = vpop.f32.mrf.mxu2  ;;  %v12378_v56 = vld [vmem:[#allocation8 + $0x594] sm:$0xf] }
 0x74d   :  { %v7834_v54 = vadd.f32 %v7833_v1, %v17050_v53  ;;  %v8162_v41 = vpop.f32.mrf.mxu3  ;;  %v17051_v1 = vld [vmem:[#allocation51_spill] sm:$0xff] }
 0x74e   :  { %17049 = vst [vmem:[#allocation57_spill] sm:$0xff] %v15773_v28  ;;  %v8453_v11 = vpop.f32.mrf.mxu0  ;;  %v10482_v28 = vor.u32 %v12319_v8, %v10481_v27  ;;  %v10323_v27 = vld [vmem:[#allocation8 + $0x278] sm:$0xf0] }
 0x74f   :  { %v15776_v23 = vadd.f32 %v8162_v41, %v7834_v54  ;;  %v15779_v58 = vadd.f32 %v8453_v11, %v15644_v37  ;;  %v10730_v41 = vor.u32 %v12382_v59, %v10729_v62  ;;  %v10734_v11 = vor.u32 %v12378_v56, %v10731_v38  ;;  %v10761_v56 = vld [vmem:[#allocation8 + $0x5d0] sm:$0xf] }
 0x750   :  { %v12390_v38 = vld [vmem:[#allocation8 + $0x5ec] sm:$0xf0] }
 0x753   :  { %v8755_v21 = vpop.f32.mrf.mxu1 }
 0x754   :  { %v8756_v50 = vadd.f32 %v8755_v21, %v15680_v51  ;;  %v7835_v42 = vpop.f32.mrf.mxu2  ;;  %v17052_v51 = vld [vmem:[#allocation42_spill] sm:$0xff] }
 0x755   :  { %v7836_v53 = vadd.f32 %v7835_v42, %v17051_v1  ;;  %v8164_v54 = vpop.f32.mrf.mxu3 }
 0x756   :  { %v15783_v37 = vpop.f32.mrf.mxu0  ;;  %8794 = vmatmul.bf16.gmra.mxu1 %v10294_v25  ;;  %v9075_v42 = vmax.f32 %v8756_v50, 0.0  ;;  %v12275_v25 = vld [vmem:[#allocation8 + $0x25c] sm:$0xf] }
 0x757   :  { %v15785_v47 = vadd.f32 %v8164_v54, %v7836_v53  ;;  %v10513_v53 = vld [vmem:[#allocation8 + $0x3d8] sm:$0xf] }
 0x758   :  { %v12327_v54 = vld [vmem:[#allocation8 + $0x3f4] sm:$0xf0] }
 0x759   :  { %7877 = vmatmul.bf16.gmra.mxu2 %v10730_v41  ;;  %8495 = vmatmul.bf16.gmra.mxu0 %v10482_v28  ;;  %v10326_v28 = vor.u32 %v12275_v25, %v10323_v27  ;;  %v12386_v41 = vld [vmem:[#allocation8 + $0x5d4] sm:$0xf] }
 0x75a   :  { %8206 = vmatmul.bf16.gmra.mxu3 %v10734_v11  ;;  %v10763_v11 = vld [vmem:[#allocation8 + $0x5f0] sm:$0xf0] }
 0x75b   :  { %v8757_v48 = vpop.f32.mrf.mxu1 }
 0x75c   :  { %v8758_v31 = vadd.f32 %v8757_v48, %v15689_v16  ;;  %v7838_v36 = vpop.f32.mrf.mxu2  ;;  %v17053_v48 = vld [vmem:[#allocation48_spill] sm:$0xff] }
 0x75d   :  { %v7839_v21 = vadd.f32 %v7838_v36, %v17052_v51  ;;  %v8167_v49 = vpop.f32.mrf.mxu3 }
 0x75e   :  { %v9076_v1 = vmax.f32 %v8758_v31, 0.0  ;;  %v15789_v62 = vpop.f32.mrf.mxu0 }
 0x75f   :  { %v15791_v59 = vadd.f32 %v8167_v49, %v7839_v21  ;;  %v10762_v49 = vor.u32 %v12390_v38, %v10761_v56  ;;  %v10514_v21 = vor.u32 %v12327_v54, %v10513_v53  ;;  %v10355_v53 = vld [vmem:[#allocation8 + $0x2b8] sm:$0xf0] }
 0x760   :  { %v15793_v8 = vpack.c.bf16 %v9076_v1, %v9075_v42  ;;  %v10766_v42 = vor.u32 %v12386_v41, %v10763_v11  ;;  %v10793_v41 = vld [vmem:[#allocation8 + $0x610] sm:$0xf] }
 0x763   :  { %v8760_v16 = vpop.f32.mrf.mxu1 }
 0x764   :  { %v8761_v36 = vadd.f32 %v8760_v16, %v15698_v34  ;;  %v7840_v50 = vpop.f32.mrf.mxu2  ;;  %v17054_v34 = vld [vmem:[#allocation52_spill] sm:$0xff] }
 0x765   :  { %v7841_v31 = vadd.f32 %v7840_v50, %v17053_v48  ;;  %v8169_v51 = vpop.f32.mrf.mxu3 }
 0x766   :  { %v15797_v18 = vpop.f32.mrf.mxu0  ;;  %8799 = vmatmul.bf16.gmra.mxu1 %v10326_v28  ;;  %v9077_v50 = vmax.f32 %v8761_v36, 0.0  ;;  %v12283_v28 = vld [vmem:[#allocation8 + $0x29c] sm:$0xf] }
 0x767   :  { %v15799_v1 = vadd.f32 %v8169_v51, %v7841_v31  ;;  %v10358_v11 = vor.u32 %v12283_v28, %v10355_v53  ;;  %v12398_v31 = vld [vmem:[#allocation8 + $0x62c] sm:$0xf0]  ;;  %v10545_v51 = vld [vmem:[#allocation8 + $0x418] sm:$0xf] }
 0x769   :  { %7882 = vmatmul.bf16.gmra.mxu2 %v10762_v49  ;;  %8500 = vmatmul.bf16.gmra.mxu0 %v10514_v21  ;;  %v12335_v49 = vld [vmem:[#allocation8 + $0x434] sm:$0xf0]  ;;  %v12394_v21 = vld [vmem:[#allocation8 + $0x614] sm:$0xf] }
 0x76a   :  { %8211 = vmatmul.bf16.gmra.mxu3 %v10766_v42  ;;  %v10795_v42 = vld [vmem:[#allocation8 + $0x630] sm:$0xf0] }
 0x76b   :  { %v8762_v25 = vpop.f32.mrf.mxu1 }
 0x76c   :  { %v8763_v27 = vadd.f32 %v8762_v25, %v15707_v6  ;;  %v7843_v52 = vpop.f32.mrf.mxu2  ;;  %v17055_v25 = vld [vmem:[#allocation49_spill] sm:$0xff] }
 0x76d   :  { %v7844_v16 = vadd.f32 %v7843_v52, %v17054_v34  ;;  %v8172_v3 = vpop.f32.mrf.mxu3 }
 0x76e   :  { %v9078_v48 = vmax.f32 %v8763_v27, 0.0  ;;  %v15803_v56 = vpop.f32.mrf.mxu0 }
 0x76f   :  { %v15805_v38 = vadd.f32 %v8172_v3, %v7844_v16  ;;  %v10794_v3 = vor.u32 %v12398_v31, %v10793_v41  ;;  %v10546_v16 = vor.u32 %v12335_v49, %v10545_v51 }
 0x770   :  { %v15807_v54 = vpack.c.bf16 %v9078_v48, %v9077_v50  ;;  %v10798_v50 = vor.u32 %v12394_v21, %v10795_v42  ;;  %v10825_v42 = vld [vmem:[#allocation8 + $0x650] sm:$0xf] }
 0x773   :  { %v8765_v6 = vpop.f32.mrf.mxu1 }
 0x774   :  { %v8766_v52 = vadd.f32 %v8765_v6, %v15716_v10  ;;  %v7845_v36 = vpop.f32.mrf.mxu2 }
 0x775   :  { %v7846_v27 = vadd.f32 %v7845_v36, %v17055_v25  ;;  %v8174_v34 = vpop.f32.mrf.mxu3 }
 0x776   :  { %v8466_v9 = vpop.f32.mrf.mxu0  ;;  %8804 = vmatmul.bf16.gmra.mxu1 %v10358_v11  ;;  %v9079_v41 = vmax.f32 %v8766_v52, 0.0 }
 0x777   :  { %v15811_v48 = vadd.f32 %v8174_v34, %v7846_v27  ;;  %v15814_v28 = vadd.f32 %v8466_v9, %v15686_v0  ;;  %v12291_v9 = vld [vmem:[#allocation8 + $0x2dc] sm:$0xf]  ;;  %v12406_v34 = vld [vmem:[#allocation8 + $0x66c] sm:$0xf0] }
 0x778   :  { %v10387_v0 = vld [vmem:[#allocation8 + $0x2f8] sm:$0xf0] }
 0x779   :  { %7887 = vmatmul.bf16.gmra.mxu2 %v10794_v3  ;;  %8505 = vmatmul.bf16.gmra.mxu0 %v10546_v16  ;;  %v10390_v27 = vor.u32 %v12291_v9, %v10387_v0  ;;  %v12343_v3 = vld [vmem:[#allocation8 + $0x474] sm:$0xf0] }
 0x77a   :  { %8216 = vmatmul.bf16.gmra.mxu3 %v10798_v50  ;;  %v10827_v50 = vld [vmem:[#allocation8 + $0x670] sm:$0xf0] }
 0x77b   :  { %v8767_v53 = vpop.f32.mrf.mxu1 }
 0x77c   :  { %v8768_v10 = vadd.f32 %v8767_v53, %v15725_v30  ;;  %v7848_v6 = vpop.f32.mrf.mxu2  ;;  %v10577_v30 = vld [vmem:[#allocation8 + $0x458] sm:$0xf] }
 0x77d   :  { %v7849_v36 = vadd.f32 %v7848_v6, %v17056_v63  ;;  %v8177_v25 = vpop.f32.mrf.mxu3  ;;  %v12402_v63 = vld [vmem:[#allocation8 + $0x654] sm:$0xf] }
 0x77e   :  { %v9080_v31 = vmax.f32 %v8768_v10, 0.0  ;;  %v8468_v51 = vpop.f32.mrf.mxu0  ;;  %v17057_v10 = vld [vmem:[#allocation98_spill] sm:$0xff] }
 0x77f   :  { %v15818_v11 = vadd.f32 %v8177_v25, %v7849_v36  ;;  %v15821_v49 = vadd.f32 %v8468_v51, %v15695_v60  ;;  %v10826_v60 = vor.u32 %v12406_v34, %v10825_v42  ;;  %v10578_v25 = vor.u32 %v12343_v3, %v10577_v30 }
 0x780   :  { %v15823_v21 = vpack.c.bf16 %v9080_v31, %v9079_v41  ;;  %v10830_v41 = vor.u32 %v12402_v63, %v10827_v50  ;;  %v10419_v63 = vld [vmem:[#allocation8 + $0x338] sm:$0xf0] }
 0x783   :  { %v8770_v16 = vpop.f32.mrf.mxu1 }
 0x784   :  { %v8771_v52 = vadd.f32 %v8770_v16, %v15734_v22  ;;  %v7850_v53 = vpop.f32.mrf.mxu2 }
 0x785   :  { %v7851_v6 = vadd.f32 %v7850_v53, %v17057_v10  ;;  %v8179_v36 = vpop.f32.mrf.mxu3 }
 0x786   :  { %v8471_v51 = vpop.f32.mrf.mxu0  ;;  %8809 = vmatmul.bf16.gmra.mxu1 %v10390_v27  ;;  %v9081_v42 = vmax.f32 %v8771_v52, 0.0 }
 0x787   :  { %v15827_v31 = vadd.f32 %v8179_v36, %v7851_v6  ;;  %v15830_v9 = vadd.f32 %v8471_v51, %v15704_v45  ;;  %v12299_v45 = vld [vmem:[#allocation8 + $0x31c] sm:$0xf]  ;;  %v10857_v6 = vld [vmem:[#allocation8 + $0x690] sm:$0xf] }
 0x788   :  { %v10422_v36 = vor.u32 %v12299_v45, %v10419_v63 }
 0x789   :  { %7892 = vmatmul.bf16.gmra.mxu2 %v10826_v60  ;;  %8510 = vmatmul.bf16.gmra.mxu0 %v10578_v25  ;;  %v12414_v60 = vld [vmem:[#allocation8 + $0x6ac] sm:$0xf0]  ;;  %v12351_v25 = vld [vmem:[#allocation8 + $0x4b4] sm:$0xf0] }
 0x78a   :  { %8221 = vmatmul.bf16.gmra.mxu3 %v10830_v41  ;;  %v10859_v41 = vld [vmem:[#allocation8 + $0x6b0] sm:$0xf0] }
 0x78b   :  { %v8772_v0 = vpop.f32.mrf.mxu1 }
 0x78c   :  { %v8773_v22 = vadd.f32 %v8772_v0, %v15743_v2  ;;  %v7853_v16 = vpop.f32.mrf.mxu2  ;;  %v10609_v2 = vld [vmem:[#allocation8 + $0x498] sm:$0xf] }
 0x78d   :  { %v7854_v53 = vadd.f32 %v7853_v16, %v17058_v7  ;;  %v8182_v10 = vpop.f32.mrf.mxu3  ;;  %v12410_v7 = vld [vmem:[#allocation8 + $0x694] sm:$0xf] }
 0x78e   :  { %v9082_v34 = vmax.f32 %v8773_v22, 0.0  ;;  %v8473_v30 = vpop.f32.mrf.mxu0  ;;  %v17059_v22 = vld [vmem:[#allocation17_spill] sm:$0xff] }
 0x78f   :  { %v15834_v27 = vadd.f32 %v8182_v10, %v7854_v53  ;;  %v15837_v3 = vadd.f32 %v8473_v30, %v15713_v55  ;;  %v10858_v55 = vor.u32 %v12414_v60, %v10857_v6  ;;  %v10610_v10 = vor.u32 %v12351_v25, %v10609_v2 }
 0x790   :  { %v15839_v50 = vpack.c.bf16 %v9082_v34, %v9081_v42  ;;  %v10862_v42 = vor.u32 %v12410_v7, %v10859_v41  ;;  %v10451_v7 = vld [vmem:[#allocation8 + $0x378] sm:$0xf0] }
 0x793   :  { %v8775_v51 = vpop.f32.mrf.mxu1 }
 0x794   :  { %v8776_v52 = vadd.f32 %v8775_v51, %v15752_v13  ;;  %v7855_v0 = vpop.f32.mrf.mxu2 }
 0x795   :  { %v7856_v16 = vadd.f32 %v7855_v0, %v17059_v22  ;;  %v8184_v53 = vpop.f32.mrf.mxu3 }
 0x796   :  { %v8476_v30 = vpop.f32.mrf.mxu0  ;;  %8814 = vmatmul.bf16.gmra.mxu1 %v10422_v36  ;;  %v9083_v6 = vmax.f32 %v8776_v52, 0.0 }
 0x797   :  { %v15843_v34 = vadd.f32 %v8184_v53, %v7856_v16  ;;  %v15846_v45 = vadd.f32 %v8476_v30, %v15722_v20  ;;  %v12307_v20 = vld [vmem:[#allocation8 + $0x35c] sm:$0xf]  ;;  %v10889_v16 = vld [vmem:[#allocation8 + $0x6d0] sm:$0xf] }
 0x798   :  { %v10454_v53 = vor.u32 %v12307_v20, %v10451_v7 }
 0x799   :  { %7897 = vmatmul.bf16.gmra.mxu2 %v10858_v55  ;;  %8515 = vmatmul.bf16.gmra.mxu0 %v10610_v10  ;;  %v12422_v55 = vld [vmem:[#allocation8 + $0x6ec] sm:$0xf0]  ;;  %v12359_v10 = vld [vmem:[#allocation8 + $0x4f4] sm:$0xf0] }
 0x79a   :  { %8226 = vmatmul.bf16.gmra.mxu3 %v10862_v42  ;;  %v10891_v42 = vld [vmem:[#allocation8 + $0x6f0] sm:$0xf0] }
 0x79b   :  { %v8777_v63 = vpop.f32.mrf.mxu1 }
 0x79c   :  { %v8778_v13 = vadd.f32 %v8777_v63, %v15761_v24  ;;  %v7858_v51 = vpop.f32.mrf.mxu2  ;;  %v10641_v24 = vld [vmem:[#allocation8 + $0x4d8] sm:$0xf] }
 0x79d   :  { %v7859_v0 = vadd.f32 %v7858_v51, %v17060_v19  ;;  %v8187_v22 = vpop.f32.mrf.mxu3  ;;  %v12418_v19 = vld [vmem:[#allocation8 + $0x6d4] sm:$0xf] }
 0x79e   :  { %v9084_v60 = vmax.f32 %v8778_v13, 0.0  ;;  %v8478_v2 = vpop.f32.mrf.mxu0  ;;  %v17061_v63 = vld [vmem:[#allocation25_spill] sm:$0xff] }
 0x79f   :  { %v15850_v36 = vadd.f32 %v8187_v22, %v7859_v0  ;;  %v15853_v25 = vadd.f32 %v8478_v2, %v15731_v39  ;;  %v10890_v0 = vor.u32 %v12422_v55, %v10889_v16  ;;  %v10642_v22 = vor.u32 %v12359_v10, %v10641_v24 }
 0x7a0   :  { %v15855_v41 = vpack.c.bf16 %v9084_v60, %v9083_v6  ;;  %v10894_v2 = vor.u32 %v12418_v19, %v10891_v42  ;;  %v12315_v42 = vld [vmem:[#allocation8 + $0x39c] sm:$0xf] }
 0x7a3   :  { %v8780_v30 = vpop.f32.mrf.mxu1 }
 0x7a4   :  { %v7860_v52 = vpop.f32.mrf.mxu2  ;;  %v8781_v60 = vadd.f32 %v8780_v30, %v15770_v61  ;;  %v10921_v61 = vld [vmem:[#allocation8 + $0x710] sm:$0xf] }
 0x7a5   :  { %v7861_v13 = vadd.f32 %v7860_v52, %v17061_v63  ;;  %v8189_v51 = vpop.f32.mrf.mxu3  ;;  %v17062_v63 = vld [vmem:[#allocation32_spill] sm:$0xff] }
 0x7a6   :  { %v8481_v39 = vpop.f32.mrf.mxu0  ;;  %8819 = vmatmul.bf16.gmra.mxu1 %v10454_v53  ;;  %v9085_v24 = vmax.f32 %v8781_v60, 0.0 }
 0x7a7   :  { %v15858_v14 = vadd.f32 %v8189_v51, %v7861_v13  ;;  %v15861_v6 = vadd.f32 %v8481_v39, %v15740_v17  ;;  %v10483_v13 = vld [vmem:[#allocation8 + $0x3b8] sm:$0xf0] }
 0x7a8   :  { %v10486_v30 = vor.u32 %v12315_v42, %v10483_v13  ;;  %v8459_v42 = vadd.f32 %v15789_v62, %v15662_v43  ;;  %v10953_v43 = vld [vmem:[#allocation8 + $0x750] sm:$0xf] }
 0x7a9   :  { %7902 = vmatmul.bf16.gmra.mxu2 %v10890_v0  ;;  %8520 = vmatmul.bf16.gmra.mxu0 %v10642_v22  ;;  %v12430_v0 = vld [vmem:[#allocation8 + $0x72c] sm:$0xf0]  ;;  %v12367_v22 = vld [vmem:[#allocation8 + $0x534] sm:$0xf0] }
 0x7aa   :  { %8231 = vmatmul.bf16.gmra.mxu3 %v10894_v2  ;;  %v12426_v2 = vld [vmem:[#allocation8 + $0x714] sm:$0xf] }
 0x7ab   :  { %v8782_v20 = vpop.f32.mrf.mxu1 }
 0x7ac   :  { %v8783_v7 = vadd.f32 %v8782_v20, %v15779_v58  ;;  %v7863_v52 = vpop.f32.mrf.mxu2  ;;  %v10673_v58 = vld [vmem:[#allocation8 + $0x518] sm:$0xf]  ;;  %v10923_v20 = vld [vmem:[#allocation8 + $0x730] sm:$0xf0] }
 0x7ad   :  { %v7864_v16 = vadd.f32 %v7863_v52, %v17062_v63  ;;  %v8192_v55 = vpop.f32.mrf.mxu3 }
 0x7ae   :  { %v9086_v53 = vmax.f32 %v8783_v7, 0.0  ;;  %v8483_v10 = vpop.f32.mrf.mxu0  ;;  %v17063_v7 = vld [vmem:[#allocation20_spill] sm:$0xff] }
 0x7af   :  { %v15866_v19 = vadd.f32 %v8192_v55, %v7864_v16  ;;  %v15869_v17 = vadd.f32 %v8483_v10, %v15749_v40  ;;  %v10922_v16 = vor.u32 %v12430_v0, %v10921_v61  ;;  %v10674_v55 = vor.u32 %v12367_v22, %v10673_v58 }
 0x7b0   :  { %v15871_v51 = vpack.c.bf16 %v9086_v53, %v9085_v24  ;;  %v10926_v10 = vor.u32 %v12426_v2, %v10923_v20  ;;  %v8457_v53 = vadd.f32 %v15783_v37, %v15653_v35  ;;  %v12323_v37 = vld [vmem:[#allocation8 + $0x3dc] sm:$0xf] }
 0x7b3   :  { %v8785_v39 = vpop.f32.mrf.mxu1 }
 0x7b4   :  { %v7865_v60 = vpop.f32.mrf.mxu2  ;;  %v8786_v13 = vadd.f32 %v8785_v39, %v8457_v53  ;;  %v12438_v39 = vld [vmem:[#allocation8 + $0x76c] sm:$0xf0]  ;;  %v10955_v53 = vld [vmem:[#allocation8 + $0x770] sm:$0xf0] }
 0x7b5   :  { %v7866_v52 = vadd.f32 %v7865_v60, %v17063_v7  ;;  %v8194_v63 = vpop.f32.mrf.mxu3 }
 0x7b6   :  { %v8486_v40 = vpop.f32.mrf.mxu0  ;;  %8824 = vmatmul.bf16.gmra.mxu1 %v10486_v30  ;;  %v17064_v30 = vld [vmem:[#allocation24_spill] sm:$0xff]  ;;  %v9087_v20 = vmax.f32 %v8786_v13, 0.0  ;;  %v17065_v13 = vld [vmem:[#allocation23_spill] sm:$0xff] }
 0x7b7   :  { %v15874_v12 = vadd.f32 %v8194_v63, %v7866_v52  ;;  %v15877_v24 = vadd.f32 %v8486_v40, %v15758_v57  ;;  %v10515_v52 = vld [vmem:[#allocation8 + $0x3f8] sm:$0xf0] }
 0x7b8   :  { %v10518_v62 = vor.u32 %v12323_v37, %v10515_v52 }
 0x7b9   :  { %7907 = vmatmul.bf16.gmra.mxu2 %v10922_v16  ;;  %8525 = vmatmul.bf16.gmra.mxu0 %v10674_v55  ;;  %v10705_v16 = vld [vmem:[#allocation8 + $0x558] sm:$0xf] }
 0x7ba   :  { %8236 = vmatmul.bf16.gmra.mxu3 %v10926_v10  ;;  %v12375_v55 = vld [vmem:[#allocation8 + $0x574] sm:$0xf0]  ;;  %v12434_v10 = vld [vmem:[#allocation8 + $0x754] sm:$0xf] }
 0x7bb   :  { %v8787_v61 = vpop.f32.mrf.mxu1 }
 0x7bc   :  { %v8788_v0 = vadd.f32 %v8787_v61, %v8459_v42  ;;  %v7868_v58 = vpop.f32.mrf.mxu2 }
 0x7bd   :  { %v7869_v22 = vadd.f32 %v7868_v58, %v17064_v30  ;;  %v8197_v2 = vpop.f32.mrf.mxu3  ;;  %v10954_v58 = vor.u32 %v12438_v39, %v10953_v43  ;;  %v10706_v30 = vor.u32 %v12375_v55, %v10705_v16 }
 0x7be   :  { %v9088_v60 = vmax.f32 %v8788_v0, 0.0  ;;  %v8488_v57 = vpop.f32.mrf.mxu0 }
 0x7bf   :  { %v15884_v7 = vadd.f32 %v8197_v2, %v7869_v22  ;;  %v15887_v35 = vadd.f32 %v8488_v57, %v15767_v29  ;;  %v10958_v29 = vor.u32 %v12434_v10, %v10955_v53  ;;  %v8464_v57 = vadd.f32 %v15803_v56, %v15677_v44  ;;  %v10985_v44 = vld [vmem:[#allocation8 + $0x790] sm:$0xf] }
 0x7c0   :  { %v9209_v63 = vpack.c.bf16 %v9088_v60, %v9087_v20  ;;  %v8462_v60 = vadd.f32 %v15797_v18, %v15671_v15  ;;  %v12331_v15 = vld [vmem:[#allocation8 + $0x41c] sm:$0xf] }
 0x7c3   :  { %v8790_v40 = vpop.f32.mrf.mxu1 }
 0x7c4   :  { %v7870_v42 = vpop.f32.mrf.mxu2  ;;  %v8791_v37 = vadd.f32 %v8790_v40, %v8462_v60  ;;  %v12446_v40 = vld [vmem:[#allocation8 + $0x7ac] sm:$0xf0] }
 0x7c5   :  { %v7871_v61 = vadd.f32 %v7870_v42, %v17065_v13  ;;  %v8199_v0 = vpop.f32.mrf.mxu3  ;;  %v10547_v13 = vld [vmem:[#allocation8 + $0x438] sm:$0xf0] }
 0x7c6   :  { %v8491_v22 = vpop.f32.mrf.mxu0  ;;  %8829 = vmatmul.bf16.gmra.mxu1 %v10518_v62  ;;  %v17066_v62 = vld [vmem:[#allocation29_spill] sm:$0xff]  ;;  %v9089_v10 = vmax.f32 %v8791_v37, 0.0  ;;  %v10550_v56 = vor.u32 %v12331_v15, %v10547_v13  ;;  %v17067_v37 = vld [vmem:[#allocation39_spill] sm:$0xff] }
 0x7c7   :  { %v15890_v2 = vadd.f32 %v8199_v0, %v7871_v61  ;;  %v15893_v20 = vadd.f32 %v8491_v22, %v15776_v23  ;;  %v10737_v0 = vld [vmem:[#allocation8 + $0x598] sm:$0xf]  ;;  %v12442_v22 = vld [vmem:[#allocation8 + $0x794] sm:$0xf] }
 0x7c9   :  { %7912 = vmatmul.bf16.gmra.mxu2 %v10954_v58  ;;  %8530 = vmatmul.bf16.gmra.mxu0 %v10706_v30  ;;  %v12383_v58 = vld [vmem:[#allocation8 + $0x5b4] sm:$0xf0] }
 0x7ca   :  { %8241 = vmatmul.bf16.gmra.mxu3 %v10958_v29  ;;  %v10987_v29 = vld [vmem:[#allocation8 + $0x7b0] sm:$0xf0] }
 0x7cb   :  { %v8792_v52 = vpop.f32.mrf.mxu1 }
 0x7cc   :  { %v8793_v43 = vadd.f32 %v8792_v52, %v8464_v57  ;;  %v7873_v39 = vpop.f32.mrf.mxu2 }
 0x7cd   :  { %v7874_v16 = vadd.f32 %v7873_v39, %v17066_v62  ;;  %v8202_v55 = vpop.f32.mrf.mxu3  ;;  %v10738_v39 = vor.u32 %v12383_v58, %v10737_v0  ;;  %v10579_v0 = vld [vmem:[#allocation8 + $0x478] sm:$0xf0] }
 0x7ce   :  { %v9090_v53 = vmax.f32 %v8793_v43, 0.0  ;;  %v8493_v23 = vpop.f32.mrf.mxu0 }
 0x7cf   :  { %v15900_v42 = vadd.f32 %v8202_v55, %v7874_v16  ;;  %v15903_v18 = vadd.f32 %v8493_v23, %v15785_v47  ;;  %v10986_v47 = vor.u32 %v12446_v40, %v10985_v44  ;;  %v10990_v16 = vor.u32 %v12442_v22, %v10987_v29  ;;  %v17068_v23 = vld [vmem:[#allocation43_spill] sm:$0xff]  ;;  %v10769_v22 = vld [vmem:[#allocation8 + $0x5d8] sm:$0xf] }
 0x7d0   :  { %v9210_v61 = vpack.c.bf16 %v9090_v53, %v9089_v10  ;;  %v12391_v29 = vld [vmem:[#allocation8 + $0x5f4] sm:$0xf0] }
 0x7d2   :  { %9288 = vmatpush.bf16.msrb.mxu2 %v9210_v61 }
 0x7d3   :  { %v8795_v30 = vpop.f32.mrf.mxu1 }
 0x7d4   :  { %v8796_v60 = vadd.f32 %v8795_v30, %v15814_v28  ;;  %v7875_v57 = vpop.f32.mrf.mxu2  ;;  %v12454_v30 = vld [vmem:[#allocation8 + $0x7ec] sm:$0xf0] }
 0x7d5   :  { %v7876_v52 = vadd.f32 %v7875_v57, %v17067_v37  ;;  %v8204_v43 = vpop.f32.mrf.mxu3  ;;  %v11019_v37 = vld [vmem:[#allocation8 + $0x7f0] sm:$0xf0] }
 0x7d6   :  { %v15907_v62 = vpop.f32.mrf.mxu0  ;;  %8834 = vmatmul.bf16.gmra.mxu1 %v10550_v56  ;;  %9289 = vmatpush.bf16.msrb.mxu2 %v9209_v63  ;;  %v9091_v61 = vmax.f32 %v8796_v60, 0.0  ;;  %v12339_v56 = vld [vmem:[#allocation8 + $0x45c] sm:$0xf]  ;;  %v12450_v60 = vld [vmem:[#allocation8 + $0x7d4] sm:$0xf] }
 0x7d7   :  { %v15909_v55 = vadd.f32 %v8204_v43, %v7876_v52 }
 0x7d9   :  { %7917 = vmatmul.bf16.gmra.mxu2 %v10986_v47  ;;  %8535 = vmatmul.bf16.gmra.mxu0 %v10738_v39 }
 0x7da   :  { %9290 = vmatpush.bf16.msrb.mxu2 %v15871_v51  ;;  %8246 = vmatmul.bf16.gmra.mxu3 %v10990_v16  ;;  %v11017_v51 = vld [vmem:[#allocation8 + $0x7d0] sm:$0xf] }
 0x7db   :  { %v8797_v10 = vpop.f32.mrf.mxu1  ;;  %v11018_v16 = vor.u32 %v12454_v30, %v11017_v51  ;;  %v10611_v30 = vld [vmem:[#allocation8 + $0x4b8] sm:$0xf0] }
 0x7dc   :  { %v8798_v28 = vadd.f32 %v8797_v10, %v15821_v49  ;;  %v7878_v53 = vpop.f32.mrf.mxu2  ;;  %v10582_v49 = vor.u32 %v12339_v56, %v10579_v0  ;;  %v10770_v10 = vor.u32 %v12391_v29, %v10769_v22 }
 0x7dd   :  { %v7879_v15 = vadd.f32 %v7878_v53, %v17068_v23  ;;  %v8207_v13 = vpop.f32.mrf.mxu3 }
 0x7de   :  { %v9092_v44 = vmax.f32 %v8798_v28, 0.0  ;;  %v15914_v40 = vpop.f32.mrf.mxu0  ;;  %9291 = vmatpush.bf16.msrb.mxu2 %v15855_v41  ;;  %v17069_v41 = vld [vmem:[#allocation95_spill] sm:$0xff] }
 0x7df   :  { %v15917_v63 = vadd.f32 %v8207_v13, %v7879_v15  ;;  %v17070_v13 = vld [vmem:[#allocation59_spill] sm:$0xff] }
 0x7e0   :  { %v15919_v58 = vpack.c.bf16 %v9092_v44, %v9091_v61 }
 0x7e2   :  { %9292 = vmatpush.bf16.msrb.mxu2 %v15839_v50  ;;  %v11022_v50 = vor.u32 %v12450_v60, %v11019_v37  ;;  %v12399_v60 = vld [vmem:[#allocation8 + $0x634] sm:$0xf0] }
 0x7e3   :  { %v8800_v57 = vpop.f32.mrf.mxu1 }
 0x7e4   :  { %v8801_v52 = vadd.f32 %v8800_v57, %v15830_v9  ;;  %v7880_v43 = vpop.f32.mrf.mxu2  ;;  %v12462_v57 = vld [vmem:[#allocation8 + $0x82c] sm:$0xf0] }
 0x7e5   :  { %v7881_v47 = vadd.f32 %v7880_v43, %v17069_v41  ;;  %v8209_v39 = vpop.f32.mrf.mxu3  ;;  %v12458_v43 = vld [vmem:[#allocation8 + $0x814] sm:$0xf] }
 0x7e6   :  { %v15924_v28 = vpop.f32.mrf.mxu0  ;;  %8839 = vmatmul.bf16.gmra.mxu1 %v10582_v49  ;;  %9293 = vmatpush.bf16.msrb.mxu2 %v15823_v21  ;;  %v9093_v56 = vmax.f32 %v8801_v52, 0.0  ;;  %v12347_v49 = vld [vmem:[#allocation8 + $0x49c] sm:$0xf]  ;;  %v11051_v41 = vld [vmem:[#allocation8 + $0x830] sm:$0xf0] }
 0x7e7   :  { %v15927_v53 = vadd.f32 %v8209_v39, %v7881_v47  ;;  %v10614_v29 = vor.u32 %v12347_v49, %v10611_v30  ;;  %v17071_v39 = vld [vmem:[#allocation87_spill] sm:$0xff] }
 0x7e9   :  { %7922 = vmatmul.bf16.gmra.mxu2 %v11018_v16  ;;  %8540 = vmatmul.bf16.gmra.mxu0 %v10770_v10 }
 0x7ea   :  { %9294 = vmatpush.bf16.msrb.mxu2 %v15807_v54  ;;  %8251 = vmatmul.bf16.gmra.mxu3 %v11022_v50  ;;  %v11049_v54 = vld [vmem:[#allocation8 + $0x810] sm:$0xf] }
 0x7eb   :  { %v8802_v9 = vpop.f32.mrf.mxu1  ;;  %v11050_v10 = vor.u32 %v12462_v57, %v11049_v54 }
 0x7ec   :  { %v8803_v23 = vadd.f32 %v8802_v9, %v15837_v3  ;;  %v7883_v15 = vpop.f32.mrf.mxu2  ;;  %v10801_v3 = vld [vmem:[#allocation8 + $0x618] sm:$0xf] }
 0x7ed   :  { %v7884_v61 = vadd.f32 %v7883_v15, %v17070_v13  ;;  %v8212_v44 = vpop.f32.mrf.mxu3  ;;  %v10802_v50 = vor.u32 %v12399_v60, %v10801_v3  ;;  %v10643_v60 = vld [vmem:[#allocation8 + $0x4f8] sm:$0xf0] }
 0x7ee   :  { %v9094_v0 = vmax.f32 %v8803_v23, 0.0  ;;  %v15932_v51 = vpop.f32.mrf.mxu0  ;;  %9295 = vmatpush.bf16.msrb.mxu2 %v15793_v8  ;;  %v11054_v23 = vor.u32 %v12458_v43, %v11051_v41  ;;  %v11081_v43 = vld [vmem:[#allocation8 + $0x850] sm:$0xf] }
 0x7ef   :  { %v15935_v21 = vadd.f32 %v8212_v44, %v7884_v61 }
 0x7f0   :  { %v15937_v22 = vpack.c.bf16 %v9094_v0, %v9093_v56  ;;  %v17072_v56 = vld [vmem:[#allocation72_spill] sm:$0xff] }
 0x7f3   :  { %v8805_v37 = vpop.f32.mrf.mxu1 }
 0x7f4   :  { %v8806_v52 = vadd.f32 %v8805_v37, %v15846_v45  ;;  %v7885_v47 = vpop.f32.mrf.mxu2 }
 0x7f5   :  { %v7886_v16 = vadd.f32 %v7885_v47, %v17071_v39  ;;  %v8214_v8 = vpop.f32.mrf.mxu3  ;;  %v12470_v47 = vld [vmem:[#allocation8 + $0x86c] sm:$0xf0]  ;;  %v12407_v39 = vld [vmem:[#allocation8 + $0x674] sm:$0xf0] }
 0x7f6   :  { %v8506_v9 = vpop.f32.mrf.mxu0  ;;  %8844 = vmatmul.bf16.gmra.mxu1 %v10614_v29  ;;  %v9095_v30 = vmax.f32 %v8806_v52, 0.0 }
 0x7f7   :  { %v15941_v15 = vadd.f32 %v8214_v8, %v7886_v16  ;;  %v15944_v13 = vadd.f32 %v8506_v9, %v15818_v11  ;;  %v12355_v11 = vld [vmem:[#allocation8 + $0x4dc] sm:$0xf]  ;;  %v12466_v8 = vld [vmem:[#allocation8 + $0x854] sm:$0xf]  ;;  %v17073_v9 = vld [vmem:[#allocation96_spill] sm:$0xff] }
 0x7f8   :  { %v10646_v41 = vor.u32 %v12355_v11, %v10643_v60 }
 0x7f9   :  { %7927 = vmatmul.bf16.gmra.mxu2 %v11050_v10  ;;  %8545 = vmatmul.bf16.gmra.mxu0 %v10802_v50  ;;  %v11083_v10 = vld [vmem:[#allocation8 + $0x870] sm:$0xf0] }
 0x7fa   :  { %8256 = vmatmul.bf16.gmra.mxu3 %v11054_v23 }
 0x7fb   :  { %v8807_v61 = vpop.f32.mrf.mxu1 }
 0x7fc   :  { %v8808_v45 = vadd.f32 %v8807_v61, %v15853_v25  ;;  %v7888_v44 = vpop.f32.mrf.mxu2  ;;  %v10833_v25 = vld [vmem:[#allocation8 + $0x658] sm:$0xf] }
 0x7fd   :  { %v7889_v0 = vadd.f32 %v7888_v44, %v17072_v56  ;;  %v8217_v49 = vpop.f32.mrf.mxu3  ;;  %v11086_v56 = vor.u32 %v12466_v8, %v11083_v10  ;;  %v11113_v10 = vld [vmem:[#allocation8 + $0x890] sm:$0xf] }
 0x7fe   :  { %v9096_v54 = vmax.f32 %v8808_v45, 0.0  ;;  %v8508_v57 = vpop.f32.mrf.mxu0  ;;  %v10834_v45 = vor.u32 %v12407_v39, %v10833_v25 }
 0x7ff   :  { %v15948_v29 = vadd.f32 %v8217_v49, %v7889_v0  ;;  %v15951_v3 = vadd.f32 %v8508_v57, %v15827_v31  ;;  %v11082_v31 = vor.u32 %v12470_v47, %v11081_v43  ;;  %v17074_v57 = vld [vmem:[#allocation76_spill] sm:$0xff] }
 0x800   :  { %v15953_v37 = vpack.c.bf16 %v9096_v54, %v9095_v30 }
 0x803   :  { %v8810_v16 = vpop.f32.mrf.mxu1 }
 0x804   :  { %v8811_v52 = vadd.f32 %v8810_v16, %v15861_v6  ;;  %v7890_v50 = vpop.f32.mrf.mxu2  ;;  %v10675_v16 = vld [vmem:[#allocation8 + $0x538] sm:$0xf0] }
 0x805   :  { %v7891_v23 = vadd.f32 %v7890_v50, %v17073_v9  ;;  %v8219_v61 = vpop.f32.mrf.mxu3  ;;  %v12478_v9 = vld [vmem:[#allocation8 + $0x8ac] sm:$0xf0] }
 0x806   :  { %v8511_v44 = vpop.f32.mrf.mxu0  ;;  %8849 = vmatmul.bf16.gmra.mxu1 %v10646_v41  ;;  %v9097_v43 = vmax.f32 %v8811_v52, 0.0 }
 0x807   :  { %v15957_v0 = vadd.f32 %v8219_v61, %v7891_v23  ;;  %v15960_v49 = vadd.f32 %v8511_v44, %v15834_v27  ;;  %v12363_v27 = vld [vmem:[#allocation8 + $0x51c] sm:$0xf]  ;;  %v12415_v23 = vld [vmem:[#allocation8 + $0x6b4] sm:$0xf0] }
 0x808   :  { %v10678_v50 = vor.u32 %v12363_v27, %v10675_v16  ;;  %v17076_v27 = vld [vmem:[#allocation67_spill] sm:$0xff] }
 0x809   :  { %7932 = vmatmul.bf16.gmra.mxu2 %v11082_v31  ;;  %8550 = vmatmul.bf16.gmra.mxu0 %v10834_v45  ;;  %v12474_v31 = vld [vmem:[#allocation8 + $0x894] sm:$0xf] }
 0x80a   :  { %8261 = vmatmul.bf16.gmra.mxu3 %v11086_v56  ;;  %v11115_v45 = vld [vmem:[#allocation8 + $0x8b0] sm:$0xf0] }
 0x80b   :  { %v8812_v30 = vpop.f32.mrf.mxu1  ;;  %v17075_v56 = vld [vmem:[#allocation73_spill] sm:$0xff] }
 0x80c   :  { %v8813_v6 = vadd.f32 %v8812_v30, %v15869_v17  ;;  %v7893_v54 = vpop.f32.mrf.mxu2  ;;  %v10865_v17 = vld [vmem:[#allocation8 + $0x698] sm:$0xf] }
 0x80d   :  { %v7894_v11 = vadd.f32 %v7893_v54, %v17074_v57  ;;  %v8222_v60 = vpop.f32.mrf.mxu3  ;;  %v10866_v54 = vor.u32 %v12415_v23, %v10865_v17 }
 0x80e   :  { %v9098_v47 = vmax.f32 %v8813_v6, 0.0  ;;  %v8513_v25 = vpop.f32.mrf.mxu0 }
 0x80f   :  { %v15964_v41 = vadd.f32 %v8222_v60, %v7894_v11  ;;  %v15967_v39 = vadd.f32 %v8513_v25, %v15843_v34  ;;  %v11114_v34 = vor.u32 %v12478_v9, %v11113_v10  ;;  %v11118_v11 = vor.u32 %v12474_v31, %v11115_v45  ;;  %v10707_v31 = vld [vmem:[#allocation8 + $0x578] sm:$0xf0] }
 0x810   :  { %v15969_v8 = vpack.c.bf16 %v9098_v47, %v9097_v43 }
 0x813   :  { %v8815_v61 = vpop.f32.mrf.mxu1 }
 0x814   :  { %v8816_v52 = vadd.f32 %v8815_v61, %v15877_v24  ;;  %v7895_v44 = vpop.f32.mrf.mxu2 }
 0x815   :  { %v7896_v30 = vadd.f32 %v7895_v44, %v17075_v56  ;;  %v8224_v6 = vpop.f32.mrf.mxu3  ;;  %v11145_v44 = vld [vmem:[#allocation8 + $0x8d0] sm:$0xf] }
 0x816   :  { %v8516_v57 = vpop.f32.mrf.mxu0  ;;  %8854 = vmatmul.bf16.gmra.mxu1 %v10678_v50  ;;  %v9099_v10 = vmax.f32 %v8816_v52, 0.0 }
 0x817   :  { %v15973_v60 = vadd.f32 %v8224_v6, %v7896_v30  ;;  %v15976_v43 = vadd.f32 %v8516_v57, %v15850_v36  ;;  %v12371_v36 = vld [vmem:[#allocation8 + $0x55c] sm:$0xf]  ;;  %v12486_v30 = vld [vmem:[#allocation8 + $0x8ec] sm:$0xf0]  ;;  %v12423_v6 = vld [vmem:[#allocation8 + $0x6f4] sm:$0xf0] }
 0x818   :  { %v10710_v56 = vor.u32 %v12371_v36, %v10707_v31  ;;  %v11147_v57 = vld [vmem:[#allocation8 + $0x8f0] sm:$0xf0] }
 0x819   :  { %7937 = vmatmul.bf16.gmra.mxu2 %v11114_v34  ;;  %8555 = vmatmul.bf16.gmra.mxu0 %v10866_v54  ;;  %v12482_v54 = vld [vmem:[#allocation8 + $0x8d4] sm:$0xf] }
 0x81a   :  { %8266 = vmatmul.bf16.gmra.mxu3 %v11118_v11  ;;  %v17077_v11 = vld [vmem:[#allocation82_spill] sm:$0xff] }
 0x81b   :  { %v8817_v47 = vpop.f32.mrf.mxu1 }
 0x81c   :  { %v8818_v24 = vadd.f32 %v8817_v47, %v15887_v35  ;;  %v7898_v25 = vpop.f32.mrf.mxu2  ;;  %v10897_v35 = vld [vmem:[#allocation8 + $0x6d8] sm:$0xf] }
 0x81d   :  { %v7899_v16 = vadd.f32 %v7898_v25, %v17076_v27  ;;  %v8227_v61 = vpop.f32.mrf.mxu3  ;;  %v11146_v25 = vor.u32 %v12486_v30, %v11145_v44  ;;  %v10898_v27 = vor.u32 %v12423_v6, %v10897_v35 }
 0x81e   :  { %v9100_v9 = vmax.f32 %v8818_v24, 0.0  ;;  %v8518_v17 = vpop.f32.mrf.mxu0 }
 0x81f   :  { %v15980_v50 = vadd.f32 %v8227_v61, %v7899_v16  ;;  %v15983_v23 = vadd.f32 %v8518_v17, %v15858_v14  ;;  %v11150_v16 = vor.u32 %v12482_v54, %v11147_v57  ;;  %v12379_v57 = vld [vmem:[#allocation8 + $0x59c] sm:$0xf] }
 0x820   :  { %v15985_v45 = vpack.c.bf16 %v9100_v9, %v9099_v10 }
 0x823   :  { %v8820_v34 = vpop.f32.mrf.mxu1 }
 0x824   :  { %v7900_v52 = vpop.f32.mrf.mxu2  ;;  %v8821_v9 = vadd.f32 %v8820_v34, %v15893_v20  ;;  %v11177_v20 = vld [vmem:[#allocation8 + $0x910] sm:$0xf] }
 0x825   :  { %v7901_v47 = vadd.f32 %v7900_v52, %v17077_v11  ;;  %v8229_v24 = vpop.f32.mrf.mxu3  ;;  %v17078_v52 = vld [vmem:[#allocation88_spill] sm:$0xff]  ;;  %v10739_v11 = vld [vmem:[#allocation8 + $0x5b8] sm:$0xf0] }
 0x826   :  { %v8521_v14 = vpop.f32.mrf.mxu0  ;;  %8859 = vmatmul.bf16.gmra.mxu1 %v10710_v56  ;;  %v9101_v35 = vmax.f32 %v8821_v9, 0.0  ;;  %v10742_v34 = vor.u32 %v12379_v57, %v10739_v11  ;;  %v8499_v57 = vadd.f32 %v15914_v40, %v15799_v1  ;;  %v11209_v1 = vld [vmem:[#allocation8 + $0x950] sm:$0xf] }
 0x827   :  { %v15988_v61 = vadd.f32 %v8229_v24, %v7901_v47  ;;  %v15991_v10 = vadd.f32 %v8521_v14, %v15866_v19  ;;  %v12494_v24 = vld [vmem:[#allocation8 + $0x92c] sm:$0xf0]  ;;  %v12490_v14 = vld [vmem:[#allocation8 + $0x914] sm:$0xf] }
 0x829   :  { %7942 = vmatmul.bf16.gmra.mxu2 %v11146_v25  ;;  %8560 = vmatmul.bf16.gmra.mxu0 %v10898_v27  ;;  %v12431_v25 = vld [vmem:[#allocation8 + $0x734] sm:$0xf0] }
 0x82a   :  { %8271 = vmatmul.bf16.gmra.mxu3 %v11150_v16  ;;  %v11179_v16 = vld [vmem:[#allocation8 + $0x930] sm:$0xf0] }
 0x82b   :  { %v8822_v17 = vpop.f32.mrf.mxu1 }
 0x82c   :  { %v8823_v36 = vadd.f32 %v8822_v17, %v15903_v18  ;;  %v7903_v31 = vpop.f32.mrf.mxu2  ;;  %v10929_v18 = vld [vmem:[#allocation8 + $0x718] sm:$0xf]  ;;  %v17079_v17 = vld [vmem:[#allocation55_spill] sm:$0xff] }
 0x82d   :  { %v7904_v44 = vadd.f32 %v7903_v31, %v17078_v52  ;;  %v8232_v30 = vpop.f32.mrf.mxu3  ;;  %v11178_v52 = vor.u32 %v12494_v24, %v11177_v20 }
 0x82e   :  { %v9102_v56 = vmax.f32 %v8823_v36, 0.0  ;;  %v8523_v6 = vpop.f32.mrf.mxu0 }
 0x82f   :  { %v15996_v54 = vadd.f32 %v8232_v30, %v7904_v44  ;;  %v15999_v19 = vadd.f32 %v8523_v6, %v15874_v12  ;;  %v10930_v44 = vor.u32 %v12431_v25, %v10929_v18  ;;  %v11182_v30 = vor.u32 %v12490_v14, %v11179_v16 }
 0x830   :  { %v16001_v47 = vpack.c.bf16 %v9102_v56, %v9101_v35  ;;  %v8497_v56 = vadd.f32 %v15907_v62, %v15791_v59  ;;  %v12387_v62 = vld [vmem:[#allocation8 + $0x5dc] sm:$0xf] }
 0x833   :  { %v8825_v27 = vpop.f32.mrf.mxu1 }
 0x834   :  { %v7905_v9 = vpop.f32.mrf.mxu2  ;;  %v8826_v11 = vadd.f32 %v8825_v27, %v8497_v56  ;;  %v12502_v27 = vld [vmem:[#allocation8 + $0x96c] sm:$0xf0]  ;;  %v11211_v56 = vld [vmem:[#allocation8 + $0x970] sm:$0xf0] }
 0x835   :  { %v7906_v36 = vadd.f32 %v7905_v9, %v17079_v17  ;;  %v8234_v31 = vpop.f32.mrf.mxu3 }
 0x836   :  { %v8526_v12 = vpop.f32.mrf.mxu0  ;;  %8864 = vmatmul.bf16.gmra.mxu1 %v10742_v34  ;;  %v17080_v34 = vld [vmem:[#allocation62_spill] sm:$0xff]  ;;  %v9103_v16 = vmax.f32 %v8826_v11, 0.0  ;;  %v17081_v11 = vld [vmem:[#allocation63_spill] sm:$0xff] }
 0x837   :  { %v16004_v6 = vadd.f32 %v8234_v31, %v7906_v36  ;;  %v16007_v35 = vadd.f32 %v8526_v12, %v15884_v7  ;;  %v10771_v36 = vld [vmem:[#allocation8 + $0x5f8] sm:$0xf0] }
 0x838   :  { %v10774_v40 = vor.u32 %v12387_v62, %v10771_v36 }
 0x839   :  { %7947 = vmatmul.bf16.gmra.mxu2 %v11178_v52  ;;  %8565 = vmatmul.bf16.gmra.mxu0 %v10930_v44  ;;  %v10961_v52 = vld [vmem:[#allocation8 + $0x758] sm:$0xf] }
 0x83a   :  { %8276 = vmatmul.bf16.gmra.mxu3 %v11182_v30  ;;  %v12439_v44 = vld [vmem:[#allocation8 + $0x774] sm:$0xf0]  ;;  %v12498_v30 = vld [vmem:[#allocation8 + $0x954] sm:$0xf] }
 0x83b   :  { %v8827_v20 = vpop.f32.mrf.mxu1 }
 0x83c   :  { %v8828_v24 = vadd.f32 %v8827_v20, %v8499_v57  ;;  %v7908_v18 = vpop.f32.mrf.mxu2 }
 0x83d   :  { %v7909_v25 = vadd.f32 %v7908_v18, %v17080_v34  ;;  %v8237_v14 = vpop.f32.mrf.mxu3  ;;  %v11210_v18 = vor.u32 %v12502_v27, %v11209_v1  ;;  %v10962_v34 = vor.u32 %v12439_v44, %v10961_v52 }
 0x83e   :  { %v9104_v9 = vmax.f32 %v8828_v24, 0.0  ;;  %v8528_v7 = vpop.f32.mrf.mxu0 }
 0x83f   :  { %v16014_v17 = vadd.f32 %v8237_v14, %v7909_v25  ;;  %v16017_v59 = vadd.f32 %v8528_v7, %v15890_v2  ;;  %v11214_v2 = vor.u32 %v12498_v30, %v11211_v56  ;;  %v8504_v7 = vadd.f32 %v15932_v51, %v15811_v48  ;;  %v11241_v48 = vld [vmem:[#allocation8 + $0x990] sm:$0xf] }
 0x840   :  { %v9217_v31 = vpack.c.bf16 %v9104_v9, %v9103_v16  ;;  %v8502_v9 = vadd.f32 %v15924_v28, %v15805_v38  ;;  %v12395_v28 = vld [vmem:[#allocation8 + $0x61c] sm:$0xf] }
 0x843   :  { %v8830_v12 = vpop.f32.mrf.mxu1 }
 0x844   :  { %v7910_v57 = vpop.f32.mrf.mxu2  ;;  %v8831_v62 = vadd.f32 %v8830_v12, %v8502_v9  ;;  %v12510_v12 = vld [vmem:[#allocation8 + $0x9ac] sm:$0xf0]  ;;  %v12506_v9 = vld [vmem:[#allocation8 + $0x994] sm:$0xf] }
 0x845   :  { %v7911_v20 = vadd.f32 %v7910_v57, %v17081_v11  ;;  %v8239_v24 = vpop.f32.mrf.mxu3  ;;  %v10803_v11 = vld [vmem:[#allocation8 + $0x638] sm:$0xf0] }
 0x846   :  { %v8531_v25 = vpop.f32.mrf.mxu0  ;;  %8869 = vmatmul.bf16.gmra.mxu1 %v10774_v40  ;;  %v17082_v40 = vld [vmem:[#allocation28_spill] sm:$0xff]  ;;  %v9105_v30 = vmax.f32 %v8831_v62, 0.0  ;;  %v10806_v51 = vor.u32 %v12395_v28, %v10803_v11  ;;  %v17083_v62 = vld [vmem:[#allocation53_spill] sm:$0xff] }
 0x847   :  { %v16020_v14 = vadd.f32 %v8239_v24, %v7911_v20  ;;  %v16023_v16 = vadd.f32 %v8531_v25, %v15900_v42  ;;  %v10993_v24 = vld [vmem:[#allocation8 + $0x798] sm:$0xf] }
 0x849   :  { %7952 = vmatmul.bf16.gmra.mxu2 %v11210_v18  ;;  %8570 = vmatmul.bf16.gmra.mxu0 %v10962_v34  ;;  %v12447_v18 = vld [vmem:[#allocation8 + $0x7b4] sm:$0xf0] }
 0x84a   :  { %8281 = vmatmul.bf16.gmra.mxu3 %v11214_v2 }
 0x84b   :  { %v8832_v36 = vpop.f32.mrf.mxu1 }
 0x84c   :  { %v8833_v1 = vadd.f32 %v8832_v36, %v8504_v7  ;;  %v7913_v27 = vpop.f32.mrf.mxu2  ;;  %v11243_v7 = vld [vmem:[#allocation8 + $0x9b0] sm:$0xf0] }
 0x84d   :  { %v7914_v52 = vadd.f32 %v7913_v27, %v17082_v40  ;;  %v8242_v44 = vpop.f32.mrf.mxu3  ;;  %v10994_v27 = vor.u32 %v12447_v18, %v10993_v24  ;;  %v10835_v24 = vld [vmem:[#allocation8 + $0x678] sm:$0xf0] }
 0x84e   :  { %v9106_v56 = vmax.f32 %v8833_v1, 0.0  ;;  %v8533_v42 = vpop.f32.mrf.mxu0 }
 0x84f   :  { %v16030_v57 = vadd.f32 %v8242_v44, %v7914_v52  ;;  %v16033_v38 = vadd.f32 %v8533_v42, %v15909_v55  ;;  %v11242_v55 = vor.u32 %v12510_v12, %v11241_v48  ;;  %v11246_v44 = vor.u32 %v12506_v9, %v11243_v7  ;;  %v17084_v42 = vld [vmem:[#allocation84_spill] sm:$0xff]  ;;  %v12455_v9 = vld [vmem:[#allocation8 + $0x7f4] sm:$0xf0] }
 0x850   :  { %v9218_v20 = vpack.c.bf16 %v9106_v56, %v9105_v30 }
 0x852   :  { %9301 = vmatpush.bf16.msrb.mxu3 %v9218_v20 }
 0x853   :  { %v8835_v34 = vpop.f32.mrf.mxu1 }
 0x854   :  { %v8836_v25 = vadd.f32 %v8835_v34, %v15944_v13  ;;  %v7915_v2 = vpop.f32.mrf.mxu2  ;;  %v12518_v34 = vld [vmem:[#allocation8 + $0x9ec] sm:$0xf0] }
 0x855   :  { %v7916_v36 = vadd.f32 %v7915_v2, %v17083_v62  ;;  %v8244_v1 = vpop.f32.mrf.mxu3  ;;  %v11025_v2 = vld [vmem:[#allocation8 + $0x7d8] sm:$0xf] }
 0x856   :  { %v16037_v40 = vpop.f32.mrf.mxu0  ;;  %8874 = vmatmul.bf16.gmra.mxu1 %v10806_v51  ;;  %9302 = vmatpush.bf16.msrb.mxu3 %v9217_v31  ;;  %v9107_v20 = vmax.f32 %v8836_v25, 0.0  ;;  %v12403_v51 = vld [vmem:[#allocation8 + $0x65c] sm:$0xf] }
 0x857   :  { %v16039_v52 = vadd.f32 %v8244_v1, %v7916_v36  ;;  %v12514_v36 = vld [vmem:[#allocation8 + $0x9d4] sm:$0xf] }
 0x858   :  { %v11275_v1 = vld [vmem:[#allocation8 + $0x9f0] sm:$0xf0] }
 0x859   :  { %7957 = vmatmul.bf16.gmra.mxu2 %v11242_v55  ;;  %8575 = vmatmul.bf16.gmra.mxu0 %v10994_v27 }
 0x85a   :  { %9303 = vmatpush.bf16.msrb.mxu3 %v16001_v47  ;;  %v11273_v47 = vld [vmem:[#allocation8 + $0x9d0] sm:$0xf] }
 0x85b   :  { %8286 = vmatmul.bf16.gmra.mxu3 %v11246_v44  ;;  %v8837_v13 = vpop.f32.mrf.mxu1  ;;  %v11274_v44 = vor.u32 %v12518_v34, %v11273_v47  ;;  %v10867_v34 = vld [vmem:[#allocation8 + $0x6b8] sm:$0xf0] }
 0x85c   :  { %v8838_v30 = vadd.f32 %v8837_v13, %v15951_v3  ;;  %v7918_v56 = vpop.f32.mrf.mxu2  ;;  %v10838_v3 = vor.u32 %v12403_v51, %v10835_v24  ;;  %v11026_v13 = vor.u32 %v12455_v9, %v11025_v2 }
 0x85d   :  { %v7919_v28 = vadd.f32 %v7918_v56, %v17084_v42  ;;  %v8247_v11 = vpop.f32.mrf.mxu3  ;;  %v11278_v56 = vor.u32 %v12514_v36, %v11275_v1 }
 0x85e   :  { %v9108_v48 = vmax.f32 %v8838_v30, 0.0  ;;  %v16044_v12 = vpop.f32.mrf.mxu0  ;;  %9304 = vmatpush.bf16.msrb.mxu3 %v15985_v45  ;;  %v17085_v45 = vld [vmem:[#allocation26_spill] sm:$0xff] }
 0x85f   :  { %v16047_v31 = vadd.f32 %v8247_v11, %v7919_v28  ;;  %v17086_v11 = vld [vmem:[#allocation36_spill] sm:$0xff] }
 0x860   :  { %v16049_v18 = vpack.c.bf16 %v9108_v48, %v9107_v20 }
 0x862   :  { %9305 = vmatpush.bf16.msrb.mxu3 %v15969_v8 }
 0x863   :  { %v8840_v7 = vpop.f32.mrf.mxu1 }
 0x864   :  { %v8841_v25 = vadd.f32 %v8840_v7, %v15960_v49  ;;  %v7920_v62 = vpop.f32.mrf.mxu2  ;;  %v12526_v7 = vld [vmem:[#allocation8 + $0xa2c] sm:$0xf0] }
 0x865   :  { %v7921_v55 = vadd.f32 %v7920_v62, %v17085_v45  ;;  %v8249_v27 = vpop.f32.mrf.mxu3  ;;  %v12463_v62 = vld [vmem:[#allocation8 + $0x834] sm:$0xf0]  ;;  %v12522_v45 = vld [vmem:[#allocation8 + $0xa14] sm:$0xf] }
 0x866   :  { %v16054_v30 = vpop.f32.mrf.mxu0  ;;  %8879 = vmatmul.bf16.gmra.mxu1 %v10838_v3  ;;  %9306 = vmatpush.bf16.msrb.mxu3 %v15953_v37  ;;  %v9109_v51 = vmax.f32 %v8841_v25, 0.0  ;;  %v12411_v3 = vld [vmem:[#allocation8 + $0x69c] sm:$0xf] }
 0x867   :  { %v16057_v8 = vadd.f32 %v8249_v27, %v7921_v55  ;;  %v10870_v9 = vor.u32 %v12411_v3, %v10867_v34  ;;  %v11307_v55 = vld [vmem:[#allocation8 + $0xa30] sm:$0xf0] }
 0x868   :  { %v17087_v27 = vld [vmem:[#allocation41_spill] sm:$0xff] }
 0x869   :  { %7962 = vmatmul.bf16.gmra.mxu2 %v11274_v44  ;;  %8580 = vmatmul.bf16.gmra.mxu0 %v11026_v13 }
 0x86a   :  { %9307 = vmatpush.bf16.msrb.mxu3 %v15937_v22  ;;  %v11305_v22 = vld [vmem:[#allocation8 + $0xa10] sm:$0xf] }
 0x86b   :  { %8291 = vmatmul.bf16.gmra.mxu3 %v11278_v56  ;;  %v8842_v49 = vpop.f32.mrf.mxu1  ;;  %v11306_v13 = vor.u32 %v12526_v7, %v11305_v22 }
 0x86c   :  { %v8843_v42 = vadd.f32 %v8842_v49, %v15967_v39  ;;  %v7923_v28 = vpop.f32.mrf.mxu2  ;;  %v11057_v39 = vld [vmem:[#allocation8 + $0x818] sm:$0xf] }
 0x86d   :  { %v7924_v20 = vadd.f32 %v7923_v28, %v17086_v11  ;;  %v8252_v48 = vpop.f32.mrf.mxu3  ;;  %v11058_v56 = vor.u32 %v12463_v62, %v11057_v39  ;;  %v11310_v11 = vor.u32 %v12522_v45, %v11307_v55  ;;  %v10899_v62 = vld [vmem:[#allocation8 + $0x6f8] sm:$0xf0]  ;;  %v12534_v55 = vld [vmem:[#allocation8 + $0xa6c] sm:$0xf0] }
 0x86e   :  { %v9110_v24 = vmax.f32 %v8843_v42, 0.0  ;;  %v16062_v47 = vpop.f32.mrf.mxu0  ;;  %9308 = vmatpush.bf16.msrb.mxu3 %v15919_v58 }
 0x86f   :  { %v16065_v37 = vadd.f32 %v8252_v48, %v7924_v20 }
 0x870   :  { %v16067_v2 = vpack.c.bf16 %v9110_v24, %v9109_v51  ;;  %v17088_v51 = vld [vmem:[#allocation92_spill] sm:$0xff] }
 0x873   :  { %v8845_v36 = vpop.f32.mrf.mxu1 }
 0x874   :  { %v8846_v1 = vadd.f32 %v8845_v36, %v15976_v43  ;;  %v7925_v25 = vpop.f32.mrf.mxu2 }
 0x875   :  { %v7926_v44 = vadd.f32 %v7925_v25, %v17087_v27  ;;  %v8254_v58 = vpop.f32.mrf.mxu3  ;;  %v11337_v25 = vld [vmem:[#allocation8 + $0xa50] sm:$0xf]  ;;  %v12471_v27 = vld [vmem:[#allocation8 + $0x874] sm:$0xf0] }
 0x876   :  { %v8546_v49 = vpop.f32.mrf.mxu0  ;;  %8884 = vmatmul.bf16.gmra.mxu1 %v10870_v9  ;;  %v9111_v34 = vmax.f32 %v8846_v1, 0.0 }
 0x877   :  { %v16071_v42 = vadd.f32 %v8254_v58, %v7926_v44  ;;  %v16074_v28 = vadd.f32 %v8546_v49, %v15948_v29  ;;  %v12419_v29 = vld [vmem:[#allocation8 + $0x6dc] sm:$0xf]  ;;  %v17089_v49 = vld [vmem:[#allocation80_spill] sm:$0xff] }
 0x878   :  { %v10902_v45 = vor.u32 %v12419_v29, %v10899_v62 }
 0x879   :  { %7967 = vmatmul.bf16.gmra.mxu2 %v11306_v13  ;;  %8585 = vmatmul.bf16.gmra.mxu0 %v11058_v56  ;;  %v12530_v13 = vld [vmem:[#allocation8 + $0xa54] sm:$0xf] }
 0x87a   :  { %v11339_v56 = vld [vmem:[#allocation8 + $0xa70] sm:$0xf0] }
 0x87b   :  { %8296 = vmatmul.bf16.gmra.mxu3 %v11310_v11  ;;  %v8847_v43 = vpop.f32.mrf.mxu1 }
 0x87c   :  { %v8848_v20 = vadd.f32 %v8847_v43, %v15983_v23  ;;  %v7928_v48 = vpop.f32.mrf.mxu2  ;;  %v11089_v23 = vld [vmem:[#allocation8 + $0x858] sm:$0xf] }
 0x87d   :  { %v7929_v24 = vadd.f32 %v7928_v48, %v17088_v51  ;;  %v8257_v3 = vpop.f32.mrf.mxu3 }
 0x87e   :  { %v9112_v22 = vmax.f32 %v8848_v20, 0.0  ;;  %v8548_v7 = vpop.f32.mrf.mxu0  ;;  %v11090_v20 = vor.u32 %v12471_v27, %v11089_v23 }
 0x87f   :  { %v16078_v9 = vadd.f32 %v8257_v3, %v7929_v24  ;;  %v16081_v39 = vadd.f32 %v8548_v7, %v15957_v0  ;;  %v11338_v0 = vor.u32 %v12534_v55, %v11337_v25  ;;  %v11342_v3 = vor.u32 %v12530_v13, %v11339_v56  ;;  %v17090_v7 = vld [vmem:[#allocation78_spill] sm:$0xff]  ;;  %v11369_v13 = vld [vmem:[#allocation8 + $0xa90] sm:$0xf] }
 0x880   :  { %v16083_v36 = vpack.c.bf16 %v9112_v22, %v9111_v34 }
 0x883   :  { %v8850_v44 = vpop.f32.mrf.mxu1 }
 0x884   :  { %v8851_v58 = vadd.f32 %v8850_v44, %v15991_v10  ;;  %v7930_v1 = vpop.f32.mrf.mxu2  ;;  %v10931_v44 = vld [vmem:[#allocation8 + $0x738] sm:$0xf0] }
 0x885   :  { %v7931_v11 = vadd.f32 %v7930_v1, %v17089_v49  ;;  %v8259_v43 = vpop.f32.mrf.mxu3  ;;  %v12542_v49 = vld [vmem:[#allocation8 + $0xaac] sm:$0xf0] }
 0x886   :  { %v8551_v48 = vpop.f32.mrf.mxu0  ;;  %8889 = vmatmul.bf16.gmra.mxu1 %v10902_v45  ;;  %v9113_v25 = vmax.f32 %v8851_v58, 0.0 }
 0x887   :  { %v16087_v51 = vadd.f32 %v8259_v43, %v7931_v11  ;;  %v16090_v24 = vadd.f32 %v8551_v48, %v15964_v41  ;;  %v12427_v41 = vld [vmem:[#allocation8 + $0x71c] sm:$0xf]  ;;  %v12479_v11 = vld [vmem:[#allocation8 + $0x8b4] sm:$0xf0]  ;;  %v11371_v48 = vld [vmem:[#allocation8 + $0xab0] sm:$0xf0] }
 0x888   :  { %v10934_v56 = vor.u32 %v12427_v41, %v10931_v44  ;;  %v17092_v41 = vld [vmem:[#allocation83_spill] sm:$0xff] }
 0x889   :  { %7972 = vmatmul.bf16.gmra.mxu2 %v11338_v0  ;;  %8590 = vmatmul.bf16.gmra.mxu0 %v11090_v20  ;;  %v12538_v20 = vld [vmem:[#allocation8 + $0xa94] sm:$0xf] }
 0x88b   :  { %8301 = vmatmul.bf16.gmra.mxu3 %v11342_v3  ;;  %v8852_v10 = vpop.f32.mrf.mxu1  ;;  %v17091_v3 = vld [vmem:[#allocation34_spill] sm:$0xff] }
 0x88c   :  { %v8853_v34 = vadd.f32 %v8852_v10, %v15999_v19  ;;  %v7933_v22 = vpop.f32.mrf.mxu2  ;;  %v11121_v19 = vld [vmem:[#allocation8 + $0x898] sm:$0xf] }
 0x88d   :  { %v7934_v29 = vadd.f32 %v7933_v22, %v17090_v7  ;;  %v8262_v62 = vpop.f32.mrf.mxu3  ;;  %v11122_v22 = vor.u32 %v12479_v11, %v11121_v19 }
 0x88e   :  { %v9114_v55 = vmax.f32 %v8853_v34, 0.0  ;;  %v8553_v23 = vpop.f32.mrf.mxu0 }
 0x88f   :  { %v16094_v45 = vadd.f32 %v8262_v62, %v7934_v29  ;;  %v16097_v27 = vadd.f32 %v8553_v23, %v15973_v60  ;;  %v11370_v60 = vor.u32 %v12542_v49, %v11369_v13 }
 0x890   :  { %v16099_v1 = vpack.c.bf16 %v9114_v55, %v9113_v25  ;;  %v11374_v25 = vor.u32 %v12538_v20, %v11371_v48  ;;  %v11401_v48 = vld [vmem:[#allocation8 + $0xad0] sm:$0xf] }
 0x893   :  { %v8855_v43 = vpop.f32.mrf.mxu1 }
 0x894   :  { %v8856_v0 = vadd.f32 %v8855_v43, %v16007_v35  ;;  %v7935_v58 = vpop.f32.mrf.mxu2 }
 0x895   :  { %v7936_v10 = vadd.f32 %v7935_v58, %v17091_v3  ;;  %v8264_v34 = vpop.f32.mrf.mxu3  ;;  %v10963_v58 = vld [vmem:[#allocation8 + $0x778] sm:$0xf0] }
 0x896   :  { %v8556_v7 = vpop.f32.mrf.mxu0  ;;  %8894 = vmatmul.bf16.gmra.mxu1 %v10934_v56  ;;  %v9115_v13 = vmax.f32 %v8856_v0, 0.0  ;;  %v11403_v0 = vld [vmem:[#allocation8 + $0xaf0] sm:$0xf0] }
 0x897   :  { %v16103_v29 = vadd.f32 %v8264_v34, %v7936_v10  ;;  %v16106_v62 = vadd.f32 %v8556_v7, %v15980_v50  ;;  %v12435_v50 = vld [vmem:[#allocation8 + $0x75c] sm:$0xf]  ;;  %v12550_v10 = vld [vmem:[#allocation8 + $0xaec] sm:$0xf0]  ;;  %v12487_v34 = vld [vmem:[#allocation8 + $0x8f4] sm:$0xf0] }
 0x898   :  { %v10966_v3 = vor.u32 %v12435_v50, %v10963_v58  ;;  %v12546_v7 = vld [vmem:[#allocation8 + $0xad4] sm:$0xf] }
 0x899   :  { %7977 = vmatmul.bf16.gmra.mxu2 %v11370_v60  ;;  %8595 = vmatmul.bf16.gmra.mxu0 %v11122_v22 }
 0x89b   :  { %8306 = vmatmul.bf16.gmra.mxu3 %v11374_v25  ;;  %v8857_v35 = vpop.f32.mrf.mxu1  ;;  %v17093_v25 = vld [vmem:[#allocation30_spill] sm:$0xff] }
 0x89c   :  { %v8858_v55 = vadd.f32 %v8857_v35, %v16017_v59  ;;  %v7938_v23 = vpop.f32.mrf.mxu2  ;;  %v11153_v59 = vld [vmem:[#allocation8 + $0x8d8] sm:$0xf] }
 0x89d   :  { %v7939_v44 = vadd.f32 %v7938_v23, %v17092_v41  ;;  %v8267_v43 = vpop.f32.mrf.mxu3  ;;  %v11402_v23 = vor.u32 %v12550_v10, %v11401_v48  ;;  %v11154_v41 = vor.u32 %v12487_v34, %v11153_v59 }
 0x89e   :  { %v9116_v49 = vmax.f32 %v8858_v55, 0.0  ;;  %v8558_v19 = vpop.f32.mrf.mxu0 }
 0x89f   :  { %v16110_v56 = vadd.f32 %v8267_v43, %v7939_v44  ;;  %v16113_v11 = vadd.f32 %v8558_v19, %v15988_v61 }
 0x8a0   :  { %v16115_v20 = vpack.c.bf16 %v9116_v49, %v9115_v13  ;;  %v11406_v13 = vor.u32 %v12546_v7, %v11403_v0  ;;  %v12443_v7 = vld [vmem:[#allocation8 + $0x79c] sm:$0xf] }
 0x8a1   :  { %v10995_v0 = vld [vmem:[#allocation8 + $0x7b8] sm:$0xf0] }
 0x8a3   :  { %v8860_v60 = vpop.f32.mrf.mxu1 }
 0x8a4   :  { %v7940_v22 = vpop.f32.mrf.mxu2  ;;  %v8861_v49 = vadd.f32 %v8860_v60, %v16023_v16  ;;  %v11433_v16 = vld [vmem:[#allocation8 + $0xb10] sm:$0xf]  ;;  %v10998_v60 = vor.u32 %v12443_v7, %v10995_v0 }
 0x8a5   :  { %v7941_v35 = vadd.f32 %v7940_v22, %v17093_v25  ;;  %v8269_v55 = vpop.f32.mrf.mxu3 }
 0x8a6   :  { %v8561_v61 = vpop.f32.mrf.mxu0  ;;  %8899 = vmatmul.bf16.gmra.mxu1 %v10966_v3  ;;  %v9117_v59 = vmax.f32 %v8861_v49, 0.0 }
 0x8a7   :  { %v16118_v44 = vadd.f32 %v8269_v55, %v7941_v35  ;;  %v16121_v43 = vadd.f32 %v8561_v61, %v15996_v54  ;;  %v12558_v35 = vld [vmem:[#allocation8 + $0xb2c] sm:$0xf0]  ;;  %v12495_v55 = vld [vmem:[#allocation8 + $0x934] sm:$0xf0]  ;;  %v11435_v61 = vld [vmem:[#allocation8 + $0xb30] sm:$0xf0] }
 0x8a9   :  { %7982 = vmatmul.bf16.gmra.mxu2 %v11402_v23  ;;  %8600 = vmatmul.bf16.gmra.mxu0 %v11154_v41  ;;  %v12554_v41 = vld [vmem:[#allocation8 + $0xb14] sm:$0xf] }
 0x8ab   :  { %8311 = vmatmul.bf16.gmra.mxu3 %v11406_v13  ;;  %v8862_v19 = vpop.f32.mrf.mxu1 }
 0x8ac   :  { %v8863_v50 = vadd.f32 %v8862_v19, %v16033_v38  ;;  %v7943_v58 = vpop.f32.mrf.mxu2  ;;  %v11185_v38 = vld [vmem:[#allocation8 + $0x918] sm:$0xf]  ;;  %v11434_v19 = vor.u32 %v12558_v35, %v11433_v16 }
 0x8ad   :  { %v7944_v48 = vadd.f32 %v7943_v58, %v15262_v5  ;;  %v8272_v10 = vpop.f32.mrf.mxu3 }
 0x8ae   :  { %v9118_v3 = vmax.f32 %v8863_v50, 0.0  ;;  %v8563_v34 = vpop.f32.mrf.mxu0  ;;  %v11186_v50 = vor.u32 %v12495_v55, %v11185_v38 }
 0x8af   :  { %v16126_v22 = vadd.f32 %v8272_v10, %v7944_v48  ;;  %v16129_v54 = vadd.f32 %v8563_v34, %v16004_v6  ;;  %v11438_v10 = vor.u32 %v12554_v41, %v11435_v61  ;;  %v11217_v61 = vld [vmem:[#allocation8 + $0x958] sm:$0xf] }
 0x8b0   :  { %v16131_v25 = vpack.c.bf16 %v9118_v3, %v9117_v59  ;;  %v8537_v59 = vadd.f32 %v16037_v40, %v15917_v63  ;;  %v8539_v3 = vadd.f32 %v16044_v12, %v15927_v53  ;;  %v12451_v40 = vld [vmem:[#allocation8 + $0x7dc] sm:$0xf]  ;;  %v11465_v53 = vld [vmem:[#allocation8 + $0xb50] sm:$0xf] }
 0x8b3   :  { %v8865_v23 = vpop.f32.mrf.mxu1 }
 0x8b4   :  { %v7945_v5 = vpop.f32.mrf.mxu2 }
 0x8b5   :  { %v7946_v13 = vadd.f32 %v7945_v5, %v15270_v4  ;;  %v8274_v49 = vpop.f32.mrf.mxu3  ;;  %v8866_v4 = vadd.f32 %v8865_v23, %v8537_v59  ;;  %v11027_v5 = vld [vmem:[#allocation8 + $0x7f8] sm:$0xf0]  ;;  %v12566_v23 = vld [vmem:[#allocation8 + $0xb6c] sm:$0xf0] }
 0x8b6   :  { %v8566_v6 = vpop.f32.mrf.mxu0  ;;  %8904 = vmatmul.bf16.gmra.mxu1 %v10998_v60  ;;  %v11030_v12 = vor.u32 %v12451_v40, %v11027_v5  ;;  %v11466_v59 = vor.u32 %v12566_v23, %v11465_v53  ;;  %v11059_v23 = vld [vmem:[#allocation8 + $0x838] sm:$0xf0] }
 0x8b7   :  { %v16134_v58 = vadd.f32 %v8274_v49, %v7946_v13  ;;  %v16137_v48 = vadd.f32 %v8566_v6, %v16014_v17  ;;  %v9119_v35 = vmax.f32 %v8866_v4, 0.0  ;;  %v12503_v13 = vld [vmem:[#allocation8 + $0x974] sm:$0xf0] }
 0x8b9   :  { %7987 = vmatmul.bf16.gmra.mxu2 %v11434_v19  ;;  %8605 = vmatmul.bf16.gmra.mxu0 %v11186_v50  ;;  %v11467_v50 = vld [vmem:[#allocation8 + $0xb70] sm:$0xf0] }
 0x8bb   :  { %8316 = vmatmul.bf16.gmra.mxu3 %v11438_v10  ;;  %v8867_v34 = vpop.f32.mrf.mxu1 }
 0x8bc   :  { %v8868_v7 = vadd.f32 %v8867_v34, %v8539_v3  ;;  %v7948_v0 = vpop.f32.mrf.mxu2  ;;  %v11218_v3 = vor.u32 %v12503_v13, %v11217_v61  ;;  %v12574_v13 = vld [vmem:[#allocation8 + $0xbac] sm:$0xf0] }
 0x8bd   :  { %v7949_v16 = vadd.f32 %v7948_v0, %v15278_v46  ;;  %v8277_v60 = vpop.f32.mrf.mxu3  ;;  %v12562_v46 = vld [vmem:[#allocation8 + $0xb54] sm:$0xf]  ;;  %v8542_v0 = vadd.f32 %v16054_v30, %v15935_v21  ;;  %v12459_v30 = vld [vmem:[#allocation8 + $0x81c] sm:$0xf] }
 0x8be   :  { %v9120_v17 = vmax.f32 %v8868_v7, 0.0  ;;  %v8568_v38 = vpop.f32.mrf.mxu0  ;;  %v11470_v7 = vor.u32 %v12562_v46, %v11467_v50 }
 0x8bf   :  { %v16144_v55 = vadd.f32 %v8277_v60, %v7949_v16  ;;  %v16147_v63 = vadd.f32 %v8568_v38, %v16020_v14  ;;  %v8544_v16 = vadd.f32 %v16062_v47, %v15941_v15  ;;  %v11497_v15 = vld [vmem:[#allocation8 + $0xb90] sm:$0xf]  ;;  %v11062_v47 = vor.u32 %v12459_v30, %v11059_v23 }
 0x8c0   :  { %v9225_v41 = vpack.c.bf16 %v9120_v17, %v9119_v35  ;;  %v12582_v23 = vld [vmem:[#allocation8 + $0xbec] sm:$0xf0] }
 0x8c3   :  { %v8870_v49 = vpop.f32.mrf.mxu1 }
 0x8c4   :  { %v7950_v19 = vpop.f32.mrf.mxu2 }
 0x8c5   :  { %v7951_v6 = vadd.f32 %v7950_v19, %v15287_v33  ;;  %v8279_v10 = vpop.f32.mrf.mxu3  ;;  %v8871_v33 = vadd.f32 %v8870_v49, %v8542_v0  ;;  %v11249_v49 = vld [vmem:[#allocation8 + $0x998] sm:$0xf] }
 0x8c6   :  { %v8571_v4 = vpop.f32.mrf.mxu0  ;;  %8909 = vmatmul.bf16.gmra.mxu1 %v11030_v12  ;;  %v12511_v19 = vld [vmem:[#allocation8 + $0x9b4] sm:$0xf0] }
 0x8c7   :  { %v16150_v14 = vadd.f32 %v8279_v10, %v7951_v6  ;;  %v16153_v34 = vadd.f32 %v8571_v4, %v16030_v57  ;;  %v9121_v5 = vmax.f32 %v8871_v33, 0.0  ;;  %v12570_v6 = vld [vmem:[#allocation8 + $0xb94] sm:$0xf]  ;;  %v11250_v4 = vor.u32 %v12511_v19, %v11249_v49 }
 0x8c8   :  { %v11499_v10 = vld [vmem:[#allocation8 + $0xbb0] sm:$0xf0] }
 0x8c9   :  { %7992 = vmatmul.bf16.gmra.mxu2 %v11466_v59  ;;  %8610 = vmatmul.bf16.gmra.mxu0 %v11218_v3  ;;  %v12578_v19 = vld [vmem:[#allocation8 + $0xbd4] sm:$0xf] }
 0x8cb   :  { %8321 = vmatmul.bf16.gmra.mxu3 %v11470_v7  ;;  %v8872_v60 = vpop.f32.mrf.mxu1 }
 0x8cc   :  { %v8873_v35 = vadd.f32 %v8872_v60, %v8544_v16  ;;  %v7953_v17 = vpop.f32.mrf.mxu2  ;;  %v11502_v16 = vor.u32 %v12570_v6, %v11499_v10 }
 0x8cd   :  { %v7954_v38 = vadd.f32 %v7953_v17, %v15296_v26  ;;  %v8282_v40 = vpop.f32.mrf.mxu3 }
 0x8ce   :  { %v9122_v57 = vmax.f32 %v8873_v35, 0.0  ;;  %v8573_v53 = vpop.f32.mrf.mxu0 }
 0x8cf   :  { %v16160_v12 = vadd.f32 %v8282_v40, %v7954_v38  ;;  %v16163_v21 = vadd.f32 %v8573_v53, %v16039_v52  ;;  %v11498_v52 = vor.u32 %v12574_v13, %v11497_v15  ;;  %v11091_v53 = vld [vmem:[#allocation8 + $0x878] sm:$0xf0]  ;;  %v12519_v15 = vld [vmem:[#allocation8 + $0x9f4] sm:$0xf0] }
 0x8d0   :  { %v9226_v61 = vpack.c.bf16 %v9122_v57, %v9121_v5  ;;  %v12467_v57 = vld [vmem:[#allocation8 + $0x85c] sm:$0xf] }
 0x8d2   :  { %9314 = vmatpush.bf16.msra.mxu2 %v9226_v61  ;;  %v11281_v61 = vld [vmem:[#allocation8 + $0x9d8] sm:$0xf] }
 0x8d3   :  { %v8875_v46 = vpop.f32.mrf.mxu1  ;;  %v11282_v6 = vor.u32 %v12519_v15, %v11281_v61  ;;  %v12586_v15 = vld [vmem:[#allocation8 + $0xc14] sm:$0xf] }
 0x8d4   :  { %v8876_v26 = vadd.f32 %v8875_v46, %v16074_v28  ;;  %v7955_v50 = vpop.f32.mrf.mxu2  ;;  %v11531_v46 = vld [vmem:[#allocation8 + $0xbf0] sm:$0xf0] }
 0x8d5   :  { %v7956_v59 = vadd.f32 %v7955_v50, %v15305_v32  ;;  %v8284_v3 = vpop.f32.mrf.mxu3  ;;  %v17094_v32 = vld [vmem:[#allocation94_spill] sm:$0xff] }
 0x8d6   :  { %v16167_v7 = vpop.f32.mrf.mxu0  ;;  %8914 = vmatmul.bf16.gmra.mxu1 %v11062_v47  ;;  %9315 = vmatpush.bf16.msra.mxu2 %v9225_v41  ;;  %v9123_v17 = vmax.f32 %v8876_v26, 0.0 }
 0x8d7   :  { %v16169_v0 = vadd.f32 %v8284_v3, %v7956_v59  ;;  %v11534_v3 = vor.u32 %v12578_v19, %v11531_v46 }
 0x8d9   :  { %7997 = vmatmul.bf16.gmra.mxu2 %v11498_v52  ;;  %8615 = vmatmul.bf16.gmra.mxu0 %v11250_v4 }
 0x8da   :  { %9316 = vmatpush.bf16.msra.mxu2 %v16131_v25  ;;  %v11529_v25 = vld [vmem:[#allocation8 + $0xbd0] sm:$0xf] }
 0x8db   :  { %8326 = vmatmul.bf16.gmra.mxu3 %v11502_v16  ;;  %v8877_v28 = vpop.f32.mrf.mxu1  ;;  %v11530_v50 = vor.u32 %v12582_v23, %v11529_v25  ;;  %v17096_v16 = vld [vmem:[#allocation18_spill] sm:$0xff] }
 0x8dc   :  { %v8878_v33 = vadd.f32 %v8877_v28, %v16081_v39  ;;  %v7958_v60 = vpop.f32.mrf.mxu2  ;;  %v11094_v39 = vor.u32 %v12467_v57, %v11091_v53  ;;  %v12590_v53 = vld [vmem:[#allocation8 + $0xc2c] sm:$0xf0]  ;;  %v12527_v25 = vld [vmem:[#allocation8 + $0xa34] sm:$0xf0] }
 0x8dd   :  { %v7959_v35 = vadd.f32 %v7958_v60, %v17094_v32 }
 0x8de   :  { %v9124_v38 = vmax.f32 %v8878_v33, 0.0  ;;  %v8287_v40 = vpop.f32.mrf.mxu3  ;;  %v16174_v5 = vpop.f32.mrf.mxu0  ;;  %9317 = vmatpush.bf16.msra.mxu2 %v16115_v20  ;;  %v17095_v20 = vld [vmem:[#allocation93_spill] sm:$0xff] }
 0x8df   :  { %v16177_v41 = vadd.f32 %v8287_v40, %v7959_v35 }
 0x8e0   :  { %v16179_v30 = vpack.c.bf16 %v9124_v38, %v9123_v17  ;;  %v12475_v17 = vld [vmem:[#allocation8 + $0x89c] sm:$0xf] }
 0x8e1   :  { %v11123_v38 = vld [vmem:[#allocation8 + $0x8b8] sm:$0xf0] }
 0x8e2   :  { %9318 = vmatpush.bf16.msra.mxu2 %v16099_v1  ;;  %v11126_v57 = vor.u32 %v12475_v17, %v11123_v38  ;;  %v11155_v17 = vld [vmem:[#allocation8 + $0x8f8] sm:$0xf0] }
 0x8e3   :  { %v8880_v47 = vpop.f32.mrf.mxu1 }
 0x8e4   :  { %v8881_v13 = vadd.f32 %v8880_v47, %v16090_v24  ;;  %v7960_v49 = vpop.f32.mrf.mxu2  ;;  %v11563_v47 = vld [vmem:[#allocation8 + $0xc30] sm:$0xf0] }
 0x8e5   :  { %v7961_v26 = vadd.f32 %v7960_v49, %v17095_v20 }
 0x8e6   :  { %v8289_v10 = vpop.f32.mrf.mxu3  ;;  %v16184_v59 = vpop.f32.mrf.mxu0  ;;  %8919 = vmatmul.bf16.gmra.mxu1 %v11094_v39  ;;  %9319 = vmatpush.bf16.msra.mxu2 %v16083_v36  ;;  %v9125_v33 = vmax.f32 %v8881_v13, 0.0  ;;  %v17097_v13 = vld [vmem:[#allocation99_spill] sm:$0xff] }
 0x8e7   :  { %v16187_v1 = vadd.f32 %v8289_v10, %v7961_v26 }
 0x8e9   :  { %8002 = vmatmul.bf16.gmra.mxu2 %v11530_v50  ;;  %8620 = vmatmul.bf16.gmra.mxu0 %v11282_v6  ;;  %v11566_v6 = vor.u32 %v12586_v15, %v11563_v47  ;;  %v11595_v15 = vld [vmem:[#allocation8 + $0xc70] sm:$0xf0] }
 0x8ea   :  { %9320 = vmatpush.bf16.msra.mxu2 %v16067_v2  ;;  %v11561_v2 = vld [vmem:[#allocation8 + $0xc10] sm:$0xf] }
 0x8eb   :  { %8331 = vmatmul.bf16.gmra.mxu3 %v11534_v3  ;;  %v8882_v24 = vpop.f32.mrf.mxu1  ;;  %v17099_v47 = vld [vmem:[#allocation101_spill] sm:$0xff] }
 0x8ec   :  { %v8883_v52 = vadd.f32 %v8882_v24, %v16097_v27  ;;  %v7963_v4 = vpop.f32.mrf.mxu2  ;;  %v11313_v27 = vld [vmem:[#allocation8 + $0xa18] sm:$0xf]  ;;  %v17098_v24 = vld [vmem:[#allocation100_spill] sm:$0xff] }
 0x8ed   :  { %v7964_v28 = vadd.f32 %v7963_v4, %v17096_v16  ;;  %v11314_v19 = vor.u32 %v12527_v25, %v11313_v27  ;;  %v12535_v27 = vld [vmem:[#allocation8 + $0xa74] sm:$0xf0] }
 0x8ee   :  { %v9126_v60 = vmax.f32 %v8883_v52, 0.0  ;;  %v8292_v32 = vpop.f32.mrf.mxu3  ;;  %v16192_v35 = vpop.f32.mrf.mxu0  ;;  %9321 = vmatpush.bf16.msra.mxu2 %v16049_v18  ;;  %v11562_v18 = vor.u32 %v12590_v53, %v11561_v2  ;;  %v11593_v2 = vld [vmem:[#allocation8 + $0xc50] sm:$0xf] }
 0x8ef   :  { %v16195_v36 = vadd.f32 %v8292_v32, %v7964_v28  ;;  %v12598_v53 = vld [vmem:[#allocation8 + $0xc6c] sm:$0xf0] }
 0x8f0   :  { %v16197_v40 = vpack.c.bf16 %v9126_v60, %v9125_v33 }
 0x8f3   :  { %v8885_v39 = vpop.f32.mrf.mxu1 }
 0x8f4   :  { %v8886_v23 = vadd.f32 %v8885_v39, %v16106_v62  ;;  %v7965_v61 = vpop.f32.mrf.mxu2 }
 0x8f5   :  { %v7966_v49 = vadd.f32 %v7965_v61, %v17097_v13  ;;  %v12594_v61 = vld [vmem:[#allocation8 + $0xc54] sm:$0xf] }
 0x8f6   :  { %v8294_v46 = vpop.f32.mrf.mxu3  ;;  %v8586_v20 = vpop.f32.mrf.mxu0  ;;  %8924 = vmatmul.bf16.gmra.mxu1 %v11126_v57  ;;  %v9127_v4 = vmax.f32 %v8886_v23, 0.0 }
 0x8f7   :  { %v16201_v26 = vadd.f32 %v8294_v46, %v7966_v49  ;;  %v16204_v50 = vadd.f32 %v8586_v20, %v16078_v9  ;;  %v12483_v9 = vld [vmem:[#allocation8 + $0x8dc] sm:$0xf]  ;;  %v11594_v49 = vor.u32 %v12598_v53, %v11593_v2 }
 0x8f8   :  { %v11158_v57 = vor.u32 %v12483_v9, %v11155_v17  ;;  %v11187_v17 = vld [vmem:[#allocation8 + $0x938] sm:$0xf0] }
 0x8f9   :  { %8007 = vmatmul.bf16.gmra.mxu2 %v11562_v18  ;;  %8625 = vmatmul.bf16.gmra.mxu0 %v11314_v19 }
 0x8fb   :  { %8336 = vmatmul.bf16.gmra.mxu3 %v11566_v6  ;;  %v8887_v62 = vpop.f32.mrf.mxu1  ;;  %v11598_v6 = vor.u32 %v12594_v61, %v11595_v15  ;;  %v12602_v61 = vld [vmem:[#allocation8 + $0xc94] sm:$0xf] }
 0x8fc   :  { %v8888_v10 = vadd.f32 %v8887_v62, %v16113_v11  ;;  %v7968_v3 = vpop.f32.mrf.mxu2  ;;  %v11345_v11 = vld [vmem:[#allocation8 + $0xa58] sm:$0xf]  ;;  %v11627_v15 = vld [vmem:[#allocation8 + $0xcb0] sm:$0xf0] }
 0x8fd   :  { %v7969_v52 = vadd.f32 %v7968_v3, %v17098_v24  ;;  %v17100_v3 = vld [vmem:[#allocation102_spill] sm:$0xff] }
 0x8fe   :  { %v9128_v16 = vmax.f32 %v8888_v10, 0.0  ;;  %v8297_v28 = vpop.f32.mrf.mxu3  ;;  %v8588_v33 = vpop.f32.mrf.mxu0 }
 0x8ff   :  { %v16208_v60 = vadd.f32 %v8297_v28, %v7969_v52  ;;  %v16211_v32 = vadd.f32 %v8588_v33, %v16087_v51  ;;  %v11346_v51 = vor.u32 %v12535_v27, %v11345_v11  ;;  %v12606_v11 = vld [vmem:[#allocation8 + $0xcac] sm:$0xf0]  ;;  %v12543_v27 = vld [vmem:[#allocation8 + $0xab4] sm:$0xf0] }
 0x900   :  { %v16213_v38 = vpack.c.bf16 %v9128_v16, %v9127_v4 }
 0x903   :  { %v8890_v25 = vpop.f32.mrf.mxu1 }
 0x904   :  { %v8891_v39 = vadd.f32 %v8890_v25, %v16121_v43  ;;  %v7970_v23 = vpop.f32.mrf.mxu2 }
 0x905   :  { %v7971_v13 = vadd.f32 %v7970_v23, %v17099_v47  ;;  %v17101_v47 = vld [vmem:[#allocation103_spill] sm:$0xff] }
 0x906   :  { %v8299_v18 = vpop.f32.mrf.mxu3  ;;  %v8591_v19 = vpop.f32.mrf.mxu0  ;;  %8929 = vmatmul.bf16.gmra.mxu1 %v11158_v57  ;;  %v9129_v52 = vmax.f32 %v8891_v39, 0.0  ;;  %v11625_v57 = vld [vmem:[#allocation8 + $0xc90] sm:$0xf] }
 0x907   :  { %v16217_v46 = vadd.f32 %v8299_v18, %v7971_v13  ;;  %v16220_v20 = vadd.f32 %v8591_v19, %v16094_v45  ;;  %v12491_v45 = vld [vmem:[#allocation8 + $0x91c] sm:$0xf] }
 0x908   :  { %v11190_v53 = vor.u32 %v12491_v45, %v11187_v17 }
 0x909   :  { %8012 = vmatmul.bf16.gmra.mxu2 %v11594_v49  ;;  %8630 = vmatmul.bf16.gmra.mxu0 %v11346_v51  ;;  %v11626_v49 = vor.u32 %v12606_v11, %v11625_v57  ;;  %v11219_v57 = vld [vmem:[#allocation8 + $0x978] sm:$0xf0]  ;;  %v11657_v11 = vld [vmem:[#allocation8 + $0xcd0] sm:$0xf] }
 0x90b   :  { %8341 = vmatmul.bf16.gmra.mxu3 %v11598_v6  ;;  %v8892_v43 = vpop.f32.mrf.mxu1 }
 0x90c   :  { %v8893_v62 = vadd.f32 %v8892_v43, %v16129_v54  ;;  %v7973_v10 = vpop.f32.mrf.mxu2  ;;  %v11377_v54 = vld [vmem:[#allocation8 + $0xa98] sm:$0xf]  ;;  %v11630_v43 = vor.u32 %v12602_v61, %v11627_v15  ;;  %v11659_v15 = vld [vmem:[#allocation8 + $0xcf0] sm:$0xf0] }
 0x90d   :  { %v7974_v24 = vadd.f32 %v7973_v10, %v17100_v3  ;;  %v17102_v3 = vld [vmem:[#allocation104_spill] sm:$0xff] }
 0x90e   :  { %v9130_v4 = vmax.f32 %v8893_v62, 0.0  ;;  %v8302_v16 = vpop.f32.mrf.mxu3  ;;  %v8593_v28 = vpop.f32.mrf.mxu0 }
 0x90f   :  { %v16224_v33 = vadd.f32 %v8302_v16, %v7974_v24  ;;  %v16227_v9 = vadd.f32 %v8593_v28, %v16103_v29  ;;  %v11378_v29 = vor.u32 %v12543_v27, %v11377_v54  ;;  %v12614_v27 = vld [vmem:[#allocation8 + $0xcec] sm:$0xf0] }
 0x910   :  { %v16229_v2 = vpack.c.bf16 %v9130_v4, %v9129_v52 }
 0x913   :  { %v8895_v25 = vpop.f32.mrf.mxu1 }
 0x914   :  { %v8896_v39 = vadd.f32 %v8895_v25, %v16137_v48  ;;  %v7975_v23 = vpop.f32.mrf.mxu2  ;;  %v12551_v25 = vld [vmem:[#allocation8 + $0xaf4] sm:$0xf0] }
 0x915   :  { %v7976_v13 = vadd.f32 %v7975_v23, %v17101_v47  ;;  %v17103_v47 = vld [vmem:[#allocation105_spill] sm:$0xff] }
 0x916   :  { %v8304_v51 = vpop.f32.mrf.mxu3  ;;  %v8596_v18 = vpop.f32.mrf.mxu0  ;;  %8934 = vmatmul.bf16.gmra.mxu1 %v11190_v53  ;;  %v9131_v52 = vmax.f32 %v8896_v39, 0.0  ;;  %v12610_v39 = vld [vmem:[#allocation8 + $0xcd4] sm:$0xf] }
 0x917   :  { %v16233_v19 = vadd.f32 %v8304_v51, %v7976_v13  ;;  %v16236_v6 = vadd.f32 %v8596_v18, %v16110_v56  ;;  %v12499_v56 = vld [vmem:[#allocation8 + $0x95c] sm:$0xf] }
 0x918   :  { %v11222_v54 = vor.u32 %v12499_v56, %v11219_v57 }
 0x919   :  { %8017 = vmatmul.bf16.gmra.mxu2 %v11626_v49  ;;  %8635 = vmatmul.bf16.gmra.mxu0 %v11378_v29  ;;  %v11658_v49 = vor.u32 %v12614_v27, %v11657_v11  ;;  %v11251_v27 = vld [vmem:[#allocation8 + $0x9b8] sm:$0xf0] }
 0x91b   :  { %8346 = vmatmul.bf16.gmra.mxu3 %v11630_v43  ;;  %v8897_v48 = vpop.f32.mrf.mxu1 }
 0x91c   :  { %v8898_v62 = vadd.f32 %v8897_v48, %v16147_v63  ;;  %v7978_v10 = vpop.f32.mrf.mxu2  ;;  %v11409_v63 = vld [vmem:[#allocation8 + $0xad8] sm:$0xf]  ;;  %v11662_v48 = vor.u32 %v12610_v39, %v11659_v15 }
 0x91d   :  { %v7979_v24 = vadd.f32 %v7978_v10, %v17102_v3  ;;  %v11410_v29 = vor.u32 %v12551_v25, %v11409_v63 }
 0x91e   :  { %v9132_v4 = vmax.f32 %v8898_v62, 0.0  ;;  %v8307_v16 = vpop.f32.mrf.mxu3  ;;  %v8598_v28 = vpop.f32.mrf.mxu0 }
 0x91f   :  { %v16240_v45 = vadd.f32 %v8307_v16, %v7979_v24  ;;  %v16243_v17 = vadd.f32 %v8598_v28, %v16118_v44 }
 0x920   :  { %v16245_v53 = vpack.c.bf16 %v9132_v4, %v9131_v52  ;;  %v17104_v52 = vld [vmem:[#allocation106_spill] sm:$0xff] }
 0x923   :  { %v8900_v23 = vpop.f32.mrf.mxu1 }
 0x924   :  { %v7980_v61 = vpop.f32.mrf.mxu2  ;;  %v8901_v62 = vadd.f32 %v8900_v23, %v16153_v34  ;;  %v11689_v34 = vld [vmem:[#allocation8 + $0xd10] sm:$0xf] }
 0x925   :  { %v7981_v13 = vadd.f32 %v7980_v61, %v17103_v47  ;;  %v12622_v23 = vld [vmem:[#allocation8 + $0xd2c] sm:$0xf0]  ;;  %v12559_v61 = vld [vmem:[#allocation8 + $0xb34] sm:$0xf0]  ;;  %v12618_v47 = vld [vmem:[#allocation8 + $0xd14] sm:$0xf] }
 0x926   :  { %v8309_v51 = vpop.f32.mrf.mxu3  ;;  %v8601_v44 = vpop.f32.mrf.mxu0  ;;  %8939 = vmatmul.bf16.gmra.mxu1 %v11222_v54  ;;  %v9133_v16 = vmax.f32 %v8901_v62, 0.0  ;;  %v12507_v54 = vld [vmem:[#allocation8 + $0x99c] sm:$0xf] }
 0x927   :  { %v16248_v18 = vadd.f32 %v8309_v51, %v7981_v13  ;;  %v16251_v43 = vadd.f32 %v8601_v44, %v16126_v22  ;;  %v11254_v25 = vor.u32 %v12507_v54, %v11251_v27  ;;  %v11691_v13 = vld [vmem:[#allocation8 + $0xd30] sm:$0xf0]  ;;  %v11690_v51 = vor.u32 %v12622_v23, %v11689_v34 }
 0x929   :  { %8022 = vmatmul.bf16.gmra.mxu2 %v11658_v49  ;;  %8640 = vmatmul.bf16.gmra.mxu0 %v11410_v29  ;;  %v17105_v49 = vld [vmem:[#allocation107_spill] sm:$0xff] }
 0x92b   :  { %8351 = vmatmul.bf16.gmra.mxu3 %v11662_v48  ;;  %v8902_v10 = vpop.f32.mrf.mxu1 }
 0x92c   :  { %v8903_v3 = vadd.f32 %v8902_v10, %v16163_v21  ;;  %v7983_v24 = vpop.f32.mrf.mxu2  ;;  %v11441_v21 = vld [vmem:[#allocation8 + $0xb18] sm:$0xf] }
 0x92d   :  { %v7984_v4 = vadd.f32 %v7983_v24, %v17104_v52  ;;  %v11442_v44 = vor.u32 %v12559_v61, %v11441_v21  ;;  %v8577_v24 = vadd.f32 %v16167_v7, %v16047_v31  ;;  %v8579_v52 = vadd.f32 %v16174_v5, %v16057_v8  ;;  %v12515_v7 = vld [vmem:[#allocation8 + $0x9dc] sm:$0xf]  ;;  %v11721_v8 = vld [vmem:[#allocation8 + $0xd50] sm:$0xf] }
 0x92e   :  { %v9134_v28 = vmax.f32 %v8903_v3, 0.0  ;;  %v8312_v56 = vpop.f32.mrf.mxu3  ;;  %v8603_v57 = vpop.f32.mrf.mxu0  ;;  %v11694_v3 = vor.u32 %v12618_v47, %v11691_v13  ;;  %v11283_v21 = vld [vmem:[#allocation8 + $0x9f8] sm:$0xf0]  ;;  %v12567_v47 = vld [vmem:[#allocation8 + $0xb74] sm:$0xf0] }
 0x92f   :  { %v16256_v11 = vadd.f32 %v8312_v56, %v7984_v4  ;;  %v16259_v22 = vadd.f32 %v8603_v57, %v16134_v58  ;;  %v17106_v57 = vld [vmem:[#allocation108_spill] sm:$0xff]  ;;  %v11286_v5 = vor.u32 %v12515_v7, %v11283_v21 }
 0x930   :  { %v16261_v63 = vpack.c.bf16 %v9134_v28, %v9133_v16 }
 0x933   :  { %v8905_v39 = vpop.f32.mrf.mxu1 }
 0x934   :  { %v7985_v15 = vpop.f32.mrf.mxu2  ;;  %v8906_v4 = vadd.f32 %v8905_v39, %v8577_v24  ;;  %v12630_v39 = vld [vmem:[#allocation8 + $0xd6c] sm:$0xf0] }
 0x935   :  { %v7986_v29 = vadd.f32 %v7985_v15, %v17105_v49  ;;  %v11473_v15 = vld [vmem:[#allocation8 + $0xb58] sm:$0xf] }
 0x936   :  { %v8314_v48 = vpop.f32.mrf.mxu3  ;;  %v8606_v58 = vpop.f32.mrf.mxu0  ;;  %8944 = vmatmul.bf16.gmra.mxu1 %v11254_v25  ;;  %v9135_v27 = vmax.f32 %v8906_v4, 0.0 }
 0x937   :  { %v16264_v62 = vadd.f32 %v8314_v48, %v7986_v29  ;;  %v16267_v10 = vadd.f32 %v8606_v58, %v16144_v55  ;;  %v12626_v29 = vld [vmem:[#allocation8 + $0xd54] sm:$0xf]  ;;  %v11722_v58 = vor.u32 %v12630_v39, %v11721_v8  ;;  %v11315_v39 = vld [vmem:[#allocation8 + $0xa38] sm:$0xf0] }
 0x939   :  { %8027 = vmatmul.bf16.gmra.mxu2 %v11690_v51  ;;  %8645 = vmatmul.bf16.gmra.mxu0 %v11442_v44  ;;  %v11723_v51 = vld [vmem:[#allocation8 + $0xd70] sm:$0xf0] }
 0x93a   :  { %v17107_v44 = vld [vmem:[#allocation109_spill] sm:$0xff] }
 0x93b   :  { %8356 = vmatmul.bf16.gmra.mxu3 %v11694_v3  ;;  %v8907_v16 = vpop.f32.mrf.mxu1  ;;  %v11474_v3 = vor.u32 %v12567_v47, %v11473_v15  ;;  %v12638_v47 = vld [vmem:[#allocation8 + $0xdac] sm:$0xf0] }
 0x93c   :  { %v8908_v28 = vadd.f32 %v8907_v16, %v8579_v52  ;;  %v7988_v56 = vpop.f32.mrf.mxu2  ;;  %v11726_v16 = vor.u32 %v12626_v29, %v11723_v51 }
 0x93d   :  { %v7989_v54 = vadd.f32 %v7988_v56, %v17106_v57  ;;  %v8584_v56 = vadd.f32 %v16192_v35, %v16071_v42  ;;  %v11753_v42 = vld [vmem:[#allocation8 + $0xd90] sm:$0xf] }
 0x93e   :  { %v9136_v34 = vmax.f32 %v8908_v28, 0.0  ;;  %v8317_v55 = vpop.f32.mrf.mxu3  ;;  %v8608_v25 = vpop.f32.mrf.mxu0  ;;  %v8582_v28 = vadd.f32 %v16184_v59, %v16065_v37  ;;  %v12523_v59 = vld [vmem:[#allocation8 + $0xa1c] sm:$0xf] }
 0x93f   :  { %v16274_v23 = vadd.f32 %v8317_v55, %v7989_v54  ;;  %v16277_v31 = vadd.f32 %v8608_v25, %v16150_v14  ;;  %v17108_v55 = vld [vmem:[#allocation110_spill] sm:$0xff]  ;;  %v11318_v35 = vor.u32 %v12523_v59, %v11315_v39 }
 0x940   :  { %v9233_v61 = vpack.c.bf16 %v9136_v34, %v9135_v27  ;;  %v12531_v59 = vld [vmem:[#allocation8 + $0xa5c] sm:$0xf] }
 0x943   :  { %v8910_v13 = vpop.f32.mrf.mxu1 }
 0x944   :  { %v7990_v49 = vpop.f32.mrf.mxu2  ;;  %v8911_v57 = vadd.f32 %v8910_v13, %v8582_v28  ;;  %v11505_v13 = vld [vmem:[#allocation8 + $0xb98] sm:$0xf] }
 0x945   :  { %v7991_v48 = vadd.f32 %v7990_v49, %v17107_v44  ;;  %v12575_v49 = vld [vmem:[#allocation8 + $0xbb4] sm:$0xf0] }
 0x946   :  { %v8319_v24 = vpop.f32.mrf.mxu3  ;;  %v8611_v52 = vpop.f32.mrf.mxu0  ;;  %8949 = vmatmul.bf16.gmra.mxu1 %v11286_v5  ;;  %v9137_v7 = vmax.f32 %v8911_v57, 0.0 }
 0x947   :  { %v16280_v14 = vadd.f32 %v8319_v24, %v7991_v48  ;;  %v16283_v4 = vadd.f32 %v8611_v52, %v16160_v12  ;;  %v12634_v48 = vld [vmem:[#allocation8 + $0xd94] sm:$0xf]  ;;  %v11754_v52 = vor.u32 %v12638_v47, %v11753_v42  ;;  %v12646_v42 = vld [vmem:[#allocation8 + $0xdec] sm:$0xf0]  ;;  %v12583_v47 = vld [vmem:[#allocation8 + $0xbf4] sm:$0xf0] }
 0x949   :  { %8032 = vmatmul.bf16.gmra.mxu2 %v11722_v58  ;;  %8650 = vmatmul.bf16.gmra.mxu0 %v11474_v3  ;;  %v11755_v58 = vld [vmem:[#allocation8 + $0xdb0] sm:$0xf0]  ;;  %v17109_v3 = vld [vmem:[#allocation111_spill] sm:$0xff] }
 0x94b   :  { %8361 = vmatmul.bf16.gmra.mxu3 %v11726_v16  ;;  %v8912_v54 = vpop.f32.mrf.mxu1 }
 0x94c   :  { %v8913_v27 = vadd.f32 %v8912_v54, %v8584_v56  ;;  %v7993_v34 = vpop.f32.mrf.mxu2  ;;  %v11758_v54 = vor.u32 %v12634_v48, %v11755_v58 }
 0x94d   :  { %v7994_v25 = vadd.f32 %v7993_v34, %v17108_v55  ;;  %v17110_v55 = vld [vmem:[#allocation86_spill] sm:$0xff] }
 0x94e   :  { %v9138_v21 = vmax.f32 %v8913_v27, 0.0  ;;  %v8322_v12 = vpop.f32.mrf.mxu3  ;;  %v8613_v8 = vpop.f32.mrf.mxu0 }
 0x94f   :  { %v16290_v5 = vadd.f32 %v8322_v12, %v7994_v25  ;;  %v16293_v37 = vadd.f32 %v8613_v8, %v16169_v0  ;;  %v11506_v0 = vor.u32 %v12575_v49, %v11505_v13 }
 0x950   :  { %v9234_v15 = vpack.c.bf16 %v9138_v21, %v9137_v7 }
 0x952   :  { %9327 = vmatpush.bf16.msra.mxu3 %v9234_v15  ;;  %v11785_v15 = vld [vmem:[#allocation8 + $0xdd0] sm:$0xf] }
 0x953   :  { %v8915_v29 = vpop.f32.mrf.mxu1  ;;  %v11786_v48 = vor.u32 %v12646_v42, %v11785_v15 }
 0x954   :  { %v8916_v51 = vadd.f32 %v8915_v29, %v16204_v50  ;;  %v7995_v44 = vpop.f32.mrf.mxu2  ;;  %v12642_v29 = vld [vmem:[#allocation8 + $0xdd4] sm:$0xf] }
 0x955   :  { %v7996_v24 = vadd.f32 %v7995_v44, %v17109_v3  ;;  %v17111_v44 = vld [vmem:[#allocation74_spill] sm:$0xff] }
 0x956   :  { %v8324_v16 = vpop.f32.mrf.mxu3  ;;  %v8616_v28 = vpop.f32.mrf.mxu0  ;;  %8954 = vmatmul.bf16.gmra.mxu1 %v11318_v35  ;;  %9328 = vmatpush.bf16.msra.mxu3 %v9233_v61  ;;  %v9139_v7 = vmax.f32 %v8916_v51, 0.0  ;;  %v11537_v35 = vld [vmem:[#allocation8 + $0xbd8] sm:$0xf]  ;;  %v11787_v51 = vld [vmem:[#allocation8 + $0xdf0] sm:$0xf0] }
 0x957   :  { %v16297_v56 = vadd.f32 %v8324_v16, %v7996_v24  ;;  %v16300_v57 = vadd.f32 %v8616_v28, %v16177_v41  ;;  %v11538_v58 = vor.u32 %v12583_v47, %v11537_v35  ;;  %v12650_v35 = vld [vmem:[#allocation8 + $0xe14] sm:$0xf] }
 0x958   :  { %v17113_v47 = vld [vmem:[#allocation77_spill] sm:$0xff] }
 0x959   :  { %8037 = vmatmul.bf16.gmra.mxu2 %v11754_v52  ;;  %8655 = vmatmul.bf16.gmra.mxu0 %v11506_v0  ;;  %v11790_v0 = vor.u32 %v12642_v29, %v11787_v51 }
 0x95a   :  { %9329 = vmatpush.bf16.msra.mxu3 %v16261_v63  ;;  %v11347_v63 = vld [vmem:[#allocation8 + $0xa78] sm:$0xf0] }
 0x95b   :  { %8366 = vmatmul.bf16.gmra.mxu3 %v11758_v54  ;;  %v8917_v50 = vpop.f32.mrf.mxu1  ;;  %v17112_v54 = vld [vmem:[#allocation40_spill] sm:$0xff] }
 0x95c   :  { %v8918_v27 = vadd.f32 %v8917_v50, %v16211_v32  ;;  %v7998_v34 = vpop.f32.mrf.mxu2  ;;  %v11350_v32 = vor.u32 %v12531_v59, %v11347_v63  ;;  %v11569_v59 = vld [vmem:[#allocation8 + $0xc18] sm:$0xf] }
 0x95d   :  { %v7999_v25 = vadd.f32 %v7998_v34, %v17110_v55  ;;  %v12591_v63 = vld [vmem:[#allocation8 + $0xc34] sm:$0xf0] }
 0x95e   :  { %v9140_v21 = vmax.f32 %v8918_v27, 0.0  ;;  %v8327_v61 = vpop.f32.mrf.mxu3  ;;  %v8618_v12 = vpop.f32.mrf.mxu0  ;;  %9330 = vmatpush.bf16.msra.mxu3 %v16245_v53 }
 0x95f   :  { %v16306_v41 = vadd.f32 %v8327_v61, %v7999_v25  ;;  %v16309_v8 = vadd.f32 %v8618_v12, %v16187_v1  ;;  %v11817_v61 = vld [vmem:[#allocation8 + $0xe10] sm:$0xf] }
 0x960   :  { %v16311_v39 = vpack.c.bf16 %v9140_v21, %v9139_v7  ;;  %v12539_v7 = vld [vmem:[#allocation8 + $0xa9c] sm:$0xf]  ;;  %v12654_v12 = vld [vmem:[#allocation8 + $0xe2c] sm:$0xf0] }
 0x962   :  { %9331 = vmatpush.bf16.msra.mxu3 %v16229_v2 }
 0x963   :  { %v8920_v13 = vpop.f32.mrf.mxu1 }
 0x964   :  { %v8921_v49 = vadd.f32 %v8920_v13, %v16220_v20  ;;  %v8000_v53 = vpop.f32.mrf.mxu2 }
 0x965   :  { %v8001_v1 = vadd.f32 %v8000_v53, %v17111_v44 }
 0x966   :  { %v8329_v3 = vpop.f32.mrf.mxu3  ;;  %v8621_v24 = vpop.f32.mrf.mxu0  ;;  %8959 = vmatmul.bf16.gmra.mxu1 %v11350_v32  ;;  %9332 = vmatpush.bf16.msra.mxu3 %v16213_v38  ;;  %v9141_v27 = vmax.f32 %v8921_v49, 0.0  ;;  %v11818_v49 = vor.u32 %v12654_v12, %v11817_v61 }
 0x967   :  { %v16317_v2 = vadd.f32 %v8329_v3, %v8001_v1  ;;  %v16320_v52 = vadd.f32 %v8621_v24, %v16195_v36  ;;  %v17114_v3 = vld [vmem:[#allocation37_spill] sm:$0xff] }
 0x969   :  { %8042 = vmatmul.bf16.gmra.mxu2 %v11786_v48  ;;  %8660 = vmatmul.bf16.gmra.mxu0 %v11538_v58 }
 0x96a   :  { %9333 = vmatpush.bf16.msra.mxu3 %v16197_v40  ;;  %v11379_v40 = vld [vmem:[#allocation8 + $0xab8] sm:$0xf0] }
 0x96b   :  { %8371 = vmatmul.bf16.gmra.mxu3 %v11790_v0  ;;  %v8922_v20 = vpop.f32.mrf.mxu1 }
 0x96c   :  { %v8923_v16 = vadd.f32 %v8922_v20, %v16227_v9  ;;  %v8003_v28 = vpop.f32.mrf.mxu2  ;;  %v11382_v9 = vor.u32 %v12539_v7, %v11379_v40  ;;  %v12662_v7 = vld [vmem:[#allocation8 + $0xe6c] sm:$0xf0]  ;;  %v12599_v40 = vld [vmem:[#allocation8 + $0xc74] sm:$0xf0] }
 0x96d   :  { %v8004_v50 = vadd.f32 %v8003_v28, %v17112_v54 }
 0x96e   :  { %v9142_v34 = vmax.f32 %v8923_v16, 0.0  ;;  %v8332_v38 = vpop.f32.mrf.mxu3  ;;  %v8623_v55 = vpop.f32.mrf.mxu0  ;;  %9334 = vmatpush.bf16.msra.mxu3 %v16179_v30  ;;  %v11819_v30 = vld [vmem:[#allocation8 + $0xe30] sm:$0xf0] }
 0x96f   :  { %v16326_v36 = vadd.f32 %v8332_v38, %v8004_v50  ;;  %v16329_v25 = vadd.f32 %v8623_v55, %v16201_v26  ;;  %v11570_v26 = vor.u32 %v12591_v63, %v11569_v59  ;;  %v11822_v1 = vor.u32 %v12650_v35, %v11819_v30  ;;  %v11849_v38 = vld [vmem:[#allocation8 + $0xe50] sm:$0xf]  ;;  %v12658_v59 = vld [vmem:[#allocation8 + $0xe54] sm:$0xf] }
 0x970   :  { %v16331_v21 = vpack.c.bf16 %v9142_v34, %v9141_v27  ;;  %v11411_v27 = vld [vmem:[#allocation8 + $0xaf8] sm:$0xf0]  ;;  %v11851_v63 = vld [vmem:[#allocation8 + $0xe70] sm:$0xf0] }
 0x973   :  { %v8925_v15 = vpop.f32.mrf.mxu1 }
 0x974   :  { %v8926_v32 = vadd.f32 %v8925_v15, %v16236_v6  ;;  %v8005_v42 = vpop.f32.mrf.mxu2  ;;  %v17115_v15 = vld [vmem:[#allocation21_spill] sm:$0xff] }
 0x975   :  { %v8006_v13 = vadd.f32 %v8005_v42, %v17113_v47  ;;  %v11850_v42 = vor.u32 %v12662_v7, %v11849_v38  ;;  %v12607_v38 = vld [vmem:[#allocation8 + $0xcb4] sm:$0xf0] }
 0x976   :  { %v8334_v53 = vpop.f32.mrf.mxu3  ;;  %v8626_v29 = vpop.f32.mrf.mxu0  ;;  %8964 = vmatmul.bf16.gmra.mxu1 %v11382_v9  ;;  %v9143_v0 = vmax.f32 %v8926_v32, 0.0 }
 0x977   :  { %v16335_v51 = vadd.f32 %v8334_v53, %v8006_v13  ;;  %v16338_v44 = vadd.f32 %v8626_v29, %v16208_v60  ;;  %v12547_v60 = vld [vmem:[#allocation8 + $0xadc] sm:$0xf]  ;;  %v17116_v29 = vld [vmem:[#allocation33_spill] sm:$0xff] }
 0x978   :  { %v11414_v55 = vor.u32 %v12547_v60, %v11411_v27  ;;  %v12670_v27 = vld [vmem:[#allocation8 + $0xeac] sm:$0xf0] }
 0x979   :  { %8047 = vmatmul.bf16.gmra.mxu2 %v11818_v49  ;;  %8665 = vmatmul.bf16.gmra.mxu0 %v11570_v26  ;;  %v11854_v49 = vor.u32 %v12658_v59, %v11851_v63 }
 0x97b   :  { %8376 = vmatmul.bf16.gmra.mxu3 %v11822_v1  ;;  %v8927_v6 = vpop.f32.mrf.mxu1 }
 0x97c   :  { %v8928_v48 = vadd.f32 %v8927_v6, %v16243_v17  ;;  %v8008_v58 = vpop.f32.mrf.mxu2  ;;  %v11601_v17 = vld [vmem:[#allocation8 + $0xc58] sm:$0xf] }
 0x97d   :  { %v8009_v24 = vadd.f32 %v8008_v58, %v17114_v3 }
 0x97e   :  { %v9144_v20 = vmax.f32 %v8928_v48, 0.0  ;;  %v8337_v16 = vpop.f32.mrf.mxu3  ;;  %v8628_v28 = vpop.f32.mrf.mxu0 }
 0x97f   :  { %v16342_v54 = vadd.f32 %v8337_v16, %v8009_v24  ;;  %v16345_v50 = vadd.f32 %v8628_v28, %v16217_v46  ;;  %v11602_v46 = vor.u32 %v12599_v40, %v11601_v17  ;;  %v11881_v28 = vld [vmem:[#allocation8 + $0xe90] sm:$0xf]  ;;  %v12666_v40 = vld [vmem:[#allocation8 + $0xe94] sm:$0xf] }
 0x980   :  { %v16347_v34 = vpack.c.bf16 %v9144_v20, %v9143_v0  ;;  %v11443_v20 = vld [vmem:[#allocation8 + $0xb38] sm:$0xf0]  ;;  %v11882_v59 = vor.u32 %v12670_v27, %v11881_v28  ;;  %v12678_v28 = vld [vmem:[#allocation8 + $0xeec] sm:$0xf0] }
 0x983   :  { %v8930_v61 = vpop.f32.mrf.mxu1 }
 0x984   :  { %v8931_v9 = vadd.f32 %v8930_v61, %v16251_v43  ;;  %v8010_v12 = vpop.f32.mrf.mxu2  ;;  %v11883_v61 = vld [vmem:[#allocation8 + $0xeb0] sm:$0xf0] }
 0x985   :  { %v8011_v32 = vadd.f32 %v8010_v12, %v17115_v15 }
 0x986   :  { %v8339_v35 = vpop.f32.mrf.mxu3  ;;  %v8631_v30 = vpop.f32.mrf.mxu0  ;;  %8969 = vmatmul.bf16.gmra.mxu1 %v11414_v55  ;;  %v9145_v6 = vmax.f32 %v8931_v9, 0.0  ;;  %v17117_v9 = vld [vmem:[#allocation54_spill] sm:$0xff] }
 0x987   :  { %v16351_v47 = vadd.f32 %v8339_v35, %v8011_v32  ;;  %v16354_v13 = vadd.f32 %v8631_v30, %v16224_v33  ;;  %v12555_v33 = vld [vmem:[#allocation8 + $0xb1c] sm:$0xf] }
 0x988   :  { %v11446_v60 = vor.u32 %v12555_v33, %v11443_v20  ;;  %v11913_v33 = vld [vmem:[#allocation8 + $0xed0] sm:$0xf] }
 0x989   :  { %8052 = vmatmul.bf16.gmra.mxu2 %v11850_v42  ;;  %8670 = vmatmul.bf16.gmra.mxu0 %v11602_v46  ;;  %v11886_v46 = vor.u32 %v12666_v40, %v11883_v61  ;;  %v11914_v61 = vor.u32 %v12678_v28, %v11913_v33  ;;  %v12623_v28 = vld [vmem:[#allocation8 + $0xd34] sm:$0xf0] }
 0x98b   :  { %8381 = vmatmul.bf16.gmra.mxu3 %v11854_v49  ;;  %v8932_v43 = vpop.f32.mrf.mxu1  ;;  %v17118_v49 = vld [vmem:[#allocation45_spill] sm:$0xff] }
 0x98c   :  { %v8933_v26 = vadd.f32 %v8932_v43, %v16259_v22  ;;  %v8013_v53 = vpop.f32.mrf.mxu2  ;;  %v11633_v22 = vld [vmem:[#allocation8 + $0xc98] sm:$0xf] }
 0x98d   :  { %v8014_v1 = vadd.f32 %v8013_v53, %v17116_v29 }
 0x98e   :  { %v9146_v48 = vmax.f32 %v8933_v26, 0.0  ;;  %v8342_v58 = vpop.f32.mrf.mxu3  ;;  %v8633_v3 = vpop.f32.mrf.mxu0 }
 0x98f   :  { %v16358_v24 = vadd.f32 %v8342_v58, %v8014_v1  ;;  %v16361_v0 = vadd.f32 %v8633_v3, %v16233_v19  ;;  %v11634_v19 = vor.u32 %v12607_v38, %v11633_v22  ;;  %v11475_v58 = vld [vmem:[#allocation8 + $0xb78] sm:$0xf0] }
 0x990   :  { %v16363_v16 = vpack.c.bf16 %v9146_v48, %v9145_v6 }
 0x993   :  { %v8935_v55 = vpop.f32.mrf.mxu1 }
 0x994   :  { %v8936_v7 = vadd.f32 %v8935_v55, %v16267_v10  ;;  %v8015_v17 = vpop.f32.mrf.mxu2  ;;  %v12674_v55 = vld [vmem:[#allocation8 + $0xed4] sm:$0xf] }
 0x995   :  { %v8016_v12 = vadd.f32 %v8015_v17, %v17117_v9  ;;  %v17119_v17 = vld [vmem:[#allocation89_spill] sm:$0xff] }
 0x996   :  { %v8344_v63 = vpop.f32.mrf.mxu3  ;;  %v8636_v15 = vpop.f32.mrf.mxu0  ;;  %8974 = vmatmul.bf16.gmra.mxu1 %v11446_v60  ;;  %v9147_v26 = vmax.f32 %v8936_v7, 0.0  ;;  %v12615_v60 = vld [vmem:[#allocation8 + $0xcf4] sm:$0xf0]  ;;  %v11915_v7 = vld [vmem:[#allocation8 + $0xef0] sm:$0xf0] }
 0x997   :  { %v16367_v32 = vadd.f32 %v8344_v63, %v8016_v12  ;;  %v16370_v42 = vadd.f32 %v8636_v15, %v16240_v45  ;;  %v12563_v45 = vld [vmem:[#allocation8 + $0xb5c] sm:$0xf]  ;;  %v11918_v63 = vor.u32 %v12674_v55, %v11915_v7  ;;  %v17121_v55 = vld [vmem:[#allocation27_spill] sm:$0xff] }
 0x998   :  { %v11478_v20 = vor.u32 %v12563_v45, %v11475_v58  ;;  %v11945_v58 = vld [vmem:[#allocation8 + $0xf10] sm:$0xf] }
 0x999   :  { %8057 = vmatmul.bf16.gmra.mxu2 %v11882_v59  ;;  %8675 = vmatmul.bf16.gmra.mxu0 %v11634_v19 }
 0x99b   :  { %8386 = vmatmul.bf16.gmra.mxu3 %v11886_v46  ;;  %v8937_v10 = vpop.f32.mrf.mxu1 }
 0x99c   :  { %v8938_v35 = vadd.f32 %v8937_v10, %v16277_v31  ;;  %v8018_v30 = vpop.f32.mrf.mxu2  ;;  %v11665_v31 = vld [vmem:[#allocation8 + $0xcd8] sm:$0xf] }
 0x99d   :  { %v8019_v43 = vadd.f32 %v8018_v30, %v17118_v49  ;;  %v17120_v10 = vld [vmem:[#allocation22_spill] sm:$0xff] }
 0x99e   :  { %v9148_v53 = vmax.f32 %v8938_v35, 0.0  ;;  %v8347_v29 = vpop.f32.mrf.mxu3  ;;  %v8638_v1 = vpop.f32.mrf.mxu0 }
 0x99f   :  { %v16374_v6 = vadd.f32 %v8347_v29, %v8019_v43  ;;  %v16377_v48 = vadd.f32 %v8638_v1, %v16248_v18  ;;  %v11666_v18 = vor.u32 %v12615_v60, %v11665_v31  ;;  %v11507_v1 = vld [vmem:[#allocation8 + $0xbb8] sm:$0xf0] }
 0x9a0   :  { %v16379_v3 = vpack.c.bf16 %v9148_v53, %v9147_v26 }
 0x9a3   :  { %v8940_v27 = vpop.f32.mrf.mxu1 }
 0x9a4   :  { %v8941_v22 = vadd.f32 %v8940_v27, %v16283_v4  ;;  %v8020_v38 = vpop.f32.mrf.mxu2 }
 0x9a5   :  { %v8021_v40 = vadd.f32 %v8020_v38, %v17119_v17  ;;  %v11947_v38 = vld [vmem:[#allocation8 + $0xf30] sm:$0xf0] }
 0x9a6   :  { %v8349_v9 = vpop.f32.mrf.mxu3  ;;  %v8641_v12 = vpop.f32.mrf.mxu0  ;;  %8979 = vmatmul.bf16.gmra.mxu1 %v11478_v20  ;;  %v9149_v30 = vmax.f32 %v8941_v22, 0.0  ;;  %v12686_v20 = vld [vmem:[#allocation8 + $0xf2c] sm:$0xf0]  ;;  %v12682_v22 = vld [vmem:[#allocation8 + $0xf14] sm:$0xf] }
 0x9a7   :  { %v16383_v59 = vadd.f32 %v8349_v9, %v8021_v40  ;;  %v16386_v19 = vadd.f32 %v8641_v12, %v16256_v11  ;;  %v12571_v11 = vld [vmem:[#allocation8 + $0xb9c] sm:$0xf]  ;;  %v11946_v17 = vor.u32 %v12686_v20, %v11945_v58  ;;  %v11950_v12 = vor.u32 %v12682_v22, %v11947_v38  ;;  %v11977_v58 = vld [vmem:[#allocation8 + $0xf50] sm:$0xf] }
 0x9a8   :  { %v11510_v33 = vor.u32 %v12571_v11, %v11507_v1  ;;  %v11539_v11 = vld [vmem:[#allocation8 + $0xbf8] sm:$0xf0]  ;;  %v12694_v20 = vld [vmem:[#allocation8 + $0xf6c] sm:$0xf0] }
 0x9a9   :  { %8062 = vmatmul.bf16.gmra.mxu2 %v11914_v61  ;;  %8680 = vmatmul.bf16.gmra.mxu0 %v11666_v18  ;;  %v17123_v22 = vld [vmem:[#allocation66_spill] sm:$0xff] }
 0x9ab   :  { %8391 = vmatmul.bf16.gmra.mxu3 %v11918_v63  ;;  %v8942_v4 = vpop.f32.mrf.mxu1 }
 0x9ac   :  { %v8943_v15 = vadd.f32 %v8942_v4, %v16293_v37  ;;  %v8023_v46 = vpop.f32.mrf.mxu2  ;;  %v11697_v37 = vld [vmem:[#allocation8 + $0xd18] sm:$0xf] }
 0x9ad   :  { %v8024_v35 = vadd.f32 %v8023_v46, %v17120_v10 }
 0x9ae   :  { %v9150_v49 = vmax.f32 %v8943_v15, 0.0  ;;  %v8352_v43 = vpop.f32.mrf.mxu3  ;;  %v8643_v26 = vpop.f32.mrf.mxu0  ;;  %v17122_v15 = vld [vmem:[#allocation50_spill] sm:$0xff] }
 0x9af   :  { %v16390_v53 = vadd.f32 %v8352_v43, %v8024_v35  ;;  %v16393_v29 = vadd.f32 %v8643_v26, %v16264_v62  ;;  %v11698_v62 = vor.u32 %v12623_v28, %v11697_v37  ;;  %v12631_v37 = vld [vmem:[#allocation8 + $0xd74] sm:$0xf0] }
 0x9b0   :  { %v16395_v45 = vpack.c.bf16 %v9150_v49, %v9149_v30 }
 0x9b3   :  { %v8945_v31 = vpop.f32.mrf.mxu1 }
 0x9b4   :  { %v8946_v60 = vadd.f32 %v8945_v31, %v16300_v57  ;;  %v8025_v27 = vpop.f32.mrf.mxu2 }
 0x9b5   :  { %v8026_v7 = vadd.f32 %v8025_v27, %v17121_v55  ;;  %v11979_v27 = vld [vmem:[#allocation8 + $0xf70] sm:$0xf0]  ;;  %v11978_v55 = vor.u32 %v12694_v20, %v11977_v58  ;;  %v11761_v58 = vld [vmem:[#allocation8 + $0xd98] sm:$0xf]  ;;  %v9267_v20 = vld [vmem:[#allocation9] sm:$0xff] }
 0x9b6   :  { %v8354_v40 = vpop.f32.mrf.mxu3  ;;  %v8646_v61 = vpop.f32.mrf.mxu0  ;;  %8984 = vmatmul.bf16.gmra.mxu1 %v11510_v33  ;;  %v9151_v10 = vmax.f32 %v8946_v60, 0.0  ;;  %v12690_v60 = vld [vmem:[#allocation8 + $0xf54] sm:$0xf]  ;;  %9271 = vst [vmem:[#allocation1] ss:$9 sm:$0xff] %v9267_v20 }
 0x9b7   :  { %v16399_v18 = vadd.f32 %v8354_v40, %v8026_v7  ;;  %v16402_v9 = vadd.f32 %v8646_v61, %v16274_v23  ;;  %v12579_v23 = vld [vmem:[#allocation8 + $0xbdc] sm:$0xf]  ;;  %v11982_v40 = vor.u32 %v12690_v60, %v11979_v27  ;;  %v12043_v20 = vld [vmem:[#allocation8 + $0xff0] sm:$0xf0] }
 0x9b8   :  { %v11542_v33 = vor.u32 %v12579_v23, %v11539_v11  ;;  %v12009_v23 = vld [vmem:[#allocation8 + $0xf90] sm:$0xf] }
 0x9b9   :  { %8067 = vmatmul.bf16.gmra.mxu2 %v11946_v17  ;;  %8685 = vmatmul.bf16.gmra.mxu0 %v11698_v62  ;;  %v12702_v11 = vld [vmem:[#allocation8 + $0xfac] sm:$0xf0] }
 0x9bb   :  { %8396 = vmatmul.bf16.gmra.mxu3 %v11950_v12  ;;  %v8947_v57 = vpop.f32.mrf.mxu1 }
 0x9bc   :  { %v8948_v63 = vadd.f32 %v8947_v57, %v16309_v8  ;;  %v8028_v4 = vpop.f32.mrf.mxu2  ;;  %v11729_v8 = vld [vmem:[#allocation8 + $0xd58] sm:$0xf] }
 0x9bd   :  { %v8029_v46 = vadd.f32 %v8028_v4, %v17122_v15  ;;  %v11730_v7 = vor.u32 %v12631_v37, %v11729_v8 }
 0x9be   :  { %v9152_v35 = vmax.f32 %v8948_v63, 0.0  ;;  %v8357_v30 = vpop.f32.mrf.mxu3  ;;  %v8648_v49 = vpop.f32.mrf.mxu0 }
 0x9bf   :  { %v16406_v43 = vadd.f32 %v8357_v30, %v8029_v46  ;;  %v16409_v26 = vadd.f32 %v8648_v49, %v16280_v14  ;;  %v11571_v30 = vld [vmem:[#allocation8 + $0xc38] sm:$0xf0] }
 0x9c0   :  { %v16411_v1 = vpack.c.bf16 %v9152_v35, %v9151_v10 }
 0x9c3   :  { %v8950_v28 = vpop.f32.mrf.mxu1 }
 0x9c4   :  { %v8030_v31 = vpop.f32.mrf.mxu2  ;;  %v8951_v61 = vadd.f32 %v8950_v28, %v16320_v52  ;;  %v12698_v28 = vld [vmem:[#allocation8 + $0xf94] sm:$0xf] }
 0x9c5   :  { %v16414_v38 = vadd.f32 %v8030_v31, %v17123_v22  ;;  %v12011_v31 = vld [vmem:[#allocation8 + $0xfb0] sm:$0xf0] }
 0x9c6   :  { %v16416_v14 = vpop.f32.mrf.mxu3  ;;  %v8651_v17 = vpop.f32.mrf.mxu0  ;;  %8989 = vmatmul.bf16.gmra.mxu1 %v11542_v33  ;;  %v9153_v4 = vmax.f32 %v8951_v61, 0.0  ;;  %v12639_v33 = vld [vmem:[#allocation8 + $0xdb4] sm:$0xf0] }
 0x9c7   :  { %v16419_v62 = vadd.f32 %v8651_v17, %v16290_v5  ;;  %v12587_v5 = vld [vmem:[#allocation8 + $0xc1c] sm:$0xf]  ;;  %v11762_v60 = vor.u32 %v12639_v33, %v11761_v58 }
 0x9c8   :  { %v11574_v52 = vor.u32 %v12587_v5, %v11571_v30  ;;  %v12041_v5 = vld [vmem:[#allocation8 + $0xfd0] sm:$0xf] }
 0x9c9   :  { %8072 = vmatmul.bf16.gmra.mxu2 %v11978_v55  ;;  %8690 = vmatmul.bf16.gmra.mxu0 %v11730_v7  ;;  %v12014_v55 = vor.u32 %v12698_v28, %v12011_v31 }
 0x9cb   :  { %8401 = vmatmul.bf16.gmra.mxu3 %v11982_v40  ;;  %v8952_v12 = vpop.f32.mrf.mxu1 }
 0x9cc   :  { %v8953_v57 = vadd.f32 %v8952_v12, %v16329_v25  ;;  %v16423_v63 = vpop.f32.mrf.mxu2 }
 0x9ce   :  { %v9154_v15 = vmax.f32 %v8953_v57, 0.0  ;;  %v16425_v46 = vpop.f32.mrf.mxu3  ;;  %v8653_v10 = vpop.f32.mrf.mxu0 }
 0x9cf   :  { %v16428_v35 = vadd.f32 %v8653_v10, %v16297_v56  ;;  %v12010_v56 = vor.u32 %v12702_v11, %v12009_v23  ;;  %v12710_v23 = vld [vmem:[#allocation8 + $0xfec] sm:$0xf0]  ;;  %v12647_v11 = vld [vmem:[#allocation8 + $0xdf4] sm:$0xf0] }
 0x9d0   :  { %v16430_v49 = vpack.c.bf16 %v9154_v15, %v9153_v4  ;;  %v12595_v4 = vld [vmem:[#allocation8 + $0xc5c] sm:$0xf] }
 0x9d1   :  { %v11603_v15 = vld [vmem:[#allocation8 + $0xc78] sm:$0xf0] }
 0x9d2   :  { %v11606_v30 = vor.u32 %v12595_v4, %v11603_v15  ;;  %v12603_v15 = vld [vmem:[#allocation8 + $0xc9c] sm:$0xf] }
 0x9d3   :  { %v8955_v25 = vpop.f32.mrf.mxu1 }
 0x9d4   :  { %v8956_v8 = vadd.f32 %v8955_v25, %v16338_v44  ;;  %v16433_v37 = vpop.f32.mrf.mxu2  ;;  %v12706_v25 = vld [vmem:[#allocation8 + $0xfd4] sm:$0xf] }
 0x9d6   :  { %v16435_v27 = vpop.f32.mrf.mxu3  ;;  %v16437_v22 = vpop.f32.mrf.mxu0  ;;  %8994 = vmatmul.bf16.gmra.mxu1 %v11574_v52  ;;  %v9155_v40 = vmax.f32 %v8956_v8, 0.0  ;;  %v11793_v52 = vld [vmem:[#allocation8 + $0xdd8] sm:$0xf]  ;;  %v12042_v8 = vor.u32 %v12710_v23, %v12041_v5  ;;  %v11635_v5 = vld [vmem:[#allocation8 + $0xcb8] sm:$0xf0] }
 0x9d7   :  { %v11794_v28 = vor.u32 %v12647_v11, %v11793_v52  ;;  %v11825_v52 = vld [vmem:[#allocation8 + $0xe18] sm:$0xf] }
 0x9d8   :  { %v12655_v11 = vld [vmem:[#allocation8 + $0xe34] sm:$0xf0] }
 0x9d9   :  { %8077 = vmatmul.bf16.gmra.mxu2 %v12010_v56  ;;  %8695 = vmatmul.bf16.gmra.mxu0 %v11762_v60  ;;  %v12046_v60 = vor.u32 %v12706_v25, %v12043_v20 }
 0x9db   :  { %8406 = vmatmul.bf16.gmra.mxu3 %v12014_v55  ;;  %v8957_v7 = vpop.f32.mrf.mxu1 }
 0x9dc   :  { %v8958_v17 = vadd.f32 %v8957_v7, %v16345_v50  ;;  %v16440_v44 = vpop.f32.mrf.mxu2 }
 0x9de   :  { %v9156_v61 = vmax.f32 %v8958_v17, 0.0  ;;  %v16442_v12 = vpop.f32.mrf.mxu3  ;;  %v16444_v57 = vpop.f32.mrf.mxu0 }
 0x9e0   :  { %v16446_v10 = vpack.c.bf16 %v9156_v61, %v9155_v40 }
 0x9e3   :  { %v8960_v58 = vpop.f32.mrf.mxu1 }
 0x9e4   :  { %v8961_v50 = vadd.f32 %v8960_v58, %v16354_v13  ;;  %v16449_v33 = vpop.f32.mrf.mxu2 }
 0x9e6   :  { %v16451_v31 = vpop.f32.mrf.mxu3  ;;  %v16453_v56 = vpop.f32.mrf.mxu0  ;;  %8999 = vmatmul.bf16.gmra.mxu1 %v11606_v30  ;;  %v9157_v13 = vmax.f32 %v8961_v50, 0.0  ;;  %v11638_v30 = vor.u32 %v12603_v15, %v11635_v5 }
 0x9e9   :  { %8082 = vmatmul.bf16.gmra.mxu2 %v12042_v8  ;;  %8700 = vmatmul.bf16.gmra.mxu0 %v11794_v28  ;;  %v9272_v28 = vld [vmem:[#allocation1] sm:$0xff] }
 0x9eb   :  { %8411 = vmatmul.bf16.gmra.mxu3 %v12046_v60  ;;  %v8962_v55 = vpop.f32.mrf.mxu1 }
 0x9ec   :  { %v8963_v7 = vadd.f32 %v8962_v55, %v16361_v0  ;;  %v16456_v17 = vpop.f32.mrf.mxu2  ;;  %v11826_v0 = vor.u32 %v12655_v11, %v11825_v52 }
 0x9ee   :  { %v9158_v40 = vmax.f32 %v8963_v7, 0.0  ;;  %v16458_v61 = vpop.f32.mrf.mxu3  ;;  %v16460_v4 = vpop.f32.mrf.mxu0 }
 0x9f0   :  { %v16462_v23 = vpack.c.bf16 %v9158_v40, %v9157_v13 }
 0x9f3   :  { %v8965_v58 = vpop.f32.mrf.mxu1 }
 0x9f4   :  { %v8966_v25 = vadd.f32 %v8965_v58, %v16370_v42  ;;  %v16465_v20 = vpop.f32.mrf.mxu2  ;;  %v17124_v42 = vld [vmem:[#allocation31_spill] sm:$0xff]  ;;  %v12611_v58 = vld [vmem:[#allocation8 + $0xcdc] sm:$0xf] }
 0x9f6   :  { %v16467_v8 = vpop.f32.mrf.mxu3  ;;  %v8666_v50 = vpop.f32.mrf.mxu0  ;;  %9004 = vmatmul.bf16.gmra.mxu1 %v11638_v30  ;;  %v9159_v15 = vmax.f32 %v8966_v25, 0.0 }
 0x9f7   :  { %v16470_v60 = vadd.f32 %v8666_v50, %v16342_v54  ;;  %v11857_v50 = vld [vmem:[#allocation8 + $0xe58] sm:$0xf] }
 0x9f9   :  { %8705 = vmatmul.bf16.gmra.mxu0 %v11826_v0  ;;  %9296 = vmatmul.bf16.vlgmr.msrb.gmra.mxu2 %v9272_v28  ;;  %v11667_v0 = vld [vmem:[#allocation8 + $0xcf8] sm:$0xf0]  ;;  %v12663_v28 = vld [vmem:[#allocation8 + $0xe74] sm:$0xf0] }
 0x9fa   :  { %9340 = vmatpush.bf16.msrb.mxu2 %v16430_v49 }
 0x9fb   :  { %v8967_v55 = vpop.f32.mrf.mxu1 }
 0x9fc   :  { %v8968_v7 = vadd.f32 %v8967_v55, %v16377_v48  ;;  %v8048_v13 = vpop.f32.mrf.mxu2  ;;  %v11670_v48 = vor.u32 %v12611_v58, %v11667_v0 }
 0x9fd   :  { %v8049_v40 = vadd.f32 %v8048_v13, %v17124_v42  ;;  %v11858_v42 = vor.u32 %v12663_v28, %v11857_v50 }
 0x9fe   :  { %v9160_v5 = vmax.f32 %v8968_v7, 0.0  ;;  %9341 = vmatpush.bf16.msrb.mxu2 %v16411_v1  ;;  %v8377_v52 = vpop.f32.mrf.mxu3  ;;  %v8668_v30 = vpop.f32.mrf.mxu0  ;;  %v17125_v7 = vld [vmem:[#allocation70_spill] sm:$0xff] }
 0x9ff   :  { %v16476_v11 = vadd.f32 %v8377_v52, %v8049_v40  ;;  %v16479_v54 = vadd.f32 %v8668_v30, %v16351_v47  ;;  %v17126_v30 = vld [vmem:[#allocation91_spill] sm:$0xff] }
 0xa00   :  { %v16481_v49 = vpack.c.bf16 %v9160_v5, %v9159_v15 }
 0xa02   :  { %9342 = vmatpush.bf16.msrb.mxu2 %v16395_v45 }
 0xa03   :  { %v8970_v25 = vpop.f32.mrf.mxu1 }
 0xa04   :  { %v8971_v55 = vadd.f32 %v8970_v25, %v16386_v19  ;;  %v8050_v1 = vpop.f32.mrf.mxu2  ;;  %v12619_v25 = vld [vmem:[#allocation8 + $0xd1c] sm:$0xf] }
 0xa05   :  { %v8051_v13 = vadd.f32 %v8050_v1, %v17125_v7  ;;  %v11699_v1 = vld [vmem:[#allocation8 + $0xd38] sm:$0xf0]  ;;  %v11889_v7 = vld [vmem:[#allocation8 + $0xe98] sm:$0xf] }
 0xa06   :  { %9343 = vmatpush.bf16.msrb.mxu2 %v16379_v3  ;;  %v8379_v47 = vpop.f32.mrf.mxu3  ;;  %v8671_v40 = vpop.f32.mrf.mxu0  ;;  %9009 = vmatmul.bf16.gmra.mxu1 %v11670_v48  ;;  %v9161_v0 = vmax.f32 %v8971_v55, 0.0 }
 0xa07   :  { %v16487_v52 = vadd.f32 %v8379_v47, %v8051_v13  ;;  %v16490_v15 = vadd.f32 %v8671_v40, %v16358_v24  ;;  %v12671_v13 = vld [vmem:[#allocation8 + $0xeb4] sm:$0xf0]  ;;  %v17127_v47 = vld [vmem:[#allocation68_spill] sm:$0xff] }
 0xa09   :  { %8710 = vmatmul.bf16.gmra.mxu0 %v11858_v42 }
 0xa0a   :  { %9344 = vmatpush.bf16.msrb.mxu2 %v16363_v16 }
 0xa0b   :  { %v8972_v45 = vpop.f32.mrf.mxu1 }
 0xa0c   :  { %v8973_v19 = vadd.f32 %v8972_v45, %v16393_v29  ;;  %v8053_v5 = vpop.f32.mrf.mxu2  ;;  %v11702_v29 = vor.u32 %v12619_v25, %v11699_v1  ;;  %v11890_v45 = vor.u32 %v12671_v13, %v11889_v7  ;;  %v12627_v7 = vld [vmem:[#allocation8 + $0xd5c] sm:$0xf] }
 0xa0d   :  { %v8054_v58 = vadd.f32 %v8053_v5, %v17126_v30  ;;  %v11731_v13 = vld [vmem:[#allocation8 + $0xd78] sm:$0xf0] }
 0xa0e   :  { %v9162_v50 = vmax.f32 %v8973_v19, 0.0  ;;  %9345 = vmatpush.bf16.msrb.mxu2 %v16347_v34  ;;  %v8382_v3 = vpop.f32.mrf.mxu3  ;;  %v8673_v48 = vpop.f32.mrf.mxu0 }
 0xa0f   :  { %v16496_v28 = vadd.f32 %v8382_v3, %v8054_v58  ;;  %v16499_v24 = vadd.f32 %v8673_v48, %v16367_v32 }
 0xa10   :  { %v16501_v16 = vpack.c.bf16 %v9162_v50, %v9161_v0 }
 0xa12   :  { %9346 = vmatpush.bf16.msrb.mxu2 %v16331_v21 }
 0xa13   :  { %v8975_v55 = vpop.f32.mrf.mxu1 }
 0xa14   :  { %v8976_v42 = vadd.f32 %v8975_v55, %v16402_v9  ;;  %v8055_v34 = vpop.f32.mrf.mxu2  ;;  %v17128_v9 = vld [vmem:[#allocation65_spill] sm:$0xff]  ;;  %v11734_v55 = vor.u32 %v12627_v7, %v11731_v13 }
 0xa15   :  { %v8056_v40 = vadd.f32 %v8055_v34, %v17127_v47  ;;  %v11921_v34 = vld [vmem:[#allocation8 + $0xed8] sm:$0xf] }
 0xa16   :  { %9347 = vmatpush.bf16.msrb.mxu2 %v16311_v39  ;;  %v8384_v32 = vpop.f32.mrf.mxu3  ;;  %v8676_v19 = vpop.f32.mrf.mxu0  ;;  %9014 = vmatmul.bf16.gmra.mxu1 %v11702_v29  ;;  %v9163_v3 = vmax.f32 %v8976_v42, 0.0  ;;  %v12679_v47 = vld [vmem:[#allocation8 + $0xef4] sm:$0xf0] }
 0xa17   :  { %v16507_v5 = vadd.f32 %v8384_v32, %v8056_v40  ;;  %v16510_v30 = vadd.f32 %v8676_v19, %v16374_v6  ;;  %v11922_v42 = vor.u32 %v12679_v47, %v11921_v34 }
 0xa19   :  { %8715 = vmatmul.bf16.gmra.mxu0 %v11890_v45  ;;  %v17129_v45 = vld [vmem:[#allocation71_spill] sm:$0xff] }
 0xa1b   :  { %v8977_v21 = vpop.f32.mrf.mxu1 }
 0xa1c   :  { %v8978_v58 = vadd.f32 %v8977_v21, %v16409_v26  ;;  %v8058_v0 = vpop.f32.mrf.mxu2 }
 0xa1d   :  { %v8059_v50 = vadd.f32 %v8058_v0, %v17128_v9 }
 0xa1e   :  { %v9164_v48 = vmax.f32 %v8978_v58, 0.0  ;;  %v8387_v25 = vpop.f32.mrf.mxu3  ;;  %v8678_v1 = vpop.f32.mrf.mxu0 }
 0xa1f   :  { %v16514_v39 = vadd.f32 %v8387_v25, %v8059_v50  ;;  %v16517_v29 = vadd.f32 %v8678_v1, %v16383_v59 }
 0xa20   :  { %v16519_v6 = vpack.c.bf16 %v9164_v48, %v9163_v3  ;;  %v17130_v48 = vld [vmem:[#allocation69_spill] sm:$0xff] }
 0xa23   :  { %v8980_v26 = vpop.f32.mrf.mxu1 }
 0xa24   :  { %v8060_v40 = vpop.f32.mrf.mxu2  ;;  %v8981_v0 = vadd.f32 %v8980_v26, %v16419_v62  ;;  %v11953_v26 = vld [vmem:[#allocation8 + $0xf18] sm:$0xf] }
 0xa25   :  { %v8061_v32 = vadd.f32 %v8060_v40, %v17129_v45  ;;  %v11763_v40 = vld [vmem:[#allocation8 + $0xdb8] sm:$0xf0]  ;;  %v9273_v45 = vld [vmem:[#allocation1 + $0x9] sm:$0xff] }
 0xa26   :  { %v8389_v19 = vpop.f32.mrf.mxu3  ;;  %v8681_v21 = vpop.f32.mrf.mxu0  ;;  %9019 = vmatmul.bf16.gmra.mxu1 %v11734_v55  ;;  %v9165_v1 = vmax.f32 %v8981_v0, 0.0  ;;  %9309 = vmatmul.bf16.vlgmr.msrb.gmra.mxu3 %v9273_v45 }
 0xa27   :  { %v16522_v58 = vadd.f32 %v8389_v19, %v8061_v32  ;;  %v16525_v59 = vadd.f32 %v8681_v21, %v16390_v53  ;;  %v12635_v53 = vld [vmem:[#allocation8 + $0xd9c] sm:$0xf]  ;;  %v17131_v21 = vld [vmem:[#allocation81_spill] sm:$0xff] }
 0xa28   :  { %v11766_v62 = vor.u32 %v12635_v53, %v11763_v40  ;;  %v17132_v40 = vld [vmem:[#allocation46_spill] sm:$0xff] }
 0xa29   :  { %8720 = vmatmul.bf16.gmra.mxu0 %v11922_v42 }
 0xa2b   :  { %v8982_v9 = vpop.f32.mrf.mxu1 }
 0xa2c   :  { %v8983_v50 = vadd.f32 %v8982_v9, %v16428_v35  ;;  %v8063_v3 = vpop.f32.mrf.mxu2  ;;  %v12687_v35 = vld [vmem:[#allocation8 + $0xf34] sm:$0xf0] }
 0xa2d   :  { %v8064_v25 = vadd.f32 %v8063_v3, %v17130_v48  ;;  %v11954_v9 = vor.u32 %v12687_v35, %v11953_v26 }
 0xa2e   :  { %v9166_v7 = vmax.f32 %v8983_v50, 0.0  ;;  %v8392_v13 = vpop.f32.mrf.mxu3  ;;  %v8683_v34 = vpop.f32.mrf.mxu0 }
 0xa2f   :  { %v16530_v47 = vadd.f32 %v8392_v13, %v8064_v25  ;;  %v16533_v55 = vadd.f32 %v8683_v34, %v16399_v18  ;;  %v8657_v25 = vadd.f32 %v16437_v22, %v16306_v41 }
 0xa30   :  { %v9248_v32 = vpack.c.bf16 %v9166_v7, %v9165_v1  ;;  %v8659_v1 = vadd.f32 %v16444_v57, %v16317_v2 }
 0xa33   :  { %v8985_v42 = vpop.f32.mrf.mxu1 }
 0xa34   :  { %v8065_v19 = vpop.f32.mrf.mxu2  ;;  %v8986_v7 = vadd.f32 %v8985_v42, %v8657_v25  ;;  %v8664_v25 = vadd.f32 %v16460_v4, %v16335_v51 }
 0xa35   :  { %v8066_v0 = vadd.f32 %v8065_v19, %v17131_v21  ;;  %v12643_v21 = vld [vmem:[#allocation8 + $0xddc] sm:$0xf] }
 0xa36   :  { %v8394_v50 = vpop.f32.mrf.mxu3  ;;  %v8686_v3 = vpop.f32.mrf.mxu0  ;;  %9024 = vmatmul.bf16.gmra.mxu1 %v11766_v62  ;;  %v9167_v26 = vmax.f32 %v8986_v7, 0.0 }
 0xa37   :  { %v16536_v48 = vadd.f32 %v8394_v50, %v8066_v0  ;;  %v16539_v18 = vadd.f32 %v8686_v3, %v16406_v43  ;;  %v11795_v0 = vld [vmem:[#allocation8 + $0xdf8] sm:$0xf0]  ;;  %v12695_v50 = vld [vmem:[#allocation8 + $0xf74] sm:$0xf0]  ;;  %v8662_v3 = vadd.f32 %v16453_v56, %v16326_v36 }
 0xa38   :  { %v11798_v22 = vor.u32 %v12643_v21, %v11795_v0  ;;  %v12017_v21 = vld [vmem:[#allocation8 + $0xf98] sm:$0xf] }
 0xa39   :  { %8725 = vmatmul.bf16.gmra.mxu0 %v11954_v9  ;;  %v11985_v9 = vld [vmem:[#allocation8 + $0xf58] sm:$0xf] }
 0xa3a   :  { %v11986_v57 = vor.u32 %v12695_v50, %v11985_v9  ;;  %v12703_v0 = vld [vmem:[#allocation8 + $0xfb4] sm:$0xf0] }
 0xa3b   :  { %v8987_v13 = vpop.f32.mrf.mxu1  ;;  %v12018_v56 = vor.u32 %v12703_v0, %v12017_v21 }
 0xa3c   :  { %v8988_v34 = vadd.f32 %v8987_v13, %v8659_v1  ;;  %v8068_v53 = vpop.f32.mrf.mxu2 }
 0xa3d   :  { %v8069_v45 = vadd.f32 %v8068_v53, %v17132_v40 }
 0xa3e   :  { %v9168_v62 = vmax.f32 %v8988_v34, 0.0  ;;  %v8397_v35 = vpop.f32.mrf.mxu3  ;;  %v16546_v19 = vpop.f32.mrf.mxu0 }
 0xa3f   :  { %v16548_v43 = vadd.f32 %v8397_v35, %v8069_v45  ;;  %v12651_v45 = vld [vmem:[#allocation8 + $0xe1c] sm:$0xf] }
 0xa40   :  { %v9249_v41 = vpack.c.bf16 %v9168_v62, %v9167_v26  ;;  %v11827_v26 = vld [vmem:[#allocation8 + $0xe38] sm:$0xf0] }
 0xa41   :  { %v11830_v35 = vor.u32 %v12651_v45, %v11827_v26 }
 0xa43   :  { %v8990_v2 = vpop.f32.mrf.mxu1 }
 0xa44   :  { %v8991_v1 = vadd.f32 %v8990_v2, %v8662_v3  ;;  %v12659_v3 = vld [vmem:[#allocation8 + $0xe5c] sm:$0xf] }
 0xa46   :  { %v16550_v42 = vpop.f32.mrf.mxu0  ;;  %9029 = vmatmul.bf16.gmra.mxu1 %v11798_v22  ;;  %v9169_v34 = vmax.f32 %v8991_v1, 0.0 }
 0xa49   :  { %8730 = vmatmul.bf16.gmra.mxu0 %v11986_v57 }
 0xa4b   :  { %v8992_v7 = vpop.f32.mrf.mxu1 }
 0xa4c   :  { %v8993_v13 = vadd.f32 %v8992_v7, %v8664_v25  ;;  %v11859_v25 = vld [vmem:[#allocation8 + $0xe78] sm:$0xf0]  ;;  %v12049_v7 = vld [vmem:[#allocation8 + $0xfd8] sm:$0xf] }
 0xa4e   :  { %v9170_v53 = vmax.f32 %v8993_v13, 0.0  ;;  %v16556_v40 = vpop.f32.mrf.mxu0 }
 0xa50   :  { %v9250_v62 = vpack.c.bf16 %v9170_v53, %v9169_v34 }
 0xa52   :  { %9353 = vmatpush.bf16.msrb.mxu3 %v9250_v62  ;;  %v12667_v62 = vld [vmem:[#allocation8 + $0xe9c] sm:$0xf] }
 0xa53   :  { %v8995_v22 = vpop.f32.mrf.mxu1 }
 0xa54   :  { %v8996_v36 = vadd.f32 %v8995_v22, %v16470_v60  ;;  %v11862_v60 = vor.u32 %v12659_v3, %v11859_v25 }
 0xa56   :  { %v16559_v9 = vpop.f32.mrf.mxu0  ;;  %9034 = vmatmul.bf16.gmra.mxu1 %v11830_v35  ;;  %9354 = vmatpush.bf16.msrb.mxu3 %v9249_v41  ;;  %v9171_v50 = vmax.f32 %v8996_v36, 0.0  ;;  %v12711_v41 = vld [vmem:[#allocation8 + $0xff4] sm:$0xf0] }
 0xa57   :  { %v12050_v34 = vor.u32 %v12711_v41, %v12049_v7 }
 0xa59   :  { %8735 = vmatmul.bf16.gmra.mxu0 %v12018_v56 }
 0xa5a   :  { %9355 = vmatpush.bf16.msrb.mxu3 %v9248_v32 }
 0xa5b   :  { %v8997_v51 = vpop.f32.mrf.mxu1 }
 0xa5c   :  { %v8998_v4 = vadd.f32 %v8997_v51, %v16479_v54 }
 0xa5e   :  { %v9172_v2 = vmax.f32 %v8998_v4, 0.0  ;;  %v16562_v57 = vpop.f32.mrf.mxu0  ;;  %9356 = vmatpush.bf16.msrb.mxu3 %v16519_v6 }
 0xa60   :  { %v16565_v1 = vpack.c.bf16 %v9172_v2, %v9171_v50  ;;  %v12675_v50 = vld [vmem:[#allocation8 + $0xedc] sm:$0xf] }
 0xa61   :  { %v11923_v2 = vld [vmem:[#allocation8 + $0xef8] sm:$0xf0] }
 0xa62   :  { %9357 = vmatpush.bf16.msrb.mxu3 %v16501_v16  ;;  %v11926_v25 = vor.u32 %v12675_v50, %v11923_v2 }
 0xa63   :  { %v9000_v13 = vpop.f32.mrf.mxu1 }
 0xa64   :  { %v9001_v32 = vadd.f32 %v9000_v13, %v16490_v15  ;;  %v11891_v15 = vld [vmem:[#allocation8 + $0xeb8] sm:$0xf0] }
 0xa65   :  { %v11894_v21 = vor.u32 %v12667_v62, %v11891_v15 }
 0xa66   :  { %v16569_v54 = vpop.f32.mrf.mxu0  ;;  %9039 = vmatmul.bf16.gmra.mxu1 %v11862_v60  ;;  %9358 = vmatpush.bf16.msrb.mxu3 %v16481_v49  ;;  %v9173_v45 = vmax.f32 %v9001_v32, 0.0 }
 0xa69   :  { %8740 = vmatmul.bf16.gmra.mxu0 %v12050_v34 }
 0xa6a   :  { %9359 = vmatpush.bf16.msrb.mxu3 %v16462_v23 }
 0xa6b   :  { %v9002_v6 = vpop.f32.mrf.mxu1 }
 0xa6c   :  { %v9003_v53 = vadd.f32 %v9002_v6, %v16499_v24  ;;  %v12683_v6 = vld [vmem:[#allocation8 + $0xf1c] sm:$0xf] }
 0xa6e   :  { %v9174_v16 = vmax.f32 %v9003_v53, 0.0  ;;  %v16574_v26 = vpop.f32.mrf.mxu0  ;;  %9360 = vmatpush.bf16.msrb.mxu3 %v16446_v10  ;;  %v11955_v53 = vld [vmem:[#allocation8 + $0xf38] sm:$0xf0] }
 0xa70   :  { %v16577_v35 = vpack.c.bf16 %v9174_v16, %v9173_v45  ;;  %v11958_v16 = vor.u32 %v12683_v6, %v11955_v53  ;;  %v12019_v6 = vld [vmem:[#allocation8 + $0xfb8] sm:$0xf0] }
 0xa73   :  { %v9005_v0 = vpop.f32.mrf.mxu1 }
 0xa74   :  { %v9006_v49 = vadd.f32 %v9005_v0, %v16510_v30 }
 0xa76   :  { %v8706_v22 = vpop.f32.mrf.mxu0  ;;  %9044 = vmatmul.bf16.gmra.mxu1 %v11894_v21  ;;  %v9175_v56 = vmax.f32 %v9006_v49, 0.0 }
 0xa77   :  { %v16581_v23 = vadd.f32 %v8706_v22, %v16476_v11 }
 0xa7b   :  { %v9007_v24 = vpop.f32.mrf.mxu1 }
 0xa7c   :  { %v9008_v36 = vadd.f32 %v9007_v24, %v16517_v29 }
 0xa7e   :  { %v9176_v51 = vmax.f32 %v9008_v36, 0.0  ;;  %v8708_v4 = vpop.f32.mrf.mxu0 }
 0xa7f   :  { %v16585_v10 = vadd.f32 %v8708_v4, %v16487_v52  ;;  %v17133_v4 = vld [vmem:[#allocation79_spill] sm:$0xff] }
 0xa80   :  { %v16587_v3 = vpack.c.bf16 %v9176_v51, %v9175_v56  ;;  %v12691_v56 = vld [vmem:[#allocation8 + $0xf5c] sm:$0xf] }
 0xa83   :  { %v9010_v30 = vpop.f32.mrf.mxu1 }
 0xa84   :  { %v9011_v60 = vadd.f32 %v9010_v30, %v16525_v59 }
 0xa86   :  { %v8711_v7 = vpop.f32.mrf.mxu0  ;;  %9049 = vmatmul.bf16.gmra.mxu1 %v11926_v25  ;;  %v9177_v13 = vmax.f32 %v9011_v60, 0.0 }
 0xa87   :  { %v16591_v11 = vadd.f32 %v8711_v7, %v16496_v28 }
 0xa8b   :  { %v9012_v29 = vpop.f32.mrf.mxu1 }
 0xa8c   :  { %v9013_v41 = vadd.f32 %v9012_v29, %v16533_v55  ;;  %v8360_v55 = vadd.f32 %v16416_v14, %v16414_v38  ;;  %v17134_v38 = vld [vmem:[#allocation75_spill] sm:$0xff] }
 0xa8d   :  { %v8036_v14 = vadd.f32 %v16433_v37, %v17134_v38 }
 0xa8e   :  { %v9178_v32 = vmax.f32 %v9013_v41, 0.0  ;;  %v8713_v52 = vpop.f32.mrf.mxu0  ;;  %v8689_v21 = vadd.f32 %v16546_v19, %v8360_v55 }
 0xa8f   :  { %v16595_v34 = vadd.f32 %v8713_v52, %v16507_v5 }
 0xa90   :  { %v16597_v45 = vpack.c.bf16 %v9178_v32, %v9177_v13 }
 0xa93   :  { %v9015_v59 = vpop.f32.mrf.mxu1 }
 0xa94   :  { %v9016_v62 = vadd.f32 %v9015_v59, %v16539_v18  ;;  %v11987_v18 = vld [vmem:[#allocation8 + $0xf78] sm:$0xf0] }
 0xa95   :  { %v11990_v50 = vor.u32 %v12691_v56, %v11987_v18  ;;  %v12707_v18 = vld [vmem:[#allocation8 + $0xfdc] sm:$0xf] }
 0xa96   :  { %v8716_v15 = vpop.f32.mrf.mxu0  ;;  %9054 = vmatmul.bf16.gmra.mxu1 %v11958_v16  ;;  %v9179_v49 = vmax.f32 %v9016_v62, 0.0  ;;  %v17135_v16 = vld [vmem:[#allocation85_spill] sm:$0xff] }
 0xa97   :  { %v16601_v28 = vadd.f32 %v8716_v15, %v16514_v39  ;;  %v8034_v39 = vadd.f32 %v16423_v63, %v17133_v4 }
 0xa99   :  { %v8363_v19 = vadd.f32 %v16425_v46, %v8034_v39  ;;  %v12699_v46 = vld [vmem:[#allocation8 + $0xf9c] sm:$0xf] }
 0xa9b   :  { %v9017_v5 = vpop.f32.mrf.mxu1  ;;  %v8692_v60 = vadd.f32 %v16550_v42, %v8363_v19  ;;  %v12022_v42 = vor.u32 %v12699_v46, %v12019_v6 }
 0xa9c   :  { %v9018_v0 = vadd.f32 %v9017_v5, %v8689_v21 }
 0xa9e   :  { %v9180_v22 = vmax.f32 %v9018_v0, 0.0  ;;  %v8718_v24 = vpop.f32.mrf.mxu0 }
 0xa9f   :  { %v16607_v36 = vadd.f32 %v8718_v24, %v16522_v58  ;;  %v8365_v58 = vadd.f32 %v16435_v27, %v8036_v14  ;;  %v8039_v27 = vadd.f32 %v16440_v44, %v17135_v16 }
 0xaa0   :  { %v16609_v51 = vpack.c.bf16 %v9180_v22, %v9179_v49 }
 0xaa1   :  { %v8694_v7 = vadd.f32 %v16556_v40, %v8365_v58  ;;  %v17136_v40 = vld [vmem:[#allocation58_spill] sm:$0xff]  ;;  %v8368_v15 = vadd.f32 %v16442_v12, %v8039_v27  ;;  %v8399_v27 = vpop.f32.mrf.mxu3 }
 0xaa2   :  { %v8041_v62 = vadd.f32 %v16449_v33, %v17136_v40  ;;  %v12051_v33 = vld [vmem:[#allocation8 + $0xff8] sm:$0xf0] }
 0xaa3   :  { %v9020_v2 = vpop.f32.mrf.mxu1  ;;  %v8697_v5 = vadd.f32 %v16559_v9, %v8368_v15  ;;  %v17137_v12 = vld [vmem:[#allocation38_spill] sm:$0xff] }
 0xaa4   :  { %v9021_v29 = vadd.f32 %v9020_v2, %v8692_v60  ;;  %v8370_v21 = vadd.f32 %v16451_v31, %v8041_v62  ;;  %v8044_v39 = vadd.f32 %v16456_v17, %v17137_v12  ;;  %v17138_v2 = vld [vmem:[#allocation64_spill] sm:$0xff] }
 0xaa5   :  { %v8046_v31 = vadd.f32 %v16465_v20, %v17138_v2  ;;  %v9278_v2 = vld [vmem:[#allocation1 + $0x36] sm:$0xff] }
 0xaa6   :  { %v8721_v25 = vpop.f32.mrf.mxu0  ;;  %9059 = vmatmul.bf16.gmra.mxu1 %v11990_v50  ;;  %v9181_v13 = vmax.f32 %v9021_v29, 0.0  ;;  %v8699_v0 = vadd.f32 %v16562_v57, %v8370_v21  ;;  %v12054_v50 = vor.u32 %v12707_v18, %v12051_v33  ;;  %v8373_v9 = vadd.f32 %v16458_v61, %v8044_v39 }
 0xaa7   :  { %v16617_v30 = vadd.f32 %v8721_v25, %v16530_v47  ;;  %v9274_v47 = vld [vmem:[#allocation1 + $0x12] sm:$0xff]  ;;  %v8375_v57 = vadd.f32 %v16467_v8, %v8046_v31  ;;  %v17140_v31 = vld [vmem:[#allocation90_spill] sm:$0xff] }
 0xaa8   :  { %9322 = vmatmul.bf16.vlgmr.msra.gmra.mxu2 %v9274_v47  ;;  %v8702_v38 = vadd.f32 %v16569_v54, %v8373_v9 }
 0xaa9   :  { %v8704_v14 = vadd.f32 %v16574_v26, %v8375_v57  ;;  %v8402_v21 = vpop.f32.mrf.mxu3 }
 0xaab   :  { %v9022_v63 = vpop.f32.mrf.mxu1 }
 0xaac   :  { %v9023_v41 = vadd.f32 %v9022_v63, %v8694_v7 }
 0xaae   :  { %v9182_v32 = vmax.f32 %v9023_v41, 0.0  ;;  %v8723_v52 = vpop.f32.mrf.mxu0 }
 0xaaf   :  { %v16623_v37 = vadd.f32 %v8723_v52, %v16536_v48 }
 0xab0   :  { %v9256_v53 = vpack.c.bf16 %v9182_v32, %v9181_v13 }
 0xab1   :  { %v8404_v33 = vpop.f32.mrf.mxu3 }
 0xab3   :  { %v9025_v59 = vpop.f32.mrf.mxu1 }
 0xab4   :  { %v9026_v49 = vadd.f32 %v9025_v59, %v8697_v5 }
 0xab6   :  { %v8726_v55 = vpop.f32.mrf.mxu0  ;;  %9064 = vmatmul.bf16.gmra.mxu1 %v12022_v42  ;;  %v9183_v24 = vmax.f32 %v9026_v49, 0.0 }
 0xab7   :  { %v16631_v48 = vadd.f32 %v8726_v55, %v16548_v43 }
 0xabb   :  { %v9027_v44 = vpop.f32.mrf.mxu1 }
 0xabc   :  { %v9028_v22 = vadd.f32 %v9027_v44, %v8699_v0  ;;  %v17139_v0 = vld [vmem:[#allocation35_spill] sm:$0xff] }
 0xabe   :  { %v9184_v56 = vmax.f32 %v9028_v22, 0.0  ;;  %v8728_v42 = vpop.f32.mrf.mxu0 }
 0xac0   :  { %v9257_v4 = vpack.c.bf16 %v9184_v56, %v9183_v24 }
 0xac3   :  { %v9030_v43 = vpop.f32.mrf.mxu1 }
 0xac4   :  { %v9031_v19 = vadd.f32 %v9030_v43, %v8702_v38  ;;  %v17141_v38 = vld [vmem:[#allocation60_spill] sm:$0xff] }
 0xac6   :  { %9069 = vmatmul.bf16.gmra.mxu1 %v12054_v50  ;;  %v9185_v60 = vmax.f32 %v9031_v19, 0.0  ;;  %v8731_v44 = vpop.f32.mrf.mxu0  ;;  %v9277_v50 = vld [vmem:[#allocation1 + $0x2d] sm:$0xff] }
 0xacb   :  { %v9032_v25 = vpop.f32.mrf.mxu1 }
 0xacc   :  { %v9033_v58 = vadd.f32 %v9032_v25, %v8704_v14  ;;  %v8407_v25 = vpop.f32.mrf.mxu3 }
 0xace   :  { %v9186_v7 = vmax.f32 %v9033_v58, 0.0  ;;  %v8733_v39 = vpop.f32.mrf.mxu0 }
 0xad0   :  { %v9258_v17 = vpack.c.bf16 %v9186_v7, %v9185_v60 }
 0xad2   :  { %9366 = vmatpush.bf16.msra.mxu2 %v9258_v17 }
 0xad3   :  { %v9035_v29 = vpop.f32.mrf.mxu1 }
 0xad4   :  { %v9036_v63 = vadd.f32 %v9035_v29, %v16581_v23 }
 0xad6   :  { %9367 = vmatpush.bf16.msra.mxu2 %v9257_v4  ;;  %v9187_v8 = vmax.f32 %v9036_v63, 0.0  ;;  %v8736_v7 = vpop.f32.mrf.mxu0 }
 0xada   :  { %9368 = vmatpush.bf16.msra.mxu2 %v9256_v53 }
 0xadb   :  { %v9037_v61 = vpop.f32.mrf.mxu1 }
 0xadc   :  { %v9038_v20 = vadd.f32 %v9037_v61, %v16585_v10 }
 0xade   :  { %v9188_v41 = vmax.f32 %v9038_v20, 0.0  ;;  %9369 = vmatpush.bf16.msra.mxu2 %v16609_v51 }
 0xae0   :  { %v16647_v54 = vpack.c.bf16 %v9188_v41, %v9187_v8 }
 0xae2   :  { %9370 = vmatpush.bf16.msra.mxu2 %v16597_v45 }
 0xae3   :  { %v9040_v26 = vpop.f32.mrf.mxu1 }
 0xae4   :  { %v9041_v13 = vadd.f32 %v9040_v26, %v16591_v11 }
 0xae6   :  { %9371 = vmatpush.bf16.msra.mxu2 %v16587_v3  ;;  %v9189_v52 = vmax.f32 %v9041_v13, 0.0  ;;  %v8409_v13 = vpop.f32.mrf.mxu3 }
 0xaea   :  { %9372 = vmatpush.bf16.msra.mxu2 %v16577_v35 }
 0xaeb   :  { %v9042_v23 = vpop.f32.mrf.mxu1 }
 0xaec   :  { %v9043_v32 = vadd.f32 %v9042_v23, %v16595_v34  ;;  %v8070_v34 = vpop.f32.mrf.mxu2  ;;  %v17142_v23 = vld [vmem:[#allocation97_spill] sm:$0xff] }
 0xaed   :  { %v8071_v49 = vadd.f32 %v8070_v34, %v17139_v0 }
 0xaee   :  { %v9190_v10 = vmax.f32 %v9043_v32, 0.0  ;;  %9373 = vmatpush.bf16.msra.mxu2 %v16565_v1  ;;  %v8412_v34 = vpop.f32.mrf.mxu3 }
 0xaef   :  { %v8400_v22 = vadd.f32 %v8399_v27, %v8071_v49 }
 0xaf0   :  { %v16655_v46 = vpack.c.bf16 %v9190_v10, %v9189_v52  ;;  %v8738_v52 = vpop.f32.mrf.mxu0 }
 0xaf1   :  { %v8729_v56 = vadd.f32 %v8728_v42, %v8400_v22 }
 0xaf3   :  { %v9045_v51 = vpop.f32.mrf.mxu1 }
 0xaf4   :  { %v9046_v6 = vadd.f32 %v9045_v51, %v16601_v28  ;;  %v8073_v15 = vpop.f32.mrf.mxu2  ;;  %v9275_v28 = vld [vmem:[#allocation1 + $0x1b] sm:$0xff]  ;;  %v17143_v51 = vld [vmem:[#allocation56_spill] sm:$0xff] }
 0xaf5   :  { %9335 = vmatmul.bf16.vlgmr.msra.gmra.mxu3 %v9275_v28  ;;  %v8074_v9 = vadd.f32 %v8073_v15, %v17140_v31  ;;  %v17144_v28 = vld [vmem:[#allocation61_spill] sm:$0xff] }
 0xaf6   :  { %v9191_v11 = vmax.f32 %v9046_v6, 0.0  ;;  %v8414_v49 = vpop.f32.mrf.mxu3 }
 0xaf7   :  { %v8403_v19 = vadd.f32 %v8402_v21, %v8074_v9 }
 0xaf9   :  { %v8732_v60 = vadd.f32 %v8731_v44, %v8403_v19 }
 0xafb   :  { %v9047_v45 = vpop.f32.mrf.mxu1 }
 0xafc   :  { %v9048_v53 = vadd.f32 %v9047_v45, %v16607_v36  ;;  %v9276_v36 = vld [vmem:[#allocation1 + $0x24] sm:$0xff]  ;;  %v8075_v24 = vpop.f32.mrf.mxu2 }
 0xafd   :  { %9348 = vmatmul.bf16.vlgmr.msrb.gmra.mxu2 %v9276_v36  ;;  %v8076_v14 = vadd.f32 %v8075_v24, %v17141_v38 }
 0xafe   :  { %v9192_v47 = vmax.f32 %v9048_v53, 0.0  ;;  %v9310_v31 = vpop.f32.mrf.mxu3 }
 0xaff   :  { %v8405_v58 = vadd.f32 %v8404_v33, %v8076_v14 }
 0xb00   :  { %v16659_v3 = vpack.c.bf16 %v9192_v47, %v9191_v11 }
 0xb01   :  { %v8734_v17 = vadd.f32 %v8733_v39, %v8405_v58  ;;  %v9279_v58 = vld [vmem:[#allocation1 + $0x3f] sm:$0xff] }
 0xb03   :  { %v9050_v35 = vpop.f32.mrf.mxu1 }
 0xb04   :  { %v9051_v16 = vadd.f32 %v9050_v35, %v16617_v30  ;;  %v8078_v57 = vpop.f32.mrf.mxu2 }
 0xb05   :  { %9361 = vmatmul.bf16.vlgmr.msrb.gmra.mxu3 %v9277_v50  ;;  %v8079_v32 = vadd.f32 %v8078_v57, %v17142_v23  ;;  %v9269_v50 = vstv %s16692_s6  ;;  %s12886_s6 = smov [#allocation11]  }
 0xb06   :  { %v9193_v40 = vmax.f32 %v9051_v16, 0.0  ;;  %v9312_v38 = vpop.f32.mrf.mxu3  ;;  %s9417_s16 = sshll.u32 %s12886_s6, 4  ;;  %s9418_s16 = int_to_ptr.vmem [resolvable:$true] %s9417_s16 }
 0xb07   :  { %v8408_v45 = vadd.f32 %v8407_v25, %v8079_v32 }
 0xb09   :  { %v8737_v47 = vadd.f32 %v8736_v7, %v8408_v45 }
 0xb0b   :  { %v9052_v59 = vpop.f32.mrf.mxu1 }
 0xb0c   :  { %v9053_v1 = vadd.f32 %v9052_v59, %v16623_v37  ;;  %v8080_v20 = vpop.f32.mrf.mxu2  ;;  %v8741_v59 = vpop.f32.mrf.mxu0 }
 0xb0d   :  { %9374 = vmatmul.bf16.vlgmr.msra.gmra.mxu2 %v9278_v2  ;;  %v8081_v6 = vadd.f32 %v8080_v20, %v17143_v51 }
 0xb0e   :  { %v9194_v62 = vmax.f32 %v9053_v1, 0.0 }
 0xb0f   :  { %v8410_v11 = vadd.f32 %v8409_v13, %v8081_v6 }
 0xb10   :  { %v16663_v55 = vpack.c.bf16 %v9194_v62, %v9193_v40 }
 0xb11   :  { %v8739_v35 = vadd.f32 %v8738_v52, %v8410_v11 }
 0xb13   :  { %v9055_v5 = vpop.f32.mrf.mxu1 }
 0xb14   :  { %v9056_v30 = vadd.f32 %v9055_v5, %v16631_v48  ;;  %v8083_v53 = vpop.f32.mrf.mxu2  ;;  %v17145_v5 = vld [vmem:[#allocation57_spill] sm:$0xff]  ;;  %v8743_v44 = vpop.f32.mrf.mxu0 }
 0xb15   :  { %v8084_v36 = vadd.f32 %v8083_v53, %v17144_v28 }
 0xb16   :  { %v9195_v4 = vmax.f32 %v9056_v30, 0.0 }
 0xb17   :  { %v8413_v30 = vadd.f32 %v8412_v34, %v8084_v36 }
 0xb19   :  { %v8742_v24 = vadd.f32 %v8741_v59, %v8413_v30 }
 0xb1b   :  { %v9057_v37 = vpop.f32.mrf.mxu1 }
 0xb1c   :  { %v9058_v18 = vadd.f32 %v9057_v37, %v8729_v56  ;;  %v8085_v15 = vpop.f32.mrf.mxu2 }
 0xb1d   :  { %v8086_v0 = vadd.f32 %v8085_v15, %v17145_v5 }
 0xb1e   :  { %v9196_v12 = vmax.f32 %v9058_v18, 0.0 }
 0xb1f   :  { %v8415_v22 = vadd.f32 %v8414_v49, %v8086_v0 }
 0xb20   :  { %v16667_v43 = vpack.c.bf16 %v9196_v12, %v9195_v4 }
 0xb21   :  { %v8744_v56 = vadd.f32 %v8743_v44, %v8415_v22 }
 0xb23   :  { %v9060_v48 = vpop.f32.mrf.mxu1 }
 0xb24   :  { %v9061_v29 = vadd.f32 %v9060_v48, %v8732_v60  ;;  %v9297_v2 = vpop.f32.mrf.mxu2 }
 0xb25   :  { %v9298_v9 = vadd.f32 %v9297_v2, %v9269_v50 }
 0xb26   :  { %v9197_v8 = vmax.f32 %v9061_v29, 0.0 }
 0xb27   :  { %v9311_v57 = vadd.f32 %v9310_v31, %v9298_v9 }
 0xb2b   :  { %v9062_v63 = vpop.f32.mrf.mxu1 }
 0xb2c   :  { %v9063_v61 = vadd.f32 %v9062_v63, %v8734_v17  ;;  %v9299_v48 = vpop.f32.mrf.mxu2 }
 0xb2e   :  { %v9198_v41 = vmax.f32 %v9063_v61, 0.0 }
 0xb30   :  { %v9264_v26 = vpack.c.bf16 %v9198_v41, %v9197_v8 }
 0xb33   :  { %v9065_v10 = vpop.f32.mrf.mxu1 }
 0xb34   :  { %v9066_v16 = vadd.f32 %v9065_v10, %v8737_v47  ;;  %v9323_v14 = vpop.f32.mrf.mxu2 }
 0xb35   :  { %v9324_v19 = vadd.f32 %v9323_v14, %v9311_v57 }
 0xb36   :  { %v9199_v1 = vmax.f32 %v9066_v16, 0.0 }
 0xb3b   :  { %v9067_v27 = vpop.f32.mrf.mxu1 }
 0xb3c   :  { %v9068_v42 = vadd.f32 %v9067_v27, %v8739_v35  ;;  %v9325_v25 = vpop.f32.mrf.mxu2 }
 0xb3e   :  { %v9200_v40 = vmax.f32 %v9068_v42, 0.0 }
 0xb40   :  { %v9265_v62 = vpack.c.bf16 %v9200_v40, %v9199_v1 }
 0xb43   :  { %v9070_v21 = vpop.f32.mrf.mxu1 }
 0xb44   :  { %v9071_v37 = vadd.f32 %v9070_v21, %v8742_v24 }
 0xb46   :  { %v9201_v4 = vmax.f32 %v9071_v37, 0.0 }
 0xb4b   :  { %v9072_v18 = vpop.f32.mrf.mxu1 }
 0xb4c   :  { %v9073_v33 = vadd.f32 %v9072_v18, %v8744_v56 }
 0xb4e   :  { %v9202_v12 = vmax.f32 %v9073_v33, 0.0 }
 0xb50   :  { %v9266_v39 = vpack.c.bf16 %v9202_v12, %v9201_v4 }
 0xb52   :  { %9379 = vmatpush.bf16.msra.mxu3 %v9266_v39 }
 0xb56   :  { %9380 = vmatpush.bf16.msra.mxu3 %v9265_v62 }
 0xb5a   :  { %9381 = vmatpush.bf16.msra.mxu3 %v9264_v26 }
 0xb5e   :  { %9382 = vmatpush.bf16.msra.mxu3 %v16667_v43 }
 0xb62   :  { %9383 = vmatpush.bf16.msra.mxu3 %v16663_v55 }
 0xb66   :  { %9384 = vmatpush.bf16.msra.mxu3 %v16659_v3 }
 0xb6a   :  { %9385 = vmatpush.bf16.msra.mxu3 %v16655_v46 }
 0xb6e   :  { %9386 = vmatpush.bf16.msra.mxu3 %v16647_v54 }
 0xb71   :  { %9387 = vmatmul.bf16.vlgmr.msra.gmra.mxu3 %v9279_v58 }
 0xb78   :  { %v9336_v60 = vpop.f32.mrf.mxu3 }
 0xb79   :  { %v9337_v7 = vadd.f32 %v9336_v60, %v9324_v19 }
 0xb80   :  { %v9349_v17 = vpop.f32.mrf.mxu2  ;;  %v9338_v63 = vpop.f32.mrf.mxu3 }
 0xb81   :  { %v9350_v29 = vadd.f32 %v9349_v17, %v9337_v7 }
 0xb88   :  { %v9351_v61 = vpop.f32.mrf.mxu2  ;;  %v9362_v43 = vpop.f32.mrf.mxu3 }
 0xb89   :  { %v9363_v20 = vadd.f32 %v9362_v43, %v9350_v29 }
 0xb90   :  { %v9375_v8 = vpop.f32.mrf.mxu2  ;;  %v9364_v41 = vpop.f32.mrf.mxu3 }
 0xb91   :  { %v9376_v55 = vadd.f32 %v9375_v8, %v9363_v20 }
 0xb98   :  { %v9377_v26 = vpop.f32.mrf.mxu2 }
 0xbf4   :  { %v9388_v3 = vpop.f32.mrf.mxu3 }
 0xbf5   :  { %v9389_v13 = vadd.f32 %v9388_v3, %v9376_v55 }
 0xbf7   :  { %v12055_v23 = vmul.f32 -1.442695, %v9389_v13 }
 0xbf9   :  { %12743 = vpow2.f32 %v12055_v23 }
 0xbfc   :  { %v9390_v46 = vpop.f32.mrf.mxu3 }
 0xbff   :  { %v12744_v54 = vpop.eup %12743 }
 0xc00   :  { %v9395_v32 = vadd.f32 1.0, %v12744_v54 }
 0xc02   :  { %12745 = vrcp.f32 %v9395_v32  ;;  %v9407_v6 = vand.u32 2147483648, %v9395_v32  ;;  %v9405_v53 = vand.u32 2147483647, %v9395_v32  ;;  %vm9401_vm1 = vweird.f32 %v9395_v32 }
 0xc04   :  { %v9408_v47 = vor.u32 1.1754944e-38, %v9407_v6  ;;  %vm9406_vm3 = vcmp.eq.f32.partialorder %v9405_v53, 8.507059e+37 }
 0xc08   :  { %v12746_v52 = vpop.eup %12745 }
 0xc09   :  { %v9397_v10 = vmul.f32 %v12746_v52, %v9395_v32  ;;  %vm9402_vm0 = vweird.f32 %v12746_v52 }
 0xc0a   :  { %vm9403_vm2 = vmor %vm9401_vm1, %vm9402_vm0 }
 0xc0b   :  { %v9398_v51 = vsub.f32 1.0, %v9397_v10 }
 0xc0d   :  { %v9399_v45 = vmul.f32 %v12746_v52, %v9398_v51 }
 0xc0f   :  { %v9400_v11 = vadd.f32 %v12746_v52, %v9399_v45 }
 0xc11   :  { %v9404_v35 = vsel %vm9403_vm2, %v12746_v52, %v9400_v11 }
 0xc12   :  { %v9409_v16 = vsel %vm9406_vm3, %v9408_v47, %v9404_v35 }
 0xc13   :  { %9411 = vst [vmem:[#allocation11] sm:$0x1] %v9409_v16 }
 0xc14   :  { %9422 = dma.vmem_to_hbm [thread:$0]  %s9418_s16, 16, %s9420_s19, [#allocation5]  }
 0xc15   :  { %12873 = dma.done.wait [#allocation5], 16  }
 0xc16   :  { %12874 = vsyncadd [#allocation5], 4294967280 }
 0xc17   :  { %9427 = vsyncpa [#allocation4], 1 }
 0xc18   :  { %9428 = vsyncpa [#allocation7], 1 }
 0xc19   :  { %9429 = vsyncpa [#allocation10], 1 }
 0xc1a   :  { %9430 = vsyncpa [#allocation5], 1 }

</bundles_post_ra>
